<compile_context>
chip_gen: v5e
topology: v5e:2x2
jax: 0.10.0
libtpu: 0.0.40
codegen_flags: <defaults>
</compile_context>

<pallas_src>
import functools

import jax
import jax.numpy as jnp
from jax.experimental import pallas as pl
from jax.experimental.pallas import tpu as pltpu

EPS = 1e-5  # nn.LayerNorm default


def _round_up(x, m):
    return (x + m - 1) // m * m


def _mvit_layer_kernel(x_ref, g1_ref, b1_ref, wqkv_ref, wo_ref, bo_ref,
                       g2_ref, b2_ref, w1_ref, fb1_ref, w2_ref, fb2_ref,
                       o_ref, *, heads, dim_head, d_real, scale):
    """One fused Transformer layer on a (TBP, N, Dp) token tile."""
    tbp, n, dp = x_ref.shape
    ip = wo_ref.shape[0]          # padded inner (heads*dim_head -> mult of 128)
    m2 = tbp * n
    inv_d = 1.0 / d_real

    x3 = x_ref[...].astype(jnp.float32)
    x2 = x3.reshape(m2, dp)

    if d_real != dp:
        lane_d = jax.lax.broadcasted_iota(jnp.int32, (1, dp), 1)
        d_mask = (lane_d < d_real).astype(jnp.float32)
    else:
        d_mask = None

    def layer_norm(v, g, b):
        # Padded lanes of v are exactly zero -> plain sum / d_real is the mean.
        mean = jnp.sum(v, axis=-1, keepdims=True) * inv_d
        vc = v - mean
        sq = vc * vc if d_mask is None else vc * vc * d_mask
        var = jnp.sum(sq, axis=-1, keepdims=True) * inv_d
        return vc * jax.lax.rsqrt(var + EPS) * g + b

    # ---- PreNorm + multi-head self-attention + residual --------------------
    y1 = layer_norm(x2, g1_ref[...], b1_ref[...])
    wdt = wqkv_ref.dtype
    qkv = jnp.dot(y1.astype(wdt), wqkv_ref[...],
                  preferred_element_type=jnp.float32)        # (M2, 3*Ip)
    q2 = qkv[:, :ip] * scale
    k3 = qkv[:, ip:2 * ip].reshape(tbp, n, ip)
    v2 = qkv[:, 2 * ip:]

    lane_i = jax.lax.broadcasted_iota(jnp.int32, (1, ip), 1)
    acc = x2 + bo_ref[...]         # residual + to_out bias (padded lanes stay 0)
    for h in range(heads):         # static unroll, heads is small (4)
        m_h = ((lane_i >= h * dim_head) &
               (lane_i < (h + 1) * dim_head)).astype(jnp.float32)
        qh = (q2 * m_h).reshape(tbp, n, ip)
        s = jnp.einsum('bqd,bkd->bqk', qh, k3,
                       preferred_element_type=jnp.float32)   # (TBP, N, N)
        s = s - jnp.max(s, axis=-1, keepdims=True)
        p = jnp.exp(s)
        p = p * pl.reciprocal(jnp.sum(p, axis=-1, keepdims=True), approx=True)
        # concat_h(attn_h @ v_h) @ Wo  ==  sum_h attn_h @ (v_h @ Wo_h)
        vo = jnp.dot((v2 * m_h).astype(wdt), wo_ref[...],
                     preferred_element_type=jnp.float32)     # (M2, Dp)
        ctx = jnp.einsum('bqk,bkd->bqd', p, vo.reshape(tbp, n, dp),
                         preferred_element_type=jnp.float32)
        acc = acc + ctx.reshape(m2, dp)

    # ---- PreNorm + FeedForward (Linear -> SiLU -> Linear) + residual -------
    y2 = layer_norm(acc, g2_ref[...], b2_ref[...])
    hmid = jnp.dot(y2.astype(w1_ref.dtype), w1_ref[...],
                   preferred_element_type=jnp.float32) + fb1_ref[...]
    hmid = hmid * jax.nn.sigmoid(hmid)                       # SiLU
    out = acc + jnp.dot(hmid.astype(w2_ref.dtype), w2_ref[...],
                        preferred_element_type=jnp.float32) + fb2_ref[...]
    o_ref[...] = out.reshape(tbp, n, dp).astype(o_ref.dtype)


def _pad2(a, r, c):
    return jnp.pad(a, ((0, r - a.shape[0]), (0, c - a.shape[1])))


def _pad_row(a, c):
    return jnp.pad(a.astype(jnp.float32), (0, c - a.shape[0])).reshape(1, c)


class TransformerPallas:
    """JAX/Pallas counterpart of MobileViT's Transformer(dim, depth, heads,
    dim_head, mlp_dim) used inside PcdmViT.mvt (weights in (in, out) layout)."""

    def __init__(self, dim, depth, heads, dim_head, mlp_dim, key,
                 dtype=jnp.float32):
        self.dim, self.depth = dim, depth
        self.heads, self.dim_head, self.mlp_dim = heads, dim_head, mlp_dim
        inner = heads * dim_head
        self.inner = inner

        def linear_init(k, fan_in, shape):
            bound = 1.0 / (fan_in ** 0.5)
            return jax.random.uniform(k, shape, dtype, -bound, bound)

        self.layers = []
        for _ in range(depth):
            key, kqkv, ko, kob, k1, k1b, k2, k2b = jax.random.split(key, 8)
            self.layers.append(dict(
                g1=jnp.ones((dim,), dtype), b1=jnp.zeros((dim,), dtype),
                wqkv=linear_init(kqkv, dim, (dim, 3 * inner)),   # bias=False
                wo=linear_init(ko, inner, (inner, dim)),
                bo=linear_init(kob, inner, (dim,)),
                g2=jnp.ones((dim,), dtype), b2=jnp.zeros((dim,), dtype),
                w1=linear_init(k1, dim, (dim, mlp_dim)),
                fb1=linear_init(k1b, dim, (mlp_dim,)),
                w2=linear_init(k2, mlp_dim, (mlp_dim, dim)),
                fb2=linear_init(k2b, mlp_dim, (dim,)),
            ))

        # Pre-pad params once (zero pad -> padded output lanes stay exactly 0).
        Dp, Ip, Hp = (_round_up(dim, 128), _round_up(inner, 128),
                      _round_up(mlp_dim, 128))
        self._dims = (Dp, Ip, Hp)
        self._padded = []
        for p in self.layers:
            wq = p['wqkv'][:, :inner]
            wk = p['wqkv'][:, inner:2 * inner]
            wv = p['wqkv'][:, 2 * inner:]
            self._padded.append(dict(
                g1=_pad_row(p['g1'], Dp), b1=_pad_row(p['b1'], Dp),
                wqkv=jnp.concatenate([_pad2(wq, Dp, Ip), _pad2(wk, Dp, Ip),
                                      _pad2(wv, Dp, Ip)], axis=1),
                wo=_pad2(p['wo'], Ip, Dp), bo=_pad_row(p['bo'], Dp),
                g2=_pad_row(p['g2'], Dp), b2=_pad_row(p['b2'], Dp),
                w1=_pad2(p['w1'], Dp, Hp), fb1=_pad_row(p['fb1'], Hp),
                w2=_pad2(p['w2'], Hp, Dp), fb2=_pad_row(p['fb2'], Dp),
            ))

    def __call__(self, x, *, bp_tile=4):
        B, P, N, D = x.shape
        assert D == self.dim
        Dp, Ip, Hp = self._dims
        BP = B * P
        TBP = max(1, min(bp_tile, BP))
        BPp = _round_up(BP, TBP)

        xp = x.reshape(BP, N, D)
        if BPp != BP or Dp != D:
            xp = jnp.pad(xp, ((0, BPp - BP), (0, 0), (0, Dp - D)))

        kernel = functools.partial(
            _mvit_layer_kernel, heads=self.heads, dim_head=self.dim_head,
            d_real=D, scale=self.dim_head ** -0.5)

        x_spec = pl.BlockSpec((TBP, N, Dp), lambda i: (i, 0, 0))
        vec = lambda c: pl.BlockSpec((1, c), lambda i: (0, 0))
        mat = lambda r, c: pl.BlockSpec((r, c), lambda i: (0, 0))

        call = pl.pallas_call(
            kernel,
            out_shape=jax.ShapeDtypeStruct((BPp, N, Dp), x.dtype),
            grid=(BPp // TBP,),
            in_specs=[
                x_spec,                       # token tile   (pipelined)
                vec(Dp), vec(Dp),             # ln1 gamma / beta   (resident)
                mat(Dp, 3 * Ip),              # Wqkv               (resident)
                mat(Ip, Dp), vec(Dp),         # Wo, bo             (resident)
                vec(Dp), vec(Dp),             # ln2 gamma / beta   (resident)
                mat(Dp, Hp), vec(Hp),         # W1, b1             (resident)
                mat(Hp, Dp), vec(Dp),         # W2, b2             (resident)
            ],
            out_specs=x_spec,
            compiler_params=pltpu.CompilerParams(
                dimension_semantics=("parallel",)),
        )

        for p in self._padded:                # depth fused layers, chained padded
            xp = call(xp, p['g1'], p['b1'], p['wqkv'], p['wo'], p['bo'],
                      p['g2'], p['b2'], p['w1'], p['fb1'], p['w2'], p['fb2'])

        return xp[:BP, :, :D].reshape(B, P, N, D)


def _reference_transformer(x, layers, heads, dim_head):
    """Pure-JAX mirror of the PyTorch Transformer forward (for validation)."""
    B, P, N, D = x.shape
    inner = heads * dim_head
    scale = dim_head ** -0.5

    def ln(v, g, b):
        m = jnp.mean(v, axis=-1, keepdims=True)
        var = jnp.mean((v - m) ** 2, axis=-1, keepdims=True)
        return (v - m) * jax.lax.rsqrt(var + EPS) * g + b

    def split_heads(t):
        return t.reshape(B, P, N, heads, dim_head).transpose(0, 1, 3, 2, 4)

    xf = x.astype(jnp.float32)
    for p in layers:
        y = ln(xf, p['g1'], p['b1'])
        q, k, v = map(split_heads, jnp.split(y @ p['wqkv'], 3, axis=-1))
        dots = jnp.einsum('...qd,...kd->...qk', q, k) * scale
        attn = jax.nn.softmax(dots, axis=-1)
        out = jnp.einsum('...qk,...kd->...qd', attn, v)
        out = out.transpose(0, 1, 3, 2, 4).reshape(B, P, N, inner)
        xf = out @ p['wo'] + p['bo'] + xf
        y2 = ln(xf, p['g2'], p['b2'])
        h = y2 @ p['w1'] + p['fb1']
        h = h * jax.nn.sigmoid(h)
        xf = h @ p['w2'] + p['fb2'] + xf
    return xf.astype(x.dtype)


if __name__ == "__main__":
    key = jax.random.PRNGKey(0)
    k_x, k_m = jax.random.split(key)

    # Shapes of the first MobileViTBlock transformer inside PcdmViT.mvt
    # (mobilevit_xxs, 128x128 input): dim=64, depth=2, heads=4, dim_head=8,
    # mlp_dim=128; tokens laid out as (batch, ph*pw, h*w, dim).
    B, P, N, D = 2, 4, 64, 64
    depth, heads, dim_head, mlp_dim = 2, 4, 8, 128

    x = jax.random.normal(k_x, (B, P, N, D), jnp.float32)
    module = TransformerPallas(D, depth, heads, dim_head, mlp_dim, k_m)

    out = jax.block_until_ready(module(x))
    ref = _reference_transformer(x, module.layers, heads, dim_head)

    assert out.shape == (B, P, N, D)
    max_err = float(jnp.max(jnp.abs(out - ref)))
    assert jnp.allclose(out, ref, atol=2e-3, rtol=2e-3), (
        f"mismatch vs reference (max abs err {max_err})")

    print("KERNEL_OK")
</pallas_src>

<mosaic_0001>
module attributes {stable_mosaic.version = 11 : i64} {
  func.func @_mvit_layer_kernel(%arg0: i32, %arg1: memref<4x64x128xf32, #tpu.memory_space<vmem>>, %arg2: memref<1x128xf32, #tpu.memory_space<vmem>>, %arg3: memref<1x128xf32, #tpu.memory_space<vmem>>, %arg4: memref<128x384xf32, #tpu.memory_space<vmem>>, %arg5: memref<128x128xf32, #tpu.memory_space<vmem>>, %arg6: memref<1x128xf32, #tpu.memory_space<vmem>>, %arg7: memref<1x128xf32, #tpu.memory_space<vmem>>, %arg8: memref<1x128xf32, #tpu.memory_space<vmem>>, %arg9: memref<128x128xf32, #tpu.memory_space<vmem>>, %arg10: memref<1x128xf32, #tpu.memory_space<vmem>>, %arg11: memref<128x128xf32, #tpu.memory_space<vmem>>, %arg12: memref<1x128xf32, #tpu.memory_space<vmem>>, %arg13: memref<4x64x128xf32, #tpu.memory_space<vmem>>) attributes {dimension_semantics = [#tpu.dimension_semantics<parallel>], iteration_bounds = array<i64: 2>, scalar_prefetch = 0 : i64, scratch_operands = 0 : i64, tpu.core_type = #tpu.core_type<tc>, window_params = [{transform_indices = @transform_0, window_bounds = array<i64: 4, 64, 128>}, {pipeline_mode = #tpu.pipeline_mode<synchronous>, transform_indices = @transform_1, window_bounds = array<i64: 1, 128>}, {pipeline_mode = #tpu.pipeline_mode<synchronous>, transform_indices = @transform_2, window_bounds = array<i64: 1, 128>}, {pipeline_mode = #tpu.pipeline_mode<synchronous>, transform_indices = @transform_3, window_bounds = array<i64: 128, 384>}, {pipeline_mode = #tpu.pipeline_mode<synchronous>, transform_indices = @transform_4, window_bounds = array<i64: 128, 128>}, {pipeline_mode = #tpu.pipeline_mode<synchronous>, transform_indices = @transform_5, window_bounds = array<i64: 1, 128>}, {pipeline_mode = #tpu.pipeline_mode<synchronous>, transform_indices = @transform_6, window_bounds = array<i64: 1, 128>}, {pipeline_mode = #tpu.pipeline_mode<synchronous>, transform_indices = @transform_7, window_bounds = array<i64: 1, 128>}, {pipeline_mode = #tpu.pipeline_mode<synchronous>, transform_indices = @transform_8, window_bounds = array<i64: 128, 128>}, {pipeline_mode = #tpu.pipeline_mode<synchronous>, transform_indices = @transform_9, window_bounds = array<i64: 1, 128>}, {pipeline_mode = #tpu.pipeline_mode<synchronous>, transform_indices = @transform_10, window_bounds = array<i64: 128, 128>}, {pipeline_mode = #tpu.pipeline_mode<synchronous>, transform_indices = @transform_11, window_bounds = array<i64: 1, 128>}, {transform_indices = @transform_12, window_bounds = array<i64: 4, 64, 128>}]} {
    %c0 = arith.constant 0 : index
    %c0_0 = arith.constant 0 : index
    %c0_1 = arith.constant 0 : index
    %0 = vector.load %arg1[%c0, %c0_0, %c0_1] : memref<4x64x128xf32, #tpu.memory_space<vmem>>, vector<4x64x128xf32>
    %1 = vector.shape_cast %0 : vector<4x64x128xf32> to vector<256x128xf32>
    %2 = tpu.iota {dimensions = array<i32: 1>} : vector<1x128xi32>
    %c64_i32 = arith.constant 64 : i32
    %3 = vector.broadcast %c64_i32 : i32 to vector<1x128xi32>
    %4 = arith.cmpi slt, %2, %3 : vector<1x128xi32>
    %5 = arith.extui %4 : vector<1x128xi1> to vector<1x128xi32>
    %6 = arith.sitofp %5 : vector<1x128xi32> to vector<1x128xf32>
    %c0_2 = arith.constant 0 : index
    %c0_3 = arith.constant 0 : index
    %7 = vector.load %arg2[%c0_2, %c0_3] : memref<1x128xf32, #tpu.memory_space<vmem>>, vector<1x128xf32>
    %c0_4 = arith.constant 0 : index
    %c0_5 = arith.constant 0 : index
    %8 = vector.load %arg3[%c0_4, %c0_5] : memref<1x128xf32, #tpu.memory_space<vmem>>, vector<1x128xf32>
    %cst = arith.constant dense<0.000000e+00> : vector<256xf32>
    %9 = vector.multi_reduction <add>, %1, %cst [1] : vector<256x128xf32> to vector<256xf32>
    %10 = vector.shape_cast %9 : vector<256xf32> to vector<256x1xf32>
    %cst_6 = arith.constant 1.562500e-02 : f32
    %11 = vector.broadcast %cst_6 : f32 to vector<256x1xf32>
    %12 = arith.mulf %10, %11 : vector<256x1xf32>
    %13 = vector.broadcast %12 : vector<256x1xf32> to vector<256x128xf32>
    %14 = arith.subf %1, %13 : vector<256x128xf32>
    %15 = arith.mulf %14, %14 : vector<256x128xf32>
    %16 = vector.broadcast %6 : vector<1x128xf32> to vector<256x128xf32>
    %17 = arith.mulf %15, %16 : vector<256x128xf32>
    %cst_7 = arith.constant dense<0.000000e+00> : vector<256xf32>
    %18 = vector.multi_reduction <add>, %17, %cst_7 [1] : vector<256x128xf32> to vector<256xf32>
    %19 = vector.shape_cast %18 : vector<256xf32> to vector<256x1xf32>
    %cst_8 = arith.constant 1.562500e-02 : f32
    %20 = vector.broadcast %cst_8 : f32 to vector<256x1xf32>
    %21 = arith.mulf %19, %20 : vector<256x1xf32>
    %cst_9 = arith.constant 9.99999974E-6 : f32
    %22 = vector.broadcast %cst_9 : f32 to vector<256x1xf32>
    %23 = arith.addf %21, %22 : vector<256x1xf32>
    %24 = math.rsqrt %23 : vector<256x1xf32>
    %25 = vector.broadcast %24 : vector<256x1xf32> to vector<256x128xf32>
    %26 = arith.mulf %14, %25 : vector<256x128xf32>
    %27 = vector.broadcast %7 : vector<1x128xf32> to vector<256x128xf32>
    %28 = arith.mulf %26, %27 : vector<256x128xf32>
    %29 = vector.broadcast %8 : vector<1x128xf32> to vector<256x128xf32>
    %30 = arith.addf %28, %29 : vector<256x128xf32>
    %c0_10 = arith.constant 0 : index
    %c0_11 = arith.constant 0 : index
    %31 = vector.load %arg4[%c0_10, %c0_11] : memref<128x384xf32, #tpu.memory_space<vmem>>, vector<128x384xf32>
    %cst_12 = arith.constant dense<0.000000e+00> : vector<256x384xf32>
    %32 = tpu.matmul %30, %31, %cst_12 {dimension_numbers = #tpu.dot_dimension_numbers<[1], [0], [0], [1], [0, 0, 1, 1], [], []>} : vector<256x128xf32>, vector<128x384xf32>, vector<256x384xf32> -> vector<256x384xf32>
    %33 = vector.extract_strided_slice %32 {offsets = [0, 0], sizes = [256, 128], strides = [1, 1]} : vector<256x384xf32> to vector<256x128xf32>
    %cst_13 = arith.constant 0.353553385 : f32
    %34 = vector.broadcast %cst_13 : f32 to vector<256x128xf32>
    %35 = arith.mulf %33, %34 : vector<256x128xf32>
    %36 = vector.extract_strided_slice %32 {offsets = [0, 128], sizes = [256, 128], strides = [1, 1]} : vector<256x384xf32> to vector<256x128xf32>
    %37 = vector.shape_cast %36 : vector<256x128xf32> to vector<4x64x128xf32>
    %38 = vector.extract_strided_slice %32 {offsets = [0, 256], sizes = [256, 128], strides = [1, 1]} : vector<256x384xf32> to vector<256x128xf32>
    %39 = tpu.iota {dimensions = array<i32: 1>} : vector<1x128xi32>
    %c0_14 = arith.constant 0 : index
    %c0_15 = arith.constant 0 : index
    %40 = vector.load %arg6[%c0_14, %c0_15] : memref<1x128xf32, #tpu.memory_space<vmem>>, vector<1x128xf32>
    %41 = vector.broadcast %40 : vector<1x128xf32> to vector<256x128xf32>
    %42 = arith.addf %1, %41 : vector<256x128xf32>
    %c0_i32 = arith.constant 0 : i32
    %43 = vector.broadcast %c0_i32 : i32 to vector<1x128xi32>
    %44 = arith.cmpi sge, %39, %43 : vector<1x128xi32>
    %c8_i32 = arith.constant 8 : i32
    %45 = vector.broadcast %c8_i32 : i32 to vector<1x128xi32>
    %46 = arith.cmpi slt, %39, %45 : vector<1x128xi32>
    %47 = arith.andi %44, %46 : vector<1x128xi1>
    %48 = arith.extui %47 : vector<1x128xi1> to vector<1x128xi32>
    %49 = arith.sitofp %48 : vector<1x128xi32> to vector<1x128xf32>
    %50 = vector.broadcast %49 : vector<1x128xf32> to vector<256x128xf32>
    %51 = arith.mulf %35, %50 : vector<256x128xf32>
    %52 = vector.shape_cast %51 : vector<256x128xf32> to vector<4x64x128xf32>
    "tpu.trace_start"() <{level = 10 : i32, message = "bqd,bkd->bqk"}> : () -> ()
    %cst_16 = arith.constant dense<0.000000e+00> : vector<4x64x64xf32>
    %53 = tpu.matmul %52, %37, %cst_16 {dimension_numbers = #tpu.dot_dimension_numbers<[2], [2], [1], [1], [0, 0, 0, 1, 1, 1], [0], [0]>} : vector<4x64x128xf32>, vector<4x64x128xf32>, vector<4x64x64xf32> -> vector<4x64x64xf32>
    "tpu.trace_stop"() : () -> ()
    %cst_17 = arith.constant dense<0xFF800000> : vector<4x64xf32>
    %54 = vector.multi_reduction <maximumf>, %53, %cst_17 [2] : vector<4x64x64xf32> to vector<4x64xf32>
    %55 = vector.shape_cast %54 : vector<4x64xf32> to vector<4x64x1xf32>
    %56 = vector.broadcast %55 : vector<4x64x1xf32> to vector<4x64x64xf32>
    %57 = arith.subf %53, %56 : vector<4x64x64xf32>
    %58 = math.exp %57 : vector<4x64x64xf32>
    %cst_18 = arith.constant dense<0.000000e+00> : vector<4x64xf32>
    %59 = vector.multi_reduction <add>, %58, %cst_18 [2] : vector<4x64x64xf32> to vector<4x64xf32>
    %60 = vector.shape_cast %59 : vector<4x64xf32> to vector<4x64x1xf32>
    %61 = tpu.reciprocal %60 {approx = true} : vector<4x64x1xf32> -> vector<4x64x1xf32>
    %62 = vector.broadcast %61 : vector<4x64x1xf32> to vector<4x64x64xf32>
    %63 = arith.mulf %58, %62 : vector<4x64x64xf32>
    %64 = vector.broadcast %49 : vector<1x128xf32> to vector<256x128xf32>
    %65 = arith.mulf %38, %64 : vector<256x128xf32>
    %c0_19 = arith.constant 0 : index
    %c0_20 = arith.constant 0 : index
    %66 = vector.load %arg5[%c0_19, %c0_20] : memref<128x128xf32, #tpu.memory_space<vmem>>, vector<128x128xf32>
    %cst_21 = arith.constant dense<0.000000e+00> : vector<256x128xf32>
    %67 = tpu.matmul %65, %66, %cst_21 {dimension_numbers = #tpu.dot_dimension_numbers<[1], [0], [0], [1], [0, 0, 1, 1], [], []>} : vector<256x128xf32>, vector<128x128xf32>, vector<256x128xf32> -> vector<256x128xf32>
    %68 = vector.shape_cast %67 : vector<256x128xf32> to vector<4x64x128xf32>
    "tpu.trace_start"() <{level = 10 : i32, message = "bqk,bkd->bqd"}> : () -> ()
    %cst_22 = arith.constant dense<0.000000e+00> : vector<4x64x128xf32>
    %69 = tpu.matmul %63, %68, %cst_22 {dimension_numbers = #tpu.dot_dimension_numbers<[2], [1], [1], [2], [0, 0, 0, 1, 1, 2], [0], [0]>} : vector<4x64x64xf32>, vector<4x64x128xf32>, vector<4x64x128xf32> -> vector<4x64x128xf32>
    "tpu.trace_stop"() : () -> ()
    %70 = vector.shape_cast %69 : vector<4x64x128xf32> to vector<256x128xf32>
    %71 = arith.addf %42, %70 : vector<256x128xf32>
    %c8_i32_23 = arith.constant 8 : i32
    %72 = vector.broadcast %c8_i32_23 : i32 to vector<1x128xi32>
    %73 = arith.cmpi sge, %39, %72 : vector<1x128xi32>
    %c16_i32 = arith.constant 16 : i32
    %74 = vector.broadcast %c16_i32 : i32 to vector<1x128xi32>
    %75 = arith.cmpi slt, %39, %74 : vector<1x128xi32>
    %76 = arith.andi %73, %75 : vector<1x128xi1>
    %77 = arith.extui %76 : vector<1x128xi1> to vector<1x128xi32>
    %78 = arith.sitofp %77 : vector<1x128xi32> to vector<1x128xf32>
    %79 = vector.broadcast %78 : vector<1x128xf32> to vector<256x128xf32>
    %80 = arith.mulf %35, %79 : vector<256x128xf32>
    %81 = vector.shape_cast %80 : vector<256x128xf32> to vector<4x64x128xf32>
    "tpu.trace_start"() <{level = 10 : i32, message = "bqd,bkd->bqk"}> : () -> ()
    %cst_24 = arith.constant dense<0.000000e+00> : vector<4x64x64xf32>
    %82 = tpu.matmul %81, %37, %cst_24 {dimension_numbers = #tpu.dot_dimension_numbers<[2], [2], [1], [1], [0, 0, 0, 1, 1, 1], [0], [0]>} : vector<4x64x128xf32>, vector<4x64x128xf32>, vector<4x64x64xf32> -> vector<4x64x64xf32>
    "tpu.trace_stop"() : () -> ()
    %cst_25 = arith.constant dense<0xFF800000> : vector<4x64xf32>
    %83 = vector.multi_reduction <maximumf>, %82, %cst_25 [2] : vector<4x64x64xf32> to vector<4x64xf32>
    %84 = vector.shape_cast %83 : vector<4x64xf32> to vector<4x64x1xf32>
    %85 = vector.broadcast %84 : vector<4x64x1xf32> to vector<4x64x64xf32>
    %86 = arith.subf %82, %85 : vector<4x64x64xf32>
    %87 = math.exp %86 : vector<4x64x64xf32>
    %cst_26 = arith.constant dense<0.000000e+00> : vector<4x64xf32>
    %88 = vector.multi_reduction <add>, %87, %cst_26 [2] : vector<4x64x64xf32> to vector<4x64xf32>
    %89 = vector.shape_cast %88 : vector<4x64xf32> to vector<4x64x1xf32>
    %90 = tpu.reciprocal %89 {approx = true} : vector<4x64x1xf32> -> vector<4x64x1xf32>
    %91 = vector.broadcast %90 : vector<4x64x1xf32> to vector<4x64x64xf32>
    %92 = arith.mulf %87, %91 : vector<4x64x64xf32>
    %93 = vector.broadcast %78 : vector<1x128xf32> to vector<256x128xf32>
    %94 = arith.mulf %38, %93 : vector<256x128xf32>
    %c0_27 = arith.constant 0 : index
    %c0_28 = arith.constant 0 : index
    %95 = vector.load %arg5[%c0_27, %c0_28] : memref<128x128xf32, #tpu.memory_space<vmem>>, vector<128x128xf32>
    %cst_29 = arith.constant dense<0.000000e+00> : vector<256x128xf32>
    %96 = tpu.matmul %94, %95, %cst_29 {dimension_numbers = #tpu.dot_dimension_numbers<[1], [0], [0], [1], [0, 0, 1, 1], [], []>} : vector<256x128xf32>, vector<128x128xf32>, vector<256x128xf32> -> vector<256x128xf32>
    %97 = vector.shape_cast %96 : vector<256x128xf32> to vector<4x64x128xf32>
    "tpu.trace_start"() <{level = 10 : i32, message = "bqk,bkd->bqd"}> : () -> ()
    %cst_30 = arith.constant dense<0.000000e+00> : vector<4x64x128xf32>
    %98 = tpu.matmul %92, %97, %cst_30 {dimension_numbers = #tpu.dot_dimension_numbers<[2], [1], [1], [2], [0, 0, 0, 1, 1, 2], [0], [0]>} : vector<4x64x64xf32>, vector<4x64x128xf32>, vector<4x64x128xf32> -> vector<4x64x128xf32>
    "tpu.trace_stop"() : () -> ()
    %99 = vector.shape_cast %98 : vector<4x64x128xf32> to vector<256x128xf32>
    %100 = arith.addf %71, %99 : vector<256x128xf32>
    %c16_i32_31 = arith.constant 16 : i32
    %101 = vector.broadcast %c16_i32_31 : i32 to vector<1x128xi32>
    %102 = arith.cmpi sge, %39, %101 : vector<1x128xi32>
    %c24_i32 = arith.constant 24 : i32
    %103 = vector.broadcast %c24_i32 : i32 to vector<1x128xi32>
    %104 = arith.cmpi slt, %39, %103 : vector<1x128xi32>
    %105 = arith.andi %102, %104 : vector<1x128xi1>
    %106 = arith.extui %105 : vector<1x128xi1> to vector<1x128xi32>
    %107 = arith.sitofp %106 : vector<1x128xi32> to vector<1x128xf32>
    %108 = vector.broadcast %107 : vector<1x128xf32> to vector<256x128xf32>
    %109 = arith.mulf %35, %108 : vector<256x128xf32>
    %110 = vector.shape_cast %109 : vector<256x128xf32> to vector<4x64x128xf32>
    "tpu.trace_start"() <{level = 10 : i32, message = "bqd,bkd->bqk"}> : () -> ()
    %cst_32 = arith.constant dense<0.000000e+00> : vector<4x64x64xf32>
    %111 = tpu.matmul %110, %37, %cst_32 {dimension_numbers = #tpu.dot_dimension_numbers<[2], [2], [1], [1], [0, 0, 0, 1, 1, 1], [0], [0]>} : vector<4x64x128xf32>, vector<4x64x128xf32>, vector<4x64x64xf32> -> vector<4x64x64xf32>
    "tpu.trace_stop"() : () -> ()
    %cst_33 = arith.constant dense<0xFF800000> : vector<4x64xf32>
    %112 = vector.multi_reduction <maximumf>, %111, %cst_33 [2] : vector<4x64x64xf32> to vector<4x64xf32>
    %113 = vector.shape_cast %112 : vector<4x64xf32> to vector<4x64x1xf32>
    %114 = vector.broadcast %113 : vector<4x64x1xf32> to vector<4x64x64xf32>
    %115 = arith.subf %111, %114 : vector<4x64x64xf32>
    %116 = math.exp %115 : vector<4x64x64xf32>
    %cst_34 = arith.constant dense<0.000000e+00> : vector<4x64xf32>
    %117 = vector.multi_reduction <add>, %116, %cst_34 [2] : vector<4x64x64xf32> to vector<4x64xf32>
    %118 = vector.shape_cast %117 : vector<4x64xf32> to vector<4x64x1xf32>
    %119 = tpu.reciprocal %118 {approx = true} : vector<4x64x1xf32> -> vector<4x64x1xf32>
    %120 = vector.broadcast %119 : vector<4x64x1xf32> to vector<4x64x64xf32>
    %121 = arith.mulf %116, %120 : vector<4x64x64xf32>
    %122 = vector.broadcast %107 : vector<1x128xf32> to vector<256x128xf32>
    %123 = arith.mulf %38, %122 : vector<256x128xf32>
    %c0_35 = arith.constant 0 : index
    %c0_36 = arith.constant 0 : index
    %124 = vector.load %arg5[%c0_35, %c0_36] : memref<128x128xf32, #tpu.memory_space<vmem>>, vector<128x128xf32>
    %cst_37 = arith.constant dense<0.000000e+00> : vector<256x128xf32>
    %125 = tpu.matmul %123, %124, %cst_37 {dimension_numbers = #tpu.dot_dimension_numbers<[1], [0], [0], [1], [0, 0, 1, 1], [], []>} : vector<256x128xf32>, vector<128x128xf32>, vector<256x128xf32> -> vector<256x128xf32>
    %126 = vector.shape_cast %125 : vector<256x128xf32> to vector<4x64x128xf32>
    "tpu.trace_start"() <{level = 10 : i32, message = "bqk,bkd->bqd"}> : () -> ()
    %cst_38 = arith.constant dense<0.000000e+00> : vector<4x64x128xf32>
    %127 = tpu.matmul %121, %126, %cst_38 {dimension_numbers = #tpu.dot_dimension_numbers<[2], [1], [1], [2], [0, 0, 0, 1, 1, 2], [0], [0]>} : vector<4x64x64xf32>, vector<4x64x128xf32>, vector<4x64x128xf32> -> vector<4x64x128xf32>
    "tpu.trace_stop"() : () -> ()
    %128 = vector.shape_cast %127 : vector<4x64x128xf32> to vector<256x128xf32>
    %129 = arith.addf %100, %128 : vector<256x128xf32>
    %c24_i32_39 = arith.constant 24 : i32
    %130 = vector.broadcast %c24_i32_39 : i32 to vector<1x128xi32>
    %131 = arith.cmpi sge, %39, %130 : vector<1x128xi32>
    %c32_i32 = arith.constant 32 : i32
    %132 = vector.broadcast %c32_i32 : i32 to vector<1x128xi32>
    %133 = arith.cmpi slt, %39, %132 : vector<1x128xi32>
    %134 = arith.andi %131, %133 : vector<1x128xi1>
    %135 = arith.extui %134 : vector<1x128xi1> to vector<1x128xi32>
    %136 = arith.sitofp %135 : vector<1x128xi32> to vector<1x128xf32>
    %137 = vector.broadcast %136 : vector<1x128xf32> to vector<256x128xf32>
    %138 = arith.mulf %35, %137 : vector<256x128xf32>
    %139 = vector.shape_cast %138 : vector<256x128xf32> to vector<4x64x128xf32>
    "tpu.trace_start"() <{level = 10 : i32, message = "bqd,bkd->bqk"}> : () -> ()
    %cst_40 = arith.constant dense<0.000000e+00> : vector<4x64x64xf32>
    %140 = tpu.matmul %139, %37, %cst_40 {dimension_numbers = #tpu.dot_dimension_numbers<[2], [2], [1], [1], [0, 0, 0, 1, 1, 1], [0], [0]>} : vector<4x64x128xf32>, vector<4x64x128xf32>, vector<4x64x64xf32> -> vector<4x64x64xf32>
    "tpu.trace_stop"() : () -> ()
    %cst_41 = arith.constant dense<0xFF800000> : vector<4x64xf32>
    %141 = vector.multi_reduction <maximumf>, %140, %cst_41 [2] : vector<4x64x64xf32> to vector<4x64xf32>
    %142 = vector.shape_cast %141 : vector<4x64xf32> to vector<4x64x1xf32>
    %143 = vector.broadcast %142 : vector<4x64x1xf32> to vector<4x64x64xf32>
    %144 = arith.subf %140, %143 : vector<4x64x64xf32>
    %145 = math.exp %144 : vector<4x64x64xf32>
    %cst_42 = arith.constant dense<0.000000e+00> : vector<4x64xf32>
    %146 = vector.multi_reduction <add>, %145, %cst_42 [2] : vector<4x64x64xf32> to vector<4x64xf32>
    %147 = vector.shape_cast %146 : vector<4x64xf32> to vector<4x64x1xf32>
    %148 = tpu.reciprocal %147 {approx = true} : vector<4x64x1xf32> -> vector<4x64x1xf32>
    %149 = vector.broadcast %148 : vector<4x64x1xf32> to vector<4x64x64xf32>
    %150 = arith.mulf %145, %149 : vector<4x64x64xf32>
    %151 = vector.broadcast %136 : vector<1x128xf32> to vector<256x128xf32>
    %152 = arith.mulf %38, %151 : vector<256x128xf32>
    %c0_43 = arith.constant 0 : index
    %c0_44 = arith.constant 0 : index
    %153 = vector.load %arg5[%c0_43, %c0_44] : memref<128x128xf32, #tpu.memory_space<vmem>>, vector<128x128xf32>
    %cst_45 = arith.constant dense<0.000000e+00> : vector<256x128xf32>
    %154 = tpu.matmul %152, %153, %cst_45 {dimension_numbers = #tpu.dot_dimension_numbers<[1], [0], [0], [1], [0, 0, 1, 1], [], []>} : vector<256x128xf32>, vector<128x128xf32>, vector<256x128xf32> -> vector<256x128xf32>
    %155 = vector.shape_cast %154 : vector<256x128xf32> to vector<4x64x128xf32>
    "tpu.trace_start"() <{level = 10 : i32, message = "bqk,bkd->bqd"}> : () -> ()
    %cst_46 = arith.constant dense<0.000000e+00> : vector<4x64x128xf32>
    %156 = tpu.matmul %150, %155, %cst_46 {dimension_numbers = #tpu.dot_dimension_numbers<[2], [1], [1], [2], [0, 0, 0, 1, 1, 2], [0], [0]>} : vector<4x64x64xf32>, vector<4x64x128xf32>, vector<4x64x128xf32> -> vector<4x64x128xf32>
    "tpu.trace_stop"() : () -> ()
    %157 = vector.shape_cast %156 : vector<4x64x128xf32> to vector<256x128xf32>
    %158 = arith.addf %129, %157 : vector<256x128xf32>
    %c0_47 = arith.constant 0 : index
    %c0_48 = arith.constant 0 : index
    %159 = vector.load %arg7[%c0_47, %c0_48] : memref<1x128xf32, #tpu.memory_space<vmem>>, vector<1x128xf32>
    %c0_49 = arith.constant 0 : index
    %c0_50 = arith.constant 0 : index
    %160 = vector.load %arg8[%c0_49, %c0_50] : memref<1x128xf32, #tpu.memory_space<vmem>>, vector<1x128xf32>
    %cst_51 = arith.constant dense<0.000000e+00> : vector<256xf32>
    %161 = vector.multi_reduction <add>, %158, %cst_51 [1] : vector<256x128xf32> to vector<256xf32>
    %162 = vector.shape_cast %161 : vector<256xf32> to vector<256x1xf32>
    %cst_52 = arith.constant 1.562500e-02 : f32
    %163 = vector.broadcast %cst_52 : f32 to vector<256x1xf32>
    %164 = arith.mulf %162, %163 : vector<256x1xf32>
    %165 = vector.broadcast %164 : vector<256x1xf32> to vector<256x128xf32>
    %166 = arith.subf %158, %165 : vector<256x128xf32>
    %167 = arith.mulf %166, %166 : vector<256x128xf32>
    %168 = vector.broadcast %6 : vector<1x128xf32> to vector<256x128xf32>
    %169 = arith.mulf %167, %168 : vector<256x128xf32>
    %cst_53 = arith.constant dense<0.000000e+00> : vector<256xf32>
    %170 = vector.multi_reduction <add>, %169, %cst_53 [1] : vector<256x128xf32> to vector<256xf32>
    %171 = vector.shape_cast %170 : vector<256xf32> to vector<256x1xf32>
    %cst_54 = arith.constant 1.562500e-02 : f32
    %172 = vector.broadcast %cst_54 : f32 to vector<256x1xf32>
    %173 = arith.mulf %171, %172 : vector<256x1xf32>
    %cst_55 = arith.constant 9.99999974E-6 : f32
    %174 = vector.broadcast %cst_55 : f32 to vector<256x1xf32>
    %175 = arith.addf %173, %174 : vector<256x1xf32>
    %176 = math.rsqrt %175 : vector<256x1xf32>
    %177 = vector.broadcast %176 : vector<256x1xf32> to vector<256x128xf32>
    %178 = arith.mulf %166, %177 : vector<256x128xf32>
    %179 = vector.broadcast %159 : vector<1x128xf32> to vector<256x128xf32>
    %180 = arith.mulf %178, %179 : vector<256x128xf32>
    %181 = vector.broadcast %160 : vector<1x128xf32> to vector<256x128xf32>
    %182 = arith.addf %180, %181 : vector<256x128xf32>
    %c0_56 = arith.constant 0 : index
    %c0_57 = arith.constant 0 : index
    %183 = vector.load %arg9[%c0_56, %c0_57] : memref<128x128xf32, #tpu.memory_space<vmem>>, vector<128x128xf32>
    %cst_58 = arith.constant dense<0.000000e+00> : vector<256x128xf32>
    %184 = tpu.matmul %182, %183, %cst_58 {dimension_numbers = #tpu.dot_dimension_numbers<[1], [0], [0], [1], [0, 0, 1, 1], [], []>} : vector<256x128xf32>, vector<128x128xf32>, vector<256x128xf32> -> vector<256x128xf32>
    %c0_59 = arith.constant 0 : index
    %c0_60 = arith.constant 0 : index
    %185 = vector.load %arg10[%c0_59, %c0_60] : memref<1x128xf32, #tpu.memory_space<vmem>>, vector<1x128xf32>
    %186 = vector.broadcast %185 : vector<1x128xf32> to vector<256x128xf32>
    %187 = arith.addf %184, %186 : vector<256x128xf32>
    %188 = arith.negf %187 : vector<256x128xf32>
    %189 = math.exp %188 : vector<256x128xf32>
    %cst_61 = arith.constant 1.000000e+00 : f32
    %190 = vector.broadcast %cst_61 : f32 to vector<256x128xf32>
    %191 = arith.addf %190, %189 : vector<256x128xf32>
    %192 = arith.divf %190, %191 : vector<256x128xf32>
    %193 = arith.mulf %187, %192 : vector<256x128xf32>
    %c0_62 = arith.constant 0 : index
    %c0_63 = arith.constant 0 : index
    %194 = vector.load %arg11[%c0_62, %c0_63] : memref<128x128xf32, #tpu.memory_space<vmem>>, vector<128x128xf32>
    %cst_64 = arith.constant dense<0.000000e+00> : vector<256x128xf32>
    %195 = tpu.matmul %193, %194, %cst_64 {dimension_numbers = #tpu.dot_dimension_numbers<[1], [0], [0], [1], [0, 0, 1, 1], [], []>} : vector<256x128xf32>, vector<128x128xf32>, vector<256x128xf32> -> vector<256x128xf32>
    %196 = arith.addf %158, %195 : vector<256x128xf32>
    %c0_65 = arith.constant 0 : index
    %c0_66 = arith.constant 0 : index
    %197 = vector.load %arg12[%c0_65, %c0_66] : memref<1x128xf32, #tpu.memory_space<vmem>>, vector<1x128xf32>
    %198 = vector.broadcast %197 : vector<1x128xf32> to vector<256x128xf32>
    %199 = arith.addf %196, %198 : vector<256x128xf32>
    %200 = vector.shape_cast %199 : vector<256x128xf32> to vector<4x64x128xf32>
    %c0_67 = arith.constant 0 : index
    %c0_68 = arith.constant 0 : index
    %c0_69 = arith.constant 0 : index
    %201 = vector.load %arg13[%c0_67, %c0_68, %c0_69] : memref<4x64x128xf32, #tpu.memory_space<vmem>>, vector<4x64x128xf32>
    tpu.vector_store %arg13[%c0_67, %c0_68, %c0_69], %200 {strides = array<i32>} : memref<4x64x128xf32, #tpu.memory_space<vmem>>, vector<4x64x128xf32>,
    return
  }
  func.func @transform_0(%arg0: i32) -> (i32, i32, i32) {
    %c0_i32 = arith.constant 0 : i32
    %c0_i32_0 = arith.constant 0 : i32
    %c0_i32_1 = arith.constant 0 : i32
    return %arg0, %c0_i32, %c0_i32_0 : i32, i32, i32
  }
  func.func @transform_1(%arg0: i32) -> (i32, i32) {
    %c0_i32 = arith.constant 0 : i32
    %c0_i32_0 = arith.constant 0 : i32
    %c0_i32_1 = arith.constant 0 : i32
    return %c0_i32, %c0_i32_0 : i32, i32
  }
  func.func @transform_2(%arg0: i32) -> (i32, i32) {
    %c0_i32 = arith.constant 0 : i32
    %c0_i32_0 = arith.constant 0 : i32
    %c0_i32_1 = arith.constant 0 : i32
    return %c0_i32, %c0_i32_0 : i32, i32
  }
  func.func @transform_3(%arg0: i32) -> (i32, i32) {
    %c0_i32 = arith.constant 0 : i32
    %c0_i32_0 = arith.constant 0 : i32
    %c0_i32_1 = arith.constant 0 : i32
    return %c0_i32, %c0_i32_0 : i32, i32
  }
  func.func @transform_4(%arg0: i32) -> (i32, i32) {
    %c0_i32 = arith.constant 0 : i32
    %c0_i32_0 = arith.constant 0 : i32
    %c0_i32_1 = arith.constant 0 : i32
    return %c0_i32, %c0_i32_0 : i32, i32
  }
  func.func @transform_5(%arg0: i32) -> (i32, i32) {
    %c0_i32 = arith.constant 0 : i32
    %c0_i32_0 = arith.constant 0 : i32
    %c0_i32_1 = arith.constant 0 : i32
    return %c0_i32, %c0_i32_0 : i32, i32
  }
  func.func @transform_6(%arg0: i32) -> (i32, i32) {
    %c0_i32 = arith.constant 0 : i32
    %c0_i32_0 = arith.constant 0 : i32
    %c0_i32_1 = arith.constant 0 : i32
    return %c0_i32, %c0_i32_0 : i32, i32
  }
  func.func @transform_7(%arg0: i32) -> (i32, i32) {
    %c0_i32 = arith.constant 0 : i32
    %c0_i32_0 = arith.constant 0 : i32
    %c0_i32_1 = arith.constant 0 : i32
    return %c0_i32, %c0_i32_0 : i32, i32
  }
  func.func @transform_8(%arg0: i32) -> (i32, i32) {
    %c0_i32 = arith.constant 0 : i32
    %c0_i32_0 = arith.constant 0 : i32
    %c0_i32_1 = arith.constant 0 : i32
    return %c0_i32, %c0_i32_0 : i32, i32
  }
  func.func @transform_9(%arg0: i32) -> (i32, i32) {
    %c0_i32 = arith.constant 0 : i32
    %c0_i32_0 = arith.constant 0 : i32
    %c0_i32_1 = arith.constant 0 : i32
    return %c0_i32, %c0_i32_0 : i32, i32
  }
  func.func @transform_10(%arg0: i32) -> (i32, i32) {
    %c0_i32 = arith.constant 0 : i32
    %c0_i32_0 = arith.constant 0 : i32
    %c0_i32_1 = arith.constant 0 : i32
    return %c0_i32, %c0_i32_0 : i32, i32
  }
  func.func @transform_11(%arg0: i32) -> (i32, i32) {
    %c0_i32 = arith.constant 0 : i32
    %c0_i32_0 = arith.constant 0 : i32
    %c0_i32_1 = arith.constant 0 : i32
    return %c0_i32, %c0_i32_0 : i32, i32
  }
  func.func @transform_12(%arg0: i32) -> (i32, i32, i32) {
    %c0_i32 = arith.constant 0 : i32
    %c0_i32_0 = arith.constant 0 : i32
    %c0_i32_1 = arith.constant 0 : i32
    return %arg0, %c0_i32, %c0_i32_0 : i32, i32, i32
  }
}

</mosaic_0001>

<bundles_post_ra>
// kernel: tpu_custom_call.1
= control target key start
LH: loop header
LB: loop body
LE: loop exit
PB: predicated region body
PF: predicated region fallthrough
CT: control target
= control target key end

     0   :  { %s13887_s0 = inlined_call_operand.hbm [shape: f32[8,64,128], index: 0, kind: input, shape index: {}]   ;;  %s13888_s1 = inlined_call_operand.hbm [shape: f32[1,128], index: 1, kind: input, shape index: {}]   ;;  %s13889_s2 = inlined_call_operand.vmem [shape: f32[1,128], index: 2, kind: input, shape index: {}]   ;;  %s13890_s3 = inlined_call_operand.hbm [shape: f32[128,384], index: 3, kind: input, shape index: {}]   ;;  %s13891_s4 = inlined_call_operand.hbm [shape: f32[128,128], index: 4, kind: input, shape index: {}]   ;;  %s13892_s5 = inlined_call_operand.vmem [shape: f32[1,128], index: 5, kind: input, shape index: {}]   ;;  %s13893_s6 = inlined_call_operand.vmem [shape: f32[1,128], index: 6, kind: input, shape index: {}]   ;;  %s13894_s7 = inlined_call_operand.vmem [shape: f32[1,128], index: 7, kind: input, shape index: {}]   ;;  %s13895_s8 = inlined_call_operand.hbm [shape: f32[128,128], index: 8, kind: input, shape index: {}]   ;;  %s13896_s9 = inlined_call_operand.vmem [shape: f32[1,128], index: 9, kind: input, shape index: {}]   ;;  %s13897_s10 = inlined_call_operand.hbm [shape: f32[128,128], index: 10, kind: input, shape index: {}]   ;;  %s13898_s11 = inlined_call_operand.vmem [shape: f32[1,128], index: 11, kind: input, shape index: {}]   ;;  %s13899_s12 = inlined_call_operand.hbm [shape: f32[8,64,128], index: 12, kind: output, shape index: {}]  }
   0x1   :  { %14103 = sst [smem:[#allocation150_spill]] %s13888_s1 }
   0x2   :  { %14104 = sst [smem:[#allocation151_spill]] %s13890_s3 }
   0x3   :  { %14105 = sst [smem:[#allocation152_spill]] %s13891_s4 }
   0x4   :  { %14106 = sst [smem:[#allocation153_spill]] %s13895_s8 }
   0x5   :  { %14107 = sst [smem:[#allocation154_spill]] %s13897_s10 }
   0x6   :  { %14108 = sst [smem:[#allocation155_spill]] %s13899_s12 }
   0x7   :  { %17 = vsyncpa [#allocation3], 0 }
   0x8   :  { %19 = vsyncpa [#allocation3 + $0x1], 0 }
   0x9   :  { %20 = vsyncpa [#allocation6], 0 }
   0xa   :  { %21 = vsyncpa [#allocation9], 0 }
   0xb   :  { %22 = vsyncpa [#allocation12], 0 }
   0xc   :  { %23 = vsyncpa [#allocation4], 0 }
   0xd   :  { %25 = vsyncpa [#allocation4 + $0x1], 0  ;;  %s9149_s21 = smov 0   ;;  %s9151_s22 = smov 0  }
   0xe   :  { %s9153_s23 = smov 0   ;;  %s9155_s24 = smov 0  }
   0xf LB: > { %s14109_s1 = sld [smem:[#allocation150_spill]]  ;;  %s9173_s28 = sadd.s32 4294967295, %s9070_s24   ;;  %s9070_s24 = sphi %s9155_s24, %s14618_s24   ;;  %s9066_s23 = sphi %s9153_s23, %s14617_s23   ;;  %s9062_s22 = sphi %s9151_s22, %s14616_s22   ;;  %s9058_s21 = sphi %s9149_s21, %s14615_s21  }
  0x10   : > { %p7664_p0 = scmp.ge.s32.totalorder %s9070_s24, 1  ;;  %p52_p1 = scmp.eq.s32.totalorder %s9173_s28, 0 }
  0x11   : > { %p319_p2 = scmp.lt.s32.totalorder %s9070_s24, 3  ;;  %s9072_s30 = smov [#allocation5]  }
  0x12   : > { %s333_s13 = sshll.u32 %s9072_s30, 4  ;;  %s14111_s4 = sld [smem:[#allocation152_spill]]  ;;  %s334_s13 = int_to_ptr.vmem [resolvable:$true] %s333_s13 }
  0x13   : > { %p9178_p3 = pnand %p7664_p0, %p319_p2  ;;  %s9073_s18 = smov [#allocation8]  }
  0x14   : > { %s361_s19 = sshll.u32 %s9073_s18, 4  ;;  %s13901_s20 = smov 128   ;;  %s362_s19 = int_to_ptr.vmem [resolvable:$true] %s361_s19 }
  0x15   : > { %s331_s27 = sshll.u32 %s14109_s1, 4  ;;  %p7914_p5 = pneg %p9178_p3  ;;  %s332_s27 = int_to_ptr.hbm [resolvable:$true] %s331_s27 }
  0x16   : > { %s13902_s25 = smov 8   ;;  %s14113_s3 = sld [smem:[#allocation151_spill]] }
  0x17   : > { %p9190_p6 = pnand %p7914_p5, %p52_p1  ;;  %s9076_s15 = smov [#allocation7]  }
  0x18   : > { %s359_s16 = sshll.u32 %s14111_s4, 4  ;;  %s347_s1 = sshll.u32 %s9076_s15, 4  ;;  %s360_s16 = int_to_ptr.hbm [resolvable:$true] %s359_s16  ;;  %s348_s1 = int_to_ptr.vmem [resolvable:$true] %s347_s1 }
  0x19   : > { %7917 = dma.hbm_to_vmem [thread:$0]  (!%p9190_p6), %s332_s27, 16, %s334_s13, [#allocation6]  }
  0x1a   : > { %7923 = dma.hbm_to_vmem [thread:$0]  (!%p9190_p6), %s360_s16, 2048, %s362_s19, [#allocation9], %s13901_s20, %s13901_s20, %s13902_s25  }
  0x1b   : > { %s14114_s8 = sld [smem:[#allocation153_spill]]  ;;  %s9077_s13 = smov 384  }
  0x1c   : > { %s345_s14 = sshll.u32 %s14113_s3, 4  ;;  %s9078_s12 = smov 24   ;;  %s346_s14 = int_to_ptr.hbm [resolvable:$true] %s345_s14 }
  0x1d   : > { %7920 = dma.hbm_to_vmem [thread:$0]  (!%p9190_p6), %s346_s14, 6144, %s348_s1, [#allocation6], %s9077_s13, %s9077_s13, %s9078_s12  }
  0x1e   : > { %s9079_s16 = smov [#allocation10]   ;;  %s14115_s10 = sld [smem:[#allocation154_spill]] }
  0x1f   : > { %s384_s19 = sshll.u32 %s9079_s16, 4  ;;  %s9080_s1 = smov [#allocation11]   ;;  %s385_s19 = int_to_ptr.vmem [resolvable:$true] %s384_s19 }
  0x20   : > { %s401_s12 = sshll.u32 %s9080_s1, 4  ;;  %s7663_s14 = sadd.s32 4294967294, %s9070_s24   ;;  %s402_s12 = int_to_ptr.vmem [resolvable:$true] %s401_s12 }
  0x21   : > { %s382_s27 = sshll.u32 %s14114_s8, 4  ;;  %s9224_s15 = sadd.s32 1, %s9070_s24   ;;  %s383_s27 = int_to_ptr.hbm [resolvable:$true] %s382_s27 }
  0x22   : > { %7926 = dma.hbm_to_vmem [thread:$0]  (!%p9190_p6), %s383_s27, 2048, %s385_s19, [#allocation9], %s13901_s20, %s13901_s20, %s13902_s25  }
  0x23   : > { %s38_s18 = sadd.s32 1, %s9066_s23  ;;  %s35_s13 = ssub.s32 %s9070_s24, %s9224_s15 }
  0x24   : > { %s399_s4 = sshll.u32 %s14115_s10, 4  ;;  %p45_p7 = scmp.ne.s32.totalorder %s9066_s23, %s9062_s22  ;;  %s400_s4 = int_to_ptr.hbm [resolvable:$true] %s399_s4 }
  0x25   : > { %7929 = dma.hbm_to_vmem [thread:$0]  (!%p9190_p6), %s400_s4, 2048, %s402_s12, [#allocation12], %s13901_s20, %s13901_s20, %s13902_s25  }
  0x26   : > { %p36_p8 = scmp.eq.s32.totalorder %s35_s13, 0  ;;  %p46_p9 = scmp.eq.s32.totalorder %s9070_s24, 0 }
  0x27   : > { %p51_p10 = scmp.ne.s32.totalorder %s9062_s22, %s9058_s21  ;;  %p306_p11 = scmp.eq.s32.totalorder %s9173_s28, 1 }
  0x28   : > { %s9236_s27 = scalar_select %p36_p8, %s9066_s23, %s38_s18  }
  0x29   : > { %p9240_p12 = por %p52_p1, %p51_p10  ;;  %p9244_p13 = por %p306_p11, %p45_p7 }
  0x2a   : > { %p312_p0 = scmp.eq.s32.totalorder %s7663_s14, 1  ;;  %p47_p2 = por %p46_p9, %p45_p7 }
  0x2b   : > { %s418_s19 = sand.u32 1, %s9066_s23   ;;  %p7943_p6 = scmp.lt.s32.totalorder %s9070_s24, 2 }
  0x2c   : > { %p9249_p5 = por %p312_p0, %p51_p10  ;;  %s7671_s30 = sshll.u32 %s418_s19, 8 }
  0x2d   : > { %s7855_s4 = sshll.u32 %s9070_s24, 8  ;;  %s422_s20 = scalar_lea.vmem [#allocation2], %s7671_s30 }
  0x2e   : > { %s428_s18 = scalar_lea.hbm %s13887_s0, %s7855_s4  ;;  %s431_s25 = sshll.u32 %s422_s20, 4  ;;  %s432_s25 = int_to_ptr.vmem [resolvable:$true] %s431_s25 }
  0x2f   : > { %s429_s13 = sshll.u32 %s428_s18, 4  ;;  %p9258_p8 = pnand %p7943_p6, %p47_p2  ;;  %s430_s13 = int_to_ptr.hbm [resolvable:$true] %s429_s13 }
  0x30   : > { %s419_s3 = scalar_lea.sflag [#allocation3], %s418_s19  ;;  %s8962_s8 = sshra.s32 %s430_s13, 4  ;;  %s8963_s8 = int_to_ptr.hbm [resolvable:$true] %s8962_s8 }
  0x31   : > { %s8964_s10 = scalar_lea.hbm %s8963_s8, 256  ;;  %p8966_p9 = pneg %p9258_p8 }
  0x32   : > { %p8965_p7 = scmp.ne.s32.totalorder %s8963_s8, %s8964_s10  ;;  %s8969_s20 = scalar_lea.hbm %s13887_s0, 512 }
  0x33   : > { %p8970_p0 = scmp.lt.s32.totalorder %s8963_s8, %s13887_s0  ;;  %p8971_p2 = scmp.lt.s32.totalorder %s8969_s20, %s8964_s10 }
  0x34   : > { %p8967_p10 = pnand %p8966_p9, %p8965_p7 }
  0x35   : > { %p8972_p6 = por %p8971_p2, %p8970_p0 }
  0x36   : > { %p8968_p11 = pneg %p8967_p10 }
  0x38   : > { %p8973_p4 = pnand %p8972_p6, %p8968_p11 }
  0x3a   : > { %8976 = shalt.err (!%p8973_p4)
}
  0x3b   : > { %s14120_s19 = smov 8   ;;  %s14121_s18 = smov 128  }
  0x3c   : > { %7933 = dma.hbm_to_vmem [thread:$0]  (!%p9258_p8), %s430_s13, 4096, %s432_s25, %s419_s3, %s14121_s18, %s14121_s18, %s14120_s19  }
  0x3d   : > { %443 = sbr.rel (%p9178_p3) target bundleno = 4765 (0x129d), region = 68 }
  0x42   : > { %s9278_s4 = sand.u32 1, %s9062_s22  }
  0x43   : > { %s7676_s8 = sshll.u32 %s9278_s4, 8  ;;  %s446_s10 = scalar_lea.sflag [#allocation3], %s9278_s4 }
  0x44   : > { %s9284_s1 = scalar_lea.vmem [#allocation2], %s7676_s8 }
  0x45   : > { %9037 = dma.done.wait (%p9240_p12), %s446_s10, 4096  }
  0x46   : > { %9039 = vsyncadd (%p9240_p12), %s446_s10, 4294963200 }
  0x47   : > { %9041 = dma.done.wait (%p52_p1), [#allocation6], 6160  }
  0x48   : > { %9043 = vsyncadd (%p52_p1), [#allocation6], 4294961136 }
  0x49   : > { %9045 = dma.done.wait (%p52_p1), [#allocation9], 4096  }
  0x4a   : > { %9047 = vsyncadd (%p52_p1), [#allocation9], 4294963200 }
  0x4b   : > { %9049 = dma.done.wait (%p52_p1), [#allocation12], 2048  }
  0x4c   : > { %9051 = vsyncadd (%p52_p1), [#allocation12], 4294965248  ;;  %v536_v0 = vld [vmem:[%s9284_s1 + $0x90] sm:$0xff]  ;;  %v534_v1 = vld [vmem:[%s9284_s1 + $0x80] sm:$0xff]  ;;  %v550_v8 = vlaneseq  ;;  %v13903_v17 = vmov 0.0   ;;  %s13481_s19 = scalar_lea.vmem [#allocation13], %s7676_s8 }
  0x4d   : > { %v538_v2 = vld [vmem:[%s9284_s1 + $0xa0] sm:$0xff]  ;;  %593 = vadd.xlane.f32.xlu1 %v536_v0  ;;  %589 = vadd.xlane.f32.xlu0 %v534_v1  ;;  %v535_v3 = vld [vmem:[%s9284_s1 + $0x88] sm:$0xff]  ;;  %v537_v4 = vld [vmem:[%s9284_s1 + $0x98] sm:$0xff]  ;;  %s7857_s20 = sshll.u32 %s9173_s28, 8  ;;  %s14613_s18 = sld [smem:[#allocation155_spill]] }
  0x4e   : > { %597 = vadd.xlane.f32.xlu2 %v538_v2  ;;  %v539_v5 = vld [vmem:[%s9284_s1 + $0xa8] sm:$0xff]  ;;  %v540_v6 = vld [vmem:[%s9284_s1 + $0xb0] sm:$0xff]  ;;  %v9310_v7 = vld [vmem:[%s9284_s1 + $0xb8] sm:$0xff]  ;;  %v9313_v9 = vand.u32 127, %v550_v8  ;;  %s7539_s8 = sshll.u32 %s13481_s19, 4  ;;  %s7526_s29 = scalar_lea.sflag [#allocation4], %s9278_s4  ;;  %s7540_s8 = int_to_ptr.vmem [resolvable:$true] %s7539_s8 }
  0x4f   : > { %v9338_v33 = vld [vmem:[%s9284_s1 + $0xd0] sm:$0xff]  ;;  %v9341_v34 = vld [vmem:[%s9284_s1 + $0xc0] sm:$0xff]  ;;  %v9355_v43 = vld [vmem:[%s9284_s1 + $0xc8] sm:$0xff] }
  0x50   : > { %14122 = vst [vmem:[#allocation19_spill] sm:$0xff] %v9313_v9  ;;  %vm552_vm0 = vcmp.lt.s32.totalorder %v9313_v9, 64  ;;  %v1344_v46 = vld [vmem:[#allocation7 + $0x168] sm:$0xff]  ;;  %v1341_v47 = vld [vmem:[#allocation7 + $0x150] sm:$0xff]  ;;  %v9378_v57 = vld [vmem:[%s9284_s1 + $0xe0] sm:$0xff] }
  0x51   : > { %v9321_v18 = vsel %vm552_vm0, 1.0, %v13903_v17  ;;  %7858 = vmatpush.msra.mxu1 %v1344_v46  ;;  %1347 = vmatpush.msra.mxu0 %v1344_v46  ;;  %v9363_v49 = vld [vmem:[%s9284_s1 + $0xe8] sm:$0xff]  ;;  %v9366_v50 = vld [vmem:[%s9284_s1 + $0xd8] sm:$0xff]  ;;  %v9385_v60 = vld [vmem:[%s9284_s1 + $0xf0] sm:$0xff] }
  0x52   : > { %14123 = vst [vmem:[#allocation20_spill] sm:$0xff] %v9321_v18  ;;  %v9389_v61 = vld [vmem:[%s9284_s1 + $0xf8] sm:$0xff]  ;;  %v1335_v63 = vld [vmem:[#allocation7 + $0x120] sm:$0xff]  ;;  %v1308_v8 = vld [vmem:[#allocation7 + $0x48] sm:$0xff] }
  0x53   : > { %7859 = vmatpush.msra.mxu1 %v1341_v47  ;;  %1348 = vmatpush.msra.mxu0 %v1341_v47  ;;  %v1338_v62 = vld [vmem:[#allocation7 + $0x138] sm:$0xff]  ;;  %s7538_s10 = scalar_lea.hbm %s14613_s18, %s7857_s20  ;;  %s9012_s14 = scalar_lea.hbm %s14613_s18, 512 }
  0x54   : > { %s7541_s3 = sshll.u32 %s7538_s10, 4  ;;  %s7542_s3 = int_to_ptr.hbm [resolvable:$true] %s7541_s3 }
  0x55   : > { %591 = vadd.xlane.f32.xlu0 %v535_v3  ;;  %595 = vadd.xlane.f32.xlu1 %v537_v4  ;;  %s9006_s28 = sshra.s32 %s7542_s3, 4  ;;  %s9007_s28 = int_to_ptr.hbm [resolvable:$true] %s9006_s28 }
  0x56   : > { %599 = vadd.xlane.f32.xlu2 %v539_v5  ;;  %7860 = vmatpush.msra.mxu1 %v1338_v62  ;;  %s9008_s25 = scalar_lea.hbm %s9007_s28, 256  ;;  %p9013_p12 = scmp.lt.s32.totalorder %s9007_s28, %s14613_s18 }
  0x57   : > { %1349 = vmatpush.msra.mxu0 %v1338_v62  ;;  %p9009_p1 = scmp.ne.s32.totalorder %s9007_s28, %s9008_s25  ;;  %p9014_p8 = scmp.lt.s32.totalorder %s9012_s14, %s9008_s25 }
  0x58   : > { %7861 = vmatpush.msra.mxu1 %v1335_v63 }
  0x59   : > { %1350 = vmatpush.msra.mxu0 %v1335_v63  ;;  %p9010_p3 = pnand %p9009_p1, %p9244_p13  ;;  %p9015_p7 = por %p9014_p8, %p9013_p12 }
  0x5b   : > { %p9011_p4 = pneg %p9010_p3 }
  0x5d   : > { %601 = vadd.xlane.f32.xlu0 %v540_v6  ;;  %p9016_p9 = pnand %p9015_p7, %p9011_p4 }
  0x5e   : > { %603 = vadd.xlane.f32.xlu2 %v9310_v7 }
  0xc0   : > { %v594_v10 = vpop.xlane.xlu1 %593  ;;  %v590_v11 = vpop.xlane.xlu0 %589 }
  0xc1   : > { %v639_v12 = vmul.f32 0.015625, %v594_v10  ;;  %v637_v13 = vmul.f32 0.015625, %v590_v11  ;;  %v598_v14 = vpop.xlane.xlu2 %597  ;;  %v1305_v10 = vld [vmem:[#allocation7 + $0x30] sm:$0xff]  ;;  %v1302_v11 = vld [vmem:[#allocation7 + $0x18] sm:$0xff] }
  0xc2   : > { %v641_v38 = vmul.f32 0.015625, %v598_v14 }
  0xc3   : > { %v9316_v15 = vsub.f32 %v536_v0, %v639_v12  ;;  %v9318_v16 = vsub.f32 %v534_v1, %v637_v13  ;;  %v1332_v0 = vld [vmem:[#allocation7 + $0x108] sm:$0xff]  ;;  %v1329_v1 = vld [vmem:[#allocation7 + $0xf0] sm:$0xff]  ;;  %v1299_v12 = vld [vmem:[#allocation7] sm:$0xff] }
  0xc4   : > { %v9352_v41 = vsub.f32 %v538_v2, %v641_v38  ;;  %7862 = vmatpush.msra.mxu1 %v1332_v0  ;;  %1351 = vmatpush.msra.mxu0 %v1332_v0  ;;  %v1326_v2 = vld [vmem:[#allocation7 + $0xd8] sm:$0xff] }
  0xc5   : > { %v703_v19 = vmul.f32 %v9316_v15, %v9316_v15  ;;  %v701_v20 = vmul.f32 %v9318_v16, %v9318_v16 }
  0xc6   : > { %v705_v45 = vmul.f32 %v9352_v41, %v9352_v41  ;;  %7863 = vmatpush.msra.mxu1 %v1329_v1  ;;  %1352 = vmatpush.msra.mxu0 %v1329_v1 }
  0xc7   : > { %v735_v21 = vmul.f32 %v9321_v18, %v703_v19  ;;  %v733_v22 = vmul.f32 %v9321_v18, %v701_v20 }
  0xc8   : > { %v592_v23 = vpop.xlane.xlu0 %591  ;;  %v596_v24 = vpop.xlane.xlu1 %595  ;;  %v737_v51 = vmul.f32 %v9321_v18, %v705_v45  ;;  %7864 = vmatpush.msra.mxu1 %v1326_v2  ;;  %1353 = vmatpush.msra.mxu0 %v1326_v2 }
  0xc9   : > { %v638_v25 = vmul.f32 0.015625, %v592_v23  ;;  %785 = vadd.xlane.f32.xlu2 %v735_v21  ;;  %781 = vadd.xlane.f32.xlu1 %v733_v22  ;;  %v600_v26 = vpop.xlane.xlu2 %599  ;;  %v640_v27 = vmul.f32 0.015625, %v596_v24 }
  0xca   : > { %v642_v28 = vmul.f32 0.015625, %v600_v26 }
  0xcb   : > { %v9329_v29 = vsub.f32 %v535_v3, %v638_v25  ;;  %v9333_v31 = vsub.f32 %v537_v4, %v640_v27  ;;  %v1323_v3 = vld [vmem:[#allocation7 + $0xc0] sm:$0xff]  ;;  %v1320_v4 = vld [vmem:[#allocation7 + $0xa8] sm:$0xff] }
  0xcc   : > { %v9331_v30 = vsub.f32 %v539_v5, %v642_v28  ;;  %7865 = vmatpush.msra.mxu1 %v1323_v3  ;;  %1354 = vmatpush.msra.mxu0 %v1323_v3  ;;  %v1317_v5 = vld [vmem:[#allocation7 + $0x90] sm:$0xff] }
  0xcd   : > { %v702_v32 = vmul.f32 %v9329_v29, %v9329_v29  ;;  %v704_v37 = vmul.f32 %v9333_v31, %v9333_v31 }
  0xce   : > { %v706_v36 = vmul.f32 %v9331_v30, %v9331_v30  ;;  %7866 = vmatpush.msra.mxu1 %v1320_v4  ;;  %1355 = vmatpush.msra.mxu0 %v1320_v4  ;;  %v9421_v4 = vld [vmem:[#allocation5] ss:$0 sm:$0xff] }
  0xcf   : > { %v734_v35 = vmul.f32 %v9321_v18, %v702_v32  ;;  %v736_v40 = vmul.f32 %v9321_v18, %v704_v37 }
  0xd0   : > { %v738_v39 = vmul.f32 %v9321_v18, %v706_v36  ;;  %v602_v42 = vpop.xlane.xlu0 %601  ;;  %7867 = vmatpush.msra.mxu1 %v1317_v5  ;;  %1356 = vmatpush.msra.mxu0 %v1317_v5 }
  0xd1   : > { %609 = vadd.xlane.f32.xlu2 %v9338_v33  ;;  %605 = vadd.xlane.f32.xlu1 %v9341_v34  ;;  %v643_v44 = vmul.f32 0.015625, %v602_v42  ;;  %v604_v52 = vpop.xlane.xlu2 %603 }
  0xd2   : > { %783 = vadd.xlane.f32.xlu0 %v734_v35  ;;  %v644_v54 = vmul.f32 0.015625, %v604_v52 }
  0xd3   : > { %v9360_v48 = vsub.f32 %v540_v6, %v643_v44  ;;  %v1314_v6 = vld [vmem:[#allocation7 + $0x78] sm:$0xff] }
  0xd4   : > { %v9375_v56 = vsub.f32 %v9310_v7, %v644_v54  ;;  %7868 = vmatpush.msra.mxu1 %v1314_v6  ;;  %1357 = vmatpush.msra.mxu0 %v1314_v6  ;;  %v1311_v7 = vld [vmem:[#allocation7 + $0x60] sm:$0xff]  ;;  %v9427_v6 = vld [vmem:[%s9284_s1 + $0x10] sm:$0xff] }
  0xd5   : > { %v707_v53 = vmul.f32 %v9360_v48, %v9360_v48 }
  0xd6   : > { %v708_v58 = vmul.f32 %v9375_v56, %v9375_v56  ;;  %7869 = vmatpush.msra.mxu1 %v1311_v7  ;;  %1358 = vmatpush.msra.mxu0 %v1311_v7  ;;  %v9430_v7 = vld [vmem:[%s9284_s1] sm:$0xff] }
  0xd7   : > { %v739_v55 = vmul.f32 %v9321_v18, %v707_v53 }
  0xd8   : > { %v740_v59 = vmul.f32 %v9321_v18, %v708_v58  ;;  %7870 = vmatpush.msra.mxu1 %v1308_v8  ;;  %1359 = vmatpush.msra.mxu0 %v1308_v8 }
  0xd9   : > { %791 = vadd.xlane.f32.xlu2 %v738_v39  ;;  %787 = vadd.xlane.f32.xlu1 %v736_v40 }
  0xda   : > { %607 = vadd.xlane.f32.xlu0 %v9355_v43  ;;  %7871 = vmatpush.msra.mxu1 %v1305_v10 }
  0xdb   : > { %1360 = vmatpush.msra.mxu0 %v1305_v10 }
  0xdc   : > { %7872 = vmatpush.msra.mxu1 %v1302_v11 }
  0xdd   : > { %1361 = vmatpush.msra.mxu0 %v1302_v11 }
  0xde   : > { %7873 = vmatpush.msra.mxu1 %v1299_v12 }
  0xdf   : > { %1362 = vmatpush.msra.mxu0 %v1299_v12 }
  0xe1   : > { %615 = vadd.xlane.f32.xlu2 %v9363_v49  ;;  %611 = vadd.xlane.f32.xlu1 %v9366_v50 }
  0xe2   : > { %789 = vadd.xlane.f32.xlu0 %v737_v51 }
  0xe9   : > { %793 = vadd.xlane.f32.xlu1 %v739_v55 }
  0xea   : > { %613 = vadd.xlane.f32.xlu0 %v9378_v57 }
  0xf1   : > { %617 = vadd.xlane.f32.xlu1 %v9385_v60 }
  0xf2   : > { %795 = vadd.xlane.f32.xlu0 %v740_v59 }
  0xfa   : > { %619 = vadd.xlane.f32.xlu0 %v9389_v61 }
 0x13c   : > { %v786_v13 = vpop.xlane.xlu2 %785  ;;  %v782_v14 = vpop.xlane.xlu1 %781 }
 0x13d   : > { %v831_v19 = vmul.f32 0.015625, %v786_v13  ;;  %v829_v20 = vmul.f32 0.015625, %v782_v14 }
 0x13f   : > { %v9392_v21 = vadd.f32 1e-05, %v831_v19  ;;  %v861_v22 = vadd.f32 1e-05, %v829_v20  ;;  %v9440_v19 = vld [vmem:[%s13889_s2] ss:$0 sm:$0xff] }
 0x141   : > { %8001 = vrsqrt.f32 %v9392_v21  ;;  %vm1043_vm2 = vweird.f32 %v861_v22  ;;  %vm1063_vm4 = vweird.f32 %v9392_v21 }
 0x142   : > { %8003 = vrsqrt.f32 %v861_v22 }
 0x144   : > { %v610_v23 = vpop.xlane.xlu2 %609  ;;  %v606_v24 = vpop.xlane.xlu1 %605 }
 0x145   : > { %v647_v25 = vmul.f32 0.015625, %v610_v23  ;;  %v645_v26 = vmul.f32 0.015625, %v606_v24  ;;  %v784_v27 = vpop.xlane.xlu0 %783 }
 0x146   : > { %v830_v28 = vmul.f32 0.015625, %v784_v27 }
 0x147   : > { %v9395_v32 = vpop.eup %8001  ;;  %v9398_v35 = vsub.f32 %v9338_v33, %v647_v25  ;;  %v9401_v36 = vsub.f32 %v9341_v34, %v645_v26 }
 0x148   : > { %v8004_v37 = vpop.eup %8003  ;;  %v9403_v38 = vadd.f32 1e-05, %v830_v28  ;;  %v1058_v39 = vmul.f32 %v9395_v32, %v9392_v21  ;;  %vm1064_vm5 = vweird.f32 %v9395_v32 }
 0x149   : > { %v1038_v40 = vmul.f32 %v8004_v37, %v861_v22  ;;  %v709_v42 = vmul.f32 %v9401_v36, %v9401_v36  ;;  %v711_v44 = vmul.f32 %v9398_v35, %v9398_v35  ;;  %vm1044_vm1 = vweird.f32 %v8004_v37  ;;  %vm9464_vm8 = vmor %vm1063_vm4, %vm1064_vm5 }
 0x14a   : > { %8005 = vrsqrt.f32 %v9403_v38  ;;  %v1059_v51 = vmul.f32 %v9395_v32, %v1058_v39  ;;  %vm1045_vm3 = vmor %vm1043_vm2, %vm1044_vm1  ;;  %vm1053_vm7 = vweird.f32 %v9403_v38 }
 0x14b   : > { %v1039_v33 = vmul.f32 %v8004_v37, %v1038_v40  ;;  %v741_v45 = vmul.f32 %v9321_v18, %v709_v42  ;;  %v743_v34 = vmul.f32 %v9321_v18, %v711_v44 }
 0x14c   : > { %v792_v46 = vpop.xlane.xlu2 %791  ;;  %v788_v47 = vpop.xlane.xlu1 %787  ;;  %v1060_v1 = vmul.f32 0.5, %v1059_v51 }
 0x14d   : > { %v1040_v52 = vmul.f32 0.5, %v1039_v33  ;;  %v832_v53 = vmul.f32 0.015625, %v788_v47  ;;  %v608_v54 = vpop.xlane.xlu0 %607  ;;  %797 = vadd.xlane.f32.xlu2 %v741_v45  ;;  %801 = vadd.xlane.f32.xlu0 %v743_v34  ;;  %v834_v59 = vmul.f32 0.015625, %v792_v46  ;;  %v9480_v46 = vld [vmem:[%s9284_s1 + $0x8] sm:$0xff] }
 0x14e   : > { %v646_v55 = vmul.f32 0.015625, %v608_v54  ;;  %v1061_v20 = vsub.f32 1.5, %v1060_v1 }
 0x14f   : > { %v1041_v58 = vsub.f32 1.5, %v1040_v52  ;;  %v9415_v62 = vadd.f32 1e-05, %v832_v53 }
 0x150   : > { %v8006_v63 = vpop.eup %8005  ;;  %v9418_v0 = vsub.f32 %v9355_v43, %v646_v55  ;;  %v9432_v43 = vadd.f32 1e-05, %v834_v59  ;;  %v1062_v44 = vmul.f32 %v9395_v32, %v1061_v20 }
 0x151   : > { %v1042_v2 = vmul.f32 %v8004_v37, %v1041_v58  ;;  %v1048_v3 = vmul.f32 %v8006_v63, %v9403_v38  ;;  %8007 = vrsqrt.f32 %v9415_v62  ;;  %vm1054_vm6 = vweird.f32 %v8006_v63 }
 0x152   : > { %v710_v5 = vmul.f32 %v9418_v0, %v9418_v0  ;;  %8009 = vrsqrt.f32 %v9432_v43  ;;  %vm1055_vm9 = vmor %vm1053_vm7, %vm1054_vm6  ;;  %v1066_v1 = vsel %vm9464_vm8, %v9395_v32, %v1062_v44  ;;  %vm1073_vm10 = vweird.f32 %v9415_v62 }
 0x153   : > { %v1049_v8 = vmul.f32 %v8006_v63, %v1048_v3  ;;  %v1046_v10 = vsel %vm1045_vm3, %v8004_v37, %v1042_v2  ;;  %vm1093_vm0 = vweird.f32 %v9432_v43 }
 0x154   : > { %v616_v11 = vpop.xlane.xlu2 %615  ;;  %v612_v12 = vpop.xlane.xlu1 %611  ;;  %v742_v13 = vmul.f32 %v9321_v18, %v710_v5  ;;  %v1213_v14 = vmul.f32 %v1046_v10, %v9318_v16 }
 0x155   : > { %v1050_v22 = vmul.f32 0.5, %v1049_v8  ;;  %v650_v23 = vmul.f32 0.015625, %v616_v11  ;;  %v648_v24 = vmul.f32 0.015625, %v612_v12  ;;  %v790_v25 = vpop.xlane.xlu0 %789  ;;  %561 = vadd.xlane.f32.xlu0 %v9427_v6  ;;  %557 = vadd.xlane.f32.xlu2 %v9430_v7  ;;  %v1215_v11 = vmul.f32 %v1066_v1, %v9316_v15 }
 0x156   : > { %v833_v26 = vmul.f32 0.015625, %v790_v25  ;;  %799 = vadd.xlane.f32.xlu1 %v742_v13  ;;  %v1248_v16 = vmul.f32 %v9421_v4, %v1213_v14  ;;  %v9509_v14 = vld [vmem:[%s9284_s1 + $0x28] sm:$0xff] }
 0x157   : > { %v1051_v27 = vsub.f32 1.5, %v1050_v22  ;;  %v9448_v28 = vsub.f32 %v9363_v49, %v650_v23  ;;  %v9451_v37 = vsub.f32 %v9366_v50, %v648_v24  ;;  %v9453_v39 = vpop.eup %8007  ;;  %v9514_v22 = vld [vmem:[%s9284_s1 + $0x18] sm:$0xff] }
 0x158   : > { %v9456_v40 = vadd.f32 1e-05, %v833_v26  ;;  %v9459_v42 = vadd.f32 %v9440_v19, %v1248_v16  ;;  %v1068_v33 = vmul.f32 %v9453_v39, %v9415_v62  ;;  %v9484_v54 = vpop.eup %8009  ;;  %vm1074_vm11 = vweird.f32 %v9453_v39 }
 0x159   : > { %v1052_v50 = vmul.f32 %v8006_v63, %v1051_v27  ;;  %v714_v38 = vmul.f32 %v9448_v28, %v9448_v28  ;;  %v712_v21 = vmul.f32 %v9451_v37, %v9451_v37  ;;  %v1088_v8 = vmul.f32 %v9484_v54, %v9432_v43  ;;  %vm9519_vm12 = vmor %vm1073_vm10, %vm1074_vm11  ;;  %v1346_v43 = vld [vmem:[#allocation7 + $0x178] sm:$0xff] }
 0x15a   : > { %8011 = vrsqrt.f32 %v9456_v40  ;;  %1411 = vmatmul.f32.vlgmr.msra.gmra.mxu1 %v9459_v42  ;;  %v1069_v45 = vmul.f32 %v9453_v39, %v1068_v33  ;;  %v1250_v26 = vmul.f32 %v9421_v4, %v1215_v11  ;;  %vm1083_vm13 = vweird.f32 %v9456_v40  ;;  %7874 = vmatpush.msra.mxu3 %v1346_v43 }
 0x15b   : > { %v746_v34 = vmul.f32 %v9321_v18, %v714_v38  ;;  %v1056_v47 = vsel %vm1055_vm9, %v8006_v63, %v1052_v50  ;;  %v744_v52 = vmul.f32 %v9321_v18, %v712_v21  ;;  %v1089_v15 = vmul.f32 %v9484_v54, %v1088_v8  ;;  %1573 = vmatpush.msra.mxu2 %v1346_v43 }
 0x15c   : > { %v794_v51 = vpop.xlane.xlu1 %793  ;;  %v1214_v53 = vmul.f32 %v1056_v47, %v9329_v29  ;;  %v1070_v55 = vmul.f32 0.5, %v1069_v45  ;;  %vm1094_vm1 = vweird.f32 %v9484_v54 }
 0x15d   : > { %v835_v58 = vmul.f32 0.015625, %v794_v51  ;;  %v614_v59 = vpop.xlane.xlu0 %613  ;;  %807 = vadd.xlane.f32.xlu0 %v746_v34  ;;  %803 = vadd.xlane.f32.xlu2 %v744_v52  ;;  %v1090_v21 = vmul.f32 0.5, %v1089_v15  ;;  %v9539_v34 = vadd.f32 %v9440_v19, %v1250_v26  ;;  %vm9566_vm2 = vmor %vm1093_vm0, %vm1094_vm1 }
 0x15e   : > { %v649_v2 = vmul.f32 0.015625, %v614_v59  ;;  %559 = vadd.xlane.f32.xlu1 %v9480_v46  ;;  %v1249_v63 = vmul.f32 %v9421_v4, %v1214_v53  ;;  %v1071_v3 = vsub.f32 1.5, %v1070_v55 }
 0x15f   : > { %v9492_v29 = vadd.f32 1e-05, %v835_v58 }
 0x160   : > { %v8012_v5 = vpop.eup %8011  ;;  %v9497_v10 = vsub.f32 %v9378_v57, %v649_v2  ;;  %v9500_v32 = vadd.f32 %v9440_v19, %v1249_v63  ;;  %v1072_v12 = vmul.f32 %v9453_v39, %v1071_v3 }
 0x161   : > { %v1078_v13 = vmul.f32 %v8012_v5, %v9456_v40  ;;  %8013 = vrsqrt.f32 %v9492_v29  ;;  %vm1084_vm14 = vweird.f32 %v8012_v5  ;;  %vm1103_vm3 = vweird.f32 %v9492_v29 }
 0x162   : > { %1414 = vmatmul.f32.gmra.mxu1 %v9500_v32  ;;  %v713_v57 = vmul.f32 %v9497_v10, %v9497_v10  ;;  %v1076_v49 = vsel %vm9519_vm12, %v9453_v39, %v1072_v12  ;;  %vm1085_vm15 = vmor %vm1083_vm13, %vm1084_vm14 }
 0x163   : > { %v1079_v20 = vmul.f32 %v8012_v5, %v1078_v13  ;;  %v1216_v39 = vmul.f32 %v1076_v49, %v9333_v31  ;;  %v1091_v31 = vsub.f32 1.5, %v1090_v21 }
 0x164   : > { %v618_v24 = vpop.xlane.xlu1 %617  ;;  %v745_v25 = vmul.f32 %v9321_v18, %v713_v57  ;;  %v1343_v57 = vld [vmem:[#allocation7 + $0x160] sm:$0xff] }
 0x165   : > { %v1080_v16 = vmul.f32 0.5, %v1079_v20  ;;  %v651_v27 = vmul.f32 0.015625, %v618_v24  ;;  %v796_v44 = vpop.xlane.xlu0 %795  ;;  %567 = vadd.xlane.f32.xlu0 %v9509_v14  ;;  %563 = vadd.xlane.f32.xlu2 %v9514_v22  ;;  %v1251_v53 = vmul.f32 %v9421_v4, %v1216_v39  ;;  %v9574_v20 = vld [vmem:[%s9284_s1 + $0x30] sm:$0xff] }
 0x166   : > { %v836_v50 = vmul.f32 0.015625, %v796_v44  ;;  %805 = vadd.xlane.f32.xlu1 %v745_v25  ;;  %7875 = vmatpush.msra.mxu3 %v1343_v57 }
 0x167   : > { %v9530_v62 = vpop.eup %8013  ;;  %v1081_v33 = vsub.f32 1.5, %v1080_v16  ;;  %v9534_v38 = vsub.f32 %v9385_v60, %v651_v27  ;;  %v9549_v60 = vld [vmem:[%s9284_s1 + $0x20] sm:$0xff]  ;;  %v9561_v3 = vadd.f32 %v9440_v19, %v1251_v53  ;;  %1574 = vmatpush.msra.mxu2 %v1343_v57 }
 0x168   : > { %v9536_v45 = vadd.f32 1e-05, %v836_v50  ;;  %v1098_v51 = vmul.f32 %v9530_v62, %v9492_v29  ;;  %vm1104_vm4 = vweird.f32 %v9530_v62  ;;  %v1334_v53 = vld [vmem:[#allocation7 + $0x118] sm:$0xff] }
 0x169   : > { %v1082_v47 = vmul.f32 %v8012_v5, %v1081_v33  ;;  %v715_v52 = vmul.f32 %v9534_v38, %v9534_v38  ;;  %vm1105_vm5 = vmor %vm1103_vm3, %vm1104_vm4 }
 0x16a   : > { %8015 = vrsqrt.f32 %v9536_v45  ;;  %1417 = vmatmul.f32.gmra.mxu1 %v9539_v34  ;;  %v1099_v55 = vmul.f32 %v9530_v62, %v1098_v51  ;;  %vm1113_vm6 = vweird.f32 %v9536_v45 }
 0x16b   : > { %v747_v40 = vmul.f32 %v9321_v18, %v715_v52  ;;  %v1086_v59 = vsel %vm1085_vm15, %v8012_v5, %v1082_v47  ;;  %v1092_v5 = vmul.f32 %v9484_v54, %v1091_v31  ;;  %v1331_v31 = vld [vmem:[#allocation7 + $0x100] sm:$0xff] }
 0x16c   : > { %v1217_v8 = vmul.f32 %v1086_v59, %v9352_v41  ;;  %v1100_v11 = vmul.f32 0.5, %v1099_v55  ;;  %v1325_v55 = vld [vmem:[#allocation7 + $0xd0] sm:$0xff]  ;;  %v1319_v59 = vld [vmem:[#allocation7 + $0xa0] sm:$0xff] }
 0x16d   : > { %v620_v58 = vpop.xlane.xlu0 %619  ;;  %809 = vadd.xlane.f32.xlu2 %v747_v40  ;;  %v1096_v25 = vsel %vm9566_vm2, %v9484_v54, %v1092_v5  ;;  %v9591_v54 = vld [vmem:[%s9284_s1 + $0x38] sm:$0xff]  ;;  %v1307_v5 = vld [vmem:[#allocation7 + $0x40] sm:$0xff] }
 0x16e   : > { %v652_v1 = vmul.f32 0.015625, %v620_v58  ;;  %565 = vadd.xlane.f32.xlu1 %v9549_v60  ;;  %v1252_v15 = vmul.f32 %v9421_v4, %v1217_v8  ;;  %v1101_v23 = vsub.f32 1.5, %v1100_v11  ;;  %v1218_v16 = vmul.f32 %v1096_v25, %v9331_v30  ;;  %v1337_v40 = vld [vmem:[#allocation7 + $0x130] sm:$0xff]  ;;  %v1322_v58 = vld [vmem:[#allocation7 + $0xb8] sm:$0xff]  ;;  %v1304_v11 = vld [vmem:[#allocation7 + $0x28] sm:$0xff] }
 0x16f   : > { %v1310_v8 = vld [vmem:[#allocation7 + $0x58] sm:$0xff] }
 0x170   : > { %v8016_v2 = vpop.eup %8015  ;;  %v9558_v63 = vsub.f32 %v9389_v61, %v652_v1  ;;  %v9585_v26 = vadd.f32 %v9440_v19, %v1252_v15  ;;  %v1102_v27 = vmul.f32 %v9530_v62, %v1101_v23  ;;  %v1253_v49 = vmul.f32 %v9421_v4, %v1218_v16  ;;  %v1316_v1 = vld [vmem:[#allocation7 + $0x88] sm:$0xff] }
 0x171   : > { %v1108_v12 = vmul.f32 %v8016_v2, %v9536_v45  ;;  %vm1114_vm7 = vweird.f32 %v8016_v2 }
 0x172   : > { %1420 = vmatmul.f32.gmra.mxu1 %v9561_v3  ;;  %v716_v61 = vmul.f32 %v9558_v63, %v9558_v63  ;;  %v1106_v29 = vsel %vm1105_vm5, %v9530_v62, %v1102_v27  ;;  %v9598_v30 = vadd.f32 %v9440_v19, %v1253_v49  ;;  %vm1115_vm8 = vmor %vm1113_vm6, %vm1114_vm7 }
 0x173   : > { %v1109_v24 = vmul.f32 %v8016_v2, %v1108_v12  ;;  %v1219_v33 = vmul.f32 %v1106_v29, %v9360_v48  ;;  %v1340_v48 = vld [vmem:[#allocation7 + $0x148] sm:$0xff]  ;;  %v1301_v12 = vld [vmem:[#allocation7 + $0x10] sm:$0xff] }
 0x174   : > { %v748_v41 = vmul.f32 %v9321_v18, %v716_v61  ;;  %7876 = vmatpush.msra.mxu3 %v1340_v48  ;;  %1575 = vmatpush.msra.mxu2 %v1340_v48 }
 0x175   : > { %569 = vadd.xlane.f32.xlu2 %v9574_v20  ;;  %v1110_v44 = vmul.f32 0.5, %v1109_v24  ;;  %v1254_v39 = vmul.f32 %v9421_v4, %v1219_v33 }
 0x176   : > { %811 = vadd.xlane.f32.xlu1 %v748_v41  ;;  %7877 = vmatpush.msra.mxu3 %v1337_v40 }
 0x177   : > { %v1111_v50 = vsub.f32 1.5, %v1110_v44  ;;  %v9604_v51 = vadd.f32 %v9440_v19, %v1254_v39  ;;  %1576 = vmatpush.msra.mxu2 %v1337_v40 }
 0x178   : > { %7878 = vmatpush.msra.mxu3 %v1334_v53 }
 0x179   : > { %v1112_v21 = vmul.f32 %v8016_v2, %v1111_v50  ;;  %1577 = vmatpush.msra.mxu2 %v1334_v53 }
 0x17a   : > { %1423 = vmatmul.f32.gmra.mxu1 %v9585_v26  ;;  %7879 = vmatpush.msra.mxu3 %v1331_v31 }
 0x17b   : > { %v1116_v47 = vsel %vm1115_vm8, %v8016_v2, %v1112_v21  ;;  %1578 = vmatpush.msra.mxu2 %v1331_v31  ;;  %v1313_v2 = vld [vmem:[#allocation7 + $0x70] sm:$0xff] }
 0x17c   : > { %v1220_v62 = vmul.f32 %v1116_v47, %v9375_v56  ;;  %v1328_v56 = vld [vmem:[#allocation7 + $0xe8] sm:$0xff] }
 0x17d   : > { %7880 = vmatpush.msra.mxu3 %v1328_v56  ;;  %1579 = vmatpush.msra.mxu2 %v1328_v56 }
 0x17e   : > { %571 = vadd.xlane.f32.xlu1 %v9591_v54  ;;  %v1255_v45 = vmul.f32 %v9421_v4, %v1220_v62 }
 0x17f   : > { %7881 = vmatpush.msra.mxu3 %v1325_v55  ;;  %1580 = vmatpush.msra.mxu2 %v1325_v55 }
 0x180   : > { %v9610_v52 = vadd.f32 %v9440_v19, %v1255_v45 }
 0x181   : > { %7882 = vmatpush.msra.mxu3 %v1322_v58  ;;  %1581 = vmatpush.msra.mxu2 %v1322_v58 }
 0x182   : > { %1426 = vmatmul.f32.gmra.mxu1 %v9598_v30 }
 0x183   : > { %7883 = vmatpush.msra.mxu3 %v1319_v59  ;;  %1582 = vmatpush.msra.mxu2 %v1319_v59 }
 0x185   : > { %7884 = vmatpush.msra.mxu3 %v1316_v1  ;;  %1583 = vmatpush.msra.mxu2 %v1316_v1 }
 0x187   : > { %7885 = vmatpush.msra.mxu3 %v1313_v2  ;;  %1584 = vmatpush.msra.mxu2 %v1313_v2 }
 0x189   : > { %7886 = vmatpush.msra.mxu3 %v1310_v8  ;;  %1585 = vmatpush.msra.mxu2 %v1310_v8 }
 0x18a   : > { %1429 = vmatmul.f32.gmra.mxu1 %v9604_v51 }
 0x18b   : > { %7887 = vmatpush.msra.mxu3 %v1307_v5  ;;  %1586 = vmatpush.msra.mxu2 %v1307_v5 }
 0x18d   : > { %7888 = vmatpush.msra.mxu3 %v1304_v11  ;;  %1587 = vmatpush.msra.mxu2 %v1304_v11 }
 0x18f   : > { %7889 = vmatpush.msra.mxu3 %v1301_v12  ;;  %1588 = vmatpush.msra.mxu2 %v1301_v12 }
 0x192   : > { %1432 = vmatmul.f32.gmra.mxu1 %v9610_v52 }
 0x1c0   : > { %v798_v13 = vpop.xlane.xlu2 %797  ;;  %v802_v61 = vpop.xlane.xlu0 %801 }
 0x1c1   : > { %v837_v43 = vmul.f32 0.015625, %v798_v13  ;;  %v839_v57 = vmul.f32 0.015625, %v802_v61 }
 0x1c3   : > { %v869_v41 = vadd.f32 1e-05, %v837_v43  ;;  %v9613_v15 = vadd.f32 1e-05, %v839_v57  ;;  %v9640_v43 = vld [vmem:[%s9284_s1 + $0x50] sm:$0xff] }
 0x1c5   : > { %8017 = vrsqrt.f32 %v869_v41  ;;  %vm1123_vm10 = vweird.f32 %v869_v41  ;;  %vm1143_vm13 = vweird.f32 %v9613_v15 }
 0x1c6   : > { %8019 = vrsqrt.f32 %v9613_v15 }
 0x1c8   : > { %v562_v23 = vpop.xlane.xlu0 %561  ;;  %v558_v24 = vpop.xlane.xlu2 %557 }
 0x1c9   : > { %v800_v25 = vpop.xlane.xlu1 %799  ;;  %v623_v16 = vmul.f32 0.015625, %v562_v23  ;;  %v621_v27 = vmul.f32 0.015625, %v558_v24  ;;  %v9645_v23 = vld [vmem:[%s9284_s1 + $0x40] sm:$0xff] }
 0x1ca   : > { %v838_v44 = vmul.f32 0.015625, %v800_v25 }
 0x1cb   : > { %v8018_v49 = vpop.eup %8017  ;;  %v9617_v50 = vsub.f32 %v9427_v6, %v623_v16  ;;  %v9620_v29 = vsub.f32 %v9430_v7, %v621_v27 }
 0x1cc   : > { %v9622_v33 = vpop.eup %8019  ;;  %v1118_v21 = vmul.f32 %v8018_v49, %v869_v41  ;;  %v870_v39 = vadd.f32 1e-05, %v838_v44  ;;  %vm1124_vm9 = vweird.f32 %v8018_v49 }
 0x1cd   : > { %v687_v47 = vmul.f32 %v9617_v50, %v9617_v50  ;;  %v685_v62 = vmul.f32 %v9620_v29, %v9620_v29  ;;  %v1138_v48 = vmul.f32 %v9622_v33, %v9613_v15  ;;  %vm1125_vm11 = vmor %vm1123_vm10, %vm1124_vm9  ;;  %vm1144_vm14 = vweird.f32 %v9622_v33 }
 0x1ce   : > { %v1119_v45 = vmul.f32 %v8018_v49, %v1118_v21  ;;  %8021 = vrsqrt.f32 %v870_v39  ;;  %vm1133_vm15 = vweird.f32 %v870_v39  ;;  %vm9691_vm1 = vmor %vm1143_vm13, %vm1144_vm14 }
 0x1cf   : > { %v719_v6 = vmul.f32 %v9321_v18, %v687_v47  ;;  %v717_v7 = vmul.f32 %v9321_v18, %v685_v62  ;;  %v1139_v58 = vmul.f32 %v9622_v33, %v1138_v48 }
 0x1d0   : > { %v1120_v40 = vmul.f32 0.5, %v1119_v45  ;;  %v808_v53 = vpop.xlane.xlu0 %807  ;;  %v804_v56 = vpop.xlane.xlu2 %803 }
 0x1d1   : > { %v560_v31 = vpop.xlane.xlu1 %559  ;;  %753 = vadd.xlane.f32.xlu1 %v719_v6  ;;  %749 = vadd.xlane.f32.xlu0 %v717_v7  ;;  %v840_v1 = vmul.f32 0.015625, %v804_v56  ;;  %v1140_v13 = vmul.f32 0.5, %v1139_v58  ;;  %v842_v61 = vmul.f32 0.015625, %v808_v53 }
 0x1d2   : > { %v1121_v55 = vsub.f32 1.5, %v1120_v40  ;;  %v622_v59 = vmul.f32 0.015625, %v560_v31 }
 0x1d3   : > { %v9636_v11 = vadd.f32 1e-05, %v840_v1  ;;  %v1141_v62 = vsub.f32 1.5, %v1140_v13  ;;  %v9651_v45 = vadd.f32 1e-05, %v842_v61 }
 0x1d4   : > { %v8022_v2 = vpop.eup %8021  ;;  %v1122_v8 = vmul.f32 %v8018_v49, %v1121_v55  ;;  %v9634_v5 = vsub.f32 %v9480_v46, %v622_v59 }
 0x1d5   : > { %v1128_v12 = vmul.f32 %v8022_v2, %v870_v39  ;;  %8023 = vrsqrt.f32 %v9636_v11  ;;  %vm1134_vm12 = vweird.f32 %v8022_v2  ;;  %v1142_v59 = vmul.f32 %v9622_v33, %v1141_v62 }
 0x1d6   : > { %v686_v57 = vmul.f32 %v9634_v5, %v9634_v5  ;;  %v1126_v25 = vsel %vm1125_vm11, %v8018_v49, %v1122_v8  ;;  %vm9666_vm0 = vmor %vm1133_vm15, %vm1134_vm12  ;;  %8025 = vrsqrt.f32 %v9651_v45  ;;  %v9683_v8 = vld [vmem:[%s9284_s1 + $0x48] sm:$0xff]  ;;  %vm1153_vm2 = vweird.f32 %v9636_v11 }
 0x1d7   : > { %v1129_v24 = vmul.f32 %v8022_v2, %v1128_v12  ;;  %v1221_v41 = vmul.f32 %v1126_v25, %v9401_v36  ;;  %vm1173_vm8 = vweird.f32 %v9651_v45 }
 0x1d8   : > { %v568_v46 = vpop.xlane.xlu0 %567  ;;  %v718_v16 = vmul.f32 %v9321_v18, %v686_v57  ;;  %v564_v47 = vpop.xlane.xlu2 %563 }
 0x1d9   : > { %v1130_v27 = vmul.f32 0.5, %v1129_v24  ;;  %v626_v44 = vmul.f32 0.015625, %v568_v46  ;;  %v806_v21 = vpop.xlane.xlu1 %805  ;;  %577 = vadd.xlane.f32.xlu1 %v9640_v43  ;;  %573 = vadd.xlane.f32.xlu0 %v9645_v23  ;;  %v624_v7 = vmul.f32 0.015625, %v564_v47  ;;  %v1256_v40 = vmul.f32 %v9421_v4, %v1221_v41 }
 0x1da   : > { %751 = vadd.xlane.f32.xlu2 %v718_v16  ;;  %v841_v6 = vmul.f32 0.015625, %v806_v21 }
 0x1db   : > { %v1131_v48 = vsub.f32 1.5, %v1130_v27  ;;  %v9654_v49 = vsub.f32 %v9509_v14, %v626_v44  ;;  %v9656_v36 = vpop.eup %8023  ;;  %v9672_v55 = vsub.f32 %v9514_v22, %v624_v7  ;;  %v9675_v58 = vadd.f32 %v9440_v19, %v1256_v40  ;;  %v9726_v40 = vld [vmem:[%s9284_s1 + $0x68] sm:$0xff] }
 0x1dc   : > { %v1148_v31 = vmul.f32 %v9656_v36, %v9636_v11  ;;  %v9663_v56 = vadd.f32 1e-05, %v841_v6  ;;  %v1146_v44 = vsel %vm9691_vm1, %v9622_v33, %v1142_v59  ;;  %v9707_v21 = vpop.eup %8025  ;;  %vm1154_vm3 = vweird.f32 %v9656_v36  ;;  %v9734_v59 = vld [vmem:[%s9284_s1 + $0x58] sm:$0xff] }
 0x1dd   : > { %v1132_v53 = vmul.f32 %v8022_v2, %v1131_v48  ;;  %v690_v39 = vmul.f32 %v9654_v49, %v9654_v49  ;;  %1435 = vmatmul.f32.gmra.mxu1 %v9675_v58  ;;  %1661 = vmatmul.f32.vlgmr.msra.gmra.mxu3 %v9675_v58  ;;  %v688_v61 = vmul.f32 %v9672_v55, %v9672_v55  ;;  %vm9738_vm4 = vmor %vm1153_vm2, %vm1154_vm3  ;;  %vm1174_vm9 = vweird.f32 %v9707_v21 }
 0x1de   : > { %v1149_v1 = vmul.f32 %v9656_v36, %v1148_v31  ;;  %8027 = vrsqrt.f32 %v9663_v56  ;;  %v1223_v33 = vmul.f32 %v1146_v44, %v9398_v35  ;;  %vm1163_vm5 = vweird.f32 %v9663_v56  ;;  %vm9788_vm10 = vmor %vm1173_vm8, %vm1174_vm9 }
 0x1df   : > { %v1136_v12 = vsel %vm9666_vm0, %v8022_v2, %v1132_v53  ;;  %v722_v13 = vmul.f32 %v9321_v18, %v690_v39  ;;  %v720_v16 = vmul.f32 %v9321_v18, %v688_v61 }
 0x1e0   : > { %v1150_v57 = vmul.f32 0.5, %v1149_v1  ;;  %v810_v2 = vpop.xlane.xlu2 %809  ;;  %v1222_v25 = vmul.f32 %v1136_v12, %v9418_v0  ;;  %v1258_v61 = vmul.f32 %v9421_v4, %v1223_v33 }
 0x1e1   : > { %v566_v24 = vpop.xlane.xlu1 %565  ;;  %v843_v15 = vmul.f32 0.015625, %v810_v2  ;;  %759 = vadd.xlane.f32.xlu1 %v722_v13  ;;  %755 = vadd.xlane.f32.xlu0 %v720_v16 }
 0x1e2   : > { %v625_v46 = vmul.f32 0.015625, %v566_v24  ;;  %575 = vadd.xlane.f32.xlu2 %v9683_v8  ;;  %v1151_v41 = vsub.f32 1.5, %v1150_v57  ;;  %v1257_v27 = vmul.f32 %v9421_v4, %v1222_v25 }
 0x1e3   : > { %v9712_v0 = vadd.f32 1e-05, %v843_v15  ;;  %v9759_v15 = vadd.f32 %v9440_v19, %v1258_v61  ;;  %v1342_v61 = vld [vmem:[#allocation7 + $0x158] sm:$0xff] }
 0x1e4   : > { %v9710_v47 = vsub.f32 %v9549_v60, %v625_v46  ;;  %v8028_v62 = vpop.eup %8027  ;;  %v9715_v48 = vadd.f32 %v9440_v19, %v1257_v27  ;;  %v1168_v60 = vmul.f32 %v9707_v21, %v9651_v45  ;;  %v1152_v7 = vmul.f32 %v9656_v36, %v1151_v41 }
 0x1e5   : > { %v1158_v6 = vmul.f32 %v8028_v62, %v9663_v56  ;;  %8029 = vrsqrt.f32 %v9712_v0  ;;  %vm1164_vm6 = vweird.f32 %v8028_v62  ;;  %v9769_v56 = vld [vmem:[%s9284_s1 + $0x60] sm:$0xff]  ;;  %vm1183_vm11 = vweird.f32 %v9712_v0 }
 0x1e6   : > { %v689_v53 = vmul.f32 %v9710_v47, %v9710_v47  ;;  %1438 = vmatmul.f32.gmra.mxu1 %v9715_v48  ;;  %1664 = vmatmul.f32.gmra.mxu3 %v9715_v48  ;;  %v1169_v57 = vmul.f32 %v9707_v21, %v1168_v60  ;;  %v1156_v24 = vsel %vm9738_vm4, %v9656_v36, %v1152_v7  ;;  %vm1165_vm7 = vmor %vm1163_vm5, %vm1164_vm6 }
 0x1e7   : > { %v1159_v31 = vmul.f32 %v8028_v62, %v1158_v6  ;;  %v1224_v16 = vmul.f32 %v1156_v24, %v9451_v37 }
 0x1e8   : > { %v570_v39 = vpop.xlane.xlu2 %569  ;;  %v721_v35 = vmul.f32 %v9321_v18, %v689_v53  ;;  %v1170_v41 = vmul.f32 0.5, %v1169_v57  ;;  %v9796_v57 = vld [vmem:[%s9284_s1 + $0x70] sm:$0xff] }
 0x1e9   : > { %v812_v14 = vpop.xlane.xlu1 %811  ;;  %v1160_v12 = vmul.f32 0.5, %v1159_v31  ;;  %v627_v13 = vmul.f32 0.015625, %v570_v39  ;;  %583 = vadd.xlane.f32.xlu1 %v9726_v40  ;;  %579 = vadd.xlane.f32.xlu0 %v9734_v59  ;;  %v1259_v60 = vmul.f32 %v9421_v4, %v1224_v16 }
 0x1ea   : > { %v844_v22 = vmul.f32 0.015625, %v812_v14  ;;  %757 = vadd.xlane.f32.xlu2 %v721_v35  ;;  %v1171_v37 = vsub.f32 1.5, %v1170_v41 }
 0x1eb   : > { %v9748_v2 = vpop.eup %8029  ;;  %v1161_v11 = vsub.f32 1.5, %v1160_v12  ;;  %v9753_v46 = vsub.f32 %v9574_v20, %v627_v13  ;;  %v9781_v39 = vadd.f32 %v9440_v19, %v1259_v60  ;;  %v1345_v13 = vld [vmem:[#allocation7 + $0x170] sm:$0xff] }
 0x1ec   : > { %v9750_v25 = vadd.f32 1e-05, %v844_v22  ;;  %v1178_v20 = vmul.f32 %v9748_v2, %v9712_v0  ;;  %1460 = vmatpush.msrb.mxu1 %v1345_v13  ;;  %vm1184_vm12 = vweird.f32 %v9748_v2  ;;  %v1312_v22 = vld [vmem:[#allocation7 + $0x68] sm:$0xff]  ;;  %v1306_v13 = vld [vmem:[#allocation7 + $0x38] sm:$0xff] }
 0x1ed   : > { %v691_v36 = vmul.f32 %v9753_v46, %v9753_v46  ;;  %v1162_v27 = vmul.f32 %v8028_v62, %v1161_v11  ;;  %vm1185_vm13 = vmor %vm1183_vm11, %vm1184_vm12 }
 0x1ee   : > { %8031 = vrsqrt.f32 %v9750_v25  ;;  %1441 = vmatmul.f32.gmra.mxu1 %v9759_v15  ;;  %1667 = vmatmul.f32.gmra.mxu3 %v9759_v15  ;;  %v1179_v7 = vmul.f32 %v9748_v2, %v1178_v20  ;;  %vm1193_vm14 = vweird.f32 %v9750_v25 }
 0x1ef   : > { %v723_v44 = vmul.f32 %v9321_v18, %v691_v36  ;;  %v1166_v53 = vsel %vm1165_vm7, %v8028_v62, %v1162_v27  ;;  %v1172_v62 = vmul.f32 %v9707_v21, %v1171_v37  ;;  %1461 = vmatpush.msrb.mxu1 %v1342_v61  ;;  %v1303_v61 = vld [vmem:[#allocation7 + $0x20] sm:$0xff] }
 0x1f0   : > { %v1225_v1 = vmul.f32 %v1166_v53, %v9497_v10  ;;  %v1180_v12 = vmul.f32 0.5, %v1179_v7 }
 0x1f1   : > { %v572_v6 = vpop.xlane.xlu1 %571  ;;  %761 = vadd.xlane.f32.xlu0 %v723_v44  ;;  %v1176_v36 = vsel %vm9788_vm10, %v9707_v21, %v1172_v62  ;;  %v9813_v21 = vld [vmem:[%s9284_s1 + $0x78] sm:$0xff]  ;;  %v1327_v62 = vld [vmem:[#allocation7 + $0xe0] sm:$0xff] }
 0x1f2   : > { %v628_v33 = vmul.f32 0.015625, %v572_v6  ;;  %581 = vadd.xlane.f32.xlu2 %v9769_v56  ;;  %v1260_v10 = vmul.f32 %v9421_v4, %v1225_v1  ;;  %v1181_v24 = vsub.f32 1.5, %v1180_v12  ;;  %v1226_v41 = vmul.f32 %v1176_v36, %v9448_v28  ;;  %v1333_v1 = vld [vmem:[#allocation7 + $0x110] sm:$0xff]  ;;  %v1324_v12 = vld [vmem:[#allocation7 + $0xc8] sm:$0xff] }
 0x1f4   : > { %v8032_v31 = vpop.eup %8031  ;;  %v9776_v14 = vsub.f32 %v9591_v54, %v628_v33  ;;  %v9806_v16 = vadd.f32 %v9440_v19, %v1260_v10  ;;  %v1182_v27 = vmul.f32 %v9748_v2, %v1181_v24  ;;  %v1261_v44 = vmul.f32 %v9421_v4, %v1226_v41 }
 0x1f5   : > { %v1188_v54 = vmul.f32 %v8032_v31, %v9750_v25  ;;  %vm1194_vm15 = vweird.f32 %v8032_v31 }
 0x1f6   : > { %v692_v35 = vmul.f32 %v9776_v14, %v9776_v14  ;;  %1444 = vmatmul.f32.gmra.mxu1 %v9781_v39  ;;  %1670 = vmatmul.f32.gmra.mxu3 %v9781_v39  ;;  %v1186_v6 = vsel %vm1185_vm13, %v9748_v2, %v1182_v27  ;;  %v9820_v28 = vadd.f32 %v9440_v19, %v1261_v44  ;;  %vm1195_vm0 = vmor %vm1193_vm14, %vm1194_vm15  ;;  %v1300_v27 = vld [vmem:[#allocation7 + $0x8] sm:$0xff] }
 0x1f7   : > { %v1189_v11 = vmul.f32 %v8032_v31, %v1188_v54  ;;  %v1227_v33 = vmul.f32 %v1186_v6, %v9534_v38  ;;  %v1315_v54 = vld [vmem:[#allocation7 + $0x80] sm:$0xff] }
 0x1f8   : > { %v724_v45 = vmul.f32 %v9321_v18, %v692_v35  ;;  %v1339_v35 = vld [vmem:[#allocation7 + $0x140] sm:$0xff] }
 0x1f9   : > { %585 = vadd.xlane.f32.xlu0 %v9796_v57  ;;  %v1190_v20 = vmul.f32 0.5, %v1189_v11  ;;  %v1262_v37 = vmul.f32 %v9421_v4, %v1227_v33  ;;  %1462 = vmatpush.msrb.mxu1 %v1339_v35  ;;  %v9838_v11 = vpop.f32.mrf.mxu1 }
 0x1fa   : > { %763 = vadd.xlane.f32.xlu2 %v724_v45  ;;  %v1309_v45 = vld [vmem:[#allocation7 + $0x50] sm:$0xff] }
 0x1fb   : > { %v1191_v0 = vsub.f32 1.5, %v1190_v20  ;;  %v9827_v53 = vadd.f32 %v9440_v19, %v1262_v37 }
 0x1fd   : > { %v1192_v60 = vmul.f32 %v8032_v31, %v1191_v0 }
 0x1fe   : > { %1447 = vmatmul.f32.gmra.mxu1 %v9806_v16  ;;  %1673 = vmatmul.f32.gmra.mxu3 %v9806_v16 }
 0x1ff   : > { %v1196_v7 = vsel %vm1195_vm0, %v8032_v31, %v1192_v60  ;;  %v1336_v31 = vld [vmem:[#allocation7 + $0x128] sm:$0xff] }
 0x200   : > { %v1228_v2 = vmul.f32 %v1196_v7, %v9558_v63  ;;  %1463 = vmatpush.msrb.mxu1 %v1336_v31  ;;  %v1330_v63 = vld [vmem:[#allocation7 + $0xf8] sm:$0xff] }
 0x202   : > { %587 = vadd.xlane.f32.xlu2 %v9813_v21  ;;  %v1263_v38 = vmul.f32 %v9421_v4, %v1228_v2  ;;  %1464 = vmatpush.msrb.mxu1 %v1333_v1  ;;  %v1321_v4 = vld [vmem:[#allocation7 + $0xb0] sm:$0xff] }
 0x204   : > { %v9834_v25 = vadd.f32 %v9440_v19, %v1263_v38  ;;  %1465 = vmatpush.msrb.mxu1 %v1330_v63  ;;  %v1318_v19 = vld [vmem:[#allocation7 + $0x98] sm:$0xff]  ;;  %v9845_v38 = vpop.f32.mrf.mxu1 }
 0x206   : > { %1450 = vmatmul.f32.gmra.mxu1 %v9820_v28  ;;  %1676 = vmatmul.f32.gmra.mxu3 %v9820_v28 }
 0x207   : > { %1466 = vmatpush.msrb.mxu1 %v1327_v62 }
 0x209   : > { %1467 = vmatpush.msrb.mxu1 %v1324_v12 }
 0x20b   : > { %1468 = vmatpush.msrb.mxu1 %v1321_v4 }
 0x20d   : > { %1469 = vmatpush.msrb.mxu1 %v1318_v19 }
 0x20e   : > { %1453 = vmatmul.f32.gmra.mxu1 %v9827_v53  ;;  %1679 = vmatmul.f32.gmra.mxu3 %v9827_v53 }
 0x20f   : > { %1470 = vmatpush.msrb.mxu1 %v1315_v54 }
 0x211   : > { %1471 = vmatpush.msrb.mxu1 %v1312_v22 }
 0x213   : > { %1472 = vmatpush.msrb.mxu1 %v1309_v45 }
 0x215   : > { %1473 = vmatpush.msrb.mxu1 %v1306_v13 }
 0x216   : > { %1456 = vmatmul.f32.gmra.mxu1 %v9834_v25  ;;  %1682 = vmatmul.f32.gmra.mxu3 %v9834_v25 }
 0x217   : > { %1474 = vmatpush.msrb.mxu1 %v1303_v61 }
 0x219   : > { %1475 = vmatpush.msrb.mxu1 %v1300_v27 }
 0x244   : > { %v754_v10 = vpop.xlane.xlu1 %753  ;;  %v750_v24 = vpop.xlane.xlu0 %749 }
 0x245   : > { %v815_v36 = vmul.f32 0.015625, %v754_v10  ;;  %v813_v41 = vmul.f32 0.015625, %v750_v24 }
 0x247   : > { %v9840_v20 = vadd.f32 1e-05, %v815_v36  ;;  %v845_v44 = vadd.f32 1e-05, %v813_v41 }
 0x249   : > { %8033 = vrsqrt.f32 %v9840_v20  ;;  %vm883_vm2 = vweird.f32 %v845_v44  ;;  %vm903_vm4 = vweird.f32 %v9840_v20 }
 0x24a   : > { %8035 = vrsqrt.f32 %v845_v44 }
 0x24c   : > { %v578_v0 = vpop.xlane.xlu1 %577  ;;  %v574_v6 = vpop.xlane.xlu0 %573 }
 0x24d   : > { %v631_v33 = vmul.f32 0.015625, %v578_v0  ;;  %v629_v60 = vmul.f32 0.015625, %v574_v6  ;;  %v752_v37 = vpop.xlane.xlu2 %751  ;;  %v9867_v0 = vpop.f32.mrf.mxu1 }
 0x24e   : > { %v814_v7 = vmul.f32 0.015625, %v752_v37 }
 0x24f   : > { %v9843_v2 = vpop.eup %8033  ;;  %v9848_v35 = vsub.f32 %v9645_v23, %v629_v60  ;;  %v9853_v62 = vsub.f32 %v9640_v43, %v631_v33 }
 0x250   : > { %v8036_v31 = vpop.eup %8035  ;;  %v9850_v1 = vadd.f32 1e-05, %v814_v7  ;;  %v898_v4 = vmul.f32 %v9843_v2, %v9840_v20  ;;  %vm904_vm5 = vweird.f32 %v9843_v2 }
 0x251   : > { %v878_v63 = vmul.f32 %v8036_v31, %v845_v44  ;;  %v693_v12 = vmul.f32 %v9848_v35, %v9848_v35  ;;  %v695_v13 = vmul.f32 %v9853_v62, %v9853_v62  ;;  %vm884_vm1 = vweird.f32 %v8036_v31  ;;  %vm9893_vm8 = vmor %vm903_vm4, %vm904_vm5 }
 0x252   : > { %8037 = vrsqrt.f32 %v9850_v1  ;;  %v899_v43 = vmul.f32 %v9843_v2, %v898_v4  ;;  %vm885_vm3 = vmor %vm883_vm2, %vm884_vm1  ;;  %vm893_vm7 = vweird.f32 %v9850_v1 }
 0x253   : > { %v879_v19 = vmul.f32 %v8036_v31, %v878_v63  ;;  %v725_v54 = vmul.f32 %v9321_v18, %v693_v12  ;;  %v727_v37 = vmul.f32 %v9321_v18, %v695_v13 }
 0x254   : > { %v760_v22 = vpop.xlane.xlu1 %759  ;;  %v756_v24 = vpop.xlane.xlu0 %755  ;;  %v900_v7 = vmul.f32 0.5, %v899_v43 }
 0x255   : > { %v880_v23 = vmul.f32 0.5, %v879_v19  ;;  %v576_v45 = vpop.xlane.xlu2 %575  ;;  %765 = vadd.xlane.f32.xlu1 %v725_v54  ;;  %v816_v41 = vmul.f32 0.015625, %v756_v24  ;;  %v818_v60 = vmul.f32 0.015625, %v760_v22 }
 0x256   : > { %v630_v61 = vmul.f32 0.015625, %v576_v45  ;;  %v901_v45 = vsub.f32 1.5, %v900_v7 }
 0x257   : > { %v881_v10 = vsub.f32 1.5, %v880_v23  ;;  %v9871_v63 = vadd.f32 1e-05, %v816_v41  ;;  %v9878_v23 = vadd.f32 1e-05, %v818_v60 }
 0x258   : > { %v8038_v36 = vpop.eup %8037  ;;  %v9865_v27 = vsub.f32 %v9683_v8, %v630_v61  ;;  %v9880_v61 = vld [vmem:[#allocation5] ss:$0 sm:$0xff]  ;;  %v902_v60 = vmul.f32 %v9843_v2, %v901_v45 }
 0x259   : > { %v882_v6 = vmul.f32 %v8036_v31, %v881_v10  ;;  %v888_v33 = vmul.f32 %v8038_v36, %v9850_v1  ;;  %8039 = vrsqrt.f32 %v9871_v63  ;;  %vm894_vm6 = vweird.f32 %v8038_v36  ;;  %v9902_v1 = vld [vmem:[%s13889_s2] ss:$0 sm:$0xff] }
 0x25a   : > { %v694_v12 = vmul.f32 %v9865_v27, %v9865_v27  ;;  %8041 = vrsqrt.f32 %v9878_v23  ;;  %vm895_vm9 = vmor %vm893_vm7, %vm894_vm6  ;;  %vm913_vm10 = vweird.f32 %v9871_v63  ;;  %vm933_vm0 = vweird.f32 %v9878_v23 }
 0x25b   : > { %v889_v44 = vmul.f32 %v8038_v36, %v888_v33  ;;  %v886_v4 = vsel %vm885_vm3, %v8036_v31, %v882_v6 }
 0x25c   : > { %v726_v8 = vmul.f32 %v9321_v18, %v694_v12  ;;  %v1197_v19 = vmul.f32 %v886_v4, %v9620_v29  ;;  %v584_v22 = vpop.xlane.xlu1 %583  ;;  %v580_v24 = vpop.xlane.xlu0 %579 }
 0x25d   : > { %v890_v54 = vmul.f32 0.5, %v889_v44  ;;  %769 = vadd.xlane.f32.xlu1 %v727_v37  ;;  %v634_v13 = vmul.f32 0.015625, %v584_v22  ;;  %v758_v43 = vpop.xlane.xlu2 %757  ;;  %v632_v37 = vmul.f32 0.015625, %v580_v24 }
 0x25e   : > { %767 = vadd.xlane.f32.xlu0 %v726_v8  ;;  %v1232_v10 = vmul.f32 %v9880_v61, %v1197_v19  ;;  %v817_v29 = vmul.f32 0.015625, %v758_v43 }
 0x25f   : > { %v891_v31 = vsub.f32 1.5, %v890_v54  ;;  %v9888_v6 = vsub.f32 %v9726_v40, %v634_v13  ;;  %v9890_v33 = vpop.eup %8039  ;;  %v9905_v40 = vpop.f32.mrf.mxu1  ;;  %v9912_v8 = vsub.f32 %v9734_v59, %v632_v37  ;;  %v906_v59 = vsel %vm9893_vm8, %v9843_v2, %v902_v60 }
 0x260   : > { %v9897_v7 = vadd.f32 1e-05, %v817_v29  ;;  %v1267_v12 = vadd.f32 %v9902_v1, %v1232_v10  ;;  %v908_v44 = vmul.f32 %v9890_v33, %v9871_v63  ;;  %v9923_v10 = vpop.eup %8041  ;;  %v1199_v20 = vmul.f32 %v906_v59, %v9617_v50 }
 0x261   : > { %v892_v41 = vmul.f32 %v8038_v36, %v891_v31  ;;  %v698_v4 = vmul.f32 %v9888_v6, %v9888_v6  ;;  %v696_v43 = vmul.f32 %v9912_v8, %v9912_v8  ;;  %v928_v60 = vmul.f32 %v9923_v10, %v9878_v23 }
 0x262   : > { %8043 = vrsqrt.f32 %v9897_v7  ;;  %1363 = vmatmul.f32.vlgmr.msra.gmra.mxu0 %v1267_v12  ;;  %1476 = vmatmul.f32.vlgmr.msrb.gmra.mxu1 %v1267_v12  ;;  %v909_v54 = vmul.f32 %v9890_v33, %v908_v44  ;;  %vm914_vm11 = vweird.f32 %v9890_v33  ;;  %vm923_vm13 = vweird.f32 %v9897_v7 }
 0x263   : > { %v896_v19 = vsel %vm895_vm9, %v8038_v36, %v892_v41  ;;  %1589 = vmatmul.f32.vlgmr.msra.gmra.mxu2 %v1267_v12  ;;  %v730_v22 = vmul.f32 %v9321_v18, %v698_v4  ;;  %v728_v37 = vmul.f32 %v9321_v18, %v696_v43  ;;  %v929_v43 = vmul.f32 %v9923_v10, %v928_v60  ;;  %vm915_vm12 = vmor %vm913_vm10, %vm914_vm11 }
 0x264   : > { %v1198_v45 = vmul.f32 %v896_v19, %v9634_v5  ;;  %v910_v31 = vmul.f32 0.5, %v909_v54  ;;  %v762_v24 = vpop.xlane.xlu0 %761  ;;  %vm934_vm1 = vweird.f32 %v9923_v10 }
 0x265   : > { %v582_v13 = vpop.xlane.xlu2 %581  ;;  %775 = vadd.xlane.f32.xlu1 %v730_v22  ;;  %v819_v41 = vmul.f32 0.015625, %v762_v24  ;;  %771 = vadd.xlane.f32.xlu2 %v728_v37  ;;  %vm935_vm2 = vmor %vm933_vm0, %vm934_vm1 }
 0x266   : > { %v633_v36 = vmul.f32 0.015625, %v582_v13  ;;  %v1233_v29 = vmul.f32 %v9880_v61, %v1198_v45  ;;  %v911_v5 = vsub.f32 1.5, %v910_v31  ;;  %v1234_v13 = vmul.f32 %v9880_v61, %v1199_v20 }
 0x267   : > { %v9935_v4 = vadd.f32 1e-05, %v819_v41  ;;  %v9943_v50 = vpop.f32.mrf.mxu1  ;;  %v930_v20 = vmul.f32 0.5, %v929_v43 }
 0x268   : > { %v9928_v12 = vsub.f32 %v9769_v56, %v633_v36  ;;  %v1268_v44 = vadd.f32 %v9902_v1, %v1233_v29  ;;  %v8044_v2 = vpop.eup %8043  ;;  %v912_v19 = vmul.f32 %v9890_v33, %v911_v5 }
 0x269   : > { %v918_v56 = vmul.f32 %v8044_v2, %v9897_v7  ;;  %8045 = vrsqrt.f32 %v9935_v4  ;;  %vm924_vm14 = vweird.f32 %v8044_v2  ;;  %vm943_vm3 = vweird.f32 %v9935_v4 }
 0x26a   : > { %v697_v54 = vmul.f32 %v9928_v12, %v9928_v12  ;;  %1366 = vmatmul.f32.gmra.mxu0 %v1268_v44  ;;  %1479 = vmatmul.f32.gmra.mxu1 %v1268_v44  ;;  %v916_v29 = vsel %vm915_vm12, %v9890_v33, %v912_v19  ;;  %vm925_vm15 = vmor %vm923_vm13, %vm924_vm14 }
 0x26b   : > { %v919_v22 = vmul.f32 %v8044_v2, %v918_v56  ;;  %1592 = vmatmul.f32.gmra.mxu2 %v1268_v44  ;;  %v1269_v44 = vadd.f32 %v9902_v1, %v1234_v13  ;;  %v1200_v60 = vmul.f32 %v916_v29, %v9672_v55  ;;  %v931_v55 = vsub.f32 1.5, %v930_v20 }
 0x26c   : > { %v729_v45 = vmul.f32 %v9321_v18, %v697_v54  ;;  %v586_v24 = vpop.xlane.xlu0 %585 }
 0x26d   : > { %v764_v59 = vpop.xlane.xlu2 %763  ;;  %v920_v31 = vmul.f32 0.5, %v919_v22  ;;  %v635_v41 = vmul.f32 0.015625, %v586_v24 }
 0x26e   : > { %v820_v36 = vmul.f32 0.015625, %v764_v59  ;;  %773 = vadd.xlane.f32.xlu0 %v729_v45 }
 0x26f   : > { %v921_v37 = vsub.f32 1.5, %v920_v31  ;;  %v8046_v56 = vpop.eup %8045  ;;  %v9956_v63 = vsub.f32 %v9796_v57, %v635_v41  ;;  %v1235_v57 = vmul.f32 %v9880_v61, %v1200_v60  ;;  %v9965_v45 = vpop.f32.mrf.mxu1  ;;  %v932_v41 = vmul.f32 %v9923_v10, %v931_v55 }
 0x270   : > { %v9951_v5 = vadd.f32 1e-05, %v820_v36  ;;  %v938_v22 = vmul.f32 %v8046_v56, %v9935_v4  ;;  %vm944_vm4 = vweird.f32 %v8046_v56 }
 0x271   : > { %v922_v54 = vmul.f32 %v8044_v2, %v921_v37  ;;  %v699_v33 = vmul.f32 %v9956_v63, %v9956_v63  ;;  %v1270_v36 = vadd.f32 %v9902_v1, %v1235_v57  ;;  %vm945_vm5 = vmor %vm943_vm3, %vm944_vm4 }
 0x272   : > { %8047 = vrsqrt.f32 %v9951_v5  ;;  %1369 = vmatmul.f32.gmra.mxu0 %v1269_v44  ;;  %1482 = vmatmul.f32.gmra.mxu1 %v1269_v44  ;;  %v939_v13 = vmul.f32 %v8046_v56, %v938_v22  ;;  %vm953_vm6 = vweird.f32 %v9951_v5 }
 0x273   : > { %1595 = vmatmul.f32.gmra.mxu2 %v1269_v44  ;;  %v731_v7 = vmul.f32 %v9321_v18, %v699_v33  ;;  %v926_v59 = vsel %vm925_vm15, %v8044_v2, %v922_v54 }
 0x274   : > { %v1201_v29 = vmul.f32 %v926_v59, %v9710_v47  ;;  %v940_v37 = vmul.f32 0.5, %v939_v13  ;;  %v936_v47 = vsel %vm935_vm2, %v9923_v10, %v932_v41 }
 0x275   : > { %v588_v19 = vpop.xlane.xlu2 %587  ;;  %777 = vadd.xlane.f32.xlu2 %v731_v7  ;;  %v1202_v33 = vmul.f32 %v936_v47, %v9654_v49 }
 0x276   : > { %v636_v43 = vmul.f32 0.015625, %v588_v19  ;;  %v941_v20 = vsub.f32 1.5, %v940_v37 }
 0x277   : > { %v9981_v54 = vpop.f32.mrf.mxu1  ;;  %v1237_v57 = vmul.f32 %v9880_v61, %v1202_v33 }
 0x278   : > { %v8048_v31 = vpop.eup %8047  ;;  %v9970_v24 = vsub.f32 %v9813_v21, %v636_v43  ;;  %v1236_v21 = vmul.f32 %v9880_v61, %v1201_v29  ;;  %v942_v19 = vmul.f32 %v8046_v56, %v941_v20 }
 0x279   : > { %v948_v44 = vmul.f32 %v8048_v31, %v9951_v5  ;;  %vm954_vm7 = vweird.f32 %v8048_v31  ;;  %v1272_v10 = vadd.f32 %v9902_v1, %v1237_v57 }
 0x27a   : > { %v700_v2 = vmul.f32 %v9970_v24, %v9970_v24  ;;  %1372 = vmatmul.f32.gmra.mxu0 %v1270_v36  ;;  %1485 = vmatmul.f32.gmra.mxu1 %v1270_v36  ;;  %v1271_v22 = vadd.f32 %v9902_v1, %v1236_v21  ;;  %v946_v13 = vsel %vm945_vm5, %v8046_v56, %v942_v19  ;;  %vm955_vm8 = vmor %vm953_vm6, %vm954_vm7 }
 0x27b   : > { %1598 = vmatmul.f32.gmra.mxu2 %v1270_v36  ;;  %v949_v60 = vmul.f32 %v8048_v31, %v948_v44  ;;  %v1203_v4 = vmul.f32 %v946_v13, %v9753_v46 }
 0x27c   : > { %v732_v23 = vmul.f32 %v9321_v18, %v700_v2 }
 0x27d   : > { %v950_v7 = vmul.f32 0.5, %v949_v60  ;;  %v1238_v59 = vmul.f32 %v9880_v61, %v1203_v4 }
 0x27e   : > { %779 = vadd.xlane.f32.xlu0 %v732_v23 }
 0x27f   : > { %v951_v55 = vsub.f32 1.5, %v950_v7  ;;  %v9990_v43 = vpop.f32.mrf.mxu1  ;;  %v1273_v29 = vadd.f32 %v9902_v1, %v1238_v59 }
 0x281   : > { %v952_v49 = vmul.f32 %v8048_v31, %v951_v55 }
 0x282   : > { %1375 = vmatmul.f32.gmra.mxu0 %v1271_v22  ;;  %1488 = vmatmul.f32.gmra.mxu1 %v1271_v22 }
 0x283   : > { %1601 = vmatmul.f32.gmra.mxu2 %v1271_v22  ;;  %v956_v36 = vsel %vm955_vm8, %v8048_v31, %v952_v49 }
 0x284   : > { %v1204_v56 = vmul.f32 %v956_v36, %v9776_v14 }
 0x286   : > { %v1239_v46 = vmul.f32 %v9880_v61, %v1204_v56 }
 0x287   : > { %v9995_v5 = vpop.f32.mrf.mxu1 }
 0x288   : > { %v1274_v41 = vadd.f32 %v9902_v1, %v1239_v46 }
 0x28a   : > { %1378 = vmatmul.f32.gmra.mxu0 %v1272_v10  ;;  %1491 = vmatmul.f32.gmra.mxu1 %v1272_v10 }
 0x28b   : > { %1604 = vmatmul.f32.gmra.mxu2 %v1272_v10 }
 0x28f   : > { %v9999_v37 = vpop.f32.mrf.mxu1 }
 0x292   : > { %1381 = vmatmul.f32.gmra.mxu0 %v1273_v29  ;;  %1494 = vmatmul.f32.gmra.mxu1 %v1273_v29 }
 0x293   : > { %1607 = vmatmul.f32.gmra.mxu2 %v1273_v29 }
 0x297   : > { %v10001_v44 = vpop.f32.mrf.mxu1 }
 0x29a   : > { %1384 = vmatmul.f32.gmra.mxu0 %v1274_v41  ;;  %1497 = vmatmul.f32.gmra.mxu1 %v1274_v41 }
 0x29b   : > { %1610 = vmatmul.f32.gmra.mxu2 %v1274_v41 }
 0x29f   : > { %v10003_v31 = vpop.f32.mrf.mxu1 }
 0x2a7   : > { %v10005_v2 = vpop.f32.mrf.mxu1 }
 0x2af   : > { %v10007_v14 = vpop.f32.mrf.mxu1 }
 0x2b0   : > { %14140 = vst [vmem:[#allocation21_spill] sm:$0xff] %v10007_v14 }
 0x2b7   : > { %v10009_v60 = vpop.f32.mrf.mxu1 }
 0x2b8   : > { %14141 = vst [vmem:[#allocation22_spill] sm:$0xff] %v10009_v60 }
 0x2bf   : > { %v10011_v49 = vpop.f32.mrf.mxu1 }
 0x2c0   : > { %14142 = vst [vmem:[#allocation23_spill] sm:$0xff] %v10011_v49 }
 0x2c8   : > { %v766_v23 = vpop.xlane.xlu1 %765 }
 0x2c9   : > { %v821_v21 = vmul.f32 0.015625, %v766_v23 }
 0x2cb   : > { %v853_v20 = vadd.f32 1e-05, %v821_v21 }
 0x2cd   : > { %8049 = vrsqrt.f32 %v853_v20  ;;  %vm963_vm10 = vweird.f32 %v853_v20 }
 0x2d0   : > { %v770_v47 = vpop.xlane.xlu1 %769 }
 0x2d1   : > { %v823_v22 = vmul.f32 0.015625, %v770_v47  ;;  %v768_v33 = vpop.xlane.xlu0 %767 }
 0x2d2   : > { %v822_v19 = vmul.f32 0.015625, %v768_v33 }
 0x2d3   : > { %v8050_v7 = vpop.eup %8049  ;;  %v855_v57 = vadd.f32 1e-05, %v823_v22 }
 0x2d4   : > { %v958_v55 = vmul.f32 %v8050_v7, %v853_v20  ;;  %v854_v13 = vadd.f32 1e-05, %v822_v19  ;;  %vm964_vm9 = vweird.f32 %v8050_v7 }
 0x2d5   : > { %8051 = vrsqrt.f32 %v855_v57  ;;  %vm965_vm11 = vmor %vm963_vm10, %vm964_vm9  ;;  %vm983_vm13 = vweird.f32 %v855_v57 }
 0x2d6   : > { %v959_v10 = vmul.f32 %v8050_v7, %v958_v55  ;;  %8053 = vrsqrt.f32 %v854_v13  ;;  %vm973_vm14 = vweird.f32 %v854_v13 }
 0x2d8   : > { %v960_v4 = vmul.f32 0.5, %v959_v10  ;;  %v776_v36 = vpop.xlane.xlu1 %775  ;;  %v772_v47 = vpop.xlane.xlu2 %771 }
 0x2d9   : > { %v826_v23 = vmul.f32 0.015625, %v776_v36  ;;  %v824_v33 = vmul.f32 0.015625, %v772_v47 }
 0x2da   : > { %v961_v59 = vsub.f32 1.5, %v960_v4 }
 0x2db   : > { %v8052_v29 = vpop.eup %8051  ;;  %v10014_v18 = vadd.f32 1e-05, %v826_v23  ;;  %v856_v4 = vadd.f32 1e-05, %v824_v33  ;;  %v2355_v33 = vld [vmem:[#allocation8 + $0x78] sm:$0xff] }
 0x2dc   : > { %v8054_v56 = vpop.eup %8053  ;;  %v962_v46 = vmul.f32 %v8050_v7, %v961_v59  ;;  %v978_v41 = vmul.f32 %v8052_v29, %v855_v57  ;;  %vm984_vm15 = vweird.f32 %v8052_v29  ;;  %2356 = vmatpush.msrb.mxu0 %v2355_v33 }
 0x2dd   : > { %v968_v21 = vmul.f32 %v8054_v56, %v854_v13  ;;  %8055 = vrsqrt.f32 %v856_v4  ;;  %vm974_vm12 = vweird.f32 %v8054_v56  ;;  %vm985_vm1 = vmor %vm983_vm13, %vm984_vm15  ;;  %vm993_vm2 = vweird.f32 %v856_v4 }
 0x2de   : > { %v979_v22 = vmul.f32 %v8052_v29, %v978_v41  ;;  %v966_v19 = vsel %vm965_vm11, %v8050_v7, %v962_v46  ;;  %8057 = vrsqrt.f32 %v10014_v18  ;;  %vm975_vm0 = vmor %vm973_vm14, %vm974_vm12  ;;  %vm1013_vm8 = vweird.f32 %v10014_v18 }
 0x2df   : > { %v969_v55 = vmul.f32 %v8054_v56, %v968_v21  ;;  %v1205_v10 = vmul.f32 %v966_v19, %v9848_v35  ;;  %v10016_v60 = vpop.f32.mrf.mxu1  ;;  %v2354_v19 = vld [vmem:[#allocation8 + $0x70] sm:$0xff] }
 0x2e0   : > { %v980_v17 = vmul.f32 0.5, %v979_v22  ;;  %14143 = vst [vmem:[#allocation24_spill] sm:$0xff] %v10016_v60  ;;  %2357 = vmatpush.msrb.mxu0 %v2354_v19 }
 0x2e1   : > { %v970_v49 = vmul.f32 0.5, %v969_v55  ;;  %v1240_v20 = vmul.f32 %v9880_v61, %v1205_v10  ;;  %v774_v36 = vpop.xlane.xlu0 %773 }
 0x2e2   : > { %v981_v59 = vsub.f32 1.5, %v980_v17  ;;  %v825_v41 = vmul.f32 0.015625, %v774_v36  ;;  %v2353_v36 = vld [vmem:[#allocation8 + $0x68] sm:$0xff] }
 0x2e3   : > { %v971_v14 = vsub.f32 1.5, %v970_v49  ;;  %v1275_v7 = vadd.f32 %v9902_v1, %v1240_v20  ;;  %v8056_v49 = vpop.eup %8055  ;;  %2358 = vmatpush.msrb.mxu0 %v2353_v36 }
 0x2e4   : > { %v982_v35 = vmul.f32 %v8052_v29, %v981_v59  ;;  %v10021_v23 = vadd.f32 1e-05, %v825_v41  ;;  %v988_v57 = vmul.f32 %v8056_v49, %v856_v4  ;;  %v10027_v22 = vpop.eup %8057  ;;  %vm994_vm3 = vweird.f32 %v8056_v49  ;;  %v2350_v4 = vld [vmem:[#allocation8 + $0x50] sm:$0xff] }
 0x2e5   : > { %v972_v46 = vmul.f32 %v8054_v56, %v971_v14  ;;  %1387 = vmatmul.f32.gmra.mxu0 %v1275_v7  ;;  %1500 = vmatmul.f32.gmra.mxu1 %v1275_v7  ;;  %v1008_v41 = vmul.f32 %v10027_v22, %v10014_v18  ;;  %vm995_vm4 = vmor %vm993_vm2, %vm994_vm3  ;;  %vm1014_vm9 = vweird.f32 %v10027_v22  ;;  %vm1955_vm2 = vcmask 523264  }
 0x2e6   : > { %1613 = vmatmul.f32.gmra.mxu2 %v1275_v7  ;;  %8059 = vrsqrt.f32 %v10021_v23  ;;  %v986_v47 = vsel %vm985_vm1, %v8052_v29, %v982_v35  ;;  %v989_v55 = vmul.f32 %v8056_v49, %v988_v57  ;;  %vm1003_vm5 = vweird.f32 %v10021_v23  ;;  %vm10061_vm10 = vmor %vm1013_vm8, %vm1014_vm9 }
 0x2e7   : > { %v976_v17 = vsel %vm975_vm0, %v8054_v56, %v972_v46  ;;  %v10025_v13 = vpop.f32.mrf.mxu1  ;;  %v1207_v59 = vmul.f32 %v986_v47, %v9853_v62  ;;  %v1009_v57 = vmul.f32 %v10027_v22, %v1008_v41  ;;  %vm1755_vm1 = vcmp.lt.s32.totalorder %v9313_v9, 8 }
 0x2e8   : > { %v1206_v21 = vmul.f32 %v976_v17, %v9865_v27  ;;  %14144 = vst [vmem:[#allocation25_spill] sm:$0xff] %v10025_v13  ;;  %v778_v10 = vpop.xlane.xlu2 %777  ;;  %v990_v29 = vmul.f32 0.5, %v989_v55  ;;  %v2351_v55 = vld [vmem:[#allocation8 + $0x58] sm:$0xff]  ;;  %vm2761_vm3 = vcmp.ge.s32.totalorder %v9313_v9, 8 }
 0x2e9   : > { %v827_v20 = vmul.f32 0.015625, %v778_v10  ;;  %v1242_v62 = vmul.f32 %v9880_v61, %v1207_v59 }
 0x2ea   : > { %v1241_v14 = vmul.f32 %v9880_v61, %v1206_v21  ;;  %v991_v46 = vsub.f32 1.5, %v990_v29  ;;  %v2352_v21 = vld [vmem:[#allocation8 + $0x60] sm:$0xff]  ;;  %v2349_v29 = vld [vmem:[#allocation8 + $0x48] sm:$0xff] }
 0x2eb   : > { %v10035_v35 = vadd.f32 1e-05, %v827_v20  ;;  %2359 = vmatpush.msrb.mxu0 %v2352_v21  ;;  %v1277_v36 = vadd.f32 %v9902_v1, %v1242_v62 }
 0x2ec   : > { %v1276_v56 = vadd.f32 %v9902_v1, %v1241_v14  ;;  %v8060_v27 = vpop.eup %8059  ;;  %v992_v47 = vmul.f32 %v8056_v49, %v991_v46 }
 0x2ed   : > { %v998_v7 = vmul.f32 %v8060_v27, %v10021_v23  ;;  %8061 = vrsqrt.f32 %v10035_v35  ;;  %2360 = vmatpush.msrb.mxu0 %v2351_v55  ;;  %vm1004_vm6 = vweird.f32 %v8060_v27  ;;  %v2348_v23 = vld [vmem:[#allocation8 + $0x40] sm:$0xff]  ;;  %vm1023_vm11 = vweird.f32 %v10035_v35 }
 0x2ee   : > { %1390 = vmatmul.f32.gmra.mxu0 %v1276_v56  ;;  %1503 = vmatmul.f32.gmra.mxu1 %v1276_v56  ;;  %v996_v20 = vsel %vm995_vm4, %v8056_v49, %v992_v47  ;;  %vm1005_vm7 = vmor %vm1003_vm5, %vm1004_vm6  ;;  %vm2762_vm4 = vcmp.lt.s32.totalorder %v9313_v9, 16  ;;  %vm3767_vm6 = vcmp.ge.s32.totalorder %v9313_v9, 16 }
 0x2ef   : > { %1616 = vmatmul.f32.gmra.mxu2 %v1276_v56  ;;  %v999_v17 = vmul.f32 %v8060_v27, %v998_v7  ;;  %v10040_v14 = vpop.f32.mrf.mxu1  ;;  %v1208_v59 = vmul.f32 %v996_v20, %v9912_v8  ;;  %v1010_v7 = vmul.f32 0.5, %v1009_v57  ;;  %2361 = vmatpush.msrb.mxu0 %v2350_v4  ;;  %vm2763_vm5 = vmand %vm2761_vm3, %vm2762_vm4 }
 0x2f0   : > { %14145 = vst [vmem:[#allocation26_spill] sm:$0xff] %v10040_v14 }
 0x2f1   : > { %v1000_v33 = vmul.f32 0.5, %v999_v17  ;;  %v780_v19 = vpop.xlane.xlu0 %779  ;;  %2362 = vmatpush.msrb.mxu0 %v2349_v29  ;;  %v1243_v8 = vmul.f32 %v9880_v61, %v1208_v59  ;;  %v1011_v62 = vsub.f32 1.5, %v1010_v7  ;;  %v2344_v29 = vld [vmem:[#allocation8 + $0x20] sm:$0xff] }
 0x2f2   : > { %v828_v10 = vmul.f32 0.015625, %v780_v19  ;;  %v2346_v19 = vld [vmem:[#allocation8 + $0x30] sm:$0xff] }
 0x2f3   : > { %v1001_v56 = vsub.f32 1.5, %v1000_v33  ;;  %v10047_v46 = vpop.eup %8061  ;;  %2363 = vmatpush.msrb.mxu0 %v2348_v23  ;;  %v2347_v33 = vld [vmem:[#allocation8 + $0x38] sm:$0xff]  ;;  %v1278_v55 = vadd.f32 %v9902_v1, %v1243_v8  ;;  %v2342_v23 = vld [vmem:[#allocation8 + $0x10] sm:$0xff] }
 0x2f4   : > { %v10045_v41 = vadd.f32 1e-05, %v828_v10  ;;  %v1018_v49 = vmul.f32 %v10047_v46, %v10035_v35  ;;  %v2345_v10 = vld [vmem:[#allocation8 + $0x28] sm:$0xff]  ;;  %vm1024_vm12 = vweird.f32 %v10047_v46 }
 0x2f5   : > { %v1002_v17 = vmul.f32 %v8060_v27, %v1001_v56  ;;  %2364 = vmatpush.msrb.mxu0 %v2347_v33  ;;  %v1012_v56 = vmul.f32 %v10027_v22, %v1011_v62  ;;  %vm1025_vm13 = vmor %vm1023_vm11, %vm1024_vm12 }
 0x2f6   : > { %1393 = vmatmul.f32.gmra.mxu0 %v1277_v36  ;;  %1506 = vmatmul.f32.gmra.mxu1 %v1277_v36  ;;  %8063 = vrsqrt.f32 %v10045_v41  ;;  %v1019_v21 = vmul.f32 %v10047_v46, %v1018_v49  ;;  %vm1033_vm14 = vweird.f32 %v10045_v41 }
 0x2f7   : > { %1619 = vmatmul.f32.gmra.mxu2 %v1277_v36  ;;  %v10054_v57 = vpop.f32.mrf.mxu1  ;;  %v1006_v47 = vsel %vm1005_vm7, %v8060_v27, %v1002_v17  ;;  %2365 = vmatpush.msrb.mxu0 %v2346_v19  ;;  %v1016_v8 = vsel %vm10061_vm10, %v10027_v22, %v1012_v56  ;;  %v2340_v22 = vld [vmem:[#allocation8] sm:$0xff]  ;;  %vm3768_vm7 = vcmp.lt.s32.totalorder %v9313_v9, 24 }
 0x2f8   : > { %14146 = vst [vmem:[#allocation27_spill] sm:$0xff] %v10054_v57  ;;  %v1209_v4 = vmul.f32 %v1006_v47, %v9928_v12  ;;  %v1020_v36 = vmul.f32 0.5, %v1019_v21  ;;  %v2343_v12 = vld [vmem:[#allocation8 + $0x18] sm:$0xff]  ;;  %v1210_v21 = vmul.f32 %v1016_v8, %v9888_v6  ;;  %v2341_v47 = vld [vmem:[#allocation8 + $0x8] sm:$0xff]  ;;  %vm3769_vm8 = vmand %vm3767_vm6, %vm3768_vm7 }
 0x2f9   : > { %2366 = vmatpush.msrb.mxu0 %v2345_v10 }
 0x2fa   : > { %v1244_v18 = vmul.f32 %v9880_v61, %v1209_v4  ;;  %v1021_v7 = vsub.f32 1.5, %v1020_v36  ;;  %v1245_v35 = vmul.f32 %v9880_v61, %v1210_v21 }
 0x2fb   : > { %2367 = vmatpush.msrb.mxu0 %v2344_v29  ;;  %v10087_v29 = vpop.f32.mrf.mxu2 }
 0x2fc   : > { %v8064_v20 = vpop.eup %8063  ;;  %v1279_v62 = vadd.f32 %v9902_v1, %v1244_v18  ;;  %v1022_v33 = vmul.f32 %v10047_v46, %v1021_v7  ;;  %v1280_v6 = vadd.f32 %v9902_v1, %v1245_v35  ;;  %14152 = vst [vmem:[#allocation31_spill] sm:$0xff] %v10087_v29 }
 0x2fd   : > { %v1028_v59 = vmul.f32 %v8064_v20, %v10045_v41  ;;  %2368 = vmatpush.msrb.mxu0 %v2343_v12  ;;  %vm1034_vm15 = vweird.f32 %v8064_v20 }
 0x2fe   : > { %1396 = vmatmul.f32.gmra.mxu0 %v1278_v55  ;;  %1509 = vmatmul.f32.gmra.mxu1 %v1278_v55  ;;  %v1026_v10 = vsel %vm1025_vm13, %v10047_v46, %v1022_v33  ;;  %vm1035_vm0 = vmor %vm1033_vm14, %vm1034_vm15  ;;  %v1364_v46 = vpop.f32.mrf.mxu0 }
 0x2ff   : > { %1622 = vmatmul.f32.gmra.mxu2 %v1278_v55  ;;  %v1029_v17 = vmul.f32 %v8064_v20, %v1028_v59  ;;  %v10067_v49 = vpop.f32.mrf.mxu1  ;;  %2369 = vmatpush.msrb.mxu0 %v2342_v23  ;;  %v1211_v56 = vmul.f32 %v1026_v10, %v9956_v63 }
 0x300   : > { %14149 = vst [vmem:[#allocation28_spill] sm:$0xff] %v10067_v49 }
 0x301   : > { %v1030_v19 = vmul.f32 0.5, %v1029_v17  ;;  %2370 = vmatpush.msrb.mxu0 %v2341_v47  ;;  %v1246_v27 = vmul.f32 %v9880_v61, %v1211_v56 }
 0x303   : > { %v1031_v55 = vsub.f32 1.5, %v1030_v19  ;;  %2371 = vmatpush.msrb.mxu0 %v2340_v22  ;;  %v1281_v41 = vadd.f32 %v9902_v1, %v1246_v27  ;;  %v10096_v8 = vpop.f32.mrf.mxu2  ;;  %v10120_v19 = vmul.f32 0.35355338, %v1364_v46 }
 0x304   : > { %14154 = vst [vmem:[#allocation33_spill] sm:$0xff] %v10096_v8 }
 0x305   : > { %v1032_v36 = vmul.f32 %v8064_v20, %v1031_v55  ;;  %14158 = vst [vmem:[#allocation36_spill] sm:$0xff] %v10120_v19 }
 0x306   : > { %1399 = vmatmul.f32.gmra.mxu0 %v1279_v62  ;;  %1512 = vmatmul.f32.gmra.mxu1 %v1279_v62 }
 0x307   : > { %1625 = vmatmul.f32.gmra.mxu2 %v1279_v62  ;;  %v10078_v4 = vpop.f32.mrf.mxu1  ;;  %v1036_v18 = vsel %vm1035_vm0, %v8064_v20, %v1032_v36  ;;  %v1367_v20 = vpop.f32.mrf.mxu0 }
 0x308   : > { %14150 = vst [vmem:[#allocation29_spill] sm:$0xff] %v10078_v4  ;;  %v1212_v12 = vmul.f32 %v1036_v18, %v9970_v24  ;;  %v14155_v24 = vmov 0.0   ;;  %v10129_v22 = vmul.f32 0.35355338, %v1367_v20 }
 0x30a   : > { %v1247_v63 = vmul.f32 %v9880_v61, %v1212_v12  ;;  %v10102_v61 = vsel %vm1755_vm1, 1.0, %v14155_v24  ;;  %14159 = vst [vmem:[#allocation37_spill] sm:$0xff] %v10129_v22 }
 0x30b   : > { %v2308_v23 = vmul.f32 %v10102_v61, %v10087_v29  ;;  %v2309_v21 = vmul.f32 %v10102_v61, %v10096_v8 }
 0x30c   : > { %v1282_v17 = vadd.f32 %v9902_v1, %v1247_v63  ;;  %v10107_v1 = vpop.f32.mrf.mxu2 }
 0x30d   : > { %14156 = vst [vmem:[#allocation34_spill] sm:$0xff] %v10107_v1 }
 0x30e   : > { %1402 = vmatmul.f32.gmra.mxu0 %v1280_v6  ;;  %1515 = vmatmul.f32.gmra.mxu1 %v1280_v6 }
 0x30f   : > { %1628 = vmatmul.f32.gmra.mxu2 %v1280_v6  ;;  %v10085_v59 = vpop.f32.mrf.mxu1  ;;  %v1370_v62 = vpop.f32.mrf.mxu0 }
 0x310   : > { %14151 = vst [vmem:[#allocation30_spill] sm:$0xff] %v10085_v59  ;;  %v10139_v6 = vmul.f32 0.35355338, %v1370_v62 }
 0x312   : > { %14161 = vst [vmem:[#allocation39_spill] sm:$0xff] %v10139_v6 }
 0x314   : > { %v10117_v47 = vpop.f32.mrf.mxu2 }
 0x315   : > { %14157 = vst [vmem:[#allocation35_spill] sm:$0xff] %v10117_v47  ;;  %v2311_v10 = vmul.f32 %v10102_v61, %v10117_v47 }
 0x316   : > { %1405 = vmatmul.f32.gmra.mxu0 %v1281_v41  ;;  %1518 = vmatmul.f32.gmra.mxu1 %v1281_v41 }
 0x317   : > { %1631 = vmatmul.f32.gmra.mxu2 %v1281_v41  ;;  %v10092_v7 = vpop.f32.mrf.mxu1  ;;  %v1373_v33 = vpop.f32.mrf.mxu0 }
 0x318   : > { %14153 = vst [vmem:[#allocation32_spill] sm:$0xff] %v10092_v7  ;;  %1799 = vmatpush.xpose.msrb.mxu3 %v10092_v7  ;;  %v10149_v18 = vmul.f32 0.35355338, %v1373_v33 }
 0x31a   : > { %14163 = vst [vmem:[#allocation41_spill] sm:$0xff] %v10149_v18  ;;  %v1762_v12 = vmul.f32 %v10102_v61, %v10149_v18 }
 0x31c   : > { %1800 = vmatpush.xpose.msrb.mxu3 %v10085_v59  ;;  %v10131_v35 = vpop.f32.mrf.mxu2 }
 0x31d   : > { %14160 = vst [vmem:[#allocation38_spill] sm:$0xff] %v10131_v35  ;;  %v2312_v56 = vmul.f32 %v10102_v61, %v10131_v35 }
 0x31e   : > { %1408 = vmatmul.f32.gmra.mxu0 %v1282_v17  ;;  %1521 = vmatmul.f32.gmra.mxu1 %v1282_v17 }
 0x31f   : > { %1634 = vmatmul.f32.gmra.mxu2 %v1282_v17  ;;  %v1376_v55 = vpop.f32.mrf.mxu0 }
 0x320   : > { %1801 = vmatpush.xpose.msrb.mxu3 %v10078_v4  ;;  %v10159_v63 = vmul.f32 0.35355338, %v1376_v55 }
 0x322   : > { %14165 = vst [vmem:[#allocation43_spill] sm:$0xff] %v10159_v63  ;;  %v1763_v20 = vmul.f32 %v10102_v61, %v10159_v63 }
 0x324   : > { %1802 = vmatpush.xpose.msrb.mxu3 %v10067_v49  ;;  %v10143_v36 = vpop.f32.mrf.mxu2 }
 0x325   : > { %14162 = vst [vmem:[#allocation40_spill] sm:$0xff] %v10143_v36  ;;  %v2313_v46 = vmul.f32 %v10102_v61, %v10143_v36 }
 0x326   : > { %2372 = vmatmul.f32.vlgmr.msrb.gmra.mxu0 %v2308_v23  ;;  %1524 = vmatmul.f32.gmra.mxu1 %v9459_v42 }
 0x327   : > { %1637 = vmatmul.f32.gmra.mxu2 %v9459_v42  ;;  %v2310_v42 = vmul.f32 %v10102_v61, %v10107_v1  ;;  %v1379_v27 = vpop.f32.mrf.mxu0 }
 0x328   : > { %1803 = vmatpush.xpose.msrb.mxu3 %v10054_v57  ;;  %v10169_v62 = vmul.f32 0.35355338, %v1379_v27 }
 0x32a   : > { %14167 = vst [vmem:[#allocation45_spill] sm:$0xff] %v10169_v62 }
 0x32c   : > { %1804 = vmatpush.xpose.msrb.mxu3 %v10040_v14  ;;  %v10153_v41 = vpop.f32.mrf.mxu2 }
 0x32d   : > { %14164 = vst [vmem:[#allocation42_spill] sm:$0xff] %v10153_v41  ;;  %v2314_v17 = vmul.f32 %v10102_v61, %v10153_v41 }
 0x32e   : > { %2375 = vmatmul.f32.gmra.mxu0 %v2309_v21  ;;  %1527 = vmatmul.f32.gmra.mxu1 %v9500_v32 }
 0x32f   : > { %1640 = vmatmul.f32.gmra.mxu2 %v9500_v32  ;;  %v1759_v32 = vmul.f32 %v10102_v61, %v10120_v19 }
 0x330   : > { %1805 = vmatpush.xpose.msrb.mxu3 %v10025_v13 }
 0x334   : > { %1806 = vmatpush.xpose.msrb.mxu3 %v10016_v60  ;;  %v10167_v23 = vpop.f32.mrf.mxu2 }
 0x335   : > { %14166 = vst [vmem:[#allocation44_spill] sm:$0xff] %v10167_v23  ;;  %v2315_v21 = vmul.f32 %v10102_v61, %v10167_v23 }
 0x336   : > { %2378 = vmatmul.f32.gmra.mxu0 %v2310_v42  ;;  %1530 = vmatmul.f32.gmra.mxu1 %v9539_v34 }
 0x337   : > { %1643 = vmatmul.f32.gmra.mxu2 %v9539_v34  ;;  %1807 = vmatmul.f32.vlgmr.msrb.gmra.mxu3 %v1759_v32  ;;  %v1760_v34 = vmul.f32 %v10102_v61, %v10129_v22 }
 0x33e   : > { %2381 = vmatmul.f32.gmra.mxu0 %v2311_v10  ;;  %1533 = vmatmul.f32.gmra.mxu1 %v9561_v3 }
 0x33f   : > { %1646 = vmatmul.f32.gmra.mxu2 %v9561_v3  ;;  %1810 = vmatmul.f32.gmra.mxu3 %v1760_v34  ;;  %v1761_v3 = vmul.f32 %v10102_v61, %v10139_v6 }
 0x346   : > { %2384 = vmatmul.f32.gmra.mxu0 %v2312_v56  ;;  %1536 = vmatmul.f32.gmra.mxu1 %v9585_v26 }
 0x347   : > { %1649 = vmatmul.f32.gmra.mxu2 %v9585_v26  ;;  %1813 = vmatmul.f32.gmra.mxu3 %v1761_v3  ;;  %v1382_v26 = vpop.f32.mrf.mxu0 }
 0x348   : > { %v10181_v32 = vmul.f32 0.35355338, %v1382_v26 }
 0x34a   : > { %14169 = vst [vmem:[#allocation47_spill] sm:$0xff] %v10181_v32  ;;  %v1765_v55 = vmul.f32 %v10102_v61, %v10181_v32 }
 0x34e   : > { %2387 = vmatmul.f32.gmra.mxu0 %v2313_v46  ;;  %1539 = vmatmul.f32.gmra.mxu1 %v9598_v30 }
 0x34f   : > { %1652 = vmatmul.f32.gmra.mxu2 %v9598_v30  ;;  %1816 = vmatmul.f32.gmra.mxu3 %v1762_v12  ;;  %v1385_v30 = vpop.f32.mrf.mxu0 }
 0x350   : > { %v10190_v34 = vmul.f32 0.35355338, %v1385_v30 }
 0x352   : > { %14171 = vst [vmem:[#allocation49_spill] sm:$0xff] %v10190_v34 }
 0x356   : > { %2390 = vmatmul.f32.gmra.mxu0 %v2314_v17  ;;  %1542 = vmatmul.f32.gmra.mxu1 %v9604_v51 }
 0x357   : > { %1655 = vmatmul.f32.gmra.mxu2 %v9604_v51  ;;  %1819 = vmatmul.f32.gmra.mxu3 %v1763_v20  ;;  %v1764_v51 = vmul.f32 %v10102_v61, %v10169_v62 }
 0x35e   : > { %2393 = vmatmul.f32.gmra.mxu0 %v2315_v21  ;;  %1545 = vmatmul.f32.gmra.mxu1 %v9610_v52 }
 0x35f   : > { %1658 = vmatmul.f32.gmra.mxu2 %v9610_v52  ;;  %1822 = vmatmul.f32.gmra.mxu3 %v1764_v51 }
 0x362   : > { %v10177_v33 = vpop.f32.mrf.mxu0  ;;  %v10179_v42 = vpop.f32.mrf.mxu1 }
 0x363   : > { %14168 = vst [vmem:[#allocation46_spill] sm:$0xff] %v10179_v42 }
 0x366   : > { %1548 = vmatmul.f32.gmra.mxu1 %v9675_v58  ;;  %v1766_v58 = vmul.f32 %v10102_v61, %v10190_v34 }
 0x367   : > { %1825 = vmatmul.f32.gmra.mxu3 %v1765_v55 }
 0x369   : > { %v10186_v10 = vpop.f32.mrf.mxu2 }
 0x36a   : > { %14170 = vst [vmem:[#allocation48_spill] sm:$0xff] %v10186_v10  ;;  %v2316_v52 = vmul.f32 %v10102_v61, %v10186_v10 }
 0x36b   : > { %v10192_v56 = vpop.f32.mrf.mxu0  ;;  %v10194_v27 = vpop.f32.mrf.mxu1 }
 0x36c   : > { %14172 = vst [vmem:[#allocation50_spill] sm:$0xff] %v10194_v27  ;;  %2396 = vmatmul.f32.gmra.mxu0 %v2316_v52 }
 0x36e   : > { %1551 = vmatmul.f32.gmra.mxu1 %v9715_v48 }
 0x36f   : > { %1828 = vmatmul.f32.gmra.mxu3 %v1766_v58 }
 0x372   : > { %v10199_v3 = vpop.f32.mrf.mxu2 }
 0x373   : > { %14173 = vst [vmem:[#allocation51_spill] sm:$0xff] %v10199_v3  ;;  %v10201_v46 = vpop.f32.mrf.mxu0  ;;  %v10203_v12 = vpop.f32.mrf.mxu1  ;;  %v2317_v26 = vmul.f32 %v10102_v61, %v10199_v3 }
 0x374   : > { %14174 = vst [vmem:[#allocation52_spill] sm:$0xff] %v10203_v12 }
 0x375   : > { %2399 = vmatmul.f32.gmra.mxu0 %v2317_v26 }
 0x376   : > { %1554 = vmatmul.f32.gmra.mxu1 %v9759_v15 }
 0x37a   : > { %v10208_v17 = vpop.f32.mrf.mxu2 }
 0x37b   : > { %14175 = vst [vmem:[#allocation53_spill] sm:$0xff] %v10208_v17  ;;  %v10210_v20 = vpop.f32.mrf.mxu0  ;;  %v10212_v48 = vpop.f32.mrf.mxu1  ;;  %v2318_v30 = vmul.f32 %v10102_v61, %v10208_v17 }
 0x37d   : > { %2402 = vmatmul.f32.gmra.mxu0 %v2318_v30 }
 0x37e   : > { %1557 = vmatmul.f32.gmra.mxu1 %v9781_v39 }
 0x382   : > { %v10217_v21 = vpop.f32.mrf.mxu2 }
 0x383   : > { %14176 = vst [vmem:[#allocation54_spill] sm:$0xff] %v10217_v21  ;;  %v10219_v51 = vpop.f32.mrf.mxu0  ;;  %v10221_v55 = vpop.f32.mrf.mxu1  ;;  %v2319_v15 = vmul.f32 %v10102_v61, %v10217_v21 }
 0x385   : > { %2405 = vmatmul.f32.gmra.mxu0 %v2319_v15 }
 0x386   : > { %1560 = vmatmul.f32.gmra.mxu1 %v9806_v16 }
 0x38a   : > { %v10226_v52 = vpop.f32.mrf.mxu2 }
 0x38b   : > { %14177 = vst [vmem:[#allocation55_spill] sm:$0xff] %v10226_v52  ;;  %v10228_v58 = vpop.f32.mrf.mxu0  ;;  %v10230_v26 = vpop.f32.mrf.mxu1  ;;  %v2320_v39 = vmul.f32 %v10102_v61, %v10226_v52 }
 0x38d   : > { %2408 = vmatmul.f32.gmra.mxu0 %v2320_v39 }
 0x38e   : > { %1563 = vmatmul.f32.gmra.mxu1 %v9820_v28 }
 0x392   : > { %v10235_v30 = vpop.f32.mrf.mxu2 }
 0x393   : > { %14178 = vst [vmem:[#allocation56_spill] sm:$0xff] %v10235_v30  ;;  %v10237_v34 = vpop.f32.mrf.mxu0  ;;  %v10239_v32 = vpop.f32.mrf.mxu1  ;;  %v2321_v16 = vmul.f32 %v10102_v61, %v10235_v30 }
 0x395   : > { %2411 = vmatmul.f32.gmra.mxu0 %v2321_v16  ;;  %v10257_v16 = vpop.f32.mrf.mxu3 }
 0x396   : > { %1566 = vmatmul.f32.gmra.mxu1 %v9827_v53  ;;  %14181 = vst [vmem:[#allocation59_spill] sm:$0xff] %v10257_v16 }
 0x39a   : > { %v10244_v15 = vpop.f32.mrf.mxu2 }
 0x39b   : > { %14179 = vst [vmem:[#allocation57_spill] sm:$0xff] %v10244_v15  ;;  %v10246_v62 = vpop.f32.mrf.mxu0  ;;  %v2322_v39 = vmul.f32 %v10102_v61, %v10244_v15  ;;  %v10250_v28 = vpop.f32.mrf.mxu1 }
 0x39c   : > { %1840 = vmatpush.xpose.msra.mxu3 %v10250_v28 }
 0x39d   : > { %2414 = vmatmul.f32.gmra.mxu0 %v2322_v39  ;;  %v10275_v15 = vpop.f32.mrf.mxu3 }
 0x39e   : > { %1569 = vmatmul.f32.gmra.mxu1 %v9834_v25  ;;  %14185 = vst [vmem:[#allocation63_spill] sm:$0xff] %v10275_v15 }
 0x3a0   : > { %1841 = vmatpush.xpose.msra.mxu3 %v10239_v32 }
 0x3a2   : > { %v10255_v63 = vpop.f32.mrf.mxu2 }
 0x3a3   : > { %14180 = vst [vmem:[#allocation58_spill] sm:$0xff] %v10255_v63  ;;  %v10259_v53 = vpop.f32.mrf.mxu0  ;;  %v2323_v18 = vmul.f32 %v10102_v61, %v10255_v63  ;;  %v10263_v6 = vpop.f32.mrf.mxu1 }
 0x3a4   : > { %14182 = vst [vmem:[#allocation60_spill] sm:$0xff] %v10263_v6  ;;  %1842 = vmatpush.xpose.msra.mxu3 %v10230_v26 }
 0x3a5   : > { %2417 = vmatmul.f32.gmra.mxu0 %v2323_v18  ;;  %v10291_v21 = vpop.f32.mrf.mxu3 }
 0x3a6   : > { %14189 = vst [vmem:[#allocation67_spill] sm:$0xff] %v10291_v21 }
 0x3a8   : > { %1843 = vmatpush.xpose.msra.mxu3 %v10221_v55 }
 0x3aa   : > { %v10267_v39 = vpop.f32.mrf.mxu2 }
 0x3ab   : > { %14183 = vst [vmem:[#allocation61_spill] sm:$0xff] %v10267_v39  ;;  %v10269_v25 = vpop.f32.mrf.mxu0  ;;  %v2324_v22 = vmul.f32 %v10102_v61, %v10267_v39  ;;  %v10273_v19 = vpop.f32.mrf.mxu1  ;;  %v10289_v39 = vmul.f32 0.35355338, %v10177_v33  ;;  %v10303_v33 = vmul.f32 0.35355338, %v10192_v56 }
 0x3ac   : > { %14184 = vst [vmem:[#allocation62_spill] sm:$0xff] %v10273_v19  ;;  %1844 = vmatpush.xpose.msra.mxu3 %v10212_v48 }
 0x3ad   : > { %2420 = vmatmul.f32.gmra.mxu0 %v2324_v22  ;;  %14188 = vst [vmem:[#allocation66_spill] sm:$0xff] %v10289_v39  ;;  %v1767_v17 = vmul.f32 %v10102_v61, %v10289_v39  ;;  %v1768_v41 = vmul.f32 %v10102_v61, %v10303_v33 }
 0x3ae   : > { %14192 = vst [vmem:[#allocation70_spill] sm:$0xff] %v10303_v33 }
 0x3b0   : > { %1845 = vmatpush.xpose.msra.mxu3 %v10203_v12 }
 0x3b2   : > { %v10279_v63 = vpop.f32.mrf.mxu2 }
 0x3b3   : > { %14186 = vst [vmem:[#allocation64_spill] sm:$0xff] %v10279_v63  ;;  %v10281_v18 = vpop.f32.mrf.mxu0  ;;  %v2325_v30 = vmul.f32 %v10102_v61, %v10279_v63  ;;  %v10285_v52 = vpop.f32.mrf.mxu1 }
 0x3b4   : > { %14187 = vst [vmem:[#allocation65_spill] sm:$0xff] %v10285_v52  ;;  %1846 = vmatpush.xpose.msra.mxu3 %v10194_v27 }
 0x3b5   : > { %2423 = vmatmul.f32.gmra.mxu0 %v2325_v30  ;;  %v10305_v30 = vpop.f32.mrf.mxu3 }
 0x3b6   : > { %14193 = vst [vmem:[#allocation71_spill] sm:$0xff] %v10305_v30 }
 0x3b8   : > { %1847 = vmatpush.xpose.msra.mxu3 %v10179_v42 }
 0x3ba   : > { %v10294_v22 = vpop.f32.mrf.mxu2 }
 0x3bb   : > { %14190 = vst [vmem:[#allocation68_spill] sm:$0xff] %v10294_v22  ;;  %v2382_v3 = vpop.f32.mrf.mxu0  ;;  %v2326_v63 = vmul.f32 %v10102_v61, %v10294_v22  ;;  %v10300_v10 = vpop.f32.mrf.mxu1  ;;  %1848 = vmatmul.f32.vlgmr.msra.gmra.mxu3 %v1767_v17 }
 0x3bc   : > { %14191 = vst [vmem:[#allocation69_spill] sm:$0xff] %v10300_v10 }
 0x3bd   : > { %2426 = vmatmul.f32.gmra.mxu0 %v2326_v63  ;;  %v10316_v63 = vmul.f32 0.35355338, %v10201_v46  ;;  %v10322_v22 = vpop.f32.mrf.mxu3 }
 0x3be   : > { %14198 = vst [vmem:[#allocation76_spill] sm:$0xff] %v10322_v22 }
 0x3bf   : > { %14196 = vst [vmem:[#allocation74_spill] sm:$0xff] %v10316_v63  ;;  %v1769_v17 = vmul.f32 %v10102_v61, %v10316_v63 }
 0x3c2   : > { %v10307_v23 = vpop.f32.mrf.mxu2 }
 0x3c3   : > { %14194 = vst [vmem:[#allocation72_spill] sm:$0xff] %v10307_v23  ;;  %v2385_v36 = vpop.f32.mrf.mxu0  ;;  %v2327_v35 = vmul.f32 %v10102_v61, %v10307_v23  ;;  %v10313_v47 = vpop.f32.mrf.mxu1  ;;  %1851 = vmatmul.f32.gmra.mxu3 %v1768_v41 }
 0x3c4   : > { %14195 = vst [vmem:[#allocation73_spill] sm:$0xff] %v10313_v47 }
 0x3c5   : > { %2429 = vmatmul.f32.gmra.mxu0 %v2327_v35  ;;  %v10329_v35 = vmul.f32 0.35355338, %v10210_v20 }
 0x3c7   : > { %14200 = vst [vmem:[#allocation78_spill] sm:$0xff] %v10329_v35  ;;  %v1770_v46 = vmul.f32 %v10102_v61, %v10329_v35 }
 0x3ca   : > { %v10318_v56 = vpop.f32.mrf.mxu2  ;;  %v14390_v9 = vld [vmem:[#allocation72_spill] sm:$0xff] }
 0x3cb   : > { %14197 = vst [vmem:[#allocation75_spill] sm:$0xff] %v10318_v56  ;;  %v2388_v1 = vpop.f32.mrf.mxu0  ;;  %v2328_v8 = vmul.f32 %v10102_v61, %v10318_v56  ;;  %v10326_v29 = vpop.f32.mrf.mxu1  ;;  %1854 = vmatmul.f32.gmra.mxu3 %v1769_v17 }
 0x3cc   : > { %14199 = vst [vmem:[#allocation77_spill] sm:$0xff] %v10326_v29  ;;  %v10339_v56 = vpop.f32.mrf.mxu3 }
 0x3cd   : > { %2432 = vmatmul.f32.gmra.mxu0 %v2328_v8  ;;  %14203 = vst [vmem:[#allocation81_spill] sm:$0xff] %v10339_v56  ;;  %v10342_v8 = vmul.f32 0.35355338, %v10219_v51 }
 0x3cf   : > { %14204 = vst [vmem:[#allocation82_spill] sm:$0xff] %v10342_v8  ;;  %v1771_v17 = vmul.f32 %v10102_v61, %v10342_v8 }
 0x3d2   : > { %v10331_v41 = vpop.f32.mrf.mxu2 }
 0x3d3   : > { %14201 = vst [vmem:[#allocation79_spill] sm:$0xff] %v10331_v41  ;;  %v2391_v23 = vpop.f32.mrf.mxu0  ;;  %v2329_v63 = vmul.f32 %v10102_v61, %v10331_v41  ;;  %v10337_v33 = vpop.f32.mrf.mxu1  ;;  %1857 = vmatmul.f32.gmra.mxu3 %v1770_v46 }
 0x3d4   : > { %14202 = vst [vmem:[#allocation80_spill] sm:$0xff] %v10337_v33  ;;  %v10356_v51 = vpop.f32.mrf.mxu3 }
 0x3d5   : > { %2435 = vmatmul.f32.gmra.mxu0 %v2329_v63  ;;  %v10354_v63 = vmul.f32 0.35355338, %v10228_v58  ;;  %14208 = vst [vmem:[#allocation86_spill] sm:$0xff] %v10356_v51  ;;  %v2332_v58 = vmul.f32 %v10102_v61, %v10257_v16 }
 0x3d7   : > { %14207 = vst [vmem:[#allocation85_spill] sm:$0xff] %v10354_v63 }
 0x3da   : > { %v10344_v20 = vpop.f32.mrf.mxu2 }
 0x3db   : > { %14205 = vst [vmem:[#allocation83_spill] sm:$0xff] %v10344_v20  ;;  %v2394_v39 = vpop.f32.mrf.mxu0  ;;  %v2330_v35 = vmul.f32 %v10102_v61, %v10344_v20  ;;  %v10350_v24 = vpop.f32.mrf.mxu1  ;;  %1860 = vmatmul.f32.gmra.mxu3 %v1771_v17  ;;  %v1772_v20 = vmul.f32 %v10102_v61, %v10354_v63 }
 0x3dc   : > { %14206 = vst [vmem:[#allocation84_spill] sm:$0xff] %v10350_v24  ;;  %2501 = vmatpush.msra.mxu1 %v2394_v39  ;;  %1881 = vmatpush.xpose.msrb.mxu3 %v10350_v24 }
 0x3dd   : > { %2438 = vmatmul.f32.gmra.mxu0 %v2330_v35 }
 0x3de   : > { %2502 = vmatpush.msra.mxu1 %v2391_v23 }
 0x3e0   : > { %2503 = vmatpush.msra.mxu1 %v2388_v1  ;;  %1882 = vmatpush.xpose.msrb.mxu3 %v10337_v33  ;;  %v10369_v1 = vmul.f32 0.35355338, %v10237_v34 }
 0x3e2   : > { %v10359_v46 = vpop.f32.mrf.mxu2  ;;  %2504 = vmatpush.msra.mxu1 %v2385_v36  ;;  %14211 = vst [vmem:[#allocation89_spill] sm:$0xff] %v10369_v1  ;;  %v10373_v36 = vpop.f32.mrf.mxu3 }
 0x3e3   : > { %14209 = vst [vmem:[#allocation87_spill] sm:$0xff] %v10359_v46  ;;  %v2331_v39 = vmul.f32 %v10102_v61, %v10359_v46  ;;  %v10365_v17 = vpop.f32.mrf.mxu1  ;;  %1863 = vmatmul.f32.gmra.mxu3 %v1772_v20  ;;  %v2333_v20 = vmul.f32 %v10102_v61, %v10275_v15  ;;  %v2334_v15 = vmul.f32 %v10102_v61, %v10291_v21  ;;  %v10425_v21 = vmul.f32 0.35355338, %v9867_v0 }
 0x3e4   : > { %14210 = vst [vmem:[#allocation88_spill] sm:$0xff] %v10365_v17  ;;  %2505 = vmatpush.msra.mxu1 %v2382_v3  ;;  %1883 = vmatpush.xpose.msrb.mxu3 %v10326_v29  ;;  %v1773_v3 = vmul.f32 %v10102_v61, %v10369_v1 }
 0x3e5   : > { %2441 = vmatmul.f32.gmra.mxu0 %v2331_v39  ;;  %14212 = vst [vmem:[#allocation90_spill] sm:$0xff] %v10373_v36 }
 0x3e6   : > { %2506 = vmatpush.msra.mxu1 %v10281_v18  ;;  %14216 = vst [vmem:[#allocation94_spill] sm:$0xff] %v10425_v21 }
 0x3e8   : > { %2507 = vmatpush.msra.mxu1 %v10269_v25  ;;  %1884 = vmatpush.xpose.msrb.mxu3 %v10313_v47  ;;  %v10387_v25 = vmul.f32 0.35355338, %v10246_v62  ;;  %v10402_v62 = vmul.f32 0.35355338, %v9838_v11 }
 0x3e9   : > { %v10376_v23 = vpop.f32.mrf.mxu0 }
 0x3ea   : > { %2508 = vmatpush.msra.mxu1 %v10259_v53  ;;  %14213 = vst [vmem:[#allocation91_spill] sm:$0xff] %v10387_v25  ;;  %v10389_v18 = vpop.f32.mrf.mxu3  ;;  %v1774_v35 = vmul.f32 %v10102_v61, %v10387_v25 }
 0x3eb   : > { %v10383_v34 = vpop.f32.mrf.mxu1  ;;  %1866 = vmatmul.f32.gmra.mxu3 %v1773_v3  ;;  %14214 = vst [vmem:[#allocation92_spill] sm:$0xff] %v10402_v62  ;;  %v1775_v3 = vmul.f32 %v10102_v61, %v10402_v62  ;;  %v2335_v62 = vmul.f32 %v10102_v61, %v10305_v30  ;;  %v10434_v30 = vmul.f32 0.35355338, %v9905_v40 }
 0x3ec   : > { %1885 = vmatpush.xpose.msrb.mxu3 %v10300_v10 }
 0x3ed   : > { %2444 = vmatmul.f32.gmra.mxu0 %v2332_v58  ;;  %14217 = vst [vmem:[#allocation95_spill] sm:$0xff] %v10434_v30  ;;  %v1778_v0 = vmul.f32 %v10102_v61, %v10434_v30 }
 0x3f0   : > { %1886 = vmatpush.xpose.msrb.mxu3 %v10285_v52  ;;  %v2338_v52 = vmul.f32 %v10102_v61, %v10356_v51 }
 0x3f2   : > { %v10392_v53 = vpop.f32.mrf.mxu0  ;;  %v10407_v16 = vpop.f32.mrf.mxu3 }
 0x3f3   : > { %v10398_v39 = vpop.f32.mrf.mxu1  ;;  %1869 = vmatmul.f32.gmra.mxu3 %v1774_v35  ;;  %v10414_v35 = vmul.f32 0.35355338, %v9845_v38  ;;  %v1777_v38 = vmul.f32 %v10102_v61, %v10425_v21 }
 0x3f4   : > { %1887 = vmatpush.xpose.msrb.mxu3 %v10273_v19  ;;  %v2337_v19 = vmul.f32 %v10102_v61, %v10339_v56 }
 0x3f5   : > { %2447 = vmatmul.f32.gmra.mxu0 %v2333_v20  ;;  %14215 = vst [vmem:[#allocation93_spill] sm:$0xff] %v10414_v35  ;;  %v1776_v20 = vmul.f32 %v10102_v61, %v10414_v35 }
 0x3f8   : > { %1888 = vmatpush.xpose.msrb.mxu3 %v10263_v6 }
 0x3fa   : > { %v2403_v58 = vpop.f32.mrf.mxu0  ;;  %v10422_v6 = vpop.f32.mrf.mxu3 }
 0x3fb   : > { %v10411_v46 = vpop.f32.mrf.mxu1  ;;  %1889 = vmatmul.f32.vlgmr.msrb.gmra.mxu3 %v1775_v3  ;;  %v2336_v3 = vmul.f32 %v10102_v61, %v10322_v22  ;;  %v10445_v22 = vmul.f32 0.35355338, %v9943_v50 }
 0x3fd   : > { %2450 = vmatmul.f32.gmra.mxu0 %v2334_v15  ;;  %14218 = vst [vmem:[#allocation96_spill] sm:$0xff] %v10445_v22 }
 0x402   : > { %v2406_v11 = vpop.f32.mrf.mxu0 }
 0x403   : > { %v10420_v41 = vpop.f32.mrf.mxu1  ;;  %1892 = vmatmul.f32.gmra.mxu3 %v1776_v20  ;;  %v10436_v20 = vpop.f32.mrf.mxu3 }
 0x405   : > { %2453 = vmatmul.f32.gmra.mxu0 %v2335_v62 }
 0x40a   : > { %v2409_v15 = vpop.f32.mrf.mxu0 }
 0x40b   : > { %v10431_v35 = vpop.f32.mrf.mxu1  ;;  %1895 = vmatmul.f32.gmra.mxu3 %v1777_v38  ;;  %v10447_v38 = vpop.f32.mrf.mxu3 }
 0x40d   : > { %2456 = vmatmul.f32.gmra.mxu0 %v2336_v3  ;;  %v1779_v3 = vmul.f32 %v10102_v61, %v10445_v22  ;;  %v2339_v22 = vmul.f32 %v10102_v61, %v10373_v36 }
 0x412   : > { %v2412_v62 = vpop.f32.mrf.mxu0 }
 0x413   : > { %v10442_v21 = vpop.f32.mrf.mxu1  ;;  %1898 = vmatmul.f32.gmra.mxu3 %v1778_v0  ;;  %v10462_v56 = vpop.f32.mrf.mxu3 }
 0x415   : > { %2459 = vmatmul.f32.gmra.mxu0 %v2337_v19  ;;  %v10457_v19 = vmul.f32 0.35355338, %v9965_v45 }
 0x417   : > { %14219 = vst [vmem:[#allocation97_spill] sm:$0xff] %v10457_v19  ;;  %v1780_v0 = vmul.f32 %v10102_v61, %v10457_v19 }
 0x41a   : > { %v2415_v40 = vpop.f32.mrf.mxu0 }
 0x41b   : > { %v10453_v30 = vpop.f32.mrf.mxu1  ;;  %1901 = vmatmul.f32.gmra.mxu3 %v1779_v3 }
 0x41c   : > { %1922 = vmatpush.xpose.msra.mxu3 %v10453_v30 }
 0x41d   : > { %2462 = vmatmul.f32.gmra.mxu0 %v2338_v52  ;;  %v10468_v52 = vmul.f32 0.35355338, %v9981_v54 }
 0x41f   : > { %14220 = vst [vmem:[#allocation98_spill] sm:$0xff] %v10468_v52  ;;  %v1781_v3 = vmul.f32 %v10102_v61, %v10468_v52 }
 0x420   : > { %1923 = vmatpush.xpose.msra.mxu3 %v10442_v21 }
 0x422   : > { %v2418_v50 = vpop.f32.mrf.mxu0 }
 0x423   : > { %2566 = vmatpush.msrb.mxu2 %v2418_v50  ;;  %1904 = vmatmul.f32.gmra.mxu3 %v1780_v0  ;;  %v10475_v50 = vpop.f32.mrf.mxu3  ;;  %v10508_v0 = vmul.f32 0.35355338, %v10001_v44 }
 0x424   : > { %1924 = vmatpush.xpose.msra.mxu3 %v10431_v35 }
 0x425   : > { %2465 = vmatmul.f32.gmra.mxu0 %v2339_v22  ;;  %2567 = vmatpush.msrb.mxu2 %v2415_v40  ;;  %v10479_v22 = vmul.f32 0.35355338, %v9990_v43  ;;  %14224 = vst [vmem:[#allocation102_spill] sm:$0xff] %v10508_v0 }
 0x427   : > { %2568 = vmatpush.msrb.mxu2 %v2412_v62  ;;  %14221 = vst [vmem:[#allocation99_spill] sm:$0xff] %v10479_v22 }
 0x428   : > { %1925 = vmatpush.xpose.msra.mxu3 %v10420_v41 }
 0x429   : > { %2569 = vmatpush.msrb.mxu2 %v2409_v15  ;;  %v1782_v15 = vmul.f32 %v10102_v61, %v10479_v22 }
 0x42a   : > { %v10471_v45 = vpop.f32.mrf.mxu0 }
 0x42b   : > { %2570 = vmatpush.msrb.mxu2 %v2406_v11  ;;  %1907 = vmatmul.f32.gmra.mxu3 %v1781_v3  ;;  %v10489_v11 = vmul.f32 0.35355338, %v9995_v5  ;;  %v10491_v43 = vpop.f32.mrf.mxu3 }
 0x42c   : > { %1926 = vmatpush.xpose.msra.mxu3 %v10411_v46 }
 0x42d   : > { %2571 = vmatpush.msrb.mxu2 %v2403_v58  ;;  %14222 = vst [vmem:[#allocation100_spill] sm:$0xff] %v10489_v11  ;;  %v10499_v58 = vmul.f32 0.35355338, %v9999_v37 }
 0x42f   : > { %2572 = vmatpush.msrb.mxu2 %v10392_v53  ;;  %14223 = vst [vmem:[#allocation101_spill] sm:$0xff] %v10499_v58  ;;  %v1784_v40 = vmul.f32 %v10102_v61, %v10499_v58 }
 0x430   : > { %1927 = vmatpush.xpose.msra.mxu3 %v10398_v39 }
 0x431   : > { %2573 = vmatpush.msrb.mxu2 %v10376_v23  ;;  %v1783_v23 = vmul.f32 %v10102_v61, %v10489_v11 }
 0x432   : > { %v2424_v54 = vpop.f32.mrf.mxu0 }
 0x433   : > { %2806 = vmatpush.xpose.msra.mxu2 %v10092_v7  ;;  %1910 = vmatmul.f32.gmra.mxu3 %v1782_v15  ;;  %v1785_v15 = vmul.f32 %v10102_v61, %v10508_v0 }
 0x434   : > { %1928 = vmatpush.xpose.msra.mxu3 %v10383_v34 }
 0x437   : > { %2807 = vmatpush.xpose.msra.mxu2 %v10085_v59 }
 0x438   : > { %1929 = vmatpush.xpose.msra.mxu3 %v10365_v17 }
 0x43a   : > { %v2427_v53 = vpop.f32.mrf.mxu0 }
 0x43b   : > { %2808 = vmatpush.xpose.msra.mxu2 %v10078_v4  ;;  %1930 = vmatmul.f32.vlgmr.msra.gmra.mxu3 %v1783_v23  ;;  %v10517_v23 = vmul.f32 0.35355338, %v10003_v31  ;;  %v14227_v31 = vld [vmem:[#allocation21_spill] sm:$0xff] }
 0x43d   : > { %14225 = vst [vmem:[#allocation103_spill] sm:$0xff] %v10517_v23 }
 0x43e   : > { %v10502_v5 = vpop.f32.mrf.mxu3 }
 0x43f   : > { %2809 = vmatpush.xpose.msra.mxu2 %v10067_v49 }
 0x442   : > { %v2430_v62 = vpop.f32.mrf.mxu0 }
 0x443   : > { %2810 = vmatpush.xpose.msra.mxu2 %v10054_v57  ;;  %1933 = vmatmul.f32.gmra.mxu3 %v1784_v40  ;;  %v10525_v57 = vmul.f32 0.35355338, %v10005_v2  ;;  %v14229_v2 = vld [vmem:[#allocation22_spill] sm:$0xff] }
 0x445   : > { %14226 = vst [vmem:[#allocation104_spill] sm:$0xff] %v10525_v57 }
 0x446   : > { %v10511_v3 = vpop.f32.mrf.mxu3 }
 0x447   : > { %2811 = vmatpush.xpose.msra.mxu2 %v10040_v14  ;;  %v1786_v14 = vmul.f32 %v10102_v61, %v10517_v23 }
 0x44a   : > { %v2433_v37 = vpop.f32.mrf.mxu0 }
 0x44b   : > { %2812 = vmatpush.xpose.msra.mxu2 %v10025_v13  ;;  %1936 = vmatmul.f32.gmra.mxu3 %v1785_v15  ;;  %v1787_v15 = vmul.f32 %v10102_v61, %v10525_v57  ;;  %v10532_v13 = vmul.f32 0.35355338, %v14227_v31  ;;  %v14231_v57 = vld [vmem:[#allocation23_spill] sm:$0xff] }
 0x44c   : > { %v10546_v59 = vmul.f32 0.35355338, %v14231_v57 }
 0x44d   : > { %14228 = vst [vmem:[#allocation21_spill] sm:$0xff] %v10532_v13  ;;  %v1788_v23 = vmul.f32 %v10102_v61, %v10532_v13 }
 0x44e   : > { %v10520_v40 = vpop.f32.mrf.mxu3  ;;  %14232 = vst [vmem:[#allocation23_spill] sm:$0xff] %v10546_v59 }
 0x44f   : > { %2813 = vmatpush.xpose.msra.mxu2 %v10016_v60 }
 0x452   : > { %v2436_v44 = vpop.f32.mrf.mxu0 }
 0x453   : > { %1939 = vmatmul.f32.gmra.mxu3 %v1786_v14  ;;  %v10539_v14 = vmul.f32 0.35355338, %v14229_v2 }
 0x455   : > { %14230 = vst [vmem:[#allocation22_spill] sm:$0xff] %v10539_v14  ;;  %v1789_v31 = vmul.f32 %v10102_v61, %v10539_v14 }
 0x456   : > { %v10527_v49 = vpop.f32.mrf.mxu3 }
 0x45a   : > { %v2439_v0 = vpop.f32.mrf.mxu0 }
 0x45b   : > { %1942 = vmatmul.f32.gmra.mxu3 %v1787_v15 }
 0x45e   : > { %v10534_v60 = vpop.f32.mrf.mxu3 }
 0x462   : > { %v2442_v4 = vpop.f32.mrf.mxu0 }
 0x463   : > { %2631 = vmatpush.msrb.mxu3 %v2442_v4 }
 0x464   : > { %1945 = vmatmul.f32.gmra.mxu3 %v1788_v23 }
 0x465   : > { %2632 = vmatpush.msrb.mxu3 %v2439_v0 }
 0x466   : > { %v10541_v58 = vpop.f32.mrf.mxu3 }
 0x467   : > { %2633 = vmatpush.msrb.mxu3 %v2436_v44 }
 0x469   : > { %2634 = vmatpush.msrb.mxu3 %v2433_v37  ;;  %v1790_v37 = vmul.f32 %v10102_v61, %v10546_v59 }
 0x46a   : > { %v2445_v15 = vpop.f32.mrf.mxu0 }
 0x46b   : > { %2635 = vmatpush.msrb.mxu3 %v2430_v62 }
 0x46c   : > { %1948 = vmatmul.f32.gmra.mxu3 %v1789_v31 }
 0x46d   : > { %2636 = vmatpush.msrb.mxu3 %v2427_v53 }
 0x46e   : > { %v10548_v4 = vpop.f32.mrf.mxu3 }
 0x46f   : > { %2637 = vmatpush.msrb.mxu3 %v2424_v54 }
 0x471   : > { %2638 = vmatpush.msrb.mxu3 %v10471_v45 }
 0x472   : > { %v2448_v0 = vpop.f32.mrf.mxu0 }
 0x473   : > { %2847 = vmatpush.xpose.msra.mxu3 %v10250_v28 }
 0x474   : > { %1951 = vmatmul.f32.gmra.mxu3 %v1790_v37 }
 0x476   : > { %v10555_v62 = vpop.f32.mrf.mxu3 }
 0x477   : > { %2848 = vmatpush.xpose.msra.mxu3 %v10239_v32 }
 0x47a   : > { %v2451_v53 = vpop.f32.mrf.mxu0 }
 0x47b   : > { %2849 = vmatpush.xpose.msra.mxu3 %v10230_v26 }
 0x47e   : > { %v1890_v57 = vpop.f32.mrf.mxu3 }
 0x47f   : > { %2850 = vmatpush.xpose.msra.mxu3 %v10221_v55  ;;  %v2004_v45 = vsel %vm1955_vm2, %v1890_v57, -inf }
 0x480   : > { %2005 = vmax.xlane.f32.xlu1 %v2004_v45 }
 0x482   : > { %v2454_v54 = vpop.f32.mrf.mxu0 }
 0x483   : > { %2851 = vmatpush.xpose.msra.mxu3 %v10212_v48 }
 0x486   : > { %v1893_v61 = vpop.f32.mrf.mxu3 }
 0x487   : > { %2852 = vmatpush.xpose.msra.mxu3 %v10203_v12  ;;  %v2007_v23 = vsel %vm1955_vm2, %v1893_v61, -inf }
 0x488   : > { %2008 = vmax.xlane.f32.xlu2 %v2007_v23 }
 0x48a   : > { %v2457_v44 = vpop.f32.mrf.mxu0 }
 0x48b   : > { %2853 = vmatpush.xpose.msra.mxu3 %v10194_v27 }
 0x48e   : > { %v1896_v2 = vpop.f32.mrf.mxu3 }
 0x48f   : > { %2854 = vmatpush.xpose.msra.mxu3 %v10179_v42  ;;  %v2010_v31 = vsel %vm1955_vm2, %v1896_v2, -inf }
 0x490   : > { %2011 = vmax.xlane.f32.xlu0 %v2010_v31 }
 0x492   : > { %v2460_v37 = vpop.f32.mrf.mxu0 }
 0x496   : > { %v1899_v45 = vpop.f32.mrf.mxu3 }
 0x497   : > { %v2013_v59 = vsel %vm1955_vm2, %v1899_v45, -inf }
 0x498   : > { %2014 = vmax.xlane.f32.xlu1 %v2013_v59 }
 0x49a   : > { %v2463_v14 = vpop.f32.mrf.mxu0 }
 0x49e   : > { %v1902_v13 = vpop.f32.mrf.mxu3 }
 0x49f   : > { %v2016_v7 = vsel %vm1955_vm2, %v1902_v13, -inf }
 0x4a0   : > { %2017 = vmax.xlane.f32.xlu2 %v2016_v7 }
 0x4a2   : > { %v2466_v23 = vpop.f32.mrf.mxu0 }
 0x4a3   : > { %2696 = vmatpush.msrb.mxu1 %v2466_v23 }
 0x4a5   : > { %2697 = vmatpush.msrb.mxu1 %v2463_v14 }
 0x4a6   : > { %v1905_v11 = vpop.f32.mrf.mxu3 }
 0x4a7   : > { %2698 = vmatpush.msrb.mxu1 %v2460_v37  ;;  %v2019_v42 = vsel %vm1955_vm2, %v1905_v11, -inf }
 0x4a8   : > { %2020 = vmax.xlane.f32.xlu0 %v2019_v42 }
 0x4a9   : > { %2699 = vmatpush.msrb.mxu1 %v2457_v44 }
 0x4ab   : > { %2700 = vmatpush.msrb.mxu1 %v2454_v54 }
 0x4ad   : > { %2701 = vmatpush.msrb.mxu1 %v2451_v53 }
 0x4ae   : > { %v1908_v31 = vpop.f32.mrf.mxu3 }
 0x4af   : > { %2702 = vmatpush.msrb.mxu1 %v2448_v0  ;;  %v2022_v59 = vsel %vm1955_vm2, %v1908_v31, -inf }
 0x4b0   : > { %2023 = vmax.xlane.f32.xlu1 %v2022_v59 }
 0x4b1   : > { %2703 = vmatpush.msrb.mxu1 %v2445_v15 }
 0x4b6   : > { %v1911_v27 = vpop.f32.mrf.mxu3 }
 0x4b7   : > { %v2025_v7 = vsel %vm1955_vm2, %v1911_v27, -inf }
 0x4b8   : > { %2026 = vmax.xlane.f32.xlu0 %v2025_v7 }
 0x4f3   : > { %v2006_v23 = vpop.xlane.xlu1 %2005 }
 0x4f4   : > { %v2068_v14 = vsub.f32 %v1890_v57, %v2006_v23 }
 0x4f6   : > { %v2116_v12 = vmul.f32 1.442695, %v2068_v14 }
 0x4f8   : > { %8065 = vpow2.f32 %v2116_v12 }
 0x4fb   : > { %v2009_v37 = vpop.xlane.xlu2 %2008 }
 0x4fc   : > { %v2069_v17 = vsub.f32 %v1893_v61, %v2009_v37 }
 0x4fe   : > { %v10571_v44 = vpop.eup %8065  ;;  %v2118_v42 = vmul.f32 1.442695, %v2069_v17 }
 0x4ff   : > { %v2196_v0 = vsel %vm1955_vm2, %v10571_v44, 0.0 }
 0x500   : > { %8067 = vpow2.f32 %v2118_v42  ;;  %2197 = vadd.xlane.f32.xlu2 %v2196_v0 }
 0x503   : > { %v2012_v15 = vpop.xlane.xlu0 %2011 }
 0x504   : > { %v2070_v53 = vsub.f32 %v1896_v2, %v2012_v15 }
 0x506   : > { %v10575_v54 = vpop.eup %8067  ;;  %v2120_v59 = vmul.f32 1.442695, %v2070_v53 }
 0x507   : > { %v2199_v57 = vsel %vm1955_vm2, %v10575_v54, 0.0 }
 0x508   : > { %8069 = vpow2.f32 %v2120_v59  ;;  %2200 = vadd.xlane.f32.xlu1 %v2199_v57 }
 0x50b   : > { %v2015_v12 = vpop.xlane.xlu1 %2014 }
 0x50c   : > { %v2071_v61 = vsub.f32 %v1899_v45, %v2015_v12 }
 0x50e   : > { %v10579_v7 = vpop.eup %8069  ;;  %v2122_v17 = vmul.f32 1.442695, %v2071_v61 }
 0x50f   : > { %v2202_v23 = vsel %vm1955_vm2, %v10579_v7, 0.0 }
 0x510   : > { %8071 = vpow2.f32 %v2122_v17  ;;  %2203 = vadd.xlane.f32.xlu2 %v2202_v23 }
 0x513   : > { %v2018_v14 = vpop.xlane.xlu2 %2017 }
 0x514   : > { %v2072_v2 = vsub.f32 %v1902_v13, %v2018_v14  ;;  %v1956_v14 = vsel %vm1955_vm2, %v10389_v18, -inf }
 0x516   : > { %v10583_v37 = vpop.eup %8071  ;;  %v2124_v42 = vmul.f32 1.442695, %v2072_v2 }
 0x517   : > { %v2205_v0 = vsel %vm1955_vm2, %v10583_v37, 0.0 }
 0x518   : > { %8073 = vpow2.f32 %v2124_v42  ;;  %2206 = vadd.xlane.f32.xlu0 %v2205_v0 }
 0x51b   : > { %v2021_v15 = vpop.xlane.xlu0 %2020 }
 0x51c   : > { %v2073_v45 = vsub.f32 %v1905_v11, %v2021_v15 }
 0x51e   : > { %v10587_v53 = vpop.eup %8073  ;;  %v2126_v59 = vmul.f32 1.442695, %v2073_v45 }
 0x51f   : > { %v2208_v57 = vsel %vm1955_vm2, %v10587_v53, 0.0 }
 0x520   : > { %8075 = vpow2.f32 %v2126_v59  ;;  %2209 = vadd.xlane.f32.xlu1 %v2208_v57  ;;  %v1971_v59 = vsel %vm1955_vm2, %v10462_v56, -inf }
 0x523   : > { %v2024_v12 = vpop.xlane.xlu1 %2023 }
 0x524   : > { %v2074_v13 = vsub.f32 %v1908_v31, %v2024_v12  ;;  %v1962_v31 = vsel %vm1955_vm2, %v10422_v6, -inf  ;;  %v1977_v12 = vsel %vm1955_vm2, %v10491_v43, -inf }
 0x526   : > { %v10591_v61 = vpop.eup %8075  ;;  %v2128_v17 = vmul.f32 1.442695, %v2074_v13  ;;  %v1968_v13 = vsel %vm1955_vm2, %v10447_v38, -inf }
 0x527   : > { %v2211_v23 = vsel %vm1955_vm2, %v10591_v61, 0.0 }
 0x528   : > { %8077 = vpow2.f32 %v2128_v17  ;;  %2212 = vadd.xlane.f32.xlu2 %v2211_v23  ;;  %1957 = vmax.xlane.f32.xlu1 %v1956_v14  ;;  %v1965_v17 = vsel %vm1955_vm2, %v10436_v20, -inf  ;;  %v1974_v23 = vsel %vm1955_vm2, %v10475_v50, -inf }
 0x52b   : > { %v2027_v11 = vpop.xlane.xlu0 %2026 }
 0x52c   : > { %v2075_v2 = vsub.f32 %v1911_v27, %v2027_v11  ;;  %v1959_v27 = vsel %vm1955_vm2, %v10407_v16, -inf }
 0x52e   : > { %v10597_v42 = vpop.eup %8077  ;;  %v2130_v0 = vmul.f32 1.442695, %v2075_v2 }
 0x52f   : > { %v2214_v15 = vsel %vm1955_vm2, %v10597_v42, 0.0 }
 0x530   : > { %8079 = vpow2.f32 %v2130_v0  ;;  %1963 = vmax.xlane.f32.xlu1 %v1962_v31  ;;  %2215 = vadd.xlane.f32.xlu0 %v2214_v15 }
 0x536   : > { %v10603_v45 = vpop.eup %8079 }
 0x537   : > { %v2217_v57 = vsel %vm1955_vm2, %v10603_v45, 0.0 }
 0x538   : > { %1972 = vmax.xlane.f32.xlu1 %v1971_v59  ;;  %1960 = vmax.xlane.f32.xlu0 %v1959_v27 }
 0x539   : > { %2218 = vadd.xlane.f32.xlu2 %v2217_v57 }
 0x540   : > { %1978 = vmax.xlane.f32.xlu1 %v1977_v12  ;;  %1969 = vmax.xlane.f32.xlu0 %v1968_v13 }
 0x541   : > { %1966 = vmax.xlane.f32.xlu2 %v1965_v17 }
 0x549   : > { %1975 = vmax.xlane.f32.xlu2 %v1974_v23 }
 0x573   : > { %v2198_v14 = vpop.xlane.xlu2 %2197 }
 0x574   : > { %8081 = vrcp.f32 %v2198_v14 }
 0x57a   : > { %v8082_v11 = vpop.eup %8081 }
 0x57b   : > { %v2292_v2 = vmul.f32 %v8082_v11, %v10571_v44  ;;  %v2201_v0 = vpop.xlane.xlu1 %2200  ;;  %v10625_v44 = vpop.f32.mrf.mxu3 }
 0x57c   : > { %8083 = vrcp.f32 %v2201_v0 }
 0x57d   : > { %7701 = vmatmul.msk.f32.vlgmr.msrb.gmra.mxu3 %vm1955_vm2, %v2292_v2 }
 0x582   : > { %v8084_v31 = vpop.eup %8083 }
 0x583   : > { %v2204_v15 = vpop.xlane.xlu2 %2203  ;;  %v2293_v59 = vmul.f32 %v8084_v31, %v10575_v54  ;;  %v10630_v0 = vpop.f32.mrf.mxu3 }
 0x584   : > { %8085 = vrcp.f32 %v2204_v15 }
 0x585   : > { %7702 = vmatmul.msk.f32.gmra.mxu3 %vm1955_vm2, %v2293_v59 }
 0x58a   : > { %v8086_v27 = vpop.eup %8085 }
 0x58b   : > { %v2207_v57 = vpop.xlane.xlu0 %2206  ;;  %v2294_v12 = vmul.f32 %v8086_v27, %v10579_v7 }
 0x58c   : > { %8087 = vrcp.f32 %v2207_v57 }
 0x58d   : > { %7703 = vmatmul.msk.f32.gmra.mxu3 %vm1955_vm2, %v2294_v12  ;;  %v10639_v12 = vpop.f32.mrf.mxu3 }
 0x592   : > { %v8088_v13 = vpop.eup %8087 }
 0x593   : > { %v2210_v17 = vpop.xlane.xlu1 %2209  ;;  %v2295_v23 = vmul.f32 %v8088_v13, %v10583_v37 }
 0x594   : > { %8089 = vrcp.f32 %v2210_v17 }
 0x595   : > { %7704 = vmatmul.msk.f32.gmra.mxu3 %vm1955_vm2, %v2295_v23 }
 0x59a   : > { %v8090_v54 = vpop.eup %8089 }
 0x59b   : > { %v2213_v14 = vpop.xlane.xlu2 %2212  ;;  %v1958_v11 = vpop.xlane.xlu1 %1957  ;;  %v2296_v2 = vmul.f32 %v8090_v54, %v10587_v53 }
 0x59c   : > { %8091 = vrcp.f32 %v2213_v14  ;;  %v2052_v7 = vsub.f32 %v10389_v18, %v1958_v11 }
 0x59d   : > { %7705 = vmatmul.msk.f32.gmra.mxu3 %vm1955_vm2, %v2296_v2 }
 0x59e   : > { %v2084_v31 = vmul.f32 1.442695, %v2052_v7 }
 0x5a0   : > { %8093 = vpow2.f32 %v2084_v31 }
 0x5a2   : > { %v8092_v15 = vpop.eup %8091 }
 0x5a3   : > { %v1964_v59 = vpop.xlane.xlu1 %1963  ;;  %v2216_v37 = vpop.xlane.xlu0 %2215  ;;  %v2297_v27 = vmul.f32 %v8092_v15, %v10591_v61  ;;  %v2028_v15 = vsel %vm1955_vm2, %v10625_v44, -inf }
 0x5a4   : > { %v2054_v57 = vsub.f32 %v10422_v6, %v1964_v59  ;;  %8095 = vrcp.f32 %v2216_v37  ;;  %v10653_v59 = vpop.f32.mrf.mxu3 }
 0x5a5   : > { %7706 = vmatmul.msk.f32.gmra.mxu3 %vm1955_vm2, %v2297_v27 }
 0x5a6   : > { %v10637_v53 = vpop.eup %8093  ;;  %v2088_v13 = vmul.f32 1.442695, %v2054_v57 }
 0x5a7   : > { %v2148_v18 = vsel %vm1955_vm2, %v10637_v53, 0.0 }
 0x5a8   : > { %8097 = vpow2.f32 %v2088_v13  ;;  %2149 = vadd.xlane.f32.xlu0 %v2148_v18 }
 0x5aa   : > { %v8096_v17 = vpop.eup %8095 }
 0x5ab   : > { %v1973_v23 = vpop.xlane.xlu1 %1972  ;;  %v1961_v54 = vpop.xlane.xlu0 %1960  ;;  %v2298_v61 = vmul.f32 %v8096_v17, %v10597_v42 }
 0x5ac   : > { %v2219_v14 = vpop.xlane.xlu2 %2218  ;;  %v2053_v6 = vsub.f32 %v10407_v16, %v1961_v54  ;;  %v2057_v2 = vsub.f32 %v10462_v56, %v1973_v23  ;;  %v2034_v23 = vsel %vm1955_vm2, %v10639_v12, -inf  ;;  %v10667_v54 = vpop.f32.mrf.mxu3 }
 0x5ad   : > { %8099 = vrcp.f32 %v2219_v14  ;;  %7707 = vmatmul.msk.f32.gmra.mxu3 %vm1955_vm2, %v2298_v61 }
 0x5ae   : > { %v10646_v11 = vpop.eup %8097  ;;  %v2086_v7 = vmul.f32 1.442695, %v2053_v6  ;;  %v2094_v16 = vmul.f32 1.442695, %v2057_v2  ;;  %v14234_v2 = vld [vmem:[#allocation66_spill] sm:$0xff] }
 0x5af   : > { %v2154_v31 = vsel %vm1955_vm2, %v10646_v11, 0.0 }
 0x5b0   : > { %2155 = vadd.xlane.f32.xlu1 %v2154_v31  ;;  %2029 = vmax.xlane.f32.xlu0 %v2028_v15  ;;  %8101 = vpow2.f32 %v2086_v7  ;;  %v3361_v31 = vld [vmem:[#allocation8 + $0x78] sm:$0xff] }
 0x5b1   : > { %8103 = vpow2.f32 %v2094_v16  ;;  %3362 = vmatpush.msrb.mxu3 %v3361_v31 }
 0x5b3   : > { %v8100_v42 = vpop.eup %8099  ;;  %v1970_v27 = vpop.xlane.xlu0 %1969 }
 0x5b4   : > { %v1967_v37 = vpop.xlane.xlu2 %1966  ;;  %v2299_v57 = vmul.f32 %v8100_v42, %v10603_v45  ;;  %v2056_v17 = vsub.f32 %v10447_v38, %v1970_v27 }
 0x5b5   : > { %v2055_v56 = vsub.f32 %v10436_v20, %v1967_v37  ;;  %v14233_v20 = vmov 0.0   ;;  %v3360_v37 = vld [vmem:[#allocation8 + $0x70] sm:$0xff] }
 0x5b6   : > { %7708 = vmatmul.msk.f32.gmra.mxu3 %vm1955_vm2, %v2299_v57  ;;  %v10660_v13 = vpop.eup %8101  ;;  %v10670_v61 = vsel %vm2763_vm5, 1.0, %v14233_v20  ;;  %v2092_v14 = vmul.f32 1.442695, %v2056_v17  ;;  %v2031_v57 = vsel %vm1955_vm2, %v10630_v0, -inf  ;;  %v10685_v17 = vpop.f32.mrf.mxu3 }
 0x5b7   : > { %v2090_v18 = vmul.f32 1.442695, %v2055_v56  ;;  %v2151_v45 = vsel %vm1955_vm2, %v10660_v13, 0.0  ;;  %v10672_v6 = vpop.eup %8103  ;;  %v2774_v38 = vmul.f32 %v10670_v61, %v14234_v2  ;;  %v3359_v56 = vld [vmem:[#allocation8 + $0x68] sm:$0xff]  ;;  %3363 = vmatpush.msrb.mxu3 %v3360_v37  ;;  %v2043_v31 = vsel %vm1955_vm2, %v10685_v17, -inf }
 0x5b8   : > { %2035 = vmax.xlane.f32.xlu1 %v2034_v23  ;;  %2152 = vadd.xlane.f32.xlu2 %v2151_v45  ;;  %v2163_v42 = vsel %vm1955_vm2, %v10672_v6, 0.0  ;;  %v14235_v23 = vld [vmem:[#allocation70_spill] sm:$0xff]  ;;  %v2037_v37 = vsel %vm1955_vm2, %v10653_v59, -inf }
 0x5b9   : > { %8105 = vpow2.f32 %v2090_v18  ;;  %v2775_v45 = vmul.f32 %v10670_v61, %v14235_v23  ;;  %3364 = vmatpush.msrb.mxu3 %v3359_v56  ;;  %v14236_v56 = vld [vmem:[#allocation74_spill] sm:$0xff] }
 0x5ba   : > { %8107 = vpow2.f32 %v2092_v14  ;;  %v3358_v14 = vld [vmem:[#allocation8 + $0x60] sm:$0xff] }
 0x5bb   : > { %3365 = vmatpush.msrb.mxu3 %v3358_v14 }
 0x5bc   : > { %v1976_v7 = vpop.xlane.xlu2 %1975 }
 0x5bd   : > { %v2058_v16 = vsub.f32 %v10475_v50, %v1976_v7  ;;  %v1979_v50 = vpop.xlane.xlu1 %1978 }
 0x5be   : > { %2855 = vmatmul.f32.vlgmr.msra.gmra.mxu3 %v2774_v38  ;;  %v2059_v7 = vsub.f32 %v10491_v43, %v1979_v50  ;;  %v2776_v43 = vmul.f32 %v10670_v61, %v14236_v56  ;;  %v3347_v56 = vld [vmem:[#allocation8 + $0x8] sm:$0xff] }
 0x5bf   : > { %v10676_v15 = vpop.eup %8105  ;;  %v2096_v18 = vmul.f32 1.442695, %v2058_v16 }
 0x5c0   : > { %v2157_v27 = vsel %vm1955_vm2, %v10676_v15, 0.0  ;;  %2164 = vadd.xlane.f32.xlu1 %v2163_v42  ;;  %2032 = vmax.xlane.f32.xlu2 %v2031_v57  ;;  %v10689_v38 = vpop.eup %8107  ;;  %v3357_v42 = vld [vmem:[#allocation8 + $0x58] sm:$0xff]  ;;  %v2098_v57 = vmul.f32 1.442695, %v2059_v7 }
 0x5c1   : > { %2158 = vadd.xlane.f32.xlu0 %v2157_v27  ;;  %8109 = vpow2.f32 %v2096_v18  ;;  %v2160_v16 = vsel %vm1955_vm2, %v10689_v38, 0.0  ;;  %v3356_v27 = vld [vmem:[#allocation8 + $0x50] sm:$0xff]  ;;  %3366 = vmatpush.msrb.mxu3 %v3357_v42  ;;  %v3355_v18 = vld [vmem:[#allocation8 + $0x48] sm:$0xff]  ;;  %v3353_v7 = vld [vmem:[#allocation8 + $0x38] sm:$0xff]  ;;  %v10706_v42 = vpop.f32.mrf.mxu3 }
 0x5c2   : > { %8111 = vpow2.f32 %v2098_v57 }
 0x5c3   : > { %3367 = vmatpush.msrb.mxu3 %v3356_v27  ;;  %v3352_v27 = vld [vmem:[#allocation8 + $0x30] sm:$0xff] }
 0x5c5   : > { %3368 = vmatpush.msrb.mxu3 %v3355_v18 }
 0x5c6   : > { %2858 = vmatmul.f32.gmra.mxu3 %v2775_v45  ;;  %v3354_v45 = vld [vmem:[#allocation8 + $0x40] sm:$0xff] }
 0x5c7   : > { %v10700_v50 = vpop.eup %8109  ;;  %3369 = vmatpush.msrb.mxu3 %v3354_v45  ;;  %v3350_v45 = vld [vmem:[#allocation8 + $0x20] sm:$0xff] }
 0x5c8   : > { %2044 = vmax.xlane.f32.xlu1 %v2043_v31  ;;  %2161 = vadd.xlane.f32.xlu2 %v2160_v16  ;;  %v2166_v14 = vsel %vm1955_vm2, %v10700_v50, 0.0  ;;  %v2040_v31 = vsel %vm1955_vm2, %v10667_v54, -inf  ;;  %v14237_v16 = vld [vmem:[#allocation78_spill] sm:$0xff]  ;;  %v10710_v57 = vpop.eup %8111 }
 0x5c9   : > { %2038 = vmax.xlane.f32.xlu0 %v2037_v37  ;;  %v2777_v37 = vmul.f32 %v10670_v61, %v14237_v16  ;;  %3370 = vmatpush.msrb.mxu3 %v3353_v7  ;;  %v2169_v18 = vsel %vm1955_vm2, %v10710_v57, 0.0  ;;  %v3349_v7 = vld [vmem:[#allocation8 + $0x18] sm:$0xff]  ;;  %v10718_v16 = vpop.f32.mrf.mxu3 }
 0x5cb   : > { %3371 = vmatpush.msrb.mxu3 %v3352_v27  ;;  %v2049_v27 = vsel %vm1955_vm2, %v10718_v16, -inf }
 0x5ce   : > { %2861 = vmatmul.f32.gmra.mxu3 %v2776_v43  ;;  %v3351_v43 = vld [vmem:[#allocation8 + $0x28] sm:$0xff] }
 0x5cf   : > { %3372 = vmatpush.msrb.mxu3 %v3351_v43  ;;  %v2779_v43 = vmul.f32 %v10670_v61, %v10354_v63 }
 0x5d0   : > { %2041 = vmax.xlane.f32.xlu2 %v2040_v31  ;;  %v2778_v31 = vmul.f32 %v10670_v61, %v10342_v8  ;;  %v14248_v8 = vld [vmem:[#allocation40_spill] sm:$0xff] }
 0x5d1   : > { %2167 = vadd.xlane.f32.xlu0 %v2166_v14  ;;  %v2046_v14 = vsel %vm1955_vm2, %v10706_v42, -inf  ;;  %3373 = vmatpush.msrb.mxu3 %v3350_v45  ;;  %v2781_v45 = vmul.f32 %v10670_v61, %v10387_v25  ;;  %v14244_v25 = vld [vmem:[#allocation35_spill] sm:$0xff] }
 0x5d3   : > { %3374 = vmatpush.msrb.mxu3 %v3349_v7 }
 0x5d6   : > { %2864 = vmatmul.f32.gmra.mxu3 %v2777_v37  ;;  %v3348_v37 = vld [vmem:[#allocation8 + $0x10] sm:$0xff] }
 0x5d7   : > { %3375 = vmatpush.msrb.mxu3 %v3348_v37 }
 0x5d8   : > { %2170 = vadd.xlane.f32.xlu2 %v2169_v18  ;;  %v3346_v18 = vld [vmem:[#allocation8] sm:$0xff] }
 0x5d9   : > { %2047 = vmax.xlane.f32.xlu0 %v2046_v14  ;;  %3376 = vmatpush.msrb.mxu3 %v3347_v56  ;;  %v2780_v14 = vmul.f32 %v10670_v61, %v10369_v1  ;;  %v14240_v56 = vld [vmem:[#allocation33_spill] sm:$0xff] }
 0x5db   : > { %3377 = vmatpush.msrb.mxu3 %v3346_v18 }
 0x5de   : > { %2867 = vmatmul.f32.gmra.mxu3 %v2778_v31  ;;  %v14238_v31 = vld [vmem:[#allocation31_spill] sm:$0xff] }
 0x5df   : > { %v3314_v7 = vmul.f32 %v10670_v61, %v14238_v31 }
 0x5e0   : > { %2050 = vmax.xlane.f32.xlu2 %v2049_v27  ;;  %v3315_v27 = vmul.f32 %v10670_v61, %v14240_v56 }
 0x5e6   : > { %2870 = vmatmul.f32.gmra.mxu3 %v2779_v43  ;;  %v14242_v43 = vld [vmem:[#allocation34_spill] sm:$0xff] }
 0x5e7   : > { %v3316_v1 = vmul.f32 %v10670_v61, %v14242_v43 }
 0x5ee   : > { %2873 = vmatmul.f32.gmra.mxu3 %v2780_v14 }
 0x5f6   : > { %2876 = vmatmul.f32.gmra.mxu3 %v2781_v45  ;;  %v3317_v45 = vmul.f32 %v10670_v61, %v14244_v25 }
 0x5fe   : > { %3378 = vmatmul.f32.vlgmr.msrb.gmra.mxu3 %v3314_v7 }
 0x600   : > { %v10730_v37 = vpop.f32.mrf.mxu3 }
 0x601   : > { %14239 = vst [vmem:[#allocation105_spill] sm:$0xff] %v10730_v37  ;;  %v14246_v37 = vld [vmem:[#allocation38_spill] sm:$0xff] }
 0x602   : > { %v3318_v56 = vmul.f32 %v10670_v61, %v14246_v37 }
 0x606   : > { %3381 = vmatmul.f32.gmra.mxu3 %v3315_v27 }
 0x608   : > { %v10734_v18 = vpop.f32.mrf.mxu3 }
 0x609   : > { %14241 = vst [vmem:[#allocation106_spill] sm:$0xff] %v10734_v18 }
 0x60e   : > { %3384 = vmatmul.f32.gmra.mxu3 %v3316_v1 }
 0x610   : > { %v10738_v14 = vpop.f32.mrf.mxu3 }
 0x611   : > { %14243 = vst [vmem:[#allocation107_spill] sm:$0xff] %v10738_v14 }
 0x616   : > { %3387 = vmatmul.f32.gmra.mxu3 %v3317_v45  ;;  %v3319_v45 = vmul.f32 %v10670_v61, %v14248_v8 }
 0x618   : > { %v10742_v31 = vpop.f32.mrf.mxu3 }
 0x619   : > { %14245 = vst [vmem:[#allocation108_spill] sm:$0xff] %v10742_v31 }
 0x61b   : > { %v2150_v7 = vpop.xlane.xlu0 %2149 }
 0x61c   : > { %8113 = vrcp.f32 %v2150_v7 }
 0x61e   : > { %3390 = vmatmul.f32.gmra.mxu3 %v3318_v56 }
 0x620   : > { %v10746_v27 = vpop.f32.mrf.mxu3 }
 0x621   : > { %14247 = vst [vmem:[#allocation109_spill] sm:$0xff] %v10746_v27  ;;  %v14250_v27 = vld [vmem:[#allocation42_spill] sm:$0xff] }
 0x622   : > { %v8114_v18 = vpop.eup %8113 }
 0x623   : > { %v2276_v43 = vmul.f32 %v8114_v18, %v10637_v53  ;;  %v2156_v1 = vpop.xlane.xlu1 %2155  ;;  %v2030_v63 = vpop.xlane.xlu0 %2029 }
 0x624   : > { %v2076_v14 = vsub.f32 %v10625_v44, %v2030_v63  ;;  %v3320_v63 = vmul.f32 %v10670_v61, %v14250_v27 }
 0x625   : > { %7685 = vmatmul.msk.f32.vlgmr.msra.gmra.mxu1 %vm1955_vm2, %v2276_v43 }
 0x626   : > { %v2132_v31 = vmul.f32 1.442695, %v2076_v14  ;;  %2888 = vmatpush.xpose.msra.mxu1 %v10350_v24  ;;  %3393 = vmatmul.f32.gmra.mxu3 %v3319_v45 }
 0x628   : > { %8115 = vpow2.f32 %v2132_v31  ;;  %v10754_v56 = vpop.f32.mrf.mxu3 }
 0x629   : > { %14249 = vst [vmem:[#allocation110_spill] sm:$0xff] %v10754_v56 }
 0x62a   : > { %2889 = vmatpush.xpose.msra.mxu1 %v10337_v33 }
 0x62b   : > { %v2036_v7 = vpop.xlane.xlu1 %2035  ;;  %v2153_v53 = vpop.xlane.xlu2 %2152 }
 0x62c   : > { %v2078_v18 = vsub.f32 %v10639_v12, %v2036_v7  ;;  %8117 = vrcp.f32 %v2153_v53 }
 0x62e   : > { %v10760_v44 = vpop.eup %8115  ;;  %v2136_v43 = vmul.f32 1.442695, %v2078_v18  ;;  %2890 = vmatpush.xpose.msra.mxu1 %v10326_v29  ;;  %3396 = vmatmul.f32.gmra.mxu3 %v3320_v63  ;;  %v14252_v18 = vld [vmem:[#allocation44_spill] sm:$0xff] }
 0x62f   : > { %v2220_v31 = vsel %vm1955_vm2, %v10760_v44, 0.0  ;;  %v3321_v27 = vmul.f32 %v10670_v61, %v14252_v18 }
 0x630   : > { %8119 = vpow2.f32 %v2136_v43  ;;  %2221 = vadd.xlane.f32.xlu1 %v2220_v31  ;;  %v10765_v14 = vpop.f32.mrf.mxu3 }
 0x631   : > { %14251 = vst [vmem:[#allocation111_spill] sm:$0xff] %v10765_v14  ;;  %8121 = vrcp.f32 %v2156_v1 }
 0x632   : > { %2891 = vmatpush.xpose.msra.mxu1 %v10313_v47  ;;  %v8118_v12 = vpop.eup %8117 }
 0x633   : > { %v2165_v45 = vpop.xlane.xlu1 %2164  ;;  %v2033_v53 = vpop.xlane.xlu2 %2032  ;;  %v2277_v56 = vmul.f32 %v8118_v12, %v10660_v13  ;;  %v14254_v12 = vld [vmem:[#allocation65_spill] sm:$0xff] }
 0x634   : > { %v2159_v7 = vpop.xlane.xlu0 %2158  ;;  %v2077_v63 = vsub.f32 %v10630_v0, %v2033_v53 }
 0x635   : > { %7686 = vmatmul.msk.f32.gmra.mxu1 %vm1955_vm2, %v2277_v56 }
 0x636   : > { %v10772_v29 = vpop.eup %8119  ;;  %3399 = vmatmul.f32.gmra.mxu3 %v3321_v27  ;;  %v2134_v43 = vmul.f32 1.442695, %v2077_v63  ;;  %2892 = vmatpush.xpose.msra.mxu1 %v10300_v10  ;;  %v14255_v27 = vld [vmem:[#allocation48_spill] sm:$0xff] }
 0x637   : > { %v2226_v1 = vsel %vm1955_vm2, %v10772_v29, 0.0  ;;  %v8122_v31 = vpop.eup %8121  ;;  %v3322_v63 = vmul.f32 %v10670_v61, %v14255_v27 }
 0x638   : > { %2227 = vadd.xlane.f32.xlu1 %v2226_v1  ;;  %8123 = vpow2.f32 %v2134_v43  ;;  %v2278_v56 = vmul.f32 %v8122_v31, %v10646_v11 }
 0x639   : > { %v10778_v13 = vpop.f32.mrf.mxu3  ;;  %8125 = vrcp.f32 %v2159_v7 }
 0x63a   : > { %14253 = vst [vmem:[#allocation112_spill] sm:$0xff] %v10778_v13  ;;  %2893 = vmatpush.xpose.msra.mxu1 %v14254_v12  ;;  %v14256_v13 = vld [vmem:[#allocation62_spill] sm:$0xff]  ;;  %v1980_v12 = vsel %vm1955_vm2, %v10502_v5, -inf }
 0x63b   : > { %v2045_v0 = vpop.xlane.xlu1 %2044  ;;  %v2162_v53 = vpop.xlane.xlu2 %2161 }
 0x63c   : > { %v2039_v14 = vpop.xlane.xlu0 %2038  ;;  %v2081_v7 = vsub.f32 %v10685_v17, %v2045_v0 }
 0x63d   : > { %v2079_v18 = vsub.f32 %v10653_v59, %v2039_v14  ;;  %7687 = vmatmul.msk.f32.gmra.mxu1 %vm1955_vm2, %v2278_v56  ;;  %v14258_v56 = vld [vmem:[#allocation60_spill] sm:$0xff] }
 0x63e   : > { %3402 = vmatmul.f32.gmra.mxu3 %v3322_v63  ;;  %v10786_v1 = vpop.eup %8123  ;;  %2894 = vmatpush.xpose.msra.mxu1 %v14256_v13  ;;  %v2142_v14 = vmul.f32 1.442695, %v2081_v7  ;;  %v14259_v63 = vld [vmem:[#allocation51_spill] sm:$0xff] }
 0x63f   : > { %v2138_v43 = vmul.f32 1.442695, %v2079_v18  ;;  %v2223_v11 = vsel %vm1955_vm2, %v10786_v1, 0.0  ;;  %v8126_v31 = vpop.eup %8125  ;;  %v3323_v27 = vmul.f32 %v10670_v61, %v14259_v63  ;;  %v14279_v63 = vld [vmem:[#allocation83_spill] sm:$0xff] }
 0x640   : > { %1981 = vmax.xlane.f32.xlu1 %v1980_v12  ;;  %2224 = vadd.xlane.f32.xlu0 %v2223_v11  ;;  %v2279_v0 = vmul.f32 %v8126_v31, %v10676_v15 }
 0x641   : > { %8127 = vpow2.f32 %v2138_v43  ;;  %v10794_v59 = vpop.f32.mrf.mxu3 }
 0x642   : > { %14257 = vst [vmem:[#allocation113_spill] sm:$0xff] %v10794_v59  ;;  %8129 = vrcp.f32 %v2162_v53  ;;  %2895 = vmatpush.xpose.msra.mxu1 %v14258_v56  ;;  %v14280_v56 = vld [vmem:[#allocation87_spill] sm:$0xff] }
 0x643   : > { %v2042_v17 = vpop.xlane.xlu2 %2041  ;;  %8131 = vpow2.f32 %v2142_v14 }
 0x644   : > { %v2168_v18 = vpop.xlane.xlu0 %2167  ;;  %v2080_v12 = vsub.f32 %v10667_v54, %v2042_v17  ;;  %v14261_v17 = vld [vmem:[#allocation53_spill] sm:$0xff] }
 0x645   : > { %7688 = vmatmul.msk.f32.gmra.mxu1 %vm1955_vm2, %v2279_v0 }
 0x646   : > { %3405 = vmatmul.f32.gmra.mxu3 %v3323_v27  ;;  %v2140_v11 = vmul.f32 1.442695, %v2080_v12  ;;  %v3324_v27 = vmul.f32 %v10670_v61, %v14261_v17 }
 0x647   : > { %v10802_v43 = vpop.eup %8127 }
 0x648   : > { %v2229_v53 = vsel %vm1955_vm2, %v10802_v43, 0.0  ;;  %v8130_v7 = vpop.eup %8129  ;;  %8133 = vpow2.f32 %v2140_v11 }
 0x649   : > { %v10806_v59 = vpop.f32.mrf.mxu3  ;;  %2230 = vadd.xlane.f32.xlu2 %v2229_v53  ;;  %8135 = vrcp.f32 %v2165_v45  ;;  %v2280_v54 = vmul.f32 %v8130_v7, %v10689_v38  ;;  %v10811_v0 = vpop.eup %8131 }
 0x64a   : > { %14260 = vst [vmem:[#allocation114_spill] sm:$0xff] %v10806_v59  ;;  %v2235_v53 = vsel %vm1955_vm2, %v10811_v0, 0.0 }
 0x64b   : > { %v2171_v15 = vpop.xlane.xlu2 %2170 }
 0x64c   : > { %v2048_v31 = vpop.xlane.xlu0 %2047 }
 0x64d   : > { %v2082_v14 = vsub.f32 %v10706_v42, %v2048_v31  ;;  %7689 = vmatmul.msk.f32.gmra.mxu1 %vm1955_vm2, %v2280_v54  ;;  %v14263_v54 = vld [vmem:[#allocation54_spill] sm:$0xff] }
 0x64e   : > { %3408 = vmatmul.f32.gmra.mxu3 %v3324_v27  ;;  %v10815_v12 = vpop.eup %8133  ;;  %v3325_v27 = vmul.f32 %v10670_v61, %v14263_v54 }
 0x64f   : > { %v2144_v11 = vmul.f32 1.442695, %v2082_v14  ;;  %v2232_v45 = vsel %vm1955_vm2, %v10815_v12, 0.0  ;;  %v8136_v38 = vpop.eup %8135 }
 0x650   : > { %2233 = vadd.xlane.f32.xlu0 %v2232_v45  ;;  %v2281_v31 = vmul.f32 %v8136_v38, %v10672_v6  ;;  %v14265_v38 = vld [vmem:[#allocation55_spill] sm:$0xff] }
 0x651   : > { %8137 = vpow2.f32 %v2144_v11  ;;  %v10821_v7 = vpop.f32.mrf.mxu3  ;;  %2236 = vadd.xlane.f32.xlu2 %v2235_v53  ;;  %v1983_v11 = vsel %vm1955_vm2, %v10511_v3, -inf }
 0x652   : > { %14262 = vst [vmem:[#allocation115_spill] sm:$0xff] %v10821_v7  ;;  %8139 = vrcp.f32 %v2168_v18 }
 0x653   : > { %v2051_v42 = vpop.xlane.xlu2 %2050 }
 0x654   : > { %v2083_v14 = vsub.f32 %v10718_v16, %v2051_v42  ;;  %v1986_v16 = vsel %vm1955_vm2, %v10520_v40, -inf  ;;  %v3326_v42 = vmul.f32 %v10670_v61, %v14265_v38 }
 0x655   : > { %7690 = vmatmul.msk.f32.gmra.mxu1 %vm1955_vm2, %v2281_v31 }
 0x656   : > { %3411 = vmatmul.f32.gmra.mxu3 %v3325_v27  ;;  %v2146_v17 = vmul.f32 1.442695, %v2083_v14 }
 0x657   : > { %v10828_v59 = vpop.eup %8137 }
 0x658   : > { %v2238_v18 = vsel %vm1955_vm2, %v10828_v59, 0.0  ;;  %v8140_v45 = vpop.eup %8139  ;;  %8141 = vpow2.f32 %v2146_v17  ;;  %1984 = vmax.xlane.f32.xlu0 %v1983_v11  ;;  %v1989_v17 = vsel %vm1955_vm2, %v10527_v49, -inf }
 0x659   : > { %2239 = vadd.xlane.f32.xlu1 %v2238_v18  ;;  %v10834_v6 = vpop.f32.mrf.mxu3  ;;  %1987 = vmax.xlane.f32.xlu2 %v1986_v16  ;;  %8143 = vrcp.f32 %v2171_v15  ;;  %v2282_v53 = vmul.f32 %v8140_v45, %v10700_v50  ;;  %v1992_v50 = vsel %vm1955_vm2, %v10534_v60, -inf  ;;  %v14267_v18 = vld [vmem:[#allocation56_spill] sm:$0xff]  ;;  %v1998_v16 = vsel %vm1955_vm2, %v10548_v4, -inf }
 0x65a   : > { %14264 = vst [vmem:[#allocation116_spill] sm:$0xff] %v10834_v6  ;;  %v3327_v45 = vmul.f32 %v10670_v61, %v14267_v18  ;;  %v14275_v18 = vld [vmem:[#allocation68_spill] sm:$0xff] }
 0x65d   : > { %7691 = vmatmul.msk.f32.gmra.mxu1 %vm1955_vm2, %v2282_v53  ;;  %v1995_v53 = vsel %vm1955_vm2, %v10541_v58, -inf }
 0x65e   : > { %3414 = vmatmul.f32.gmra.mxu3 %v3326_v42  ;;  %v10842_v31 = vpop.eup %8141 }
 0x65f   : > { %v2241_v27 = vsel %vm1955_vm2, %v10842_v31, 0.0  ;;  %v8144_v14 = vpop.eup %8143 }
 0x660   : > { %2242 = vadd.xlane.f32.xlu0 %v2241_v27  ;;  %v2283_v15 = vmul.f32 %v8144_v14, %v10710_v57  ;;  %v2001_v57 = vsel %vm1955_vm2, %v10555_v62, -inf }
 0x661   : > { %1990 = vmax.xlane.f32.xlu1 %v1989_v17  ;;  %v10848_v11 = vpop.f32.mrf.mxu3  ;;  %1993 = vmax.xlane.f32.xlu2 %v1992_v50  ;;  %v14269_v17 = vld [vmem:[#allocation57_spill] sm:$0xff]  ;;  %v14271_v50 = vld [vmem:[#allocation58_spill] sm:$0xff] }
 0x662   : > { %14266 = vst [vmem:[#allocation117_spill] sm:$0xff] %v10848_v11  ;;  %v3328_v27 = vmul.f32 %v10670_v61, %v14269_v17  ;;  %v14274_v11 = vld [vmem:[#allocation64_spill] sm:$0xff] }
 0x665   : > { %7692 = vmatmul.msk.f32.gmra.mxu1 %vm1955_vm2, %v2283_v15  ;;  %v3329_v15 = vmul.f32 %v10670_v61, %v14271_v50 }
 0x666   : > { %3417 = vmatmul.f32.gmra.mxu3 %v3327_v45 }
 0x668   : > { %1996 = vmax.xlane.f32.xlu0 %v1995_v53 }
 0x669   : > { %1999 = vmax.xlane.f32.xlu1 %v1998_v16  ;;  %v10860_v42 = vpop.f32.mrf.mxu3  ;;  %v14273_v16 = vld [vmem:[#allocation61_spill] sm:$0xff] }
 0x66a   : > { %14268 = vst [vmem:[#allocation118_spill] sm:$0xff] %v10860_v42  ;;  %v3330_v6 = vmul.f32 %v10670_v61, %v14273_v16  ;;  %v14276_v42 = vld [vmem:[#allocation72_spill] sm:$0xff] }
 0x66e   : > { %3420 = vmatmul.f32.gmra.mxu3 %v3328_v27  ;;  %v3331_v27 = vmul.f32 %v10670_v61, %v14274_v11  ;;  %v14278_v11 = vld [vmem:[#allocation79_spill] sm:$0xff] }
 0x670   : > { %2002 = vmax.xlane.f32.xlu0 %v2001_v57 }
 0x671   : > { %v10866_v14 = vpop.f32.mrf.mxu3 }
 0x672   : > { %14270 = vst [vmem:[#allocation119_spill] sm:$0xff] %v10866_v14  ;;  %v3332_v14 = vmul.f32 %v10670_v61, %v14275_v18 }
 0x676   : > { %3423 = vmatmul.f32.gmra.mxu3 %v3329_v15  ;;  %v3333_v15 = vmul.f32 %v10670_v61, %v14276_v42 }
 0x679   : > { %v10870_v45 = vpop.f32.mrf.mxu3 }
 0x67a   : > { %14272 = vst [vmem:[#allocation120_spill] sm:$0xff] %v10870_v45  ;;  %v14277_v45 = vld [vmem:[#allocation75_spill] sm:$0xff] }
 0x67b   : > { %v3334_v16 = vmul.f32 %v10670_v61, %v14277_v45 }
 0x67e   : > { %3426 = vmatmul.f32.gmra.mxu3 %v3330_v6 }
 0x681   : > { %v3379_v53 = vpop.f32.mrf.mxu3 }
 0x686   : > { %3429 = vmatmul.f32.gmra.mxu3 %v3331_v27  ;;  %v3335_v27 = vmul.f32 %v10670_v61, %v14278_v11  ;;  %v3337_v11 = vmul.f32 %v10670_v61, %v14280_v56 }
 0x689   : > { %v3382_v17 = vpop.f32.mrf.mxu3 }
 0x68e   : > { %3432 = vmatmul.f32.gmra.mxu3 %v3332_v14 }
 0x691   : > { %v3385_v57 = vpop.f32.mrf.mxu3 }
 0x696   : > { %3435 = vmatmul.f32.gmra.mxu3 %v3333_v15  ;;  %v3336_v15 = vmul.f32 %v10670_v61, %v14279_v63 }
 0x699   : > { %v3388_v50 = vpop.f32.mrf.mxu3 }
 0x69e   : > { %3438 = vmatmul.f32.gmra.mxu3 %v3334_v16 }
 0x6a1   : > { %v3391_v6 = vpop.f32.mrf.mxu3 }
 0x6a3   : > { %v2222_v38 = vpop.xlane.xlu1 %2221 }
 0x6a4   : > { %8145 = vrcp.f32 %v2222_v38 }
 0x6a6   : > { %3441 = vmatmul.f32.gmra.mxu3 %v3335_v27 }
 0x6a9   : > { %v3394_v7 = vpop.f32.mrf.mxu3 }
 0x6aa   : > { %v8146_v18 = vpop.eup %8145 }
 0x6ab   : > { %v2300_v14 = vmul.f32 %v8146_v18, %v10760_v44  ;;  %v2228_v54 = vpop.xlane.xlu1 %2227 }
 0x6ad   : > { %7709 = vmatmul.msk.f32.vlgmr.msrb.gmra.mxu1 %vm1955_vm2, %v2300_v14 }
 0x6ae   : > { %3444 = vmatmul.f32.gmra.mxu3 %v3336_v15  ;;  %v14281_v15 = vld [vmem:[#allocation59_spill] sm:$0xff] }
 0x6af   : > { %v3338_v13 = vmul.f32 %v10670_v61, %v14281_v15 }
 0x6b1   : > { %v3397_v45 = vpop.f32.mrf.mxu3 }
 0x6b3   : > { %v1982_v16 = vpop.xlane.xlu1 %1981  ;;  %v2225_v38 = vpop.xlane.xlu0 %2224 }
 0x6b4   : > { %v2060_v42 = vsub.f32 %v10502_v5, %v1982_v16  ;;  %8147 = vrcp.f32 %v2225_v38  ;;  %v14282_v38 = vld [vmem:[#allocation63_spill] sm:$0xff] }
 0x6b6   : > { %v2100_v27 = vmul.f32 1.442695, %v2060_v42  ;;  %3447 = vmatmul.f32.gmra.mxu3 %v3337_v11 }
 0x6b8   : > { %8149 = vpow2.f32 %v2100_v27  ;;  %v3339_v27 = vmul.f32 %v10670_v61, %v14282_v38 }
 0x6b9   : > { %v3400_v44 = vpop.f32.mrf.mxu3  ;;  %8151 = vrcp.f32 %v2228_v54 }
 0x6ba   : > { %3507 = vmatpush.msrb.mxu1 %v3400_v44  ;;  %v8148_v18 = vpop.eup %8147  ;;  %v14283_v44 = vld [vmem:[#allocation67_spill] sm:$0xff] }
 0x6bb   : > { %v2301_v14 = vmul.f32 %v8148_v18, %v10786_v1 }
 0x6bc   : > { %3508 = vmatpush.msrb.mxu1 %v3397_v45  ;;  %v2231_v63 = vpop.xlane.xlu2 %2230 }
 0x6bd   : > { %7710 = vmatmul.msk.f32.gmra.mxu1 %vm1955_vm2, %v2301_v14  ;;  %8153 = vrcp.f32 %v2231_v63 }
 0x6be   : > { %v10894_v5 = vpop.eup %8149  ;;  %3450 = vmatmul.f32.gmra.mxu3 %v3338_v13  ;;  %3509 = vmatpush.msrb.mxu1 %v3394_v7 }
 0x6bf   : > { %v2172_v11 = vsel %vm1955_vm2, %v10894_v5, 0.0  ;;  %v8152_v42 = vpop.eup %8151 }
 0x6c0   : > { %2173 = vadd.xlane.f32.xlu2 %v2172_v11  ;;  %3510 = vmatpush.msrb.mxu1 %v3391_v6  ;;  %v2302_v16 = vmul.f32 %v8152_v42, %v10772_v29  ;;  %v3340_v29 = vmul.f32 %v10670_v61, %v14283_v44 }
 0x6c1   : > { %v10899_v54 = vpop.f32.mrf.mxu3 }
 0x6c2   : > { %3511 = vmatpush.msrb.mxu1 %v3388_v50 }
 0x6c3   : > { %v2234_v1 = vpop.xlane.xlu0 %2233  ;;  %v8154_v13 = vpop.eup %8153 }
 0x6c4   : > { %v2237_v45 = vpop.xlane.xlu2 %2236  ;;  %3512 = vmatpush.msrb.mxu1 %v3385_v57  ;;  %8155 = vrcp.f32 %v2234_v1  ;;  %v2303_v50 = vmul.f32 %v8154_v13, %v10802_v43 }
 0x6c5   : > { %7711 = vmatmul.msk.f32.gmra.mxu1 %vm1955_vm2, %v2302_v16 }
 0x6c6   : > { %3453 = vmatmul.f32.gmra.mxu3 %v3339_v27  ;;  %3513 = vmatpush.msrb.mxu1 %v3382_v17  ;;  %v14284_v27 = vld [vmem:[#allocation71_spill] sm:$0xff] }
 0x6c8   : > { %3514 = vmatpush.msrb.mxu1 %v3379_v53 }
 0x6c9   : > { %v10905_v7 = vpop.f32.mrf.mxu3 }
 0x6ca   : > { %v8156_v11 = vpop.eup %8155 }
 0x6cb   : > { %v1985_v63 = vpop.xlane.xlu0 %1984  ;;  %v2304_v16 = vmul.f32 %v8156_v11, %v10815_v12  ;;  %v14285_v11 = vld [vmem:[#allocation76_spill] sm:$0xff] }
 0x6cc   : > { %v2240_v6 = vpop.xlane.xlu1 %2239  ;;  %v2061_v18 = vsub.f32 %v10511_v3, %v1985_v63  ;;  %v1988_v14 = vpop.xlane.xlu2 %1987  ;;  %v3341_v3 = vmul.f32 %v10670_v61, %v14284_v27 }
 0x6cd   : > { %v2062_v57 = vsub.f32 %v10520_v40, %v1988_v14  ;;  %7712 = vmatmul.msk.f32.gmra.mxu1 %vm1955_vm2, %v2303_v50 }
 0x6ce   : > { %3456 = vmatmul.f32.gmra.mxu3 %v3340_v29  ;;  %v2102_v17 = vmul.f32 1.442695, %v2061_v18 }
 0x6cf   : > { %v2104_v53 = vmul.f32 1.442695, %v2062_v57 }
 0x6d0   : > { %8157 = vpow2.f32 %v2102_v17 }
 0x6d1   : > { %v10913_v42 = vpop.f32.mrf.mxu3  ;;  %8159 = vpow2.f32 %v2104_v53 }
 0x6d2   : > { %8161 = vrcp.f32 %v2237_v45 }
 0x6d3   : > { %v2243_v1 = vpop.xlane.xlu0 %2242 }
 0x6d4   : > { %v1991_v43 = vpop.xlane.xlu1 %1990  ;;  %v1994_v13 = vpop.xlane.xlu2 %1993 }
 0x6d5   : > { %v2063_v40 = vsub.f32 %v10527_v49, %v1991_v43  ;;  %v2064_v63 = vsub.f32 %v10534_v60, %v1994_v13  ;;  %7713 = vmatmul.msk.f32.gmra.mxu1 %vm1955_vm2, %v2304_v16  ;;  %v3342_v43 = vmul.f32 %v10670_v61, %v14285_v11 }
 0x6d6   : > { %3459 = vmatmul.f32.gmra.mxu3 %v3341_v3  ;;  %v10921_v50 = vpop.eup %8157 }
 0x6d7   : > { %v2106_v29 = vmul.f32 1.442695, %v2063_v40  ;;  %v10923_v18 = vpop.eup %8159  ;;  %v2108_v45 = vmul.f32 1.442695, %v2064_v63  ;;  %v2175_v12 = vsel %vm1955_vm2, %v10921_v50, 0.0 }
 0x6d8   : > { %v8162_v14 = vpop.eup %8161  ;;  %2176 = vadd.xlane.f32.xlu1 %v2175_v12  ;;  %v2178_v60 = vsel %vm1955_vm2, %v10923_v18, 0.0 }
 0x6d9   : > { %8163 = vpow2.f32 %v2106_v29  ;;  %v10927_v57 = vpop.f32.mrf.mxu3  ;;  %2179 = vadd.xlane.f32.xlu2 %v2178_v60  ;;  %v2305_v53 = vmul.f32 %v8162_v14, %v10811_v0  ;;  %v14286_v14 = vld [vmem:[#allocation81_spill] sm:$0xff] }
 0x6da   : > { %8165 = vpow2.f32 %v2108_v45  ;;  %v3343_v60 = vmul.f32 %v10670_v61, %v14286_v14 }
 0x6db   : > { %8167 = vrcp.f32 %v2240_v6  ;;  %v1997_v17 = vpop.xlane.xlu0 %1996 }
 0x6dc   : > { %v2000_v49 = vpop.xlane.xlu1 %1999  ;;  %v2065_v3 = vsub.f32 %v10541_v58, %v1997_v17 }
 0x6dd   : > { %v2066_v16 = vsub.f32 %v10548_v4, %v2000_v49  ;;  %7714 = vmatmul.msk.f32.gmra.mxu1 %vm1955_vm2, %v2305_v53  ;;  %v10954_v53 = vpop.f32.mrf.mxu1 }
 0x6de   : > { %3462 = vmatmul.f32.gmra.mxu3 %v3342_v43  ;;  %v2110_v63 = vmul.f32 1.442695, %v2065_v3  ;;  %14287 = vst [vmem:[#allocation87_spill] sm:$0xff] %v10954_v53  ;;  %v14294_v53 = vld [vmem:[#allocation95_spill] sm:$0xff] }
 0x6df   : > { %v10937_v40 = vpop.eup %8163  ;;  %v2112_v13 = vmul.f32 1.442695, %v2066_v16 }
 0x6e0   : > { %v10939_v29 = vpop.eup %8165  ;;  %v2181_v6 = vsel %vm1955_vm2, %v10937_v40, 0.0 }
 0x6e1   : > { %v8168_v0 = vpop.eup %8167  ;;  %8169 = vpow2.f32 %v2112_v13  ;;  %v10943_v45 = vpop.f32.mrf.mxu3  ;;  %2182 = vadd.xlane.f32.xlu0 %v2181_v6  ;;  %v2184_v58 = vsel %vm1955_vm2, %v10939_v29, 0.0 }
 0x6e2   : > { %8171 = vpow2.f32 %v2110_v63  ;;  %2185 = vadd.xlane.f32.xlu1 %v2184_v58  ;;  %v2306_v12 = vmul.f32 %v8168_v0, %v10828_v59  ;;  %v3344_v63 = vmul.f32 %v10670_v61, %v10356_v51 }
 0x6e3   : > { %8173 = vrcp.f32 %v2243_v1  ;;  %v2003_v4 = vpop.xlane.xlu0 %2002 }
 0x6e4   : > { %v2067_v49 = vsub.f32 %v10555_v62, %v2003_v4 }
 0x6e5   : > { %7715 = vmatmul.msk.f32.gmra.mxu1 %vm1955_vm2, %v2306_v12  ;;  %v10970_v0 = vpop.f32.mrf.mxu1  ;;  %v14289_v12 = vld [vmem:[#allocation92_spill] sm:$0xff] }
 0x6e6   : > { %3465 = vmatmul.f32.gmra.mxu3 %v3343_v60  ;;  %v2114_v43 = vmul.f32 1.442695, %v2067_v49  ;;  %14288 = vst [vmem:[#allocation59_spill] sm:$0xff] %v10970_v0  ;;  %v2782_v60 = vmul.f32 %v10670_v61, %v14289_v12 }
 0x6e7   : > { %v10952_v17 = vpop.eup %8169 }
 0x6e8   : > { %v10956_v16 = vpop.eup %8171  ;;  %v2190_v1 = vsel %vm1955_vm2, %v10952_v17, 0.0  ;;  %8175 = vpow2.f32 %v2114_v43 }
 0x6e9   : > { %v8174_v3 = vpop.eup %8173  ;;  %v10960_v59 = vpop.f32.mrf.mxu3  ;;  %2191 = vadd.xlane.f32.xlu0 %v2190_v1  ;;  %v2187_v62 = vsel %vm1955_vm2, %v10956_v16, 0.0  ;;  %v14291_v1 = vld [vmem:[#allocation93_spill] sm:$0xff] }
 0x6ea   : > { %2188 = vadd.xlane.f32.xlu2 %v2187_v62  ;;  %v2307_v13 = vmul.f32 %v8174_v3, %v10842_v31  ;;  %v3345_v31 = vmul.f32 %v10670_v61, %v10373_v36  ;;  %v2783_v3 = vmul.f32 %v10670_v61, %v14291_v1  ;;  %v14296_v36 = vld [vmem:[#allocation96_spill] sm:$0xff] }
 0x6eb   : > { %v2786_v12 = vmul.f32 %v10670_v61, %v14296_v36 }
 0x6ed   : > { %7716 = vmatmul.msk.f32.gmra.mxu1 %vm1955_vm2, %v2307_v13  ;;  %v10980_v49 = vpop.f32.mrf.mxu1 }
 0x6ee   : > { %3468 = vmatmul.f32.gmra.mxu3 %v3344_v63  ;;  %v10968_v6 = vpop.eup %8175  ;;  %14290 = vst [vmem:[#allocation63_spill] sm:$0xff] %v10980_v49  ;;  %v14293_v63 = vld [vmem:[#allocation94_spill] sm:$0xff] }
 0x6ef   : > { %v2193_v58 = vsel %vm1955_vm2, %v10968_v6, 0.0 }
 0x6f0   : > { %2194 = vadd.xlane.f32.xlu1 %v2193_v58  ;;  %v2784_v58 = vmul.f32 %v10670_v61, %v14293_v63 }
 0x6f1   : > { %v10974_v4 = vpop.f32.mrf.mxu3 }
 0x6f5   : > { %2896 = vmatmul.f32.vlgmr.msra.gmra.mxu1 %v2782_v60  ;;  %v10986_v13 = vpop.f32.mrf.mxu1  ;;  %v2785_v60 = vmul.f32 %v10670_v61, %v14294_v53  ;;  %v2788_v53 = vmul.f32 %v10670_v61, %v10468_v52 }
 0x6f6   : > { %3471 = vmatmul.f32.gmra.mxu3 %v3345_v31  ;;  %14292 = vst [vmem:[#allocation67_spill] sm:$0xff] %v10986_v13  ;;  %v2787_v13 = vmul.f32 %v10670_v61, %v10457_v19 }
 0x6f9   : > { %v10982_v43 = vpop.f32.mrf.mxu3 }
 0x6fd   : > { %2899 = vmatmul.f32.gmra.mxu1 %v2783_v3  ;;  %v10992_v31 = vpop.f32.mrf.mxu1 }
 0x6fe   : > { %14295 = vst [vmem:[#allocation71_spill] sm:$0xff] %v10992_v31 }
 0x701   : > { %v3427_v62 = vpop.f32.mrf.mxu3 }
 0x705   : > { %2902 = vmatmul.f32.gmra.mxu1 %v2784_v58  ;;  %v10996_v3 = vpop.f32.mrf.mxu1 }
 0x706   : > { %14297 = vst [vmem:[#allocation76_spill] sm:$0xff] %v10996_v3 }
 0x709   : > { %v3430_v0 = vpop.f32.mrf.mxu3 }
 0x70d   : > { %2905 = vmatmul.f32.gmra.mxu1 %v2785_v60  ;;  %v11000_v58 = vpop.f32.mrf.mxu1 }
 0x70e   : > { %14298 = vst [vmem:[#allocation121_spill] sm:$0xff] %v11000_v58 }
 0x711   : > { %v3433_v49 = vpop.f32.mrf.mxu3 }
 0x715   : > { %2908 = vmatmul.f32.gmra.mxu1 %v2786_v12  ;;  %v11004_v31 = vpop.f32.mrf.mxu1  ;;  %v2789_v12 = vmul.f32 %v10670_v61, %v10479_v22 }
 0x716   : > { %14299 = vst [vmem:[#allocation122_spill] sm:$0xff] %v11004_v31 }
 0x719   : > { %v3436_v1 = vpop.f32.mrf.mxu3 }
 0x71d   : > { %2911 = vmatmul.f32.gmra.mxu1 %v2787_v13 }
 0x721   : > { %v3439_v63 = vpop.f32.mrf.mxu3 }
 0x725   : > { %2914 = vmatmul.f32.gmra.mxu1 %v2788_v53 }
 0x729   : > { %v3442_v60 = vpop.f32.mrf.mxu3 }
 0x72a   : > { %v11008_v36 = vpop.f32.mrf.mxu1 }
 0x72b   : > { %14300 = vst [vmem:[#allocation123_spill] sm:$0xff] %v11008_v36 }
 0x72d   : > { %2917 = vmatmul.f32.gmra.mxu1 %v2789_v12 }
 0x731   : > { %v3445_v3 = vpop.f32.mrf.mxu3 }
 0x733   : > { %v2174_v51 = vpop.xlane.xlu2 %2173 }
 0x734   : > { %8177 = vrcp.f32 %v2174_v51 }
 0x739   : > { %v3448_v13 = vpop.f32.mrf.mxu3 }
 0x73a   : > { %v8178_v19 = vpop.eup %8177  ;;  %3637 = vmatpush.msra.mxu0 %v3448_v13  ;;  %v11011_v14 = vpop.f32.mrf.mxu1  ;;  %v14305_v13 = vld [vmem:[#allocation88_spill] sm:$0xff] }
 0x73b   : > { %v2284_v58 = vmul.f32 %v8178_v19, %v10894_v5  ;;  %14301 = vst [vmem:[#allocation124_spill] sm:$0xff] %v11011_v14  ;;  %v14310_v14 = vld [vmem:[#allocation46_spill] sm:$0xff] }
 0x73c   : > { %3638 = vmatpush.msra.mxu0 %v3445_v3 }
 0x73d   : > { %7693 = vmatmul.msk.f32.vlgmr.msrb.gmra.mxu2 %vm1955_vm2, %v2284_v58 }
 0x73e   : > { %2929 = vmatpush.xpose.msrb.mxu2 %v10453_v30  ;;  %3639 = vmatpush.msra.mxu0 %v3442_v60 }
 0x740   : > { %3640 = vmatpush.msra.mxu0 %v3439_v63 }
 0x741   : > { %v11015_v53 = vpop.f32.mrf.mxu3 }
 0x742   : > { %2930 = vmatpush.xpose.msrb.mxu2 %v10442_v21  ;;  %3641 = vmatpush.msra.mxu0 %v3436_v1  ;;  %v11018_v51 = vpop.f32.mrf.mxu1 }
 0x743   : > { %14302 = vst [vmem:[#allocation125_spill] sm:$0xff] %v11018_v51 }
 0x744   : > { %3642 = vmatpush.msra.mxu0 %v3433_v49 }
 0x746   : > { %2931 = vmatpush.xpose.msrb.mxu2 %v10431_v35  ;;  %3643 = vmatpush.msra.mxu0 %v3430_v0 }
 0x748   : > { %3644 = vmatpush.msra.mxu0 %v3427_v62 }
 0x749   : > { %v11021_v19 = vpop.f32.mrf.mxu3 }
 0x74a   : > { %3853 = vmatpush.xpose.msrb.mxu0 %v10250_v28  ;;  %2932 = vmatpush.xpose.msrb.mxu2 %v10420_v41  ;;  %v11025_v5 = vpop.f32.mrf.mxu1 }
 0x74b   : > { %14303 = vst [vmem:[#allocation126_spill] sm:$0xff] %v11025_v5  ;;  %v2177_v63 = vpop.xlane.xlu1 %2176  ;;  %v14308_v5 = vld [vmem:[#allocation50_spill] sm:$0xff] }
 0x74c   : > { %8179 = vrcp.f32 %v2177_v63  ;;  %v2180_v1 = vpop.xlane.xlu2 %2179 }
 0x74d   : > { %8181 = vrcp.f32 %v2180_v1 }
 0x74e   : > { %3854 = vmatpush.xpose.msrb.mxu0 %v10239_v32  ;;  %2933 = vmatpush.xpose.msrb.mxu2 %v10411_v46 }
 0x751   : > { %v3457_v49 = vpop.f32.mrf.mxu3 }
 0x752   : > { %3855 = vmatpush.xpose.msrb.mxu0 %v10230_v26  ;;  %2934 = vmatpush.xpose.msrb.mxu2 %v10398_v39  ;;  %v8180_v0 = vpop.eup %8179  ;;  %v11031_v62 = vpop.f32.mrf.mxu1 }
 0x753   : > { %14304 = vst [vmem:[#allocation127_spill] sm:$0xff] %v11031_v62  ;;  %v2285_v3 = vmul.f32 %v8180_v0, %v10921_v50  ;;  %v8182_v60 = vpop.eup %8181  ;;  %v14307_v62 = vld [vmem:[#allocation52_spill] sm:$0xff] }
 0x754   : > { %v2183_v58 = vpop.xlane.xlu0 %2182  ;;  %v2286_v1 = vmul.f32 %v8182_v60, %v10923_v18 }
 0x755   : > { %7694 = vmatmul.msk.f32.gmra.mxu2 %vm1955_vm2, %v2285_v3  ;;  %8183 = vrcp.f32 %v2183_v58  ;;  %v2186_v50 = vpop.xlane.xlu1 %2185 }
 0x756   : > { %3856 = vmatpush.xpose.msrb.mxu0 %v10221_v55  ;;  %2935 = vmatpush.xpose.msrb.mxu2 %v10383_v34  ;;  %8185 = vrcp.f32 %v2186_v50 }
 0x759   : > { %v3460_v12 = vpop.f32.mrf.mxu3 }
 0x75a   : > { %3857 = vmatpush.xpose.msrb.mxu0 %v10212_v48  ;;  %2936 = vmatpush.xpose.msrb.mxu2 %v14305_v13  ;;  %v11039_v63 = vpop.f32.mrf.mxu1 }
 0x75b   : > { %14306 = vst [vmem:[#allocation128_spill] sm:$0xff] %v11039_v63  ;;  %v8184_v0 = vpop.eup %8183 }
 0x75c   : > { %v2287_v58 = vmul.f32 %v8184_v0, %v10937_v40  ;;  %v8186_v18 = vpop.eup %8185  ;;  %v2192_v31 = vpop.xlane.xlu0 %2191 }
 0x75d   : > { %7695 = vmatmul.msk.f32.gmra.mxu2 %vm1955_vm2, %v2286_v1  ;;  %v2189_v63 = vpop.xlane.xlu2 %2188  ;;  %v2288_v1 = vmul.f32 %v8186_v18, %v10939_v29 }
 0x75e   : > { %3858 = vmatpush.xpose.msrb.mxu0 %v14307_v62  ;;  %8187 = vrcp.f32 %v2189_v63 }
 0x75f   : > { %8189 = vrcp.f32 %v2192_v31 }
 0x761   : > { %v3463_v3 = vpop.f32.mrf.mxu3 }
 0x762   : > { %3859 = vmatpush.xpose.msrb.mxu0 %v14308_v5  ;;  %v11045_v51 = vpop.f32.mrf.mxu1 }
 0x763   : > { %14309 = vst [vmem:[#allocation52_spill] sm:$0xff] %v11045_v51  ;;  %v2195_v63 = vpop.xlane.xlu1 %2194 }
 0x764   : > { %v8188_v50 = vpop.eup %8187  ;;  %8191 = vrcp.f32 %v2195_v63  ;;  %v14316_v63 = vld [vmem:[#allocation43_spill] sm:$0xff] }
 0x765   : > { %7696 = vmatmul.msk.f32.gmra.mxu2 %vm1955_vm2, %v2287_v58  ;;  %v2289_v0 = vmul.f32 %v8188_v50, %v10956_v16  ;;  %v8190_v58 = vpop.eup %8189 }
 0x766   : > { %3860 = vmatpush.xpose.msrb.mxu0 %v14310_v14  ;;  %v2290_v18 = vmul.f32 %v8190_v58, %v10952_v17  ;;  %v14317_v58 = vld [vmem:[#allocation45_spill] sm:$0xff] }
 0x769   : > { %v3466_v60 = vpop.f32.mrf.mxu3 }
 0x76a   : > { %v11050_v36 = vpop.f32.mrf.mxu1  ;;  %v8192_v16 = vpop.eup %8191 }
 0x76b   : > { %14311 = vst [vmem:[#allocation50_spill] sm:$0xff] %v11050_v36 }
 0x76d   : > { %7697 = vmatmul.msk.f32.gmra.mxu2 %vm1955_vm2, %v2288_v1 }
 0x771   : > { %v3469_v13 = vpop.f32.mrf.mxu3 }
 0x772   : > { %v11054_v51 = vpop.f32.mrf.mxu1 }
 0x773   : > { %v3010_v40 = vsel %vm1955_vm2, %v11054_v51, -inf }
 0x774   : > { %3011 = vmax.xlane.f32.xlu2 %v3010_v40 }
 0x775   : > { %7698 = vmatmul.msk.f32.gmra.mxu2 %vm1955_vm2, %v2289_v0 }
 0x779   : > { %v3472_v36 = vpop.f32.mrf.mxu3 }
 0x77a   : > { %3702 = vmatpush.msra.mxu1 %v3472_v36  ;;  %v11060_v29 = vpop.f32.mrf.mxu1 }
 0x77b   : > { %v3013_v31 = vsel %vm1955_vm2, %v11060_v29, -inf }
 0x77c   : > { %3703 = vmatpush.msra.mxu1 %v3469_v13  ;;  %3014 = vmax.xlane.f32.xlu0 %v3013_v31  ;;  %v2291_v13 = vmul.f32 %v8192_v16, %v10968_v6  ;;  %v2771_v31 = vmul.f32 %v10670_v61, %v14317_v58 }
 0x77d   : > { %7699 = vmatmul.msk.f32.gmra.mxu2 %vm1955_vm2, %v2290_v18  ;;  %v14318_v18 = vld [vmem:[#allocation47_spill] sm:$0xff] }
 0x77e   : > { %3704 = vmatpush.msra.mxu1 %v3466_v60  ;;  %v2772_v16 = vmul.f32 %v10670_v61, %v14318_v18 }
 0x780   : > { %3705 = vmatpush.msra.mxu1 %v3463_v3  ;;  %v14312_v3 = vld [vmem:[#allocation36_spill] sm:$0xff] }
 0x782   : > { %3706 = vmatpush.msra.mxu1 %v3460_v12  ;;  %v11066_v1 = vpop.f32.mrf.mxu1  ;;  %v2766_v12 = vmul.f32 %v10670_v61, %v14312_v3 }
 0x783   : > { %v3016_v36 = vsel %vm1955_vm2, %v11066_v1, -inf }
 0x784   : > { %3707 = vmatpush.msra.mxu1 %v3457_v49  ;;  %3017 = vmax.xlane.f32.xlu1 %v3016_v36  ;;  %v14319_v36 = vld [vmem:[#allocation49_spill] sm:$0xff] }
 0x785   : > { %7700 = vmatmul.msk.f32.gmra.mxu2 %vm1955_vm2, %v2291_v13  ;;  %v2773_v13 = vmul.f32 %v10670_v61, %v14319_v36 }
 0x786   : > { %3708 = vmatpush.msra.mxu1 %v11021_v19  ;;  %v14313_v19 = vld [vmem:[#allocation37_spill] sm:$0xff] }
 0x787   : > { %v2767_v60 = vmul.f32 %v10670_v61, %v14313_v19 }
 0x788   : > { %3709 = vmatpush.msra.mxu1 %v11015_v53 }
 0x78a   : > { %v11074_v17 = vpop.f32.mrf.mxu1 }
 0x78b   : > { %v3019_v49 = vsel %vm1955_vm2, %v11074_v17, -inf }
 0x78c   : > { %3020 = vmax.xlane.f32.xlu2 %v3019_v49 }
 0x78d   : > { %2814 = vmatmul.f32.vlgmr.msra.gmra.mxu2 %v2766_v12  ;;  %v14320_v12 = vld [vmem:[#allocation100_spill] sm:$0xff] }
 0x78e   : > { %3572 = vmatpush.msra.mxu2 %v10982_v43  ;;  %v14314_v43 = vld [vmem:[#allocation39_spill] sm:$0xff]  ;;  %v2790_v49 = vmul.f32 %v10670_v61, %v14320_v12 }
 0x78f   : > { %v2768_v50 = vmul.f32 %v10670_v61, %v14314_v43 }
 0x790   : > { %3573 = vmatpush.msra.mxu2 %v10974_v4 }
 0x792   : > { %3574 = vmatpush.msra.mxu2 %v10960_v59  ;;  %v11083_v6 = vpop.f32.mrf.mxu1 }
 0x793   : > { %v3022_v53 = vsel %vm1955_vm2, %v11083_v6, -inf }
 0x794   : > { %3575 = vmatpush.msra.mxu2 %v10943_v45  ;;  %3023 = vmax.xlane.f32.xlu0 %v3022_v53  ;;  %v14321_v53 = vld [vmem:[#allocation32_spill] sm:$0xff] }
 0x795   : > { %2817 = vmatmul.f32.gmra.mxu2 %v2767_v60 }
 0x796   : > { %3576 = vmatpush.msra.mxu2 %v10927_v57 }
 0x798   : > { %3577 = vmatpush.msra.mxu2 %v10913_v42  ;;  %v14315_v42 = vld [vmem:[#allocation41_spill] sm:$0xff] }
 0x79a   : > { %3578 = vmatpush.msra.mxu2 %v10905_v7  ;;  %v11093_v4 = vpop.f32.mrf.mxu1  ;;  %v2769_v7 = vmul.f32 %v10670_v61, %v14315_v42 }
 0x79b   : > { %v3025_v59 = vsel %vm1955_vm2, %v11093_v4, -inf }
 0x79c   : > { %3579 = vmatpush.msra.mxu2 %v10899_v54  ;;  %3026 = vmax.xlane.f32.xlu1 %v3025_v59  ;;  %v2770_v54 = vmul.f32 %v10670_v61, %v14316_v63  ;;  %v14323_v59 = vld [vmem:[#allocation30_spill] sm:$0xff] }
 0x79d   : > { %2820 = vmatmul.f32.gmra.mxu2 %v2768_v50  ;;  %v14324_v50 = vld [vmem:[#allocation101_spill] sm:$0xff] }
 0x7a2   : > { %v11100_v45 = vpop.f32.mrf.mxu1 }
 0x7a3   : > { %v3028_v57 = vsel %vm1955_vm2, %v11100_v45, -inf }
 0x7a4   : > { %3029 = vmax.xlane.f32.xlu2 %v3028_v57  ;;  %v2791_v57 = vmul.f32 %v10670_v61, %v14324_v50 }
 0x7a5   : > { %2823 = vmatmul.f32.gmra.mxu2 %v2769_v7  ;;  %v14325_v7 = vld [vmem:[#allocation29_spill] sm:$0xff] }
 0x7aa   : > { %v11106_v40 = vpop.f32.mrf.mxu1 }
 0x7ab   : > { %v3031_v0 = vsel %vm1955_vm2, %v11106_v40, -inf }
 0x7ac   : > { %3032 = vmax.xlane.f32.xlu1 %v3031_v0 }
 0x7ad   : > { %2826 = vmatmul.f32.gmra.mxu2 %v2770_v54  ;;  %v14327_v54 = vld [vmem:[#allocation28_spill] sm:$0xff] }
 0x7b5   : > { %2829 = vmatmul.f32.gmra.mxu2 %v2771_v31  ;;  %v14328_v31 = vld [vmem:[#allocation102_spill] sm:$0xff] }
 0x7bd   : > { %2832 = vmatmul.f32.gmra.mxu2 %v2772_v16  ;;  %v2792_v16 = vmul.f32 %v10670_v61, %v14328_v31  ;;  %v14335_v31 = vld [vmem:[#allocation24_spill] sm:$0xff] }
 0x7c0   : > { %v11121_v60 = vpop.f32.mrf.mxu2 }
 0x7c1   : > { %14322 = vst [vmem:[#allocation46_spill] sm:$0xff] %v11121_v60  ;;  %v14331_v60 = vld [vmem:[#allocation26_spill] sm:$0xff] }
 0x7c5   : > { %2835 = vmatmul.f32.gmra.mxu2 %v2773_v13  ;;  %v14329_v13 = vld [vmem:[#allocation27_spill] sm:$0xff] }
 0x7cd   : > { %2937 = vmatmul.f32.vlgmr.msrb.gmra.mxu2 %v2790_v49 }
 0x7ce   : > { %3812 = vmatpush.xpose.msrb.mxu2 %v14321_v53 }
 0x7d2   : > { %3813 = vmatpush.xpose.msrb.mxu2 %v14323_v59  ;;  %v14332_v59 = vld [vmem:[#allocation103_spill] sm:$0xff] }
 0x7d3   : > { %v2793_v50 = vmul.f32 %v10670_v61, %v14332_v59 }
 0x7d5   : > { %2940 = vmatmul.f32.gmra.mxu2 %v2791_v57  ;;  %v14333_v57 = vld [vmem:[#allocation25_spill] sm:$0xff] }
 0x7d6   : > { %3814 = vmatpush.xpose.msrb.mxu2 %v14325_v7 }
 0x7d8   : > { %v11127_v0 = vpop.f32.mrf.mxu2 }
 0x7d9   : > { %14326 = vst [vmem:[#allocation36_spill] sm:$0xff] %v11127_v0 }
 0x7da   : > { %3815 = vmatpush.xpose.msrb.mxu2 %v14327_v54 }
 0x7dd   : > { %2943 = vmatmul.f32.gmra.mxu2 %v2792_v16  ;;  %v14336_v16 = vld [vmem:[#allocation104_spill] sm:$0xff] }
 0x7de   : > { %3816 = vmatpush.xpose.msrb.mxu2 %v14329_v13  ;;  %v2794_v13 = vmul.f32 %v10670_v61, %v14336_v16 }
 0x7e0   : > { %v11133_v49 = vpop.f32.mrf.mxu2 }
 0x7e1   : > { %14330 = vst [vmem:[#allocation37_spill] sm:$0xff] %v11133_v49 }
 0x7e2   : > { %3817 = vmatpush.xpose.msrb.mxu2 %v14331_v60 }
 0x7e5   : > { %2946 = vmatmul.f32.gmra.mxu2 %v2793_v50 }
 0x7e6   : > { %3818 = vmatpush.xpose.msrb.mxu2 %v14333_v57 }
 0x7e7   : > { %v3012_v7 = vpop.xlane.xlu2 %3011 }
 0x7e8   : > { %v3074_v0 = vsub.f32 %v11054_v51, %v3012_v7  ;;  %v11140_v54 = vpop.f32.mrf.mxu2  ;;  %v14338_v7 = vld [vmem:[#allocation21_spill] sm:$0xff] }
 0x7e9   : > { %14334 = vst [vmem:[#allocation39_spill] sm:$0xff] %v11140_v54 }
 0x7ea   : > { %v3122_v53 = vmul.f32 1.442695, %v3074_v0  ;;  %3819 = vmatpush.xpose.msrb.mxu2 %v14335_v31  ;;  %v2795_v0 = vmul.f32 %v10670_v61, %v14338_v7 }
 0x7ec   : > { %8193 = vpow2.f32 %v3122_v53 }
 0x7ed   : > { %2949 = vmatmul.f32.gmra.mxu2 %v2794_v13 }
 0x7ef   : > { %v3015_v49 = vpop.xlane.xlu0 %3014 }
 0x7f0   : > { %v3075_v60 = vsub.f32 %v11060_v29, %v3015_v49  ;;  %v11146_v59 = vpop.f32.mrf.mxu2 }
 0x7f1   : > { %14337 = vst [vmem:[#allocation129_spill] sm:$0xff] %v11146_v59  ;;  %v14340_v59 = vld [vmem:[#allocation22_spill] sm:$0xff] }
 0x7f2   : > { %v11148_v50 = vpop.eup %8193  ;;  %v3124_v57 = vmul.f32 1.442695, %v3075_v60  ;;  %v2796_v16 = vmul.f32 %v10670_v61, %v14340_v59 }
 0x7f3   : > { %v3202_v51 = vsel %vm1955_vm2, %v11148_v50, 0.0 }
 0x7f4   : > { %8195 = vpow2.f32 %v3124_v57  ;;  %3203 = vadd.xlane.f32.xlu0 %v3202_v51 }
 0x7f5   : > { %2952 = vmatmul.f32.gmra.mxu2 %v2795_v0 }
 0x7f7   : > { %v3018_v54 = vpop.xlane.xlu1 %3017 }
 0x7f8   : > { %v3076_v53 = vsub.f32 %v11066_v1, %v3018_v54  ;;  %v11155_v13 = vpop.f32.mrf.mxu2 }
 0x7f9   : > { %14339 = vst [vmem:[#allocation130_spill] sm:$0xff] %v11155_v13  ;;  %v14342_v13 = vld [vmem:[#allocation23_spill] sm:$0xff] }
 0x7fa   : > { %v11157_v29 = vpop.eup %8195  ;;  %v3126_v49 = vmul.f32 1.442695, %v3076_v53  ;;  %v2797_v7 = vmul.f32 %v10670_v61, %v14342_v13 }
 0x7fb   : > { %v3205_v60 = vsel %vm1955_vm2, %v11157_v29, 0.0 }
 0x7fc   : > { %8197 = vpow2.f32 %v3126_v49  ;;  %3206 = vadd.xlane.f32.xlu2 %v3205_v60 }
 0x7fd   : > { %2955 = vmatmul.f32.gmra.mxu2 %v2796_v16 }
 0x7ff   : > { %v3021_v57 = vpop.xlane.xlu2 %3020 }
 0x800   : > { %v3077_v51 = vsub.f32 %v11074_v17, %v3021_v57  ;;  %v11164_v0 = vpop.f32.mrf.mxu2 }
 0x801   : > { %14341 = vst [vmem:[#allocation131_spill] sm:$0xff] %v11164_v0 }
 0x802   : > { %v11166_v1 = vpop.eup %8197  ;;  %v3128_v54 = vmul.f32 1.442695, %v3077_v51 }
 0x803   : > { %v3208_v53 = vsel %vm1955_vm2, %v11166_v1, 0.0 }
 0x804   : > { %8199 = vpow2.f32 %v3128_v54  ;;  %3209 = vadd.xlane.f32.xlu0 %v3208_v53 }
 0x805   : > { %2958 = vmatmul.f32.gmra.mxu2 %v2797_v7 }
 0x807   : > { %v3024_v49 = vpop.xlane.xlu0 %3023 }
 0x808   : > { %v3078_v16 = vsub.f32 %v11083_v6, %v3024_v49  ;;  %v11173_v60 = vpop.f32.mrf.mxu2 }
 0x809   : > { %14343 = vst [vmem:[#allocation132_spill] sm:$0xff] %v11173_v60 }
 0x80a   : > { %v11175_v17 = vpop.eup %8199  ;;  %v3130_v57 = vmul.f32 1.442695, %v3078_v16 }
 0x80b   : > { %v3211_v51 = vsel %vm1955_vm2, %v11175_v17, 0.0 }
 0x80c   : > { %8201 = vpow2.f32 %v3130_v57  ;;  %3212 = vadd.xlane.f32.xlu1 %v3211_v51 }
 0x80f   : > { %v3027_v0 = vpop.xlane.xlu1 %3026 }
 0x810   : > { %v3079_v59 = vsub.f32 %v11093_v4, %v3027_v0  ;;  %v11180_v61 = vpop.f32.mrf.mxu2 }
 0x811   : > { %v2962_v53 = vsel %vm1955_vm2, %v11180_v61, -inf }
 0x812   : > { %v11182_v54 = vpop.eup %8201  ;;  %v3132_v7 = vmul.f32 1.442695, %v3079_v59 }
 0x813   : > { %v3214_v6 = vsel %vm1955_vm2, %v11182_v54, 0.0 }
 0x814   : > { %8203 = vpow2.f32 %v3132_v7  ;;  %3215 = vadd.xlane.f32.xlu2 %v3214_v6  ;;  %2963 = vmax.xlane.f32.xlu1 %v2962_v53 }
 0x817   : > { %v3030_v49 = vpop.xlane.xlu2 %3029 }
 0x818   : > { %v3080_v16 = vsub.f32 %v11100_v45, %v3030_v49  ;;  %v11189_v57 = vpop.f32.mrf.mxu2 }
 0x819   : > { %v2965_v45 = vsel %vm1955_vm2, %v11189_v57, -inf }
 0x81a   : > { %v11191_v4 = vpop.eup %8203  ;;  %v3134_v0 = vmul.f32 1.442695, %v3080_v16 }
 0x81b   : > { %v3217_v59 = vsel %vm1955_vm2, %v11191_v4, 0.0 }
 0x81c   : > { %8205 = vpow2.f32 %v3134_v0  ;;  %3218 = vadd.xlane.f32.xlu0 %v3217_v59 }
 0x81f   : > { %v3033_v51 = vpop.xlane.xlu1 %3032 }
 0x820   : > { %v3081_v60 = vsub.f32 %v11106_v40, %v3033_v51  ;;  %v11196_v13 = vpop.f32.mrf.mxu2 }
 0x822   : > { %v11198_v7 = vpop.eup %8205  ;;  %v3136_v6 = vmul.f32 1.442695, %v3081_v60  ;;  %v2968_v60 = vsel %vm1955_vm2, %v11196_v13, -inf }
 0x823   : > { %v3220_v53 = vsel %vm1955_vm2, %v11198_v7, 0.0 }
 0x824   : > { %8207 = vpow2.f32 %v3136_v6  ;;  %2966 = vmax.xlane.f32.xlu0 %v2965_v45  ;;  %3221 = vadd.xlane.f32.xlu2 %v3220_v53 }
 0x828   : > { %v11204_v49 = vpop.f32.mrf.mxu2 }
 0x829   : > { %v2971_v40 = vsel %vm1955_vm2, %v11204_v49, -inf }
 0x82a   : > { %v11206_v16 = vpop.eup %8207 }
 0x82b   : > { %v3223_v0 = vsel %vm1955_vm2, %v11206_v16, 0.0 }
 0x82c   : > { %2972 = vmax.xlane.f32.xlu0 %v2971_v40  ;;  %3224 = vadd.xlane.f32.xlu1 %v3223_v0 }
 0x82d   : > { %2969 = vmax.xlane.f32.xlu2 %v2968_v60 }
 0x830   : > { %v11214_v59 = vpop.f32.mrf.mxu2 }
 0x831   : > { %v2974_v51 = vsel %vm1955_vm2, %v11214_v59, -inf }
 0x834   : > { %2975 = vmax.xlane.f32.xlu1 %v2974_v51 }
 0x838   : > { %v11218_v6 = vpop.f32.mrf.mxu2 }
 0x839   : > { %v2977_v45 = vsel %vm1955_vm2, %v11218_v6, -inf }
 0x83a   : > { %2978 = vmax.xlane.f32.xlu2 %v2977_v45 }
 0x840   : > { %v11222_v53 = vpop.f32.mrf.mxu2 }
 0x841   : > { %v2980_v40 = vsel %vm1955_vm2, %v11222_v53, -inf }
 0x842   : > { %2981 = vmax.xlane.f32.xlu0 %v2980_v40 }
 0x848   : > { %v11226_v0 = vpop.f32.mrf.mxu2 }
 0x849   : > { %v2983_v60 = vsel %vm1955_vm2, %v11226_v0, -inf }
 0x84a   : > { %2984 = vmax.xlane.f32.xlu2 %v2983_v60 }
 0x867   : > { %v3204_v31 = vpop.xlane.xlu0 %3203 }
 0x868   : > { %8209 = vrcp.f32 %v3204_v31 }
 0x86e   : > { %v8210_v51 = vpop.eup %8209 }
 0x86f   : > { %v3298_v12 = vmul.f32 %v8210_v51, %v11148_v50  ;;  %v3207_v36 = vpop.xlane.xlu2 %3206 }
 0x870   : > { %8211 = vrcp.f32 %v3207_v36 }
 0x871   : > { %7734 = vmatmul.msk.f32.vlgmr.msra.gmra.mxu0 %vm1955_vm2, %v3298_v12  ;;  %v11237_v12 = vpop.f32.mrf.mxu2 }
 0x876   : > { %v8212_v45 = vpop.eup %8211 }
 0x877   : > { %v3210_v18 = vpop.xlane.xlu0 %3209  ;;  %v3299_v58 = vmul.f32 %v8212_v45, %v11157_v29 }
 0x878   : > { %8213 = vrcp.f32 %v3210_v18 }
 0x879   : > { %7735 = vmatmul.msk.f32.gmra.mxu0 %vm1955_vm2, %v3299_v58  ;;  %v11245_v45 = vpop.f32.mrf.mxu2 }
 0x87e   : > { %v8214_v40 = vpop.eup %8213 }
 0x87f   : > { %v3213_v63 = vpop.xlane.xlu1 %3212  ;;  %v3300_v60 = vmul.f32 %v8214_v40, %v11166_v1 }
 0x880   : > { %8215 = vrcp.f32 %v3213_v63 }
 0x881   : > { %7736 = vmatmul.msk.f32.gmra.mxu0 %vm1955_vm2, %v3300_v60 }
 0x886   : > { %v8216_v31 = vpop.eup %8215 }
 0x887   : > { %v2964_v50 = vpop.xlane.xlu1 %2963  ;;  %v3216_v51 = vpop.xlane.xlu2 %3215  ;;  %v3301_v36 = vmul.f32 %v8216_v31, %v11175_v17 }
 0x888   : > { %v3058_v42 = vsub.f32 %v11180_v61, %v2964_v50  ;;  %8217 = vrcp.f32 %v3216_v51  ;;  %v3034_v50 = vsel %vm1955_vm2, %v11237_v12, -inf  ;;  %v11254_v51 = vpop.f32.mrf.mxu2 }
 0x889   : > { %7737 = vmatmul.msk.f32.gmra.mxu0 %vm1955_vm2, %v3301_v36 }
 0x88a   : > { %v3090_v58 = vmul.f32 1.442695, %v3058_v42 }
 0x88c   : > { %8219 = vpow2.f32 %v3090_v58 }
 0x88e   : > { %v8218_v18 = vpop.eup %8217 }
 0x88f   : > { %v3219_v29 = vpop.xlane.xlu0 %3218  ;;  %v3302_v63 = vmul.f32 %v8218_v18, %v11182_v54 }
 0x890   : > { %8221 = vrcp.f32 %v3219_v29 }
 0x891   : > { %7738 = vmatmul.msk.f32.gmra.mxu0 %vm1955_vm2, %v3302_v63 }
 0x892   : > { %v11243_v1 = vpop.eup %8219 }
 0x893   : > { %v3154_v17 = vsel %vm1955_vm2, %v11243_v1, 0.0 }
 0x894   : > { %3155 = vadd.xlane.f32.xlu1 %v3154_v17 }
 0x896   : > { %v8222_v61 = vpop.eup %8221 }
 0x897   : > { %v2967_v40 = vpop.xlane.xlu0 %2966  ;;  %v3222_v60 = vpop.xlane.xlu2 %3221  ;;  %v3303_v42 = vmul.f32 %v8222_v61, %v11191_v4 }
 0x898   : > { %v3059_v31 = vsub.f32 %v11189_v57, %v2967_v40  ;;  %8223 = vrcp.f32 %v3222_v60 }
 0x899   : > { %7739 = vmatmul.msk.f32.gmra.mxu0 %vm1955_vm2, %v3303_v42 }
 0x89a   : > { %v3092_v54 = vmul.f32 1.442695, %v3059_v31 }
 0x89c   : > { %8225 = vpow2.f32 %v3092_v54  ;;  %3035 = vmax.xlane.f32.xlu1 %v3034_v50 }
 0x89e   : > { %v8224_v36 = vpop.eup %8223 }
 0x89f   : > { %v2973_v58 = vpop.xlane.xlu0 %2972  ;;  %v3225_v18 = vpop.xlane.xlu1 %3224  ;;  %v3304_v29 = vmul.f32 %v8224_v36, %v11198_v7 }
 0x8a0   : > { %v3061_v4 = vsub.f32 %v11204_v49, %v2973_v58  ;;  %8227 = vrcp.f32 %v3225_v18  ;;  %v2970_v57 = vpop.xlane.xlu2 %2969  ;;  %v11264_v7 = vpop.f32.mrf.mxu2  ;;  %v3037_v58 = vsel %vm1955_vm2, %v11245_v45, -inf }
 0x8a1   : > { %v3060_v63 = vsub.f32 %v11196_v13, %v2970_v57  ;;  %7740 = vmatmul.msk.f32.gmra.mxu0 %vm1955_vm2, %v3304_v29  ;;  %v11282_v29 = vsel %vm3769_vm8, 1.0, %v14233_v20 }
 0x8a2   : > { %v11260_v17 = vpop.eup %8225  ;;  %v3096_v61 = vmul.f32 1.442695, %v3061_v4  ;;  %v3780_v57 = vmul.f32 %v11282_v29, %v14234_v2 }
 0x8a3   : > { %v3094_v40 = vmul.f32 1.442695, %v3060_v63  ;;  %v3157_v60 = vsel %vm1955_vm2, %v11260_v17, 0.0 }
 0x8a4   : > { %8229 = vpow2.f32 %v3096_v61  ;;  %3158 = vadd.xlane.f32.xlu0 %v3157_v60 }
 0x8a5   : > { %8231 = vpow2.f32 %v3094_v40  ;;  %v4367_v40 = vld [vmem:[#allocation8 + $0x78] sm:$0xff] }
 0x8a6   : > { %v8228_v42 = vpop.eup %8227  ;;  %4368 = vmatpush.msra.mxu0 %v4367_v40 }
 0x8a7   : > { %v2976_v49 = vpop.xlane.xlu1 %2975  ;;  %v3305_v31 = vmul.f32 %v8228_v42, %v11206_v16  ;;  %v4366_v42 = vld [vmem:[#allocation8 + $0x70] sm:$0xff] }
 0x8a8   : > { %v3062_v13 = vsub.f32 %v11214_v59, %v2976_v49  ;;  %v11287_v63 = vpop.f32.mrf.mxu2  ;;  %v3043_v49 = vsel %vm1955_vm2, %v11264_v7, -inf  ;;  %4369 = vmatpush.msra.mxu0 %v4366_v42  ;;  %v4362_v42 = vld [vmem:[#allocation8 + $0x50] sm:$0xff] }
 0x8a9   : > { %7741 = vmatmul.msk.f32.gmra.mxu0 %vm1955_vm2, %v3305_v31  ;;  %v3046_v40 = vsel %vm1955_vm2, %v11287_v63, -inf }
 0x8aa   : > { %v11271_v54 = vpop.eup %8229  ;;  %v3098_v50 = vmul.f32 1.442695, %v3062_v13  ;;  %v4365_v13 = vld [vmem:[#allocation8 + $0x68] sm:$0xff] }
 0x8ab   : > { %v11273_v36 = vpop.eup %8231  ;;  %v3163_v16 = vsel %vm1955_vm2, %v11271_v54, 0.0  ;;  %4370 = vmatpush.msra.mxu0 %v4365_v13  ;;  %v14344_v13 = vld [vmem:[#allocation74_spill] sm:$0xff] }
 0x8ac   : > { %8233 = vpow2.f32 %v3098_v50  ;;  %3038 = vmax.xlane.f32.xlu0 %v3037_v58  ;;  %3164 = vadd.xlane.f32.xlu1 %v3163_v16  ;;  %v3160_v59 = vsel %vm1955_vm2, %v11273_v36, 0.0  ;;  %v3781_v16 = vmul.f32 %v11282_v29, %v14235_v23  ;;  %v14349_v23 = vld [vmem:[#allocation91_spill] sm:$0xff] }
 0x8ad   : > { %3161 = vadd.xlane.f32.xlu2 %v3160_v59  ;;  %v2979_v18 = vpop.xlane.xlu2 %2978  ;;  %v4364_v59 = vld [vmem:[#allocation8 + $0x60] sm:$0xff] }
 0x8ae   : > { %v3063_v4 = vsub.f32 %v11218_v6, %v2979_v18  ;;  %v3040_v6 = vsel %vm1955_vm2, %v11254_v51, -inf  ;;  %4371 = vmatpush.msra.mxu0 %v4364_v59 }
 0x8b0   : > { %v3100_v61 = vmul.f32 1.442695, %v3063_v4 }
 0x8b1   : > { %3861 = vmatmul.f32.vlgmr.msrb.gmra.mxu0 %v3780_v57  ;;  %v4363_v57 = vld [vmem:[#allocation8 + $0x58] sm:$0xff] }
 0x8b2   : > { %v11289_v60 = vpop.eup %8233  ;;  %8235 = vpow2.f32 %v3100_v61  ;;  %v11302_v61 = vpop.f32.mrf.mxu2  ;;  %4372 = vmatpush.msra.mxu0 %v4363_v57  ;;  %v4358_v57 = vld [vmem:[#allocation8 + $0x30] sm:$0xff] }
 0x8b3   : > { %v3166_v31 = vsel %vm1955_vm2, %v11289_v60, 0.0 }
 0x8b4   : > { %3044 = vmax.xlane.f32.xlu1 %v3043_v49  ;;  %3167 = vadd.xlane.f32.xlu0 %v3166_v31  ;;  %v4361_v31 = vld [vmem:[#allocation8 + $0x48] sm:$0xff] }
 0x8b5   : > { %3041 = vmax.xlane.f32.xlu2 %v3040_v6  ;;  %v2982_v50 = vpop.xlane.xlu0 %2981  ;;  %4373 = vmatpush.msra.mxu0 %v4362_v42  ;;  %v4357_v42 = vld [vmem:[#allocation8 + $0x28] sm:$0xff] }
 0x8b6   : > { %v3064_v58 = vsub.f32 %v11222_v53, %v2982_v50  ;;  %v3782_v50 = vmul.f32 %v11282_v29, %v14344_v13  ;;  %v4352_v13 = vld [vmem:[#allocation8] sm:$0xff] }
 0x8b7   : > { %4374 = vmatpush.msra.mxu0 %v4361_v31 }
 0x8b8   : > { %v3102_v18 = vmul.f32 1.442695, %v3064_v58  ;;  %v11300_v4 = vpop.eup %8235  ;;  %v4360_v58 = vld [vmem:[#allocation8 + $0x40] sm:$0xff] }
 0x8b9   : > { %3864 = vmatmul.f32.gmra.mxu0 %v3781_v16  ;;  %v3169_v53 = vsel %vm1955_vm2, %v11300_v4, 0.0 }
 0x8ba   : > { %8237 = vpow2.f32 %v3102_v18  ;;  %4375 = vmatpush.msra.mxu0 %v4360_v58 }
 0x8bc   : > { %3047 = vmax.xlane.f32.xlu0 %v3046_v40  ;;  %v4359_v40 = vld [vmem:[#allocation8 + $0x38] sm:$0xff] }
 0x8bd   : > { %3170 = vadd.xlane.f32.xlu2 %v3169_v53  ;;  %v2985_v49 = vpop.xlane.xlu2 %2984  ;;  %v11315_v53 = vpop.f32.mrf.mxu2  ;;  %4376 = vmatpush.msra.mxu0 %v4359_v40  ;;  %v4354_v40 = vld [vmem:[#allocation8 + $0x10] sm:$0xff] }
 0x8be   : > { %v3065_v6 = vsub.f32 %v11226_v0, %v2985_v49  ;;  %v3049_v0 = vsel %vm1955_vm2, %v11302_v61, -inf  ;;  %v14345_v49 = vld [vmem:[#allocation78_spill] sm:$0xff]  ;;  %v3052_v58 = vsel %vm1955_vm2, %v11315_v53, -inf }
 0x8bf   : > { %4377 = vmatpush.msra.mxu0 %v4358_v57  ;;  %v3783_v31 = vmul.f32 %v11282_v29, %v14345_v49 }
 0x8c0   : > { %v11311_v16 = vpop.eup %8237  ;;  %v3104_v59 = vmul.f32 1.442695, %v3065_v6 }
 0x8c1   : > { %3867 = vmatmul.f32.gmra.mxu0 %v3782_v50  ;;  %v3172_v18 = vsel %vm1955_vm2, %v11311_v16, 0.0  ;;  %v4356_v50 = vld [vmem:[#allocation8 + $0x20] sm:$0xff] }
 0x8c2   : > { %8239 = vpow2.f32 %v3104_v59  ;;  %3173 = vadd.xlane.f32.xlu1 %v3172_v18  ;;  %4378 = vmatpush.msra.mxu0 %v4357_v42  ;;  %v4355_v18 = vld [vmem:[#allocation8 + $0x18] sm:$0xff]  ;;  %v4353_v42 = vld [vmem:[#allocation8 + $0x8] sm:$0xff] }
 0x8c4   : > { %4379 = vmatpush.msra.mxu0 %v4356_v50 }
 0x8c5   : > { %3050 = vmax.xlane.f32.xlu2 %v3049_v0  ;;  %v11327_v57 = vpop.f32.mrf.mxu2  ;;  %v14346_v0 = vld [vmem:[#allocation82_spill] sm:$0xff] }
 0x8c6   : > { %4380 = vmatpush.msra.mxu0 %v4355_v18  ;;  %v3784_v49 = vmul.f32 %v11282_v29, %v14346_v0  ;;  %v14351_v0 = vld [vmem:[#allocation31_spill] sm:$0xff] }
 0x8c7   : > { %v4320_v2 = vmul.f32 %v11282_v29, %v14351_v0  ;;  %v14388_v0 = vld [vmem:[#allocation64_spill] sm:$0xff] }
 0x8c8   : > { %v11321_v6 = vpop.eup %8239  ;;  %4381 = vmatpush.msra.mxu0 %v4354_v40  ;;  %v3787_v40 = vmul.f32 %v11282_v29, %v14349_v23 }
 0x8c9   : > { %3870 = vmatmul.f32.gmra.mxu0 %v3783_v31  ;;  %v3175_v59 = vsel %vm1955_vm2, %v11321_v6, 0.0  ;;  %v3055_v31 = vsel %vm1955_vm2, %v11327_v57, -inf }
 0x8ca   : > { %3053 = vmax.xlane.f32.xlu1 %v3052_v58  ;;  %3176 = vadd.xlane.f32.xlu0 %v3175_v59  ;;  %v14347_v58 = vld [vmem:[#allocation85_spill] sm:$0xff] }
 0x8cb   : > { %4382 = vmatpush.msra.mxu0 %v4353_v42  ;;  %v3785_v50 = vmul.f32 %v11282_v29, %v14347_v58  ;;  %v14348_v59 = vld [vmem:[#allocation89_spill] sm:$0xff]  ;;  %v14389_v58 = vld [vmem:[#allocation68_spill] sm:$0xff] }
 0x8cc   : > { %v3786_v18 = vmul.f32 %v11282_v29, %v14348_v59  ;;  %v14355_v59 = vld [vmem:[#allocation34_spill] sm:$0xff] }
 0x8cd   : > { %4383 = vmatpush.msra.mxu0 %v4352_v13  ;;  %v14353_v13 = vld [vmem:[#allocation33_spill] sm:$0xff] }
 0x8d1   : > { %3873 = vmatmul.f32.gmra.mxu0 %v3784_v49 }
 0x8d2   : > { %3056 = vmax.xlane.f32.xlu0 %v3055_v31  ;;  %v4321_v31 = vmul.f32 %v11282_v29, %v14353_v13 }
 0x8d9   : > { %3876 = vmatmul.f32.gmra.mxu0 %v3785_v50 }
 0x8e1   : > { %3879 = vmatmul.f32.gmra.mxu0 %v3786_v18  ;;  %v4322_v18 = vmul.f32 %v11282_v29, %v14355_v59 }
 0x8e9   : > { %3882 = vmatmul.f32.gmra.mxu0 %v3787_v40 }
 0x8ee   : > { %v11339_v49 = vpop.f32.mrf.mxu0 }
 0x8ef   : > { %14350 = vst [vmem:[#allocation133_spill] sm:$0xff] %v11339_v49  ;;  %v4323_v49 = vmul.f32 %v11282_v29, %v14244_v25 }
 0x8f1   : > { %4384 = vmatmul.f32.vlgmr.msra.gmra.mxu0 %v4320_v2 }
 0x8f6   : > { %v11343_v42 = vpop.f32.mrf.mxu0 }
 0x8f7   : > { %14352 = vst [vmem:[#allocation134_spill] sm:$0xff] %v11343_v42 }
 0x8f9   : > { %4387 = vmatmul.f32.gmra.mxu0 %v4321_v31 }
 0x8fe   : > { %v11347_v50 = vpop.f32.mrf.mxu0 }
 0x8ff   : > { %14354 = vst [vmem:[#allocation135_spill] sm:$0xff] %v11347_v50  ;;  %v4324_v50 = vmul.f32 %v11282_v29, %v14246_v37 }
 0x901   : > { %4390 = vmatmul.f32.gmra.mxu0 %v4322_v18 }
 0x906   : > { %v11351_v23 = vpop.f32.mrf.mxu0 }
 0x907   : > { %14356 = vst [vmem:[#allocation136_spill] sm:$0xff] %v11351_v23  ;;  %v3156_v40 = vpop.xlane.xlu1 %3155  ;;  %v14387_v23 = vld [vmem:[#allocation61_spill] sm:$0xff] }
 0x908   : > { %8241 = vrcp.f32 %v3156_v40 }
 0x909   : > { %4393 = vmatmul.f32.gmra.mxu0 %v4323_v49 }
 0x90e   : > { %v8242_v2 = vpop.eup %8241  ;;  %v11355_v42 = vpop.f32.mrf.mxu0 }
 0x90f   : > { %14357 = vst [vmem:[#allocation137_spill] sm:$0xff] %v11355_v42  ;;  %v3282_v13 = vmul.f32 %v8242_v2, %v11243_v1  ;;  %v3036_v31 = vpop.xlane.xlu1 %3035  ;;  %v4325_v1 = vmul.f32 %v11282_v29, %v14248_v8 }
 0x910   : > { %v3082_v59 = vsub.f32 %v11237_v12, %v3036_v31  ;;  %v14359_v12 = vld [vmem:[#allocation77_spill] sm:$0xff] }
 0x911   : > { %7718 = vmatmul.msk.f32.vlgmr.msrb.gmra.mxu1 %vm1955_vm2, %v3282_v13  ;;  %4396 = vmatmul.f32.gmra.mxu0 %v4324_v50 }
 0x912   : > { %v3138_v18 = vmul.f32 1.442695, %v3082_v59  ;;  %3894 = vmatpush.xpose.msrb.mxu1 %v10350_v24  ;;  %v14361_v24 = vld [vmem:[#allocation42_spill] sm:$0xff] }
 0x914   : > { %8243 = vpow2.f32 %v3138_v18 }
 0x916   : > { %3895 = vmatpush.xpose.msrb.mxu1 %v10337_v33  ;;  %v11364_v49 = vpop.f32.mrf.mxu0 }
 0x917   : > { %14358 = vst [vmem:[#allocation138_spill] sm:$0xff] %v11364_v49  ;;  %v3159_v40 = vpop.xlane.xlu0 %3158 }
 0x918   : > { %8245 = vrcp.f32 %v3159_v40  ;;  %v4326_v40 = vmul.f32 %v11282_v29, %v14361_v24  ;;  %v14364_v24 = vld [vmem:[#allocation44_spill] sm:$0xff] }
 0x919   : > { %4399 = vmatmul.f32.gmra.mxu0 %v4325_v1 }
 0x91a   : > { %v11368_v2 = vpop.eup %8243  ;;  %3896 = vmatpush.xpose.msrb.mxu1 %v14359_v12 }
 0x91b   : > { %v3226_v59 = vsel %vm1955_vm2, %v11368_v2, 0.0 }
 0x91c   : > { %3227 = vadd.xlane.f32.xlu2 %v3226_v59 }
 0x91e   : > { %v8246_v13 = vpop.eup %8245  ;;  %3897 = vmatpush.xpose.msrb.mxu1 %v10313_v47  ;;  %v11374_v50 = vpop.f32.mrf.mxu0  ;;  %v14362_v47 = vld [vmem:[#allocation65_spill] sm:$0xff] }
 0x91f   : > { %14360 = vst [vmem:[#allocation139_spill] sm:$0xff] %v11374_v50  ;;  %v3039_v31 = vpop.xlane.xlu0 %3038  ;;  %v3165_v18 = vpop.xlane.xlu1 %3164  ;;  %v3283_v33 = vmul.f32 %v8246_v13, %v11260_v17 }
 0x920   : > { %v3083_v1 = vsub.f32 %v11245_v45, %v3039_v31  ;;  %v3162_v49 = vpop.xlane.xlu2 %3161  ;;  %v4327_v45 = vmul.f32 %v11282_v29, %v14364_v24 }
 0x921   : > { %8247 = vrcp.f32 %v3162_v49  ;;  %7719 = vmatmul.msk.f32.gmra.mxu1 %vm1955_vm2, %v3283_v33  ;;  %4402 = vmatmul.f32.gmra.mxu0 %v4326_v40 }
 0x922   : > { %v3140_v59 = vmul.f32 1.442695, %v3083_v1  ;;  %3898 = vmatpush.xpose.msrb.mxu1 %v10300_v10 }
 0x924   : > { %8249 = vpow2.f32 %v3140_v59 }
 0x925   : > { %8251 = vrcp.f32 %v3165_v18  ;;  %v14365_v18 = vld [vmem:[#allocation62_spill] sm:$0xff] }
 0x926   : > { %3899 = vmatpush.xpose.msrb.mxu1 %v14362_v47  ;;  %v11383_v12 = vpop.f32.mrf.mxu0 }
 0x927   : > { %14363 = vst [vmem:[#allocation140_spill] sm:$0xff] %v11383_v12  ;;  %v8248_v50 = vpop.eup %8247  ;;  %v3168_v17 = vpop.xlane.xlu0 %3167 }
 0x928   : > { %v3045_v13 = vpop.xlane.xlu1 %3044  ;;  %v3042_v31 = vpop.xlane.xlu2 %3041  ;;  %v3284_v33 = vmul.f32 %v8248_v50, %v11273_v36  ;;  %v14367_v50 = vld [vmem:[#allocation48_spill] sm:$0xff] }
 0x929   : > { %v3085_v49 = vsub.f32 %v11264_v7, %v3045_v13  ;;  %v3084_v40 = vsub.f32 %v11254_v51, %v3042_v31  ;;  %4405 = vmatmul.f32.gmra.mxu0 %v4327_v45  ;;  %v14366_v51 = vld [vmem:[#allocation60_spill] sm:$0xff]  ;;  %v4328_v45 = vmul.f32 %v11282_v29, %v14367_v50 }
 0x92a   : > { %v11390_v1 = vpop.eup %8249  ;;  %7720 = vmatmul.msk.f32.gmra.mxu1 %vm1955_vm2, %v3284_v33 }
 0x92b   : > { %v3144_v59 = vmul.f32 1.442695, %v3085_v49  ;;  %v3142_v47 = vmul.f32 1.442695, %v3084_v40  ;;  %3900 = vmatpush.xpose.msrb.mxu1 %v14365_v18  ;;  %v3229_v10 = vsel %vm1955_vm2, %v11390_v1, 0.0  ;;  %v8252_v7 = vpop.eup %8251 }
 0x92c   : > { %3230 = vadd.xlane.f32.xlu1 %v3229_v10  ;;  %v3285_v33 = vmul.f32 %v8252_v7, %v11271_v54  ;;  %v14368_v7 = vld [vmem:[#allocation51_spill] sm:$0xff] }
 0x92d   : > { %8253 = vpow2.f32 %v3144_v59 }
 0x92e   : > { %8255 = vpow2.f32 %v3142_v47  ;;  %v11396_v13 = vpop.f32.mrf.mxu0 }
 0x92f   : > { %8257 = vrcp.f32 %v3168_v17  ;;  %3901 = vmatpush.xpose.msrb.mxu1 %v14366_v51  ;;  %v3048_v36 = vpop.xlane.xlu0 %3047 }
 0x930   : > { %v3086_v49 = vsub.f32 %v11287_v63, %v3048_v36  ;;  %v3171_v31 = vpop.xlane.xlu2 %3170 }
 0x931   : > { %4408 = vmatmul.f32.gmra.mxu0 %v4328_v45  ;;  %v4329_v45 = vmul.f32 %v11282_v29, %v14368_v7 }
 0x932   : > { %v3146_v10 = vmul.f32 1.442695, %v3086_v49  ;;  %7721 = vmatmul.msk.f32.gmra.mxu1 %vm1955_vm2, %v3285_v33 }
 0x933   : > { %v11403_v40 = vpop.eup %8253 }
 0x934   : > { %v11406_v47 = vpop.eup %8255  ;;  %v3235_v17 = vsel %vm1955_vm2, %v11403_v40, 0.0  ;;  %8259 = vpow2.f32 %v3146_v10 }
 0x935   : > { %3236 = vadd.xlane.f32.xlu0 %v3235_v17  ;;  %v3232_v59 = vsel %vm1955_vm2, %v11406_v47, 0.0  ;;  %v8258_v63 = vpop.eup %8257  ;;  %v3174_v36 = vpop.xlane.xlu1 %3173  ;;  %8261 = vrcp.f32 %v3171_v31 }
 0x936   : > { %3233 = vadd.xlane.f32.xlu2 %v3232_v59  ;;  %v11412_v54 = vpop.f32.mrf.mxu0  ;;  %v3286_v33 = vmul.f32 %v8258_v63, %v11289_v60  ;;  %v14369_v60 = vld [vmem:[#allocation53_spill] sm:$0xff] }
 0x938   : > { %v3051_v49 = vpop.xlane.xlu2 %3050 }
 0x939   : > { %v3087_v51 = vsub.f32 %v11302_v61, %v3051_v49  ;;  %4411 = vmatmul.f32.gmra.mxu0 %v4329_v45  ;;  %v4330_v61 = vmul.f32 %v11282_v29, %v14369_v60  ;;  %v14370_v49 = vld [vmem:[#allocation113_spill] sm:$0xff]  ;;  %v14380_v60 = vld [vmem:[#allocation116_spill] sm:$0xff] }
 0x93a   : > { %v11418_v10 = vpop.eup %8259  ;;  %7722 = vmatmul.msk.f32.gmra.mxu1 %vm1955_vm2, %v3286_v33  ;;  %v2986_v33 = vsel %vm1955_vm2, %v14370_v49, -inf  ;;  %v2995_v24 = vsel %vm1955_vm2, %v14380_v60, -inf }
 0x93b   : > { %v3148_v17 = vmul.f32 1.442695, %v3087_v51  ;;  %v3238_v59 = vsel %vm1955_vm2, %v11418_v10, 0.0  ;;  %v8262_v18 = vpop.eup %8261 }
 0x93c   : > { %3239 = vadd.xlane.f32.xlu1 %v3238_v59  ;;  %v3287_v45 = vmul.f32 %v8262_v18, %v11300_v4  ;;  %v14371_v4 = vld [vmem:[#allocation54_spill] sm:$0xff] }
 0x93d   : > { %8263 = vpow2.f32 %v3148_v17  ;;  %v3054_v31 = vpop.xlane.xlu1 %3053  ;;  %v3177_v50 = vpop.xlane.xlu0 %3176  ;;  %v4331_v18 = vmul.f32 %v11282_v29, %v14371_v4 }
 0x93e   : > { %v3088_v7 = vsub.f32 %v11315_v53, %v3054_v31  ;;  %v11424_v12 = vpop.f32.mrf.mxu0  ;;  %8265 = vrcp.f32 %v3174_v36 }
 0x940   : > { %v3150_v63 = vmul.f32 1.442695, %v3088_v7 }
 0x941   : > { %4414 = vmatmul.f32.gmra.mxu0 %v4330_v61 }
 0x942   : > { %8267 = vpow2.f32 %v3150_v63  ;;  %7723 = vmatmul.msk.f32.gmra.mxu1 %vm1955_vm2, %v3287_v45 }
 0x943   : > { %v11430_v51 = vpop.eup %8263  ;;  %8269 = vrcp.f32 %v3177_v50 }
 0x944   : > { %2987 = vmax.xlane.f32.xlu1 %v2986_v33  ;;  %v3241_v53 = vsel %vm1955_vm2, %v11430_v51, 0.0  ;;  %v8266_v36 = vpop.eup %8265 }
 0x945   : > { %3242 = vadd.xlane.f32.xlu2 %v3241_v53  ;;  %v3057_v17 = vpop.xlane.xlu0 %3056  ;;  %v3288_v63 = vmul.f32 %v8266_v36, %v11311_v16  ;;  %v14375_v36 = vld [vmem:[#allocation114_spill] sm:$0xff] }
 0x946   : > { %v3089_v7 = vsub.f32 %v11327_v57, %v3057_v17  ;;  %v11437_v59 = vpop.f32.mrf.mxu0  ;;  %v14372_v57 = vld [vmem:[#allocation115_spill] sm:$0xff] }
 0x947   : > { %v2992_v33 = vsel %vm1955_vm2, %v14372_v57, -inf  ;;  %v14374_v17 = vld [vmem:[#allocation55_spill] sm:$0xff] }
 0x948   : > { %v11441_v31 = vpop.eup %8267  ;;  %v3152_v61 = vmul.f32 1.442695, %v3089_v7  ;;  %v4332_v7 = vmul.f32 %v11282_v29, %v14374_v17  ;;  %v14378_v17 = vld [vmem:[#allocation56_spill] sm:$0xff] }
 0x949   : > { %4417 = vmatmul.f32.gmra.mxu0 %v4331_v18  ;;  %v3244_v45 = vsel %vm1955_vm2, %v11441_v31, 0.0  ;;  %v8270_v50 = vpop.eup %8269  ;;  %v2989_v18 = vsel %vm1955_vm2, %v14375_v36, -inf }
 0x94a   : > { %8271 = vpow2.f32 %v3152_v61  ;;  %7724 = vmatmul.msk.f32.gmra.mxu1 %vm1955_vm2, %v3288_v63  ;;  %3245 = vadd.xlane.f32.xlu0 %v3244_v45  ;;  %v3289_v16 = vmul.f32 %v8270_v50, %v11321_v6  ;;  %v14376_v63 = vld [vmem:[#allocation118_spill] sm:$0xff]  ;;  %v4333_v6 = vmul.f32 %v11282_v29, %v14378_v17  ;;  %v14379_v50 = vld [vmem:[#allocation117_spill] sm:$0xff]  ;;  %v14384_v17 = vld [vmem:[#allocation119_spill] sm:$0xff] }
 0x94b   : > { %v3001_v45 = vsel %vm1955_vm2, %v14376_v63, -inf }
 0x94c   : > { %2993 = vmax.xlane.f32.xlu1 %v2992_v33 }
 0x94e   : > { %v11449_v53 = vpop.f32.mrf.mxu0 }
 0x94f   : > { %14373 = vst [vmem:[#allocation113_spill] sm:$0xff] %v11449_v53 }
 0x950   : > { %v11453_v4 = vpop.eup %8271 }
 0x951   : > { %4420 = vmatmul.f32.gmra.mxu0 %v4332_v7  ;;  %v3247_v61 = vsel %vm1955_vm2, %v11453_v4, 0.0  ;;  %v2998_v7 = vsel %vm1955_vm2, %v14379_v50, -inf }
 0x952   : > { %7725 = vmatmul.msk.f32.gmra.mxu1 %vm1955_vm2, %v3289_v16  ;;  %2990 = vmax.xlane.f32.xlu0 %v2989_v18  ;;  %v14381_v16 = vld [vmem:[#allocation120_spill] sm:$0xff] }
 0x953   : > { %3248 = vadd.xlane.f32.xlu2 %v3247_v61  ;;  %v3007_v18 = vsel %vm1955_vm2, %v14381_v16, -inf }
 0x954   : > { %3002 = vmax.xlane.f32.xlu1 %v3001_v45  ;;  %v14383_v45 = vld [vmem:[#allocation57_spill] sm:$0xff] }
 0x955   : > { %v4334_v8 = vmul.f32 %v11282_v29, %v14383_v45  ;;  %v4337_v45 = vmul.f32 %v11282_v29, %v14388_v0 }
 0x956   : > { %v11463_v33 = vpop.f32.mrf.mxu0 }
 0x957   : > { %14377 = vst [vmem:[#allocation115_spill] sm:$0xff] %v11463_v33  ;;  %v14392_v33 = vld [vmem:[#allocation79_spill] sm:$0xff] }
 0x959   : > { %4423 = vmatmul.f32.gmra.mxu0 %v4333_v6  ;;  %v3004_v6 = vsel %vm1955_vm2, %v14384_v17, -inf }
 0x95a   : > { %2999 = vmax.xlane.f32.xlu0 %v2998_v7  ;;  %v14386_v7 = vld [vmem:[#allocation58_spill] sm:$0xff] }
 0x95b   : > { %2996 = vmax.xlane.f32.xlu2 %v2995_v24  ;;  %v4335_v37 = vmul.f32 %v11282_v29, %v14386_v7  ;;  %v4339_v7 = vmul.f32 %v11282_v29, %v14390_v9 }
 0x95c   : > { %3008 = vmax.xlane.f32.xlu1 %v3007_v18  ;;  %v4336_v18 = vmul.f32 %v11282_v29, %v14387_v23 }
 0x95e   : > { %v11473_v61 = vpop.f32.mrf.mxu0 }
 0x95f   : > { %14382 = vst [vmem:[#allocation114_spill] sm:$0xff] %v11473_v61  ;;  %v14391_v61 = vld [vmem:[#allocation75_spill] sm:$0xff] }
 0x961   : > { %4426 = vmatmul.f32.gmra.mxu0 %v4334_v8 }
 0x963   : > { %3005 = vmax.xlane.f32.xlu2 %v3004_v6  ;;  %v4338_v6 = vmul.f32 %v11282_v29, %v14389_v58  ;;  %v4341_v58 = vmul.f32 %v11282_v29, %v14392_v33 }
 0x966   : > { %v11479_v42 = vpop.f32.mrf.mxu0 }
 0x967   : > { %14385 = vst [vmem:[#allocation118_spill] sm:$0xff] %v11479_v42 }
 0x969   : > { %4429 = vmatmul.f32.gmra.mxu0 %v4335_v37 }
 0x96e   : > { %v4385_v24 = vpop.f32.mrf.mxu0 }
 0x971   : > { %4432 = vmatmul.f32.gmra.mxu0 %v4336_v18  ;;  %v4340_v18 = vmul.f32 %v11282_v29, %v14391_v61 }
 0x976   : > { %v4388_v25 = vpop.f32.mrf.mxu0 }
 0x979   : > { %4435 = vmatmul.f32.gmra.mxu0 %v4337_v45 }
 0x97e   : > { %v4391_v8 = vpop.f32.mrf.mxu0 }
 0x981   : > { %4438 = vmatmul.f32.gmra.mxu0 %v4338_v6 }
 0x986   : > { %v4394_v20 = vpop.f32.mrf.mxu0 }
 0x989   : > { %4441 = vmatmul.f32.gmra.mxu0 %v4339_v7  ;;  %v14393_v7 = vld [vmem:[#allocation83_spill] sm:$0xff] }
 0x98a   : > { %v4342_v53 = vmul.f32 %v11282_v29, %v14393_v7 }
 0x98e   : > { %v4397_v37 = vpop.f32.mrf.mxu0 }
 0x98f   : > { %v3228_v42 = vpop.xlane.xlu2 %3227 }
 0x990   : > { %8273 = vrcp.f32 %v3228_v42 }
 0x991   : > { %4444 = vmatmul.f32.gmra.mxu0 %v4340_v18 }
 0x996   : > { %v8274_v23 = vpop.eup %8273  ;;  %v4400_v0 = vpop.f32.mrf.mxu0 }
 0x997   : > { %v3306_v45 = vmul.f32 %v8274_v23, %v11368_v2  ;;  %v4343_v23 = vmul.f32 %v11282_v29, %v14280_v56 }
 0x999   : > { %7742 = vmatmul.msk.f32.vlgmr.msra.gmra.mxu1 %vm1955_vm2, %v3306_v45  ;;  %4447 = vmatmul.f32.gmra.mxu0 %v4341_v58 }
 0x99e   : > { %v4403_v6 = vpop.f32.mrf.mxu0 }
 0x99f   : > { %v3231_v9 = vpop.xlane.xlu1 %3230 }
 0x9a0   : > { %8275 = vrcp.f32 %v3231_v9 }
 0x9a1   : > { %4450 = vmatmul.f32.gmra.mxu0 %v4342_v53 }
 0x9a6   : > { %v8276_v61 = vpop.eup %8275  ;;  %v4406_v42 = vpop.f32.mrf.mxu0 }
 0x9a7   : > { %4513 = vmatpush.msra.mxu1 %v4406_v42  ;;  %v3307_v18 = vmul.f32 %v8276_v61, %v11390_v1  ;;  %v4344_v1 = vmul.f32 %v11282_v29, %v14281_v15 }
 0x9a8   : > { %v3237_v58 = vpop.xlane.xlu0 %3236 }
 0x9a9   : > { %v3234_v2 = vpop.xlane.xlu2 %3233  ;;  %7743 = vmatmul.msk.f32.gmra.mxu1 %vm1955_vm2, %v3307_v18  ;;  %4453 = vmatmul.f32.gmra.mxu0 %v4343_v23 }
 0x9aa   : > { %8277 = vrcp.f32 %v3234_v2  ;;  %4514 = vmatpush.msra.mxu1 %v4403_v6 }
 0x9ab   : > { %8279 = vrcp.f32 %v3237_v58  ;;  %v4346_v58 = vmul.f32 %v11282_v29, %v14283_v44 }
 0x9ac   : > { %4515 = vmatpush.msra.mxu1 %v4400_v0 }
 0x9ae   : > { %4516 = vmatpush.msra.mxu1 %v4397_v37  ;;  %v11503_v45 = vpop.f32.mrf.mxu0  ;;  %v4345_v37 = vmul.f32 %v11282_v29, %v14282_v38 }
 0x9af   : > { %v3240_v53 = vpop.xlane.xlu1 %3239 }
 0x9b0   : > { %v8278_v9 = vpop.eup %8277  ;;  %4517 = vmatpush.msra.mxu1 %v4394_v20  ;;  %8281 = vrcp.f32 %v3240_v53 }
 0x9b1   : > { %v3308_v61 = vmul.f32 %v8278_v9, %v11406_v47  ;;  %4456 = vmatmul.f32.gmra.mxu0 %v4344_v1  ;;  %v8280_v42 = vpop.eup %8279 }
 0x9b2   : > { %4518 = vmatpush.msra.mxu1 %v4391_v8  ;;  %v3309_v20 = vmul.f32 %v8280_v42, %v11403_v40 }
 0x9b3   : > { %7744 = vmatmul.msk.f32.gmra.mxu1 %vm1955_vm2, %v3308_v61 }
 0x9b4   : > { %4519 = vmatpush.msra.mxu1 %v4388_v25 }
 0x9b6   : > { %v11509_v6 = vpop.f32.mrf.mxu0  ;;  %4520 = vmatpush.msra.mxu1 %v4385_v24  ;;  %v8282_v23 = vpop.eup %8281 }
 0x9b7   : > { %v2988_v0 = vpop.xlane.xlu1 %2987 }
 0x9b8   : > { %v3066_v18 = vsub.f32 %v14370_v49, %v2988_v0  ;;  %v3243_v8 = vpop.xlane.xlu2 %3242  ;;  %v3310_v49 = vmul.f32 %v8282_v23, %v11418_v10 }
 0x9b9   : > { %4459 = vmatmul.f32.gmra.mxu0 %v4345_v37 }
 0x9ba   : > { %v3106_v47 = vmul.f32 1.442695, %v3066_v18 }
 0x9bb   : > { %7745 = vmatmul.msk.f32.gmra.mxu1 %vm1955_vm2, %v3309_v20 }
 0x9bc   : > { %8283 = vpow2.f32 %v3106_v47 }
 0x9bd   : > { %v3246_v25 = vpop.xlane.xlu0 %3245  ;;  %8285 = vrcp.f32 %v3243_v8 }
 0x9be   : > { %v11516_v2 = vpop.f32.mrf.mxu0 }
 0x9bf   : > { %v2994_v24 = vpop.xlane.xlu1 %2993 }
 0x9c0   : > { %v3068_v9 = vsub.f32 %v14372_v57, %v2994_v24  ;;  %v4347_v57 = vmul.f32 %v11282_v29, %v14284_v27 }
 0x9c1   : > { %4462 = vmatmul.f32.gmra.mxu0 %v4346_v58 }
 0x9c2   : > { %v11522_v40 = vpop.eup %8283  ;;  %v3110_v53 = vmul.f32 1.442695, %v3068_v9 }
 0x9c3   : > { %7746 = vmatmul.msk.f32.gmra.mxu1 %vm1955_vm2, %v3310_v49  ;;  %v3178_v1 = vsel %vm1955_vm2, %v11522_v40, 0.0  ;;  %v8286_v61 = vpop.eup %8285 }
 0x9c4   : > { %8287 = vpow2.f32 %v3110_v53  ;;  %3179 = vadd.xlane.f32.xlu0 %v3178_v1  ;;  %v3311_v8 = vmul.f32 %v8286_v61, %v11430_v51  ;;  %v4348_v1 = vmul.f32 %v11282_v29, %v14285_v11 }
 0x9c5   : > { %v2991_v42 = vpop.xlane.xlu0 %2990  ;;  %8289 = vrcp.f32 %v3246_v25 }
 0x9c6   : > { %v3067_v0 = vsub.f32 %v14375_v36, %v2991_v42  ;;  %v3249_v37 = vpop.xlane.xlu2 %3248  ;;  %v11528_v18 = vpop.f32.mrf.mxu0 }
 0x9c7   : > { %v3003_v10 = vpop.xlane.xlu1 %3002 }
 0x9c8   : > { %v3108_v20 = vmul.f32 1.442695, %v3067_v0  ;;  %v3071_v47 = vsub.f32 %v14376_v63, %v3003_v10 }
 0x9c9   : > { %4465 = vmatmul.f32.gmra.mxu0 %v4347_v57 }
 0x9ca   : > { %v11534_v23 = vpop.eup %8287  ;;  %8291 = vpow2.f32 %v3108_v20  ;;  %v3116_v24 = vmul.f32 1.442695, %v3071_v47 }
 0x9cb   : > { %7747 = vmatmul.msk.f32.gmra.mxu1 %vm1955_vm2, %v3311_v8  ;;  %v3184_v36 = vsel %vm1955_vm2, %v11534_v23, 0.0  ;;  %v8290_v25 = vpop.eup %8289 }
 0x9cc   : > { %8293 = vpow2.f32 %v3116_v24  ;;  %3185 = vadd.xlane.f32.xlu0 %v3184_v36  ;;  %v3312_v10 = vmul.f32 %v8290_v25, %v11441_v31  ;;  %v14395_v36 = vld [vmem:[#allocation81_spill] sm:$0xff] }
 0x9cd   : > { %v3000_v58 = vpop.xlane.xlu0 %2999  ;;  %8295 = vrcp.f32 %v3249_v37  ;;  %v11553_v37 = vpop.f32.mrf.mxu1  ;;  %v4349_v25 = vmul.f32 %v11282_v29, %v14395_v36 }
 0x9ce   : > { %v3070_v9 = vsub.f32 %v14379_v50, %v3000_v58  ;;  %v2997_v49 = vpop.xlane.xlu2 %2996  ;;  %v11540_v63 = vpop.f32.mrf.mxu0  ;;  %14394 = vst [vmem:[#allocation117_spill] sm:$0xff] %v11553_v37 }
 0x9cf   : > { %v3069_v51 = vsub.f32 %v14380_v60, %v2997_v49  ;;  %v3009_v53 = vpop.xlane.xlu1 %3008 }
 0x9d0   : > { %v11545_v61 = vpop.eup %8291  ;;  %v3114_v42 = vmul.f32 1.442695, %v3070_v9  ;;  %v3073_v0 = vsub.f32 %v14381_v16, %v3009_v53 }
 0x9d1   : > { %v3112_v57 = vmul.f32 1.442695, %v3069_v51  ;;  %4468 = vmatmul.f32.gmra.mxu0 %v4348_v1  ;;  %v3181_v50 = vsel %vm1955_vm2, %v11545_v61, 0.0 }
 0x9d2   : > { %v11551_v20 = vpop.eup %8293  ;;  %8297 = vpow2.f32 %v3114_v42  ;;  %3182 = vadd.xlane.f32.xlu2 %v3181_v50  ;;  %v3120_v16 = vmul.f32 1.442695, %v3073_v0  ;;  %v14397_v0 = vld [vmem:[#allocation86_spill] sm:$0xff] }
 0x9d3   : > { %7748 = vmatmul.msk.f32.gmra.mxu1 %vm1955_vm2, %v3312_v10  ;;  %8299 = vpow2.f32 %v3112_v57  ;;  %v3193_v60 = vsel %vm1955_vm2, %v11551_v20, 0.0  ;;  %v8296_v31 = vpop.eup %8295  ;;  %v4350_v10 = vmul.f32 %v11282_v29, %v14397_v0  ;;  %v14398_v57 = vld [vmem:[#allocation92_spill] sm:$0xff] }
 0x9d4   : > { %3194 = vadd.xlane.f32.xlu0 %v3193_v60  ;;  %8301 = vpow2.f32 %v3120_v16  ;;  %v3313_v9 = vmul.f32 %v8296_v31, %v11453_v4  ;;  %v3788_v50 = vmul.f32 %v11282_v29, %v14398_v57 }
 0x9d5   : > { %v11570_v1 = vpop.f32.mrf.mxu1 }
 0x9d6   : > { %v3006_v47 = vpop.xlane.xlu2 %3005  ;;  %v11558_v8 = vpop.f32.mrf.mxu0  ;;  %14396 = vst [vmem:[#allocation116_spill] sm:$0xff] %v11570_v1 }
 0x9d7   : > { %v3072_v24 = vsub.f32 %v14384_v17, %v3006_v47 }
 0x9d8   : > { %v11563_v58 = vpop.eup %8297 }
 0x9d9   : > { %v11566_v49 = vpop.eup %8299  ;;  %v3118_v51 = vmul.f32 1.442695, %v3072_v24  ;;  %4471 = vmatmul.f32.gmra.mxu0 %v4349_v25  ;;  %v3190_v53 = vsel %vm1955_vm2, %v11563_v58, 0.0  ;;  %v14400_v25 = vld [vmem:[#allocation90_spill] sm:$0xff] }
 0x9da   : > { %3191 = vadd.xlane.f32.xlu2 %v3190_v53  ;;  %v3187_v17 = vsel %vm1955_vm2, %v11566_v49, 0.0  ;;  %v11575_v42 = vpop.eup %8301 }
 0x9db   : > { %7749 = vmatmul.msk.f32.gmra.mxu1 %vm1955_vm2, %v3313_v9  ;;  %8303 = vpow2.f32 %v3118_v51  ;;  %3188 = vadd.xlane.f32.xlu1 %v3187_v17  ;;  %v3199_v16 = vsel %vm1955_vm2, %v11575_v42, 0.0  ;;  %v4351_v9 = vmul.f32 %v11282_v29, %v14400_v25  ;;  %v14401_v51 = vld [vmem:[#allocation93_spill] sm:$0xff]  ;;  %v14406_v25 = vld [vmem:[#allocation96_spill] sm:$0xff] }
 0x9dc   : > { %v3789_v53 = vmul.f32 %v11282_v29, %v14401_v51  ;;  %v3792_v51 = vmul.f32 %v11282_v29, %v14406_v25  ;;  %v3795_v25 = vmul.f32 %v11282_v29, %v10479_v22 }
 0x9dd   : > { %v11589_v47 = vpop.f32.mrf.mxu1 }
 0x9de   : > { %v11577_v4 = vpop.f32.mrf.mxu0  ;;  %14399 = vst [vmem:[#allocation120_spill] sm:$0xff] %v11589_v47  ;;  %v14405_v47 = vld [vmem:[#allocation95_spill] sm:$0xff] }
 0x9df   : > { %v3791_v37 = vmul.f32 %v11282_v29, %v14405_v47 }
 0x9e1   : > { %v11583_v60 = vpop.eup %8303  ;;  %4474 = vmatmul.f32.gmra.mxu0 %v4350_v10 }
 0x9e2   : > { %3200 = vadd.xlane.f32.xlu2 %v3199_v16  ;;  %v3196_v31 = vsel %vm1955_vm2, %v11583_v60, 0.0 }
 0x9e3   : > { %3902 = vmatmul.f32.vlgmr.msrb.gmra.mxu1 %v3788_v50  ;;  %3197 = vadd.xlane.f32.xlu1 %v3196_v31  ;;  %v14403_v50 = vld [vmem:[#allocation94_spill] sm:$0xff] }
 0x9e4   : > { %v3790_v16 = vmul.f32 %v11282_v29, %v14403_v50 }
 0x9e5   : > { %v11597_v17 = vpop.f32.mrf.mxu1 }
 0x9e6   : > { %v11591_v24 = vpop.f32.mrf.mxu0  ;;  %14402 = vst [vmem:[#allocation119_spill] sm:$0xff] %v11597_v17  ;;  %v14408_v17 = vld [vmem:[#allocation97_spill] sm:$0xff] }
 0x9e7   : > { %v3793_v0 = vmul.f32 %v11282_v29, %v14408_v17 }
 0x9e9   : > { %4477 = vmatmul.f32.gmra.mxu0 %v4351_v9 }
 0x9eb   : > { %3905 = vmatmul.f32.gmra.mxu1 %v3789_v53 }
 0x9ed   : > { %v11601_v1 = vpop.f32.mrf.mxu1 }
 0x9ee   : > { %v4433_v10 = vpop.f32.mrf.mxu0  ;;  %14404 = vst [vmem:[#allocation79_spill] sm:$0xff] %v11601_v1  ;;  %v3794_v1 = vmul.f32 %v11282_v29, %v10468_v52 }
 0x9f3   : > { %3908 = vmatmul.f32.gmra.mxu1 %v3790_v16 }
 0x9f5   : > { %v11607_v9 = vpop.f32.mrf.mxu1 }
 0x9f6   : > { %v4436_v31 = vpop.f32.mrf.mxu0  ;;  %14407 = vst [vmem:[#allocation83_spill] sm:$0xff] %v11607_v9 }
 0x9fb   : > { %3911 = vmatmul.f32.gmra.mxu1 %v3791_v37 }
 0x9fd   : > { %v11611_v16 = vpop.f32.mrf.mxu1 }
 0x9fe   : > { %v4439_v57 = vpop.f32.mrf.mxu0  ;;  %14409 = vst [vmem:[#allocation97_spill] sm:$0xff] %v11611_v16 }
 0xa03   : > { %3914 = vmatmul.f32.gmra.mxu1 %v3792_v51 }
 0xa05   : > { %v11615_v37 = vpop.f32.mrf.mxu1 }
 0xa06   : > { %v4442_v53 = vpop.f32.mrf.mxu0  ;;  %14410 = vst [vmem:[#allocation141_spill] sm:$0xff] %v11615_v37 }
 0xa0b   : > { %3917 = vmatmul.f32.gmra.mxu1 %v3793_v0 }
 0xa0e   : > { %v4445_v50 = vpop.f32.mrf.mxu0 }
 0xa13   : > { %3920 = vmatmul.f32.gmra.mxu1 %v3794_v1 }
 0xa16   : > { %v4448_v47 = vpop.f32.mrf.mxu0  ;;  %v11619_v51 = vpop.f32.mrf.mxu1 }
 0xa17   : > { %14411 = vst [vmem:[#allocation142_spill] sm:$0xff] %v11619_v51 }
 0xa1b   : > { %3923 = vmatmul.f32.gmra.mxu1 %v3795_v25 }
 0xa1e   : > { %v4451_v9 = vpop.f32.mrf.mxu0 }
 0xa26   : > { %v11621_v36 = vpop.f32.mrf.mxu1  ;;  %v4454_v0 = vpop.f32.mrf.mxu0 }
 0xa27   : > { %14412 = vst [vmem:[#allocation143_spill] sm:$0xff] %v11621_v36  ;;  %4643 = vmatpush.msra.mxu3 %v4454_v0 }
 0xa29   : > { %4644 = vmatpush.msra.mxu3 %v4451_v9 }
 0xa2b   : > { %4645 = vmatpush.msra.mxu3 %v4448_v47 }
 0xa2d   : > { %4646 = vmatpush.msra.mxu3 %v4445_v50 }
 0xa2e   : > { %v11623_v16 = vpop.f32.mrf.mxu0 }
 0xa2f   : > { %4647 = vmatpush.msra.mxu3 %v4442_v53 }
 0xa30   : > { %v11625_v1 = vpop.f32.mrf.mxu1 }
 0xa31   : > { %14413 = vst [vmem:[#allocation144_spill] sm:$0xff] %v11625_v1  ;;  %4648 = vmatpush.msra.mxu3 %v4439_v57  ;;  %v14446_v1 = vld [vmem:[#allocation22_spill] sm:$0xff] }
 0xa33   : > { %4649 = vmatpush.msra.mxu3 %v4436_v31 }
 0xa35   : > { %4650 = vmatpush.msra.mxu3 %v4433_v10 }
 0xa36   : > { %v11627_v37 = vpop.f32.mrf.mxu0 }
 0xa37   : > { %4859 = vmatpush.xpose.msrb.mxu3 %v10250_v28  ;;  %v3180_v36 = vpop.xlane.xlu0 %3179 }
 0xa38   : > { %v11630_v25 = vpop.f32.mrf.mxu1  ;;  %8305 = vrcp.f32 %v3180_v36 }
 0xa39   : > { %14414 = vst [vmem:[#allocation145_spill] sm:$0xff] %v11630_v25 }
 0xa3b   : > { %4860 = vmatpush.xpose.msrb.mxu3 %v10239_v32 }
 0xa3e   : > { %v8306_v47 = vpop.eup %8305  ;;  %v11633_v50 = vpop.f32.mrf.mxu0 }
 0xa3f   : > { %4861 = vmatpush.xpose.msrb.mxu3 %v10230_v26  ;;  %v3290_v9 = vmul.f32 %v8306_v47, %v11522_v40  ;;  %v3186_v26 = vpop.xlane.xlu0 %3185 }
 0xa40   : > { %v11637_v57 = vpop.f32.mrf.mxu1 }
 0xa41   : > { %14415 = vst [vmem:[#allocation146_spill] sm:$0xff] %v11637_v57  ;;  %7726 = vmatmul.msk.f32.vlgmr.msra.gmra.mxu2 %vm1955_vm2, %v3290_v9 }
 0xa42   : > { %3935 = vmatpush.xpose.msra.mxu2 %v10453_v30 }
 0xa43   : > { %4862 = vmatpush.xpose.msrb.mxu3 %v10221_v55 }
 0xa45   : > { %v3183_v28 = vpop.xlane.xlu2 %3182 }
 0xa46   : > { %3936 = vmatpush.xpose.msra.mxu2 %v10442_v21  ;;  %8307 = vrcp.f32 %v3183_v28  ;;  %v4466_v32 = vpop.f32.mrf.mxu0  ;;  %v14419_v28 = vld [vmem:[#allocation88_spill] sm:$0xff] }
 0xa47   : > { %4863 = vmatpush.xpose.msrb.mxu3 %v10212_v48  ;;  %8309 = vrcp.f32 %v3186_v26 }
 0xa48   : > { %v11644_v36 = vpop.f32.mrf.mxu1 }
 0xa49   : > { %14416 = vst [vmem:[#allocation147_spill] sm:$0xff] %v11644_v36 }
 0xa4a   : > { %3937 = vmatpush.xpose.msra.mxu2 %v10431_v35 }
 0xa4b   : > { %4864 = vmatpush.xpose.msrb.mxu3 %v14307_v62 }
 0xa4c   : > { %v8308_v40 = vpop.eup %8307 }
 0xa4d   : > { %v3291_v10 = vmul.f32 %v8308_v40, %v11545_v61  ;;  %v8310_v53 = vpop.eup %8309  ;;  %v3195_v40 = vpop.xlane.xlu0 %3194 }
 0xa4e   : > { %3938 = vmatpush.xpose.msra.mxu2 %v10420_v41  ;;  %v4469_v55 = vpop.f32.mrf.mxu0  ;;  %v3189_v48 = vpop.xlane.xlu1 %3188  ;;  %v3292_v62 = vmul.f32 %v8310_v53, %v11534_v23 }
 0xa4f   : > { %4865 = vmatpush.xpose.msrb.mxu3 %v14308_v5  ;;  %7727 = vmatmul.msk.f32.gmra.mxu2 %vm1955_vm2, %v3291_v10  ;;  %8311 = vrcp.f32 %v3189_v48  ;;  %v3192_v5 = vpop.xlane.xlu2 %3191 }
 0xa50   : > { %v11651_v31 = vpop.f32.mrf.mxu1  ;;  %8313 = vrcp.f32 %v3192_v5 }
 0xa51   : > { %14417 = vst [vmem:[#allocation148_spill] sm:$0xff] %v11651_v31  ;;  %8315 = vrcp.f32 %v3195_v40  ;;  %v14443_v31 = vld [vmem:[#allocation21_spill] sm:$0xff] }
 0xa52   : > { %3939 = vmatpush.xpose.msra.mxu2 %v10411_v46 }
 0xa53   : > { %4866 = vmatpush.xpose.msrb.mxu3 %v14310_v14 }
 0xa55   : > { %v8312_v47 = vpop.eup %8311 }
 0xa56   : > { %3940 = vmatpush.xpose.msra.mxu2 %v10398_v39  ;;  %v4472_v61 = vpop.f32.mrf.mxu0  ;;  %v3293_v9 = vmul.f32 %v8312_v47, %v11566_v49  ;;  %v8314_v10 = vpop.eup %8313 }
 0xa57   : > { %7728 = vmatmul.msk.f32.gmra.mxu2 %vm1955_vm2, %v3292_v62  ;;  %v3294_v48 = vmul.f32 %v8314_v10, %v11563_v58  ;;  %v3198_v5 = vpop.xlane.xlu1 %3197  ;;  %v8316_v47 = vpop.eup %8315 }
 0xa58   : > { %v11658_v0 = vpop.f32.mrf.mxu1  ;;  %8317 = vrcp.f32 %v3198_v5  ;;  %v3201_v40 = vpop.xlane.xlu2 %3200 }
 0xa59   : > { %14418 = vst [vmem:[#allocation149_spill] sm:$0xff] %v11658_v0  ;;  %8319 = vrcp.f32 %v3201_v40 }
 0xa5a   : > { %3941 = vmatpush.xpose.msra.mxu2 %v10383_v34 }
 0xa5e   : > { %3942 = vmatpush.xpose.msra.mxu2 %v14419_v28  ;;  %v4475_v14 = vpop.f32.mrf.mxu0  ;;  %v8318_v10 = vpop.eup %8317 }
 0xa5f   : > { %7729 = vmatmul.msk.f32.gmra.mxu2 %vm1955_vm2, %v3293_v9  ;;  %v3295_v9 = vmul.f32 %v8316_v47, %v11551_v20  ;;  %v3296_v20 = vmul.f32 %v8318_v10, %v11583_v60  ;;  %v3998_v47 = vsel %vm1955_vm2, %v11424_v12, -inf  ;;  %v14423_v10 = vld [vmem:[#allocation47_spill] sm:$0xff] }
 0xa60   : > { %v11664_v26 = vpop.f32.mrf.mxu1 }
 0xa61   : > { %v4016_v23 = vsel %vm1955_vm2, %v11664_v26, -inf }
 0xa62   : > { %4017 = vmax.xlane.f32.xlu0 %v4016_v23 }
 0xa66   : > { %v4478_v53 = vpop.f32.mrf.mxu0 }
 0xa67   : > { %7730 = vmatmul.msk.f32.gmra.mxu2 %vm1955_vm2, %v3294_v48  ;;  %4708 = vmatpush.msrb.mxu1 %v4478_v53 }
 0xa68   : > { %v11670_v62 = vpop.f32.mrf.mxu1 }
 0xa69   : > { %v4019_v49 = vsel %vm1955_vm2, %v11670_v62, -inf  ;;  %4709 = vmatpush.msrb.mxu1 %v4475_v14 }
 0xa6a   : > { %4020 = vmax.xlane.f32.xlu1 %v4019_v49  ;;  %v3773_v49 = vmul.f32 %v11282_v29, %v14313_v19 }
 0xa6b   : > { %4710 = vmatpush.msrb.mxu1 %v4472_v61 }
 0xa6d   : > { %4711 = vmatpush.msrb.mxu1 %v4469_v55 }
 0xa6f   : > { %7731 = vmatmul.msk.f32.gmra.mxu2 %vm1955_vm2, %v3295_v9  ;;  %4712 = vmatpush.msrb.mxu1 %v4466_v32  ;;  %v3992_v32 = vsel %vm1955_vm2, %v11396_v13, -inf  ;;  %v14420_v9 = vld [vmem:[#allocation41_spill] sm:$0xff] }
 0xa70   : > { %v11676_v23 = vpop.f32.mrf.mxu1 }
 0xa71   : > { %v4022_v58 = vsel %vm1955_vm2, %v11676_v23, -inf  ;;  %4713 = vmatpush.msrb.mxu1 %v11633_v50  ;;  %v8320_v50 = vpop.eup %8319 }
 0xa72   : > { %4023 = vmax.xlane.f32.xlu2 %v4022_v58 }
 0xa73   : > { %4714 = vmatpush.msrb.mxu1 %v11627_v37  ;;  %v3297_v37 = vmul.f32 %v8320_v50, %v11575_v42  ;;  %v3995_v42 = vsel %vm1955_vm2, %v11412_v54, -inf  ;;  %v14425_v50 = vld [vmem:[#allocation100_spill] sm:$0xff] }
 0xa75   : > { %4715 = vmatpush.msrb.mxu1 %v11623_v16  ;;  %v3772_v16 = vmul.f32 %v11282_v29, %v14312_v3 }
 0xa77   : > { %7732 = vmatmul.msk.f32.gmra.mxu2 %vm1955_vm2, %v3296_v20  ;;  %v3778_v20 = vmul.f32 %v11282_v29, %v14423_v10 }
 0xa78   : > { %v11685_v55 = vpop.f32.mrf.mxu1 }
 0xa79   : > { %v4025_v61 = vsel %vm1955_vm2, %v11685_v55, -inf }
 0xa7a   : > { %3993 = vmax.xlane.f32.xlu2 %v3992_v32  ;;  %4026 = vmax.xlane.f32.xlu0 %v4025_v61  ;;  %v14424_v32 = vld [vmem:[#allocation49_spill] sm:$0xff] }
 0xa7b   : > { %v3779_v61 = vmul.f32 %v11282_v29, %v14424_v32 }
 0xa7f   : > { %7733 = vmatmul.msk.f32.gmra.mxu2 %vm1955_vm2, %v3297_v37  ;;  %v3796_v37 = vmul.f32 %v11282_v29, %v14425_v50 }
 0xa80   : > { %v11693_v14 = vpop.f32.mrf.mxu1 }
 0xa81   : > { %v4028_v60 = vsel %vm1955_vm2, %v11693_v14, -inf }
 0xa82   : > { %4029 = vmax.xlane.f32.xlu1 %v4028_v60  ;;  %v14426_v60 = vld [vmem:[#allocation32_spill] sm:$0xff] }
 0xa87   : > { %3820 = vmatmul.f32.vlgmr.msrb.gmra.mxu2 %v3772_v16 }
 0xa88   : > { %v11700_v48 = vpop.f32.mrf.mxu1  ;;  %4578 = vmatpush.msrb.mxu2 %v11591_v24 }
 0xa89   : > { %v4031_v53 = vsel %vm1955_vm2, %v11700_v48, -inf }
 0xa8a   : > { %4032 = vmax.xlane.f32.xlu0 %v4031_v53  ;;  %3996 = vmax.xlane.f32.xlu1 %v3995_v42  ;;  %v14428_v53 = vld [vmem:[#allocation30_spill] sm:$0xff]  ;;  %v14429_v42 = vld [vmem:[#allocation101_spill] sm:$0xff] }
 0xa8b   : > { %4579 = vmatpush.msrb.mxu2 %v11577_v4  ;;  %v4001_v4 = vsel %vm1955_vm2, %v11437_v59, -inf }
 0xa8d   : > { %4580 = vmatpush.msrb.mxu2 %v11558_v8 }
 0xa8f   : > { %4581 = vmatpush.msrb.mxu2 %v11540_v63  ;;  %v3774_v63 = vmul.f32 %v11282_v29, %v14314_v43 }
 0xa90   : > { %v11712_v5 = vpop.f32.mrf.mxu1  ;;  %3823 = vmatmul.f32.gmra.mxu2 %v3773_v49  ;;  %v3797_v49 = vmul.f32 %v11282_v29, %v14429_v42 }
 0xa91   : > { %4582 = vmatpush.msrb.mxu2 %v11528_v18  ;;  %v4034_v24 = vsel %vm1955_vm2, %v11712_v5, -inf }
 0xa92   : > { %4035 = vmax.xlane.f32.xlu2 %v4034_v24  ;;  %3999 = vmax.xlane.f32.xlu1 %v3998_v47  ;;  %v14430_v24 = vld [vmem:[#allocation29_spill] sm:$0xff] }
 0xa93   : > { %4583 = vmatpush.msrb.mxu2 %v11516_v2  ;;  %v3775_v2 = vmul.f32 %v11282_v29, %v14420_v9 }
 0xa95   : > { %4584 = vmatpush.msrb.mxu2 %v11509_v6  ;;  %v14421_v6 = vld [vmem:[#allocation43_spill] sm:$0xff] }
 0xa96   : > { %v3776_v58 = vmul.f32 %v11282_v29, %v14421_v6 }
 0xa97   : > { %4585 = vmatpush.msrb.mxu2 %v11503_v45  ;;  %v14422_v45 = vld [vmem:[#allocation45_spill] sm:$0xff] }
 0xa98   : > { %v11724_v8 = vpop.f32.mrf.mxu1  ;;  %3826 = vmatmul.f32.gmra.mxu2 %v3774_v63  ;;  %v3777_v40 = vmul.f32 %v11282_v29, %v14422_v45 }
 0xa99   : > { %v4037_v18 = vsel %vm1955_vm2, %v11724_v8, -inf }
 0xa9a   : > { %4038 = vmax.xlane.f32.xlu2 %v4037_v18  ;;  %4002 = vmax.xlane.f32.xlu1 %v4001_v4  ;;  %v14432_v18 = vld [vmem:[#allocation28_spill] sm:$0xff] }
 0xaa0   : > { %3829 = vmatmul.f32.gmra.mxu2 %v3775_v2  ;;  %v14433_v2 = vld [vmem:[#allocation102_spill] sm:$0xff] }
 0xaa8   : > { %3832 = vmatmul.f32.gmra.mxu2 %v3776_v58  ;;  %v3798_v58 = vmul.f32 %v11282_v29, %v14433_v2 }
 0xab0   : > { %3835 = vmatmul.f32.gmra.mxu2 %v3777_v40 }
 0xab8   : > { %3838 = vmatmul.f32.gmra.mxu2 %v3778_v20  ;;  %v14434_v20 = vld [vmem:[#allocation27_spill] sm:$0xff] }
 0xac0   : > { %3841 = vmatmul.f32.gmra.mxu2 %v3779_v61 }
 0xac4   : > { %v11743_v16 = vpop.f32.mrf.mxu2 }
 0xac5   : > { %14427 = vst [vmem:[#allocation88_spill] sm:$0xff] %v11743_v16 }
 0xac8   : > { %3943 = vmatmul.f32.vlgmr.msra.gmra.mxu2 %v3796_v37 }
 0xac9   : > { %4818 = vmatpush.xpose.msra.mxu2 %v14426_v60  ;;  %v14436_v60 = vld [vmem:[#allocation26_spill] sm:$0xff] }
 0xacd   : > { %4819 = vmatpush.xpose.msra.mxu2 %v14428_v53 }
 0xad0   : > { %3946 = vmatmul.f32.gmra.mxu2 %v3797_v49  ;;  %v14437_v49 = vld [vmem:[#allocation103_spill] sm:$0xff] }
 0xad1   : > { %4820 = vmatpush.xpose.msra.mxu2 %v14430_v24  ;;  %v3799_v24 = vmul.f32 %v11282_v29, %v14437_v49 }
 0xad2   : > { %v11749_v47 = vpop.f32.mrf.mxu2 }
 0xad3   : > { %14431 = vst [vmem:[#allocation41_spill] sm:$0xff] %v11749_v47 }
 0xad5   : > { %v4018_v63 = vpop.xlane.xlu0 %4017  ;;  %4821 = vmatpush.xpose.msra.mxu2 %v14432_v18 }
 0xad6   : > { %v4080_v4 = vsub.f32 %v11664_v26, %v4018_v63  ;;  %v14438_v63 = vld [vmem:[#allocation25_spill] sm:$0xff] }
 0xad8   : > { %v4128_v40 = vmul.f32 1.442695, %v4080_v4  ;;  %3949 = vmatmul.f32.gmra.mxu2 %v3798_v58 }
 0xad9   : > { %4822 = vmatpush.xpose.msra.mxu2 %v14434_v20 }
 0xada   : > { %8321 = vpow2.f32 %v4128_v40  ;;  %v11756_v61 = vpop.f32.mrf.mxu2  ;;  %v14440_v40 = vld [vmem:[#allocation24_spill] sm:$0xff] }
 0xadb   : > { %14435 = vst [vmem:[#allocation43_spill] sm:$0xff] %v11756_v61 }
 0xadd   : > { %v4021_v37 = vpop.xlane.xlu1 %4020  ;;  %4823 = vmatpush.xpose.msra.mxu2 %v14436_v60 }
 0xade   : > { %v4081_v53 = vsub.f32 %v11670_v62, %v4021_v37  ;;  %v14441_v37 = vld [vmem:[#allocation104_spill] sm:$0xff] }
 0xadf   : > { %v3800_v60 = vmul.f32 %v11282_v29, %v14441_v37 }
 0xae0   : > { %v11762_v18 = vpop.eup %8321  ;;  %v4130_v26 = vmul.f32 1.442695, %v4081_v53  ;;  %3952 = vmatmul.f32.gmra.mxu2 %v3799_v24 }
 0xae1   : > { %4824 = vmatpush.xpose.msra.mxu2 %v14438_v63  ;;  %v4208_v4 = vsel %vm1955_vm2, %v11762_v18, 0.0 }
 0xae2   : > { %8323 = vpow2.f32 %v4130_v26  ;;  %4209 = vadd.xlane.f32.xlu0 %v4208_v4  ;;  %v11767_v58 = vpop.f32.mrf.mxu2 }
 0xae3   : > { %14439 = vst [vmem:[#allocation45_spill] sm:$0xff] %v11767_v58 }
 0xae5   : > { %4825 = vmatpush.xpose.msra.mxu2 %v14440_v40  ;;  %v4024_v20 = vpop.xlane.xlu2 %4023 }
 0xae6   : > { %v4082_v62 = vsub.f32 %v11676_v23, %v4024_v20  ;;  %v3801_v23 = vmul.f32 %v11282_v29, %v14443_v31 }
 0xae8   : > { %v11773_v0 = vpop.eup %8323  ;;  %v4132_v53 = vmul.f32 1.442695, %v4082_v62  ;;  %3955 = vmatmul.f32.gmra.mxu2 %v3800_v60  ;;  %v14444_v60 = vld [vmem:[#allocation113_spill] sm:$0xff] }
 0xae9   : > { %v4211_v24 = vsel %vm1955_vm2, %v11773_v0, 0.0  ;;  %v4004_v57 = vsel %vm1955_vm2, %v14444_v60, -inf }
 0xaea   : > { %8325 = vpow2.f32 %v4132_v53  ;;  %4212 = vadd.xlane.f32.xlu0 %v4211_v24  ;;  %v11777_v26 = vpop.f32.mrf.mxu2 }
 0xaeb   : > { %14442 = vst [vmem:[#allocation47_spill] sm:$0xff] %v11777_v26 }
 0xaed   : > { %v4027_v63 = vpop.xlane.xlu0 %4026  ;;  %v3994_v40 = vpop.xlane.xlu2 %3993 }
 0xaee   : > { %v4083_v4 = vsub.f32 %v11685_v55, %v4027_v63  ;;  %v4072_v62 = vsub.f32 %v11396_v13, %v3994_v40 }
 0xaf0   : > { %v11782_v20 = vpop.eup %8325  ;;  %v4134_v36 = vmul.f32 1.442695, %v4083_v4  ;;  %3958 = vmatmul.f32.gmra.mxu2 %v3801_v23  ;;  %v4112_v24 = vmul.f32 1.442695, %v4072_v62  ;;  %v3802_v4 = vmul.f32 %v11282_v29, %v14446_v1 }
 0xaf1   : > { %v4214_v53 = vsel %vm1955_vm2, %v11782_v20, 0.0 }
 0xaf2   : > { %8327 = vpow2.f32 %v4134_v36  ;;  %4005 = vmax.xlane.f32.xlu0 %v4004_v57  ;;  %4215 = vadd.xlane.f32.xlu2 %v4214_v53  ;;  %v11789_v55 = vpop.f32.mrf.mxu2  ;;  %v14447_v36 = vld [vmem:[#allocation115_spill] sm:$0xff] }
 0xaf3   : > { %14445 = vst [vmem:[#allocation49_spill] sm:$0xff] %v11789_v55  ;;  %8329 = vpow2.f32 %v4112_v24  ;;  %v4007_v57 = vsel %vm1955_vm2, %v14447_v36, -inf }
 0xaf5   : > { %v4030_v63 = vpop.xlane.xlu1 %4029 }
 0xaf6   : > { %v4084_v25 = vsub.f32 %v11693_v14, %v4030_v63 }
 0xaf8   : > { %v11794_v23 = vpop.eup %8327  ;;  %v4136_v13 = vmul.f32 1.442695, %v4084_v25  ;;  %3961 = vmatmul.f32.gmra.mxu2 %v3802_v4  ;;  %v14449_v25 = vld [vmem:[#allocation23_spill] sm:$0xff] }
 0xaf9   : > { %v4217_v40 = vsel %vm1955_vm2, %v11794_v23, 0.0  ;;  %v3803_v24 = vmul.f32 %v11282_v29, %v14449_v25  ;;  %v11806_v4 = vpop.eup %8329 }
 0xafa   : > { %8331 = vpow2.f32 %v4136_v13  ;;  %4218 = vadd.xlane.f32.xlu1 %v4217_v40  ;;  %4008 = vmax.xlane.f32.xlu2 %v4007_v57  ;;  %v11800_v62 = vpop.f32.mrf.mxu2  ;;  %v14450_v13 = vld [vmem:[#allocation114_spill] sm:$0xff] }
 0xafb   : > { %14448 = vst [vmem:[#allocation100_spill] sm:$0xff] %v11800_v62  ;;  %v4010_v40 = vsel %vm1955_vm2, %v14450_v13, -inf }
 0xafd   : > { %v4033_v14 = vpop.xlane.xlu0 %4032  ;;  %v3997_v53 = vpop.xlane.xlu1 %3996 }
 0xafe   : > { %v4085_v63 = vsub.f32 %v11700_v48, %v4033_v14  ;;  %v4073_v51 = vsub.f32 %v11412_v54, %v3997_v53  ;;  %v4184_v54 = vsel %vm1955_vm2, %v11806_v4, 0.0 }
 0xb00   : > { %v11808_v55 = vpop.eup %8331  ;;  %v4138_v26 = vmul.f32 1.442695, %v4085_v63  ;;  %v4114_v58 = vmul.f32 1.442695, %v4073_v51  ;;  %3964 = vmatmul.f32.gmra.mxu2 %v3803_v24 }
 0xb01   : > { %v4220_v57 = vsel %vm1955_vm2, %v11808_v55, 0.0 }
 0xb02   : > { %8333 = vpow2.f32 %v4138_v26  ;;  %4011 = vmax.xlane.f32.xlu1 %v4010_v40  ;;  %4221 = vadd.xlane.f32.xlu0 %v4220_v57  ;;  %v11816_v29 = vpop.f32.mrf.mxu2  ;;  %v14452_v40 = vld [vmem:[#allocation118_spill] sm:$0xff] }
 0xb03   : > { %8335 = vpow2.f32 %v4114_v58  ;;  %4185 = vadd.xlane.f32.xlu2 %v4184_v54  ;;  %14451 = vst [vmem:[#allocation32_spill] sm:$0xff] %v11816_v29  ;;  %v4013_v57 = vsel %vm1955_vm2, %v14452_v40, -inf }
 0xb05   : > { %v4000_v48 = vpop.xlane.xlu1 %3999  ;;  %v4036_v14 = vpop.xlane.xlu2 %4035 }
 0xb06   : > { %v4074_v51 = vsub.f32 %v11424_v12, %v4000_v48  ;;  %v4086_v53 = vsub.f32 %v11712_v5, %v4036_v14 }
 0xb08   : > { %v11820_v63 = vpop.eup %8333  ;;  %v4116_v24 = vmul.f32 1.442695, %v4074_v51  ;;  %v4140_v62 = vmul.f32 1.442695, %v4086_v53 }
 0xb09   : > { %v11822_v26 = vpop.eup %8335  ;;  %v4223_v58 = vsel %vm1955_vm2, %v11820_v63, 0.0 }
 0xb0a   : > { %8337 = vpow2.f32 %v4116_v24  ;;  %4014 = vmax.xlane.f32.xlu1 %v4013_v57  ;;  %4224 = vadd.xlane.f32.xlu0 %v4223_v58  ;;  %v4187_v12 = vsel %vm1955_vm2, %v11822_v26, 0.0  ;;  %v11830_v5 = vpop.f32.mrf.mxu2 }
 0xb0b   : > { %8339 = vpow2.f32 %v4140_v62  ;;  %4188 = vadd.xlane.f32.xlu2 %v4187_v12 }
 0xb0d   : > { %v4003_v54 = vpop.xlane.xlu1 %4002  ;;  %v4039_v48 = vpop.xlane.xlu2 %4038 }
 0xb0e   : > { %v4075_v14 = vsub.f32 %v11437_v59, %v4003_v54  ;;  %v4087_v51 = vsub.f32 %v11724_v8, %v4039_v48  ;;  %v3968_v54 = vsel %vm1955_vm2, %v11830_v5, -inf }
 0xb10   : > { %v11834_v53 = vpop.eup %8337  ;;  %v4118_v29 = vmul.f32 1.442695, %v4075_v14  ;;  %v4142_v61 = vmul.f32 1.442695, %v4087_v51 }
 0xb11   : > { %v11836_v24 = vpop.eup %8339  ;;  %v4190_v57 = vsel %vm1955_vm2, %v11834_v53, 0.0 }
 0xb12   : > { %8341 = vpow2.f32 %v4118_v29  ;;  %4191 = vadd.xlane.f32.xlu1 %v4190_v57  ;;  %v4226_v62 = vsel %vm1955_vm2, %v11836_v24, 0.0 }
 0xb13   : > { %8343 = vpow2.f32 %v4142_v61  ;;  %4227 = vadd.xlane.f32.xlu0 %v4226_v62  ;;  %v11842_v58 = vpop.f32.mrf.mxu2 }
 0xb14   : > { %v3971_v14 = vsel %vm1955_vm2, %v11842_v58, -inf }
 0xb18   : > { %v11844_v59 = vpop.eup %8341 }
 0xb19   : > { %v11846_v8 = vpop.eup %8343  ;;  %v4193_v12 = vsel %vm1955_vm2, %v11844_v59, 0.0 }
 0xb1a   : > { %4194 = vadd.xlane.f32.xlu1 %v4193_v12  ;;  %v4229_v29 = vsel %vm1955_vm2, %v11846_v8, 0.0 }
 0xb1b   : > { %3969 = vmax.xlane.f32.xlu0 %v3968_v54  ;;  %4230 = vadd.xlane.f32.xlu2 %v4229_v29  ;;  %v11854_v61 = vpop.f32.mrf.mxu2 }
 0xb1c   : > { %v3974_v48 = vsel %vm1955_vm2, %v11854_v61, -inf }
 0xb22   : > { %3975 = vmax.xlane.f32.xlu1 %v3974_v48 }
 0xb23   : > { %3972 = vmax.xlane.f32.xlu2 %v3971_v14  ;;  %v11862_v54 = vpop.f32.mrf.mxu2 }
 0xb55   : > { %v4210_v51 = vpop.xlane.xlu0 %4209 }
 0xb56   : > { %8345 = vrcp.f32 %v4210_v51  ;;  %v11867_v51 = vpop.f32.mrf.mxu2 }
 0xb5c   : > { %v8346_v57 = vpop.eup %8345 }
 0xb5d   : > { %v4304_v62 = vmul.f32 %v8346_v57, %v11762_v18  ;;  %v4213_v12 = vpop.xlane.xlu0 %4212 }
 0xb5e   : > { %8347 = vrcp.f32 %v4213_v12 }
 0xb5f   : > { %7767 = vmatmul.msk.f32.vlgmr.msra.gmra.mxu3 %vm1955_vm2, %v4304_v62 }
 0xb64   : > { %v8348_v29 = vpop.eup %8347 }
 0xb65   : > { %v4006_v47 = vpop.xlane.xlu0 %4005  ;;  %v4216_v16 = vpop.xlane.xlu2 %4215  ;;  %v4305_v48 = vmul.f32 %v8348_v29, %v11773_v0 }
 0xb66   : > { %v4076_v22 = vsub.f32 %v14444_v60, %v4006_v47  ;;  %8349 = vrcp.f32 %v4216_v16  ;;  %v11876_v60 = vpop.f32.mrf.mxu2 }
 0xb67   : > { %7768 = vmatmul.msk.f32.gmra.mxu3 %vm1955_vm2, %v4305_v48 }
 0xb68   : > { %v4120_v14 = vmul.f32 1.442695, %v4076_v22 }
 0xb6a   : > { %8351 = vpow2.f32 %v4120_v14 }
 0xb6c   : > { %v8350_v18 = vpop.eup %8349 }
 0xb6d   : > { %v4219_v57 = vpop.xlane.xlu1 %4218  ;;  %v4009_v12 = vpop.xlane.xlu2 %4008  ;;  %v4306_v62 = vmul.f32 %v8350_v18, %v11782_v20 }
 0xb6e   : > { %8353 = vrcp.f32 %v4219_v57  ;;  %v4077_v52 = vsub.f32 %v14447_v36, %v4009_v12  ;;  %v3977_v57 = vsel %vm1955_vm2, %v11862_v54, -inf }
 0xb6f   : > { %7769 = vmatmul.msk.f32.gmra.mxu3 %vm1955_vm2, %v4306_v62 }
 0xb70   : > { %v11872_v0 = vpop.eup %8351  ;;  %v4122_v47 = vmul.f32 1.442695, %v4077_v52 }
 0xb71   : > { %v4196_v16 = vsel %vm1955_vm2, %v11872_v0, 0.0 }
 0xb72   : > { %8355 = vpow2.f32 %v4122_v47  ;;  %4197 = vadd.xlane.f32.xlu0 %v4196_v16 }
 0xb74   : > { %v8354_v22 = vpop.eup %8353 }
 0xb75   : > { %v4222_v29 = vpop.xlane.xlu0 %4221  ;;  %v4012_v48 = vpop.xlane.xlu1 %4011  ;;  %v4307_v20 = vmul.f32 %v8354_v22, %v11794_v23 }
 0xb76   : > { %8357 = vrcp.f32 %v4222_v29  ;;  %v4078_v36 = vsub.f32 %v14450_v13, %v4012_v48  ;;  %v4186_v14 = vpop.xlane.xlu2 %4185  ;;  %v11888_v22 = vpop.f32.mrf.mxu2 }
 0xb77   : > { %8359 = vrcp.f32 %v4186_v14  ;;  %7770 = vmatmul.msk.f32.gmra.mxu3 %vm1955_vm2, %v4307_v20 }
 0xb78   : > { %v11881_v52 = vpop.eup %8355  ;;  %v4124_v18 = vmul.f32 1.442695, %v4078_v36 }
 0xb79   : > { %v4199_v12 = vsel %vm1955_vm2, %v11881_v52, 0.0 }
 0xb7a   : > { %8361 = vpow2.f32 %v4124_v18  ;;  %3978 = vmax.xlane.f32.xlu0 %v3977_v57  ;;  %4200 = vadd.xlane.f32.xlu2 %v4199_v12 }
 0xb7c   : > { %v8358_v23 = vpop.eup %8357 }
 0xb7d   : > { %v8360_v62 = vpop.eup %8359  ;;  %v4225_v47 = vpop.xlane.xlu0 %4224  ;;  %v4308_v16 = vmul.f32 %v8358_v23, %v11808_v55 }
 0xb7e   : > { %v4015_v13 = vpop.xlane.xlu1 %4014  ;;  %v4296_v29 = vmul.f32 %v8360_v62, %v11806_v4  ;;  %8363 = vrcp.f32 %v4225_v47  ;;  %v4189_v20 = vpop.xlane.xlu2 %4188  ;;  %v3980_v4 = vsel %vm1955_vm2, %v11867_v51, -inf }
 0xb7f   : > { %v4079_v48 = vsub.f32 %v14452_v40, %v4015_v13  ;;  %8365 = vrcp.f32 %v4189_v20  ;;  %7771 = vmatmul.msk.f32.gmra.mxu3 %vm1955_vm2, %v4308_v16  ;;  %v11907_v47 = vpop.f32.mrf.mxu2 }
 0xb80   : > { %v11893_v36 = vpop.eup %8361  ;;  %7759 = vmatmul.msk.f32.vlgmr.msrb.gmra.mxu2 %vm1955_vm2, %v4296_v29 }
 0xb81   : > { %v4126_v14 = vmul.f32 1.442695, %v4079_v48  ;;  %4941 = vmatpush.xpose.msrb.mxu2 %v10453_v30  ;;  %v4202_v55 = vsel %vm1955_vm2, %v11893_v36, 0.0 }
 0xb82   : > { %4203 = vadd.xlane.f32.xlu1 %v4202_v55  ;;  %3981 = vmax.xlane.f32.xlu2 %v3980_v4 }
 0xb83   : > { %8367 = vpow2.f32 %v4126_v14 }
 0xb84   : > { %v8364_v40 = vpop.eup %8363 }
 0xb85   : > { %v8366_v18 = vpop.eup %8365  ;;  %4942 = vmatpush.xpose.msrb.mxu2 %v10442_v21  ;;  %v4309_v12 = vmul.f32 %v8364_v40, %v11820_v63  ;;  %v3983_v21 = vsel %vm1955_vm2, %v11876_v60, -inf }
 0xb86   : > { %v4192_v57 = vpop.xlane.xlu1 %4191  ;;  %v4228_v23 = vpop.xlane.xlu0 %4227  ;;  %v4297_v30 = vmul.f32 %v8366_v18, %v11822_v26  ;;  %v3986_v26 = vsel %vm1955_vm2, %v11888_v22, -inf }
 0xb87   : > { %8369 = vrcp.f32 %v4192_v57  ;;  %7772 = vmatmul.msk.f32.gmra.mxu3 %vm1955_vm2, %v4309_v12  ;;  %v11926_v40 = vpop.f32.mrf.mxu2 }
 0xb88   : > { %8371 = vrcp.f32 %v4228_v23  ;;  %7760 = vmatmul.msk.f32.gmra.mxu2 %vm1955_vm2, %v4297_v30 }
 0xb89   : > { %v11905_v62 = vpop.eup %8367  ;;  %4943 = vmatpush.xpose.msrb.mxu2 %v10431_v35 }
 0xb8a   : > { %v4205_v63 = vsel %vm1955_vm2, %v11905_v62, 0.0  ;;  %3984 = vmax.xlane.f32.xlu1 %v3983_v21  ;;  %3987 = vmax.xlane.f32.xlu2 %v3986_v26  ;;  %v14455_v26 = vld [vmem:[#allocation66_spill] sm:$0xff] }
 0xb8b   : > { %4206 = vadd.xlane.f32.xlu0 %v4205_v63 }
 0xb8d   : > { %v8370_v13 = vpop.eup %8369  ;;  %4944 = vmatpush.xpose.msrb.mxu2 %v10420_v41  ;;  %v3989_v41 = vsel %vm1955_vm2, %v11907_v47, -inf }
 0xb8e   : > { %v8372_v16 = vpop.eup %8371  ;;  %v4195_v29 = vpop.xlane.xlu1 %4194  ;;  %v4298_v48 = vmul.f32 %v8370_v13, %v11834_v53 }
 0xb8f   : > { %8373 = vrcp.f32 %v4195_v29  ;;  %v3970_v35 = vpop.xlane.xlu0 %3969  ;;  %v4231_v20 = vpop.xlane.xlu2 %4230  ;;  %v4310_v14 = vmul.f32 %v8372_v16, %v11836_v24 }
 0xb90   : > { %v4064_v55 = vsub.f32 %v11830_v5, %v3970_v35  ;;  %8375 = vrcp.f32 %v4231_v20  ;;  %7761 = vmatmul.msk.f32.gmra.mxu2 %vm1955_vm2, %v4298_v48  ;;  %v5372_v35 = vld [vmem:[#allocation8 + $0x70] sm:$0xff]  ;;  %v4040_v20 = vsel %vm1955_vm2, %v11926_v40, -inf }
 0xb91   : > { %7773 = vmatmul.msk.f32.gmra.mxu3 %vm1955_vm2, %v4310_v14  ;;  %4945 = vmatpush.xpose.msrb.mxu2 %v10411_v46  ;;  %v14453_v46 = vld [vmem:[#allocation19_spill] sm:$0xff]  ;;  %v5371_v14 = vld [vmem:[#allocation8 + $0x68] sm:$0xff] }
 0xb92   : > { %v4096_v4 = vmul.f32 1.442695, %v4064_v55  ;;  %3990 = vmax.xlane.f32.xlu1 %v3989_v41  ;;  %vm4773_vm9 = vcmp.ge.s32.totalorder %v14453_v46, 24  ;;  %vm4774_vm10 = vcmp.lt.s32.totalorder %v14453_v46, 32 }
 0xb93   : > { %vm4775_vm11 = vmand %vm4773_vm9, %vm4774_vm10 }
 0xb94   : > { %8377 = vpow2.f32 %v4096_v4  ;;  %v14456_v4 = vld [vmem:[#allocation70_spill] sm:$0xff] }
 0xb95   : > { %v8374_v53 = vpop.eup %8373  ;;  %4946 = vmatpush.xpose.msrb.mxu2 %v10398_v39 }
 0xb96   : > { %v8376_v18 = vpop.eup %8375  ;;  %v3976_v5 = vpop.xlane.xlu1 %3975  ;;  %v4299_v24 = vmul.f32 %v8374_v53, %v11844_v59  ;;  %v5370_v53 = vld [vmem:[#allocation8 + $0x60] sm:$0xff] }
 0xb97   : > { %v4066_v57 = vsub.f32 %v11854_v61, %v3976_v5  ;;  %v3973_v12 = vpop.xlane.xlu2 %3972  ;;  %v4311_v23 = vmul.f32 %v8376_v18, %v11846_v8  ;;  %v11942_v8 = vpop.f32.mrf.mxu2  ;;  %v5369_v18 = vld [vmem:[#allocation8 + $0x58] sm:$0xff] }
 0xb98   : > { %v4065_v30 = vsub.f32 %v11842_v58, %v3973_v12  ;;  %7762 = vmatmul.msk.f32.gmra.mxu2 %vm1955_vm2, %v4299_v24  ;;  %v14454_v58 = vmov 0.0   ;;  %v4043_v24 = vsel %vm1955_vm2, %v11942_v8, -inf  ;;  %v5367_v12 = vld [vmem:[#allocation8 + $0x48] sm:$0xff] }
 0xb99   : > { %v4100_v21 = vmul.f32 1.442695, %v4066_v57  ;;  %7774 = vmatmul.msk.f32.gmra.mxu3 %vm1955_vm2, %v4311_v23  ;;  %4947 = vmatpush.xpose.msrb.mxu2 %v10383_v34  ;;  %v11945_v61 = vsel %vm4775_vm11, 1.0, %v14454_v58  ;;  %v5373_v34 = vld [vmem:[#allocation8 + $0x78] sm:$0xff]  ;;  %v5368_v57 = vld [vmem:[#allocation8 + $0x50] sm:$0xff] }
 0xb9a   : > { %v11937_v39 = vpop.eup %8377  ;;  %v4098_v63 = vmul.f32 1.442695, %v4065_v30  ;;  %v4786_v13 = vmul.f32 %v11945_v61, %v14455_v26  ;;  %5374 = vmatpush.msra.mxu3 %v5373_v34  ;;  %v4787_v41 = vmul.f32 %v11945_v61, %v14456_v4  ;;  %v14457_v23 = vld [vmem:[#allocation74_spill] sm:$0xff]  ;;  %v5366_v30 = vld [vmem:[#allocation8 + $0x40] sm:$0xff]  ;;  %v14460_v4 = vld [vmem:[#allocation85_spill] sm:$0xff] }
 0xb9b   : > { %8379 = vpow2.f32 %v4100_v21  ;;  %v4160_v59 = vsel %vm1955_vm2, %v11937_v39, 0.0  ;;  %v4788_v46 = vmul.f32 %v11945_v61, %v14457_v23  ;;  %v5365_v21 = vld [vmem:[#allocation8 + $0x38] sm:$0xff] }
 0xb9c   : > { %8381 = vpow2.f32 %v4098_v63  ;;  %4161 = vadd.xlane.f32.xlu0 %v4160_v59  ;;  %5375 = vmatpush.msra.mxu3 %v5372_v35  ;;  %v5364_v63 = vld [vmem:[#allocation8 + $0x30] sm:$0xff]  ;;  %v5363_v59 = vld [vmem:[#allocation8 + $0x28] sm:$0xff]  ;;  %v14458_v58 = vld [vmem:[#allocation78_spill] sm:$0xff] }
 0xb9d   : > { %4948 = vmatpush.xpose.msrb.mxu2 %v14419_v28  ;;  %v4789_v26 = vmul.f32 %v11945_v61, %v14458_v58  ;;  %v5361_v34 = vld [vmem:[#allocation8 + $0x18] sm:$0xff]  ;;  %v5359_v35 = vld [vmem:[#allocation8 + $0x8] sm:$0xff] }
 0xb9e   : > { %5376 = vmatpush.msra.mxu3 %v5371_v14  ;;  %v5358_v14 = vld [vmem:[#allocation8] sm:$0xff] }
 0xb9f   : > { %v11960_v55 = vpop.f32.mrf.mxu2 }
 0xba0   : > { %v4046_v5 = vsel %vm1955_vm2, %v11960_v55, -inf  ;;  %5377 = vmatpush.msra.mxu3 %v5370_v53  ;;  %v14461_v53 = vld [vmem:[#allocation89_spill] sm:$0xff] }
 0xba1   : > { %v11950_v16 = vpop.eup %8379  ;;  %4867 = vmatmul.f32.vlgmr.msrb.gmra.mxu3 %v4786_v13  ;;  %v5362_v13 = vld [vmem:[#allocation8 + $0x20] sm:$0xff] }
 0xba2   : > { %v11952_v29 = vpop.eup %8381  ;;  %v4166_v48 = vsel %vm1955_vm2, %v11950_v16, 0.0  ;;  %5378 = vmatpush.msra.mxu3 %v5369_v18  ;;  %v4792_v18 = vmul.f32 %v11945_v61, %v14461_v53 }
 0xba3   : > { %4167 = vadd.xlane.f32.xlu1 %v4166_v48  ;;  %v4163_v28 = vsel %vm1955_vm2, %v11952_v29, 0.0  ;;  %v5360_v48 = vld [vmem:[#allocation8 + $0x10] sm:$0xff] }
 0xba4   : > { %4041 = vmax.xlane.f32.xlu0 %v4040_v20  ;;  %4164 = vadd.xlane.f32.xlu2 %v4163_v28  ;;  %v14459_v20 = vld [vmem:[#allocation82_spill] sm:$0xff] }
 0xba5   : > { %5379 = vmatpush.msra.mxu3 %v5368_v57  ;;  %v4790_v28 = vmul.f32 %v11945_v61, %v14459_v20  ;;  %v11983_v57 = vld [vmem:[%s13892_s5] ss:$0 sm:$0xff]  ;;  %v14466_v20 = vld [vmem:[#allocation33_spill] sm:$0xff] }
 0xba7   : > { %5380 = vmatpush.msra.mxu3 %v5367_v12  ;;  %v8771_v12 = vld [vmem:[%s9284_s1 + $0x80] sm:$0xff] }
 0xba8   : > { %v1738_v23 = vadd.f32 %v8771_v12, %v11983_v57 }
 0xba9   : > { %4870 = vmatmul.f32.gmra.mxu3 %v4787_v41  ;;  %v4791_v41 = vmul.f32 %v11945_v61, %v14460_v4 }
 0xbaa   : > { %5381 = vmatpush.msra.mxu3 %v5366_v30 }
 0xbab   : > { %4047 = vmax.xlane.f32.xlu1 %v4046_v5  ;;  %v14462_v5 = vld [vmem:[#allocation91_spill] sm:$0xff] }
 0xbac   : > { %4044 = vmax.xlane.f32.xlu2 %v4043_v24  ;;  %5382 = vmatpush.msra.mxu3 %v5365_v21  ;;  %v4793_v24 = vmul.f32 %v11945_v61, %v14462_v5  ;;  %v14464_v21 = vld [vmem:[#allocation105_spill] sm:$0xff] }
 0xbad   : > { %v8773_v5 = vld [vmem:[%s9284_s1 + $0x90] sm:$0xff] }
 0xbae   : > { %5383 = vmatpush.msra.mxu3 %v5364_v63  ;;  %v2745_v63 = vadd.f32 %v14464_v21, %v1738_v23 }
 0xbb0   : > { %5384 = vmatpush.msra.mxu3 %v5363_v59  ;;  %v14465_v59 = vld [vmem:[#allocation133_spill] sm:$0xff] }
 0xbb1   : > { %4873 = vmatmul.f32.gmra.mxu3 %v4788_v46  ;;  %v14463_v46 = vld [vmem:[#allocation31_spill] sm:$0xff]  ;;  %v3751_v58 = vadd.f32 %v14465_v59, %v2745_v63 }
 0xbb2   : > { %5385 = vmatpush.msra.mxu3 %v5362_v13  ;;  %v5326_v30 = vmul.f32 %v11945_v61, %v14463_v46  ;;  %v8772_v13 = vld [vmem:[%s9284_s1 + $0x88] sm:$0xff]  ;;  %v12003_v46 = vpop.f32.mrf.mxu2 }
 0xbb4   : > { %5386 = vmatpush.msra.mxu3 %v5361_v34  ;;  %v1739_v34 = vadd.f32 %v8772_v13, %v11983_v57  ;;  %v14470_v13 = vld [vmem:[#allocation107_spill] sm:$0xff] }
 0xbb6   : > { %5387 = vmatpush.msra.mxu3 %v5360_v48 }
 0xbb8   : > { %5388 = vmatpush.msra.mxu3 %v5359_v35 }
 0xbb9   : > { %4876 = vmatmul.f32.gmra.mxu3 %v4789_v26 }
 0xbba   : > { %5389 = vmatpush.msra.mxu3 %v5358_v14  ;;  %v14467_v14 = vld [vmem:[#allocation106_spill] sm:$0xff] }
 0xbbb   : > { %v2746_v4 = vadd.f32 %v14467_v14, %v1739_v34 }
 0xbc1   : > { %4879 = vmatmul.f32.gmra.mxu3 %v4790_v28  ;;  %v5327_v28 = vmul.f32 %v11945_v61, %v14466_v20  ;;  %v14471_v20 = vld [vmem:[#allocation135_spill] sm:$0xff] }
 0xbc9   : > { %4882 = vmatmul.f32.gmra.mxu3 %v4791_v41  ;;  %v14468_v41 = vld [vmem:[#allocation134_spill] sm:$0xff] }
 0xbca   : > { %v3752_v53 = vadd.f32 %v14468_v41, %v2746_v4  ;;  %v8774_v4 = vld [vmem:[%s9284_s1 + $0x98] sm:$0xff] }
 0xbcb   : > { %v1741_v41 = vadd.f32 %v8774_v4, %v11983_v57 }
 0xbd1   : > { %4885 = vmatmul.f32.gmra.mxu3 %v4792_v18 }
 0xbd9   : > { %4888 = vmatmul.f32.gmra.mxu3 %v4793_v24  ;;  %v1740_v24 = vadd.f32 %v8773_v5, %v11983_v57 }
 0xbdb   : > { %v2747_v34 = vadd.f32 %v14470_v13, %v1740_v24  ;;  %v14474_v13 = vld [vmem:[#allocation136_spill] sm:$0xff] }
 0xbe1   : > { %5390 = vmatmul.f32.vlgmr.msra.gmra.mxu3 %v5326_v30 }
 0xbe2   : > { %v4652_v26 = vpop.f32.mrf.mxu3 }
 0xbe3   : > { %v11993_v48 = vadd.f32 %v4652_v26, %v3751_v58  ;;  %v14469_v58 = vld [vmem:[#allocation34_spill] sm:$0xff] }
 0xbe4   : > { %v5328_v26 = vmul.f32 %v11945_v61, %v14469_v58 }
 0xbe5   : > { %v4198_v35 = vpop.xlane.xlu0 %4197 }
 0xbe6   : > { %8383 = vrcp.f32 %v4198_v35 }
 0xbe9   : > { %5393 = vmatmul.f32.gmra.mxu3 %v5327_v28  ;;  %v3753_v28 = vadd.f32 %v14471_v20, %v2747_v34 }
 0xbea   : > { %v4655_v18 = vpop.f32.mrf.mxu3 }
 0xbeb   : > { %v12001_v12 = vadd.f32 %v4655_v18, %v3752_v53 }
 0xbec   : > { %v8384_v23 = vpop.eup %8383 }
 0xbed   : > { %v3979_v30 = vpop.xlane.xlu0 %3978  ;;  %v4201_v21 = vpop.xlane.xlu2 %4200  ;;  %v4300_v63 = vmul.f32 %v8384_v23, %v11872_v0  ;;  %v14472_v23 = vld [vmem:[#allocation35_spill] sm:$0xff] }
 0xbee   : > { %v4067_v59 = vsub.f32 %v11862_v54, %v3979_v30  ;;  %8385 = vrcp.f32 %v4201_v21  ;;  %v5329_v30 = vmul.f32 %v11945_v61, %v14472_v23  ;;  %v14473_v21 = vld [vmem:[#allocation108_spill] sm:$0xff]  ;;  %v14476_v23 = vld [vmem:[#allocation109_spill] sm:$0xff] }
 0xbef   : > { %7763 = vmatmul.msk.f32.gmra.mxu2 %vm1955_vm2, %v4300_v63  ;;  %v2748_v63 = vadd.f32 %v14473_v21, %v1741_v41 }
 0xbf0   : > { %v4102_v35 = vmul.f32 1.442695, %v4067_v59  ;;  %v12021_v59 = vpop.f32.mrf.mxu2 }
 0xbf1   : > { %5396 = vmatmul.f32.gmra.mxu3 %v5328_v26  ;;  %v3754_v34 = vadd.f32 %v14474_v13, %v2748_v63  ;;  %v14477_v13 = vld [vmem:[#allocation137_spill] sm:$0xff] }
 0xbf2   : > { %8387 = vpow2.f32 %v4102_v35  ;;  %v4658_v14 = vpop.f32.mrf.mxu3  ;;  %v8775_v35 = vld [vmem:[%s9284_s1 + $0xa0] sm:$0xff] }
 0xbf3   : > { %v12014_v0 = vadd.f32 %v4658_v14, %v3753_v28  ;;  %v1742_v20 = vadd.f32 %v8775_v35, %v11983_v57  ;;  %v8776_v35 = vld [vmem:[%s9284_s1 + $0xa8] sm:$0xff] }
 0xbf4   : > { %v8386_v54 = vpop.eup %8385 }
 0xbf5   : > { %v4204_v53 = vpop.xlane.xlu1 %4203  ;;  %v3982_v18 = vpop.xlane.xlu2 %3981  ;;  %v4301_v5 = vmul.f32 %v8386_v54, %v11881_v52 }
 0xbf6   : > { %8389 = vrcp.f32 %v4204_v53  ;;  %v4068_v24 = vsub.f32 %v11867_v51, %v3982_v18 }
 0xbf7   : > { %7764 = vmatmul.msk.f32.gmra.mxu2 %vm1955_vm2, %v4301_v5  ;;  %v14475_v5 = vld [vmem:[#allocation38_spill] sm:$0xff] }
 0xbf8   : > { %v12024_v58 = vpop.eup %8387  ;;  %v4104_v26 = vmul.f32 1.442695, %v4068_v24  ;;  %v5330_v24 = vmul.f32 %v11945_v61, %v14475_v5 }
 0xbf9   : > { %5399 = vmatmul.f32.gmra.mxu3 %v5329_v30  ;;  %v4169_v52 = vsel %vm1955_vm2, %v12024_v58, 0.0  ;;  %v2749_v30 = vadd.f32 %v14476_v23, %v1742_v20  ;;  %v1743_v20 = vadd.f32 %v8776_v35, %v11983_v57  ;;  %v8777_v35 = vld [vmem:[%s9284_s1 + $0xb0] sm:$0xff] }
 0xbfa   : > { %8391 = vpow2.f32 %v4104_v26  ;;  %4170 = vadd.xlane.f32.xlu0 %v4169_v52  ;;  %v4661_v51 = vpop.f32.mrf.mxu3  ;;  %v4049_v52 = vsel %vm1955_vm2, %v12003_v46, -inf }
 0xbfb   : > { %v12031_v28 = vadd.f32 %v4661_v51, %v3754_v34  ;;  %v12043_v34 = vpop.f32.mrf.mxu2 }
 0xbfc   : > { %v8390_v14 = vpop.eup %8389 }
 0xbfd   : > { %v3985_v4 = vpop.xlane.xlu1 %3984  ;;  %v4302_v54 = vmul.f32 %v8390_v14, %v11893_v36  ;;  %v3988_v18 = vpop.xlane.xlu2 %3987  ;;  %v3755_v36 = vadd.f32 %v14477_v13, %v2749_v30  ;;  %v14480_v13 = vld [vmem:[#allocation138_spill] sm:$0xff] }
 0xbfe   : > { %v4207_v41 = vpop.xlane.xlu0 %4206  ;;  %v4069_v53 = vsub.f32 %v11876_v60, %v3985_v4  ;;  %v4070_v21 = vsub.f32 %v11888_v22, %v3988_v18  ;;  %v14478_v18 = vld [vmem:[#allocation40_spill] sm:$0xff] }
 0xbff   : > { %8393 = vrcp.f32 %v4207_v41  ;;  %7765 = vmatmul.msk.f32.gmra.mxu2 %vm1955_vm2, %v4302_v54  ;;  %v5331_v5 = vmul.f32 %v11945_v61, %v14478_v18 }
 0xc00   : > { %v12040_v63 = vpop.eup %8391  ;;  %v4106_v26 = vmul.f32 1.442695, %v4069_v53  ;;  %v4108_v60 = vmul.f32 1.442695, %v4070_v21 }
 0xc01   : > { %5402 = vmatmul.f32.gmra.mxu3 %v5330_v24  ;;  %v4172_v51 = vsel %vm1955_vm2, %v12040_v63, 0.0  ;;  %v14479_v24 = vld [vmem:[#allocation110_spill] sm:$0xff] }
 0xc02   : > { %8395 = vpow2.f32 %v4106_v26  ;;  %4050 = vmax.xlane.f32.xlu0 %v4049_v52  ;;  %v4664_v22 = vpop.f32.mrf.mxu3  ;;  %4173 = vadd.xlane.f32.xlu2 %v4172_v51  ;;  %v2750_v23 = vadd.f32 %v14479_v24, %v1743_v20  ;;  %v1744_v20 = vadd.f32 %v8777_v35, %v11983_v57 }
 0xc03   : > { %8397 = vpow2.f32 %v4108_v60  ;;  %v12051_v14 = vadd.f32 %v4664_v22, %v3755_v36  ;;  %v12070_v51 = vpop.f32.mrf.mxu2 }
 0xc04   : > { %v3756_v36 = vadd.f32 %v14480_v13, %v2750_v23  ;;  %v4055_v23 = vsel %vm1955_vm2, %v12043_v34, -inf  ;;  %v14483_v13 = vld [vmem:[#allocation139_spill] sm:$0xff] }
 0xc05   : > { %v8394_v4 = vpop.eup %8393  ;;  %v3991_v41 = vpop.xlane.xlu1 %3990 }
 0xc06   : > { %v4303_v54 = vmul.f32 %v8394_v4, %v11905_v62  ;;  %v4071_v53 = vsub.f32 %v11907_v47, %v3991_v41  ;;  %v4052_v47 = vsel %vm1955_vm2, %v12021_v59, -inf  ;;  %v4778_v4 = vmul.f32 %v11945_v61, %v14312_v3 }
 0xc08   : > { %7766 = vmatmul.msk.f32.gmra.mxu2 %vm1955_vm2, %v4303_v54  ;;  %v12059_v30 = vpop.eup %8395  ;;  %v4110_v21 = vmul.f32 1.442695, %v4071_v53  ;;  %v14481_v54 = vld [vmem:[#allocation42_spill] sm:$0xff] }
 0xc09   : > { %5405 = vmatmul.f32.gmra.mxu3 %v5331_v5  ;;  %v12061_v26 = vpop.eup %8397  ;;  %v4175_v62 = vsel %vm1955_vm2, %v12059_v30, 0.0  ;;  %v5332_v53 = vmul.f32 %v11945_v61, %v14481_v54  ;;  %v14482_v5 = vld [vmem:[#allocation111_spill] sm:$0xff] }
 0xc0a   : > { %8399 = vpow2.f32 %v4110_v21  ;;  %4176 = vadd.xlane.f32.xlu1 %v4175_v62  ;;  %v4667_v60 = vpop.f32.mrf.mxu3  ;;  %4053 = vmax.xlane.f32.xlu2 %v4052_v47  ;;  %v4178_v52 = vsel %vm1955_vm2, %v12061_v26, 0.0  ;;  %v2751_v24 = vadd.f32 %v14482_v5, %v1744_v20  ;;  %v8778_v47 = vld [vmem:[%s9284_s1 + $0xb8] sm:$0xff] }
 0xc0b   : > { %v12072_v22 = vadd.f32 %v4667_v60, %v3756_v36  ;;  %4179 = vadd.xlane.f32.xlu0 %v4178_v52  ;;  %v4058_v36 = vsel %vm1955_vm2, %v12070_v51, -inf  ;;  %v1745_v60 = vadd.f32 %v8778_v47, %v11983_v57  ;;  %v12094_v20 = vpop.f32.mrf.mxu2  ;;  %v14485_v57 = vld [vmem:[#allocation112_spill] sm:$0xff] }
 0xc0c   : > { %v3757_v3 = vadd.f32 %v14483_v13, %v2751_v24  ;;  %v14484_v24 = vld [vmem:[#allocation44_spill] sm:$0xff] }
 0xc0d   : > { %v2752_v13 = vadd.f32 %v14485_v57, %v1745_v60 }
 0xc0f   : > { %v4162_v41 = vpop.xlane.xlu0 %4161 }
 0xc10   : > { %8401 = vrcp.f32 %v4162_v41  ;;  %4826 = vmatmul.f32.vlgmr.msra.gmra.mxu2 %v4778_v4  ;;  %v12080_v18 = vpop.eup %8399  ;;  %v4779_v41 = vmul.f32 %v11945_v61, %v14313_v19  ;;  %v4061_v19 = vsel %vm1955_vm2, %v12094_v20, -inf }
 0xc11   : > { %5408 = vmatmul.f32.gmra.mxu3 %v5332_v53  ;;  %v4181_v21 = vsel %vm1955_vm2, %v12080_v18, 0.0 }
 0xc12   : > { %4056 = vmax.xlane.f32.xlu1 %v4055_v23  ;;  %4182 = vadd.xlane.f32.xlu2 %v4181_v21  ;;  %v5333_v23 = vmul.f32 %v11945_v61, %v14484_v24 }
 0xc13   : > { %4059 = vmax.xlane.f32.xlu0 %v4058_v36  ;;  %v14486_v36 = vld [vmem:[#allocation84_spill] sm:$0xff] }
 0xc14   : > { %v4670_v62 = vpop.f32.mrf.mxu3 }
 0xc15   : > { %v12092_v52 = vadd.f32 %v4670_v62, %v3757_v3 }
 0xc16   : > { %v8402_v35 = vpop.eup %8401  ;;  %v4168_v4 = vpop.xlane.xlu1 %4167 }
 0xc17   : > { %v4288_v54 = vmul.f32 %v8402_v35, %v11937_v39  ;;  %v4042_v53 = vpop.xlane.xlu0 %4041  ;;  %v4165_v5 = vpop.xlane.xlu2 %4164  ;;  %v14487_v39 = vld [vmem:[#allocation140_spill] sm:$0xff] }
 0xc18   : > { %v4088_v21 = vsub.f32 %v11926_v40, %v4042_v53  ;;  %8403 = vrcp.f32 %v4165_v5  ;;  %4829 = vmatmul.f32.gmra.mxu2 %v4779_v41  ;;  %v3758_v62 = vadd.f32 %v14487_v39, %v2752_v13  ;;  %v14488_v41 = vld [vmem:[#allocation80_spill] sm:$0xff] }
 0xc19   : > { %7751 = vmatmul.msk.f32.vlgmr.msra.gmra.mxu1 %vm1955_vm2, %v4288_v54  ;;  %5411 = vmatmul.f32.gmra.mxu3 %v5333_v23  ;;  %v4780_v54 = vmul.f32 %v11945_v61, %v14314_v43  ;;  %v14489_v23 = vld [vmem:[#allocation48_spill] sm:$0xff] }
 0xc1a   : > { %v4144_v3 = vmul.f32 1.442695, %v4088_v21  ;;  %4900 = vmatpush.xpose.msra.mxu1 %v14486_v36  ;;  %4062 = vmax.xlane.f32.xlu2 %v4061_v19  ;;  %v5334_v21 = vmul.f32 %v11945_v61, %v14489_v23  ;;  %v14490_v36 = vld [vmem:[#allocation77_spill] sm:$0xff]  ;;  %v4781_v19 = vmul.f32 %v11945_v61, %v14420_v9 }
 0xc1c   : > { %8405 = vpow2.f32 %v4144_v3  ;;  %v4673_v47 = vpop.f32.mrf.mxu3 }
 0xc1d   : > { %v12108_v35 = vadd.f32 %v4673_v47, %v3758_v62  ;;  %8407 = vrcp.f32 %v4168_v4  ;;  %v14492_v62 = vld [vmem:[#allocation51_spill] sm:$0xff] }
 0xc1e   : > { %v8404_v40 = vpop.eup %8403  ;;  %4901 = vmatpush.xpose.msra.mxu1 %v14488_v41  ;;  %v4048_v60 = vpop.xlane.xlu1 %4047  ;;  %v5335_v47 = vmul.f32 %v11945_v61, %v14492_v62  ;;  %v14500_v62 = vld [vmem:[#allocation56_spill] sm:$0xff] }
 0xc1f   : > { %v4090_v53 = vsub.f32 %v11960_v55, %v4048_v60  ;;  %v4045_v5 = vpop.xlane.xlu2 %4044  ;;  %v4289_v24 = vmul.f32 %v8404_v40, %v11952_v29  ;;  %v14493_v60 = vld [vmem:[#allocation69_spill] sm:$0xff] }
 0xc20   : > { %v4089_v57 = vsub.f32 %v11942_v8, %v4045_v5  ;;  %4832 = vmatmul.f32.gmra.mxu2 %v4780_v54  ;;  %v14491_v8 = vld [vmem:[#allocation73_spill] sm:$0xff]  ;;  %v4782_v5 = vmul.f32 %v11945_v61, %v14421_v6 }
 0xc21   : > { %v4148_v13 = vmul.f32 1.442695, %v4090_v53  ;;  %7752 = vmatmul.msk.f32.gmra.mxu1 %vm1955_vm2, %v4289_v24  ;;  %5414 = vmatmul.f32.gmra.mxu3 %v5334_v21  ;;  %v14494_v53 = vld [vmem:[#allocation65_spill] sm:$0xff]  ;;  %v14496_v21 = vld [vmem:[#allocation62_spill] sm:$0xff] }
 0xc22   : > { %v12119_v4 = vpop.eup %8405  ;;  %v4146_v3 = vmul.f32 1.442695, %v4089_v57  ;;  %4902 = vmatpush.xpose.msra.mxu1 %v14490_v36  ;;  %v14495_v24 = vld [vmem:[#allocation53_spill] sm:$0xff]  ;;  %v14498_v36 = vld [vmem:[#allocation54_spill] sm:$0xff] }
 0xc23   : > { %8409 = vpow2.f32 %v4148_v13  ;;  %v4232_v43 = vsel %vm1955_vm2, %v12119_v4, 0.0  ;;  %v8408_v29 = vpop.eup %8407  ;;  %v5336_v23 = vmul.f32 %v11945_v61, %v14495_v24  ;;  %v14497_v13 = vld [vmem:[#allocation60_spill] sm:$0xff] }
 0xc24   : > { %8411 = vpow2.f32 %v4146_v3  ;;  %4233 = vadd.xlane.f32.xlu1 %v4232_v43  ;;  %v12124_v55 = vpop.f32.mrf.mxu3  ;;  %v4290_v39 = vmul.f32 %v8408_v29, %v11950_v16  ;;  %v4783_v3 = vmul.f32 %v11945_v61, %v14422_v45  ;;  %v5337_v43 = vmul.f32 %v11945_v61, %v14498_v36 }
 0xc25   : > { %v4784_v29 = vmul.f32 %v11945_v61, %v14423_v10  ;;  %v4785_v45 = vmul.f32 %v11945_v61, %v14424_v32  ;;  %v4802_v10 = vmul.f32 %v11945_v61, %v14425_v50  ;;  %v4803_v32 = vmul.f32 %v11945_v61, %v14429_v42 }
 0xc26   : > { %4903 = vmatpush.xpose.msra.mxu1 %v14491_v8  ;;  %v14499_v8 = vld [vmem:[#allocation55_spill] sm:$0xff]  ;;  %v4804_v50 = vmul.f32 %v11945_v61, %v14433_v2 }
 0xc28   : > { %4835 = vmatmul.f32.gmra.mxu2 %v4781_v19  ;;  %v5338_v19 = vmul.f32 %v11945_v61, %v14499_v8  ;;  %v14504_v8 = vld [vmem:[#allocation64_spill] sm:$0xff] }
 0xc29   : > { %v12132_v40 = vpop.eup %8409  ;;  %7753 = vmatmul.msk.f32.gmra.mxu1 %vm1955_vm2, %v4290_v39  ;;  %5417 = vmatmul.f32.gmra.mxu3 %v5335_v47  ;;  %v5339_v47 = vmul.f32 %v11945_v61, %v14500_v62 }
 0xc2a   : > { %v12135_v41 = vpop.eup %8411  ;;  %4904 = vmatpush.xpose.msra.mxu1 %v14493_v60  ;;  %v4238_v54 = vsel %vm1955_vm2, %v12132_v40, 0.0 }
 0xc2b   : > { %v4235_v9 = vsel %vm1955_vm2, %v12135_v41, 0.0 }
 0xc2c   : > { %4239 = vadd.xlane.f32.xlu1 %v4238_v54  ;;  %v12142_v16 = vpop.f32.mrf.mxu3  ;;  %4236 = vadd.xlane.f32.xlu0 %v4235_v9  ;;  %v12171_v54 = vpop.f32.mrf.mxu2  ;;  %v14501_v9 = vld [vmem:[#allocation57_spill] sm:$0xff] }
 0xc2e   : > { %4905 = vmatpush.xpose.msra.mxu1 %v14494_v53  ;;  %v5340_v53 = vmul.f32 %v11945_v61, %v14501_v9 }
 0xc30   : > { %4838 = vmatmul.f32.gmra.mxu2 %v4782_v5 }
 0xc31   : > { %5420 = vmatmul.f32.gmra.mxu3 %v5336_v23  ;;  %v14502_v23 = vld [vmem:[#allocation58_spill] sm:$0xff] }
 0xc32   : > { %4906 = vmatpush.xpose.msra.mxu1 %v14496_v21  ;;  %v5341_v21 = vmul.f32 %v11945_v61, %v14502_v23 }
 0xc34   : > { %v12150_v57 = vpop.f32.mrf.mxu3  ;;  %v12181_v24 = vpop.f32.mrf.mxu2 }
 0xc36   : > { %4907 = vmatpush.xpose.msra.mxu1 %v14497_v13 }
 0xc38   : > { %4841 = vmatmul.f32.gmra.mxu2 %v4783_v3  ;;  %v14503_v3 = vld [vmem:[#allocation61_spill] sm:$0xff] }
 0xc39   : > { %5423 = vmatmul.f32.gmra.mxu3 %v5337_v43  ;;  %v5342_v36 = vmul.f32 %v11945_v61, %v14503_v3  ;;  %v4807_v3 = vmul.f32 %v11945_v61, %v14443_v31 }
 0xc3c   : > { %v12157_v6 = vpop.f32.mrf.mxu3  ;;  %v12191_v43 = vpop.f32.mrf.mxu2 }
 0xc40   : > { %4844 = vmatmul.f32.gmra.mxu2 %v4784_v29  ;;  %v4805_v29 = vmul.f32 %v11945_v61, %v14437_v49 }
 0xc41   : > { %5426 = vmatmul.f32.gmra.mxu3 %v5338_v19  ;;  %v5343_v19 = vmul.f32 %v11945_v61, %v14504_v8 }
 0xc44   : > { %v12163_v39 = vpop.f32.mrf.mxu3 }
 0xc48   : > { %4847 = vmatmul.f32.gmra.mxu2 %v4785_v45  ;;  %v12199_v45 = vpop.f32.mrf.mxu2 }
 0xc49   : > { %5429 = vmatmul.f32.gmra.mxu3 %v5339_v47  ;;  %v4806_v47 = vmul.f32 %v11945_v61, %v14441_v37 }
 0xc4c   : > { %v12169_v60 = vpop.f32.mrf.mxu3 }
 0xc50   : > { %4949 = vmatmul.f32.vlgmr.msrb.gmra.mxu2 %v4802_v10  ;;  %v14505_v10 = vld [vmem:[#allocation68_spill] sm:$0xff] }
 0xc51   : > { %5432 = vmatmul.f32.gmra.mxu3 %v5340_v53  ;;  %v5344_v9 = vmul.f32 %v11945_v61, %v14505_v10 }
 0xc54   : > { %v12177_v5 = vpop.f32.mrf.mxu3 }
 0xc58   : > { %4952 = vmatmul.f32.gmra.mxu2 %v4803_v32 }
 0xc59   : > { %5435 = vmatmul.f32.gmra.mxu3 %v5341_v21 }
 0xc5c   : > { %v12185_v13 = vpop.f32.mrf.mxu3 }
 0xc60   : > { %4955 = vmatmul.f32.gmra.mxu2 %v4804_v50 }
 0xc61   : > { %5438 = vmatmul.f32.gmra.mxu3 %v5342_v36  ;;  %v14506_v36 = vld [vmem:[#allocation72_spill] sm:$0xff] }
 0xc64   : > { %v12193_v42 = vpop.f32.mrf.mxu3 }
 0xc68   : > { %4958 = vmatmul.f32.gmra.mxu2 %v4805_v29  ;;  %v5345_v29 = vmul.f32 %v11945_v61, %v14506_v36 }
 0xc69   : > { %5441 = vmatmul.f32.gmra.mxu3 %v5343_v19 }
 0xc6c   : > { %v12201_v2 = vpop.f32.mrf.mxu3 }
 0xc6d   : > { %v4171_v62 = vpop.xlane.xlu0 %4170 }
 0xc6e   : > { %8413 = vrcp.f32 %v4171_v62 }
 0xc70   : > { %4961 = vmatmul.f32.gmra.mxu2 %v4806_v47 }
 0xc71   : > { %5444 = vmatmul.f32.gmra.mxu3 %v5344_v9 }
 0xc72   : > { %v12207_v49 = vpop.f32.mrf.mxu2 }
 0xc74   : > { %v12209_v53 = vpop.f32.mrf.mxu3  ;;  %v8414_v32 = vpop.eup %8413 }
 0xc75   : > { %v4051_v23 = vpop.xlane.xlu0 %4050  ;;  %v4174_v21 = vpop.xlane.xlu2 %4173  ;;  %v4291_v50 = vmul.f32 %v8414_v32, %v12024_v58 }
 0xc76   : > { %v4091_v37 = vsub.f32 %v12003_v46, %v4051_v23  ;;  %8415 = vrcp.f32 %v4174_v21  ;;  %v4808_v46 = vmul.f32 %v11945_v61, %v14446_v1  ;;  %v14507_v23 = vld [vmem:[#allocation75_spill] sm:$0xff] }
 0xc77   : > { %7754 = vmatmul.msk.f32.gmra.mxu1 %vm1955_vm2, %v4291_v50  ;;  %v5346_v21 = vmul.f32 %v11945_v61, %v14507_v23 }
 0xc78   : > { %4964 = vmatmul.f32.gmra.mxu2 %v4807_v3  ;;  %v4150_v8 = vmul.f32 1.442695, %v4091_v37 }
 0xc79   : > { %5447 = vmatmul.f32.gmra.mxu3 %v5345_v29 }
 0xc7a   : > { %8417 = vpow2.f32 %v4150_v8  ;;  %v12218_v19 = vpop.f32.mrf.mxu2 }
 0xc7c   : > { %v12220_v62 = vpop.f32.mrf.mxu3  ;;  %v8416_v58 = vpop.eup %8415 }
 0xc7d   : > { %v4177_v47 = vpop.xlane.xlu1 %4176  ;;  %v4054_v10 = vpop.xlane.xlu2 %4053  ;;  %v4292_v31 = vmul.f32 %v8416_v58, %v12040_v63  ;;  %v4809_v58 = vmul.f32 %v11945_v61, %v14449_v25 }
 0xc7e   : > { %8419 = vrcp.f32 %v4177_v47  ;;  %v4180_v9 = vpop.xlane.xlu0 %4179  ;;  %v4092_v32 = vsub.f32 %v12021_v59, %v4054_v10 }
 0xc7f   : > { %7755 = vmatmul.msk.f32.gmra.mxu1 %vm1955_vm2, %v4292_v31  ;;  %v5347_v31 = vmul.f32 %v11945_v61, %v14392_v33 }
 0xc80   : > { %4967 = vmatmul.f32.gmra.mxu2 %v4808_v46  ;;  %v12229_v50 = vpop.eup %8417  ;;  %v4152_v3 = vmul.f32 1.442695, %v4092_v32 }
 0xc81   : > { %5450 = vmatmul.f32.gmra.mxu3 %v5346_v21  ;;  %v4241_v63 = vsel %vm1955_vm2, %v12229_v50, 0.0 }
 0xc82   : > { %8421 = vpow2.f32 %v4152_v3  ;;  %v12233_v37 = vpop.f32.mrf.mxu2  ;;  %4242 = vadd.xlane.f32.xlu2 %v4241_v63  ;;  %v5348_v63 = vmul.f32 %v11945_v61, %v14393_v7 }
 0xc83   : > { %8423 = vrcp.f32 %v4180_v9 }
 0xc84   : > { %v12235_v1 = vpop.f32.mrf.mxu3  ;;  %v8420_v59 = vpop.eup %8419 }
 0xc85   : > { %v4057_v36 = vpop.xlane.xlu1 %4056  ;;  %v4183_v29 = vpop.xlane.xlu2 %4182  ;;  %v4293_v8 = vmul.f32 %v8420_v59, %v12059_v30 }
 0xc86   : > { %v4093_v47 = vsub.f32 %v12043_v34, %v4057_v36  ;;  %v4060_v10 = vpop.xlane.xlu0 %4059 }
 0xc87   : > { %v4094_v46 = vsub.f32 %v12070_v51, %v4060_v10  ;;  %7756 = vmatmul.msk.f32.gmra.mxu1 %vm1955_vm2, %v4293_v8 }
 0xc88   : > { %4970 = vmatmul.f32.gmra.mxu2 %v4809_v58  ;;  %v12245_v32 = vpop.eup %8421  ;;  %v4154_v9 = vmul.f32 1.442695, %v4093_v47 }
 0xc89   : > { %5453 = vmatmul.f32.gmra.mxu3 %v5347_v31  ;;  %v4156_v23 = vmul.f32 1.442695, %v4094_v46  ;;  %v4244_v30 = vsel %vm1955_vm2, %v12245_v32, 0.0  ;;  %v8424_v25 = vpop.eup %8423  ;;  %v5349_v31 = vmul.f32 %v11945_v61, %v14280_v56 }
 0xc8a   : > { %8425 = vpow2.f32 %v4154_v9  ;;  %4245 = vadd.xlane.f32.xlu0 %v4244_v30  ;;  %v4294_v21 = vmul.f32 %v8424_v25, %v12061_v26 }
 0xc8b   : > { %v12249_v34 = vpop.f32.mrf.mxu2  ;;  %8427 = vpow2.f32 %v4156_v23 }
 0xc8c   : > { %v5406_v33 = vpop.f32.mrf.mxu3  ;;  %8429 = vrcp.f32 %v4183_v29 }
 0xc8d   : > { %v4063_v51 = vpop.xlane.xlu2 %4062 }
 0xc8e   : > { %v4095_v3 = vsub.f32 %v12094_v20, %v4063_v51 }
 0xc8f   : > { %7757 = vmatmul.msk.f32.gmra.mxu1 %vm1955_vm2, %v4294_v21 }
 0xc90   : > { %v12256_v59 = vpop.eup %8425  ;;  %v4158_v36 = vmul.f32 1.442695, %v4095_v3  ;;  %v5350_v3 = vmul.f32 %v11945_v61, %v14281_v15  ;;  %v5351_v15 = vmul.f32 %v11945_v61, %v14282_v38  ;;  %v5352_v38 = vmul.f32 %v11945_v61, %v14283_v44 }
 0xc91   : > { %5456 = vmatmul.f32.gmra.mxu3 %v5348_v63  ;;  %v12258_v8 = vpop.eup %8427  ;;  %v4247_v58 = vsel %vm1955_vm2, %v12256_v59, 0.0 }
 0xc92   : > { %v8430_v29 = vpop.eup %8429  ;;  %8431 = vpow2.f32 %v4158_v36  ;;  %4248 = vadd.xlane.f32.xlu1 %v4247_v58  ;;  %v4250_v20 = vsel %vm1955_vm2, %v12258_v8, 0.0 }
 0xc93   : > { %v12262_v26 = vpop.f32.mrf.mxu2  ;;  %4251 = vadd.xlane.f32.xlu2 %v4250_v20  ;;  %v4295_v47 = vmul.f32 %v8430_v29, %v12080_v18 }
 0xc94   : > { %v5409_v7 = vpop.f32.mrf.mxu3  ;;  %v4974_v9 = vsel %vm1955_vm2, %v12262_v26, -inf }
 0xc97   : > { %v4234_v10 = vpop.xlane.xlu1 %4233  ;;  %7758 = vmatmul.msk.f32.gmra.mxu1 %vm1955_vm2, %v4295_v47 }
 0xc98   : > { %8433 = vrcp.f32 %v4234_v10  ;;  %v12270_v46 = vpop.eup %8431 }
 0xc99   : > { %5459 = vmatmul.f32.gmra.mxu3 %v5349_v31  ;;  %v4253_v23 = vsel %vm1955_vm2, %v12270_v46, 0.0 }
 0xc9a   : > { %4975 = vmax.xlane.f32.xlu1 %v4974_v9  ;;  %4254 = vadd.xlane.f32.xlu0 %v4253_v23 }
 0xc9b   : > { %v12276_v30 = vpop.f32.mrf.mxu2 }
 0xc9c   : > { %v5412_v18 = vpop.f32.mrf.mxu3  ;;  %v4977_v56 = vsel %vm1955_vm2, %v12276_v30, -inf }
 0xc9d   : > { %4978 = vmax.xlane.f32.xlu2 %v4977_v56 }
 0xc9e   : > { %v8434_v25 = vpop.eup %8433 }
 0xc9f   : > { %v4312_v51 = vmul.f32 %v8434_v25, %v12119_v4  ;;  %v4237_v21 = vpop.xlane.xlu0 %4236  ;;  %v4240_v36 = vpop.xlane.xlu1 %4239 }
 0xca0   : > { %8435 = vrcp.f32 %v4237_v21  ;;  %v4998_v21 = vsel %vm1955_vm2, %v12124_v55, -inf }
 0xca1   : > { %7775 = vmatmul.msk.f32.vlgmr.msrb.gmra.mxu1 %vm1955_vm2, %v4312_v51  ;;  %5462 = vmatmul.f32.gmra.mxu3 %v5350_v3  ;;  %8437 = vrcp.f32 %v4240_v36  ;;  %v14509_v3 = vld [vmem:[#allocation86_spill] sm:$0xff] }
 0xca2   : > { %5519 = vmatpush.msrb.mxu1 %v5412_v18  ;;  %v5356_v36 = vmul.f32 %v11945_v61, %v14509_v3 }
 0xca3   : > { %v12284_v63 = vpop.f32.mrf.mxu2 }
 0xca4   : > { %5520 = vmatpush.msrb.mxu1 %v5409_v7  ;;  %v12286_v58 = vpop.f32.mrf.mxu3  ;;  %v4980_v29 = vsel %vm1955_vm2, %v12284_v63, -inf }
 0xca5   : > { %4981 = vmax.xlane.f32.xlu0 %v4980_v29 }
 0xca6   : > { %5521 = vmatpush.msrb.mxu1 %v5406_v33  ;;  %v8436_v4 = vpop.eup %8435 }
 0xca7   : > { %v4313_v20 = vmul.f32 %v8436_v4, %v12135_v41  ;;  %v8438_v10 = vpop.eup %8437  ;;  %v5001_v4 = vsel %vm1955_vm2, %v12142_v16, -inf }
 0xca8   : > { %5522 = vmatpush.msrb.mxu1 %v12235_v1  ;;  %v4314_v41 = vmul.f32 %v8438_v10, %v12132_v40 }
 0xca9   : > { %5465 = vmatmul.f32.gmra.mxu3 %v5351_v15  ;;  %7776 = vmatmul.msk.f32.gmra.mxu1 %vm1955_vm2, %v4313_v20  ;;  %v14510_v15 = vld [vmem:[#allocation90_spill] sm:$0xff] }
 0xcaa   : > { %5523 = vmatpush.msrb.mxu1 %v12220_v62  ;;  %v5357_v20 = vmul.f32 %v11945_v61, %v14510_v15 }
 0xcab   : > { %v12296_v7 = vpop.f32.mrf.mxu2 }
 0xcac   : > { %v5418_v47 = vpop.f32.mrf.mxu3  ;;  %v4983_v33 = vsel %vm1955_vm2, %v12296_v7, -inf  ;;  %5524 = vmatpush.msrb.mxu1 %v12209_v53 }
 0xcad   : > { %4984 = vmax.xlane.f32.xlu1 %v4983_v33 }
 0xcae   : > { %5525 = vmatpush.msrb.mxu1 %v12201_v2  ;;  %v5353_v2 = vmul.f32 %v11945_v61, %v14284_v27  ;;  %v14508_v27 = vld [vmem:[#allocation81_spill] sm:$0xff] }
 0xcaf   : > { %v5355_v56 = vmul.f32 %v11945_v61, %v14508_v27 }
 0xcb0   : > { %5526 = vmatpush.msrb.mxu1 %v12193_v42  ;;  %v5354_v42 = vmul.f32 %v11945_v61, %v14285_v11 }
 0xcb1   : > { %5468 = vmatmul.f32.gmra.mxu3 %v5352_v38  ;;  %7777 = vmatmul.msk.f32.gmra.mxu1 %vm1955_vm2, %v4314_v41 }
 0xcb3   : > { %v12307_v62 = vpop.f32.mrf.mxu2 }
 0xcb4   : > { %v5421_v1 = vpop.f32.mrf.mxu3  ;;  %v4986_v31 = vsel %vm1955_vm2, %v12307_v62, -inf }
 0xcb5   : > { %4987 = vmax.xlane.f32.xlu2 %v4986_v31 }
 0xcb9   : > { %5471 = vmatmul.f32.gmra.mxu3 %v5353_v2 }
 0xcbb   : > { %v12313_v53 = vpop.f32.mrf.mxu2 }
 0xcbc   : > { %v5424_v44 = vpop.f32.mrf.mxu3  ;;  %v4989_v40 = vsel %vm1955_vm2, %v12313_v53, -inf }
 0xcbd   : > { %4990 = vmax.xlane.f32.xlu0 %v4989_v40 }
 0xcc1   : > { %5474 = vmatmul.f32.gmra.mxu3 %v5354_v42 }
 0xcc3   : > { %v12319_v9 = vpop.f32.mrf.mxu2 }
 0xcc4   : > { %v5427_v23 = vpop.f32.mrf.mxu3  ;;  %v4992_v18 = vsel %vm1955_vm2, %v12319_v9, -inf }
 0xcc5   : > { %4993 = vmax.xlane.f32.xlu1 %v4992_v18 }
 0xcc9   : > { %5477 = vmatmul.f32.gmra.mxu3 %v5355_v56 }
 0xccb   : > { %v12325_v25 = vpop.f32.mrf.mxu2 }
 0xccc   : > { %v5430_v51 = vpop.f32.mrf.mxu3  ;;  %v4995_v11 = vsel %vm1955_vm2, %v12325_v25, -inf }
 0xccd   : > { %4999 = vmax.xlane.f32.xlu1 %v4998_v21  ;;  %4996 = vmax.xlane.f32.xlu0 %v4995_v11 }
 0xcd1   : > { %5480 = vmatmul.f32.gmra.mxu3 %v5356_v36 }
 0xcd4   : > { %v5433_v29 = vpop.f32.mrf.mxu3 }
 0xcd5   : > { %5002 = vmax.xlane.f32.xlu0 %v5001_v4  ;;  %v12352_v4 = vpop.f32.mrf.mxu1 }
 0xcd9   : > { %5483 = vmatmul.f32.gmra.mxu3 %v5357_v20 }
 0xcdc   : > { %v5436_v33 = vpop.f32.mrf.mxu3 }
 0xcdd   : > { %5584 = vmatpush.msra.mxu2 %v5436_v33 }
 0xcdf   : > { %5585 = vmatpush.msra.mxu2 %v5433_v29 }
 0xce1   : > { %5586 = vmatpush.msra.mxu2 %v5430_v51 }
 0xce3   : > { %5587 = vmatpush.msra.mxu2 %v5427_v23 }
 0xce4   : > { %v12337_v10 = vpop.f32.mrf.mxu3 }
 0xce5   : > { %5588 = vmatpush.msra.mxu2 %v5424_v44 }
 0xce7   : > { %5589 = vmatpush.msra.mxu2 %v5421_v1 }
 0xce9   : > { %5590 = vmatpush.msra.mxu2 %v5418_v47 }
 0xceb   : > { %5591 = vmatpush.msra.mxu2 %v12286_v58 }
 0xcec   : > { %v12340_v38 = vpop.f32.mrf.mxu3 }
 0xcf4   : > { %v12342_v41 = vpop.f32.mrf.mxu3 }
 0xcf5   : > { %v4243_v31 = vpop.xlane.xlu2 %4242 }
 0xcf6   : > { %8439 = vrcp.f32 %v4243_v31 }
 0xcfc   : > { %v5448_v2 = vpop.f32.mrf.mxu3  ;;  %v8440_v40 = vpop.eup %8439 }
 0xcfd   : > { %v4246_v42 = vpop.xlane.xlu0 %4245  ;;  %v4315_v18 = vmul.f32 %v8440_v40, %v12229_v50 }
 0xcfe   : > { %8441 = vrcp.f32 %v4246_v42 }
 0xcff   : > { %7778 = vmatmul.msk.f32.gmra.mxu1 %vm1955_vm2, %v4315_v18 }
 0xd04   : > { %v5451_v23 = vpop.f32.mrf.mxu3  ;;  %v8442_v44 = vpop.eup %8441 }
 0xd05   : > { %v4249_v1 = vpop.xlane.xlu1 %4248  ;;  %v4316_v47 = vmul.f32 %v8442_v44, %v12245_v32  ;;  %v12361_v44 = vpop.f32.mrf.mxu1 }
 0xd06   : > { %8443 = vrcp.f32 %v4249_v1  ;;  %v4252_v58 = vpop.xlane.xlu2 %4251 }
 0xd07   : > { %7779 = vmatmul.msk.f32.gmra.mxu1 %vm1955_vm2, %v4316_v47  ;;  %8445 = vrcp.f32 %v4252_v58 }
 0xd0c   : > { %v5454_v27 = vpop.f32.mrf.mxu3  ;;  %v8444_v56 = vpop.eup %8443 }
 0xd0d   : > { %v4976_v51 = vpop.xlane.xlu1 %4975  ;;  %v4317_v21 = vmul.f32 %v8444_v56, %v12256_v59  ;;  %v4255_v11 = vpop.xlane.xlu0 %4254 }
 0xd0e   : > { %v5070_v50 = vsub.f32 %v12262_v26, %v4976_v51  ;;  %v8446_v32 = vpop.eup %8445 }
 0xd0f   : > { %7780 = vmatmul.msk.f32.gmra.mxu1 %vm1955_vm2, %v4317_v21  ;;  %v4318_v33 = vmul.f32 %v8446_v32, %v12258_v8  ;;  %v5007_v32 = vsel %vm1955_vm2, %v12157_v6, -inf }
 0xd10   : > { %v4979_v3 = vpop.xlane.xlu2 %4978  ;;  %v5102_v36 = vmul.f32 1.442695, %v5070_v50  ;;  %v14511_v50 = vld [vmem:[#allocation92_spill] sm:$0xff] }
 0xd11   : > { %v5071_v29 = vsub.f32 %v12276_v30, %v4979_v3  ;;  %v5004_v3 = vsel %vm1955_vm2, %v12150_v57, -inf }
 0xd12   : > { %8447 = vpow2.f32 %v5102_v36 }
 0xd13   : > { %8449 = vrcp.f32 %v4255_v11  ;;  %v5104_v20 = vmul.f32 1.442695, %v5071_v29 }
 0xd14   : > { %v5457_v15 = vpop.f32.mrf.mxu3 }
 0xd15   : > { %8451 = vpow2.f32 %v5104_v20 }
 0xd17   : > { %7781 = vmatmul.msk.f32.gmra.mxu1 %vm1955_vm2, %v4318_v33 }
 0xd18   : > { %v4982_v31 = vpop.xlane.xlu0 %4981  ;;  %v12356_v59 = vpop.eup %8447 }
 0xd19   : > { %v5072_v26 = vsub.f32 %v12284_v63, %v4982_v31  ;;  %v5166_v30 = vsel %vm1955_vm2, %v12356_v59, 0.0  ;;  %v8450_v40 = vpop.eup %8449 }
 0xd1a   : > { %5167 = vadd.xlane.f32.xlu2 %v5166_v30  ;;  %v4319_v8 = vmul.f32 %v8450_v40, %v12270_v46  ;;  %v5010_v30 = vsel %vm1955_vm2, %v12163_v39, -inf }
 0xd1b   : > { %v5106_v42 = vmul.f32 1.442695, %v5072_v26  ;;  %v12364_v1 = vpop.eup %8451 }
 0xd1c   : > { %v5460_v18 = vpop.f32.mrf.mxu3  ;;  %v5169_v58 = vsel %vm1955_vm2, %v12364_v1, 0.0 }
 0xd1d   : > { %8453 = vpow2.f32 %v5106_v42  ;;  %5649 = vmatpush.msrb.mxu0 %v5460_v18  ;;  %v14513_v42 = vld [vmem:[#allocation94_spill] sm:$0xff] }
 0xd1e   : > { %v4796_v18 = vmul.f32 %v11945_v61, %v14513_v42 }
 0xd1f   : > { %5650 = vmatpush.msrb.mxu0 %v5457_v15  ;;  %7782 = vmatmul.msk.f32.gmra.mxu1 %vm1955_vm2, %v4319_v8 }
 0xd20   : > { %v4985_v47 = vpop.xlane.xlu1 %4984 }
 0xd21   : > { %5651 = vmatpush.msrb.mxu0 %v5454_v27  ;;  %v5073_v63 = vsub.f32 %v12296_v7, %v4985_v47  ;;  %v4794_v27 = vmul.f32 %v11945_v61, %v14511_v50  ;;  %v12378_v7 = vpop.f32.mrf.mxu1  ;;  %v5013_v50 = vsel %vm1955_vm2, %v12169_v60, -inf }
 0xd22   : > { %5170 = vadd.xlane.f32.xlu2 %v5169_v58 }
 0xd23   : > { %v12370_v56 = vpop.eup %8453  ;;  %v5108_v51 = vmul.f32 1.442695, %v5073_v63  ;;  %5652 = vmatpush.msrb.mxu0 %v5451_v23 }
 0xd24   : > { %v12372_v21 = vpop.f32.mrf.mxu3  ;;  %v5172_v46 = vsel %vm1955_vm2, %v12370_v56, 0.0 }
 0xd25   : > { %8455 = vpow2.f32 %v5108_v51  ;;  %5653 = vmatpush.msrb.mxu0 %v5448_v2  ;;  %5173 = vadd.xlane.f32.xlu1 %v5172_v46 }
 0xd27   : > { %5654 = vmatpush.msrb.mxu0 %v12342_v41  ;;  %4908 = vmatmul.f32.vlgmr.msra.gmra.mxu1 %v4794_v27  ;;  %v14514_v27 = vld [vmem:[#allocation95_spill] sm:$0xff] }
 0xd28   : > { %v4988_v11 = vpop.xlane.xlu2 %4987 }
 0xd29   : > { %5655 = vmatpush.msrb.mxu0 %v12340_v38  ;;  %v5074_v23 = vsub.f32 %v12307_v62, %v4988_v11  ;;  %v14512_v62 = vld [vmem:[#allocation93_spill] sm:$0xff]  ;;  %v12396_v15 = vpop.f32.mrf.mxu1  ;;  %v4797_v11 = vmul.f32 %v11945_v61, %v14514_v27  ;;  %v4799_v27 = vmul.f32 %v11945_v61, %v14408_v17 }
 0xd2a   : > { %5005 = vmax.xlane.f32.xlu2 %v5004_v3  ;;  %v4795_v38 = vmul.f32 %v11945_v61, %v14512_v62 }
 0xd2b   : > { %v12385_v36 = vpop.eup %8455  ;;  %v5110_v2 = vmul.f32 1.442695, %v5074_v23  ;;  %5656 = vmatpush.msrb.mxu0 %v12337_v10 }
 0xd2c   : > { %v12388_v29 = vpop.f32.mrf.mxu3  ;;  %v5175_v41 = vsel %vm1955_vm2, %v12385_v36, 0.0 }
 0xd2d   : > { %8457 = vpow2.f32 %v5110_v2  ;;  %5176 = vadd.xlane.f32.xlu0 %v5175_v41  ;;  %5008 = vmax.xlane.f32.xlu1 %v5007_v32 }
 0xd2f   : > { %4911 = vmatmul.f32.gmra.mxu1 %v4795_v38 }
 0xd30   : > { %v4991_v20 = vpop.xlane.xlu0 %4990 }
 0xd31   : > { %v5075_v10 = vsub.f32 %v12313_v53, %v4991_v20  ;;  %v12409_v53 = vpop.f32.mrf.mxu1 }
 0xd33   : > { %v12399_v33 = vpop.eup %8457  ;;  %v5112_v31 = vmul.f32 1.442695, %v5075_v10 }
 0xd34   : > { %v12401_v26 = vpop.f32.mrf.mxu3  ;;  %v5178_v40 = vsel %vm1955_vm2, %v12399_v33, 0.0 }
 0xd35   : > { %8459 = vpow2.f32 %v5112_v31  ;;  %5011 = vmax.xlane.f32.xlu0 %v5010_v30  ;;  %5179 = vadd.xlane.f32.xlu2 %v5178_v40  ;;  %v5016_v31 = vsel %vm1955_vm2, %v12177_v5, -inf }
 0xd37   : > { %4914 = vmatmul.f32.gmra.mxu1 %v4796_v18 }
 0xd38   : > { %v4994_v8 = vpop.xlane.xlu1 %4993 }
 0xd39   : > { %v5076_v47 = vsub.f32 %v12319_v9, %v4994_v8  ;;  %v12424_v32 = vpop.f32.mrf.mxu1 }
 0xd3b   : > { %v12412_v63 = vpop.eup %8459  ;;  %v5114_v58 = vmul.f32 1.442695, %v5076_v47 }
 0xd3c   : > { %v5472_v51 = vpop.f32.mrf.mxu3  ;;  %v5181_v46 = vsel %vm1955_vm2, %v12412_v63, 0.0 }
 0xd3d   : > { %8461 = vpow2.f32 %v5114_v58  ;;  %5182 = vadd.xlane.f32.xlu1 %v5181_v46  ;;  %5014 = vmax.xlane.f32.xlu2 %v5013_v50  ;;  %v5019_v46 = vsel %vm1955_vm2, %v12185_v13, -inf }
 0xd3f   : > { %4917 = vmatmul.f32.gmra.mxu1 %v4797_v11 }
 0xd40   : > { %v5000_v23 = vpop.xlane.xlu1 %4999  ;;  %v4997_v3 = vpop.xlane.xlu0 %4996 }
 0xd41   : > { %v5078_v9 = vsub.f32 %v12124_v55, %v5000_v23  ;;  %v5077_v2 = vsub.f32 %v12325_v25, %v4997_v3  ;;  %v14515_v55 = vld [vmem:[#allocation96_spill] sm:$0xff]  ;;  %v12441_v50 = vpop.f32.mrf.mxu1 }
 0xd42   : > { %v4798_v25 = vmul.f32 %v11945_v61, %v14515_v55 }
 0xd43   : > { %v12422_v41 = vpop.eup %8461  ;;  %v5118_v62 = vmul.f32 1.442695, %v5078_v9  ;;  %v5116_v38 = vmul.f32 1.442695, %v5077_v2  ;;  %v14516_v9 = vld [vmem:[#allocation98_spill] sm:$0xff] }
 0xd44   : > { %v5475_v20 = vpop.f32.mrf.mxu3  ;;  %v5184_v10 = vsel %vm1955_vm2, %v12422_v41, 0.0  ;;  %v4800_v2 = vmul.f32 %v11945_v61, %v14516_v9 }
 0xd45   : > { %8463 = vpow2.f32 %v5118_v62  ;;  %5185 = vadd.xlane.f32.xlu0 %v5184_v10  ;;  %5017 = vmax.xlane.f32.xlu1 %v5016_v31  ;;  %v14517_v10 = vld [vmem:[#allocation99_spill] sm:$0xff] }
 0xd46   : > { %8465 = vpow2.f32 %v5116_v38  ;;  %v4801_v31 = vmul.f32 %v11945_v61, %v14517_v10 }
 0xd47   : > { %4920 = vmatmul.f32.gmra.mxu1 %v4798_v25 }
 0xd48   : > { %v5003_v30 = vpop.xlane.xlu0 %5002 }
 0xd49   : > { %v5079_v40 = vsub.f32 %v12142_v16, %v5003_v30  ;;  %v12453_v62 = vpop.f32.mrf.mxu1 }
 0xd4b   : > { %v12433_v42 = vpop.eup %8463  ;;  %v5120_v18 = vmul.f32 1.442695, %v5079_v40 }
 0xd4c   : > { %v12435_v8 = vpop.eup %8465  ;;  %v5478_v47 = vpop.f32.mrf.mxu3  ;;  %v5190_v58 = vsel %vm1955_vm2, %v12433_v42, 0.0 }
 0xd4d   : > { %8467 = vpow2.f32 %v5120_v18  ;;  %5191 = vadd.xlane.f32.xlu0 %v5190_v58  ;;  %5020 = vmax.xlane.f32.xlu1 %v5019_v46  ;;  %v5187_v16 = vsel %vm1955_vm2, %v12435_v8, 0.0 }
 0xd4e   : > { %5188 = vadd.xlane.f32.xlu2 %v5187_v16 }
 0xd4f   : > { %4923 = vmatmul.f32.gmra.mxu1 %v4799_v27 }
 0xd51   : > { %v12457_v17 = vpop.f32.mrf.mxu1 }
 0xd53   : > { %v12447_v11 = vpop.eup %8467 }
 0xd54   : > { %v5481_v23 = vpop.f32.mrf.mxu3  ;;  %v5193_v3 = vsel %vm1955_vm2, %v12447_v11, 0.0 }
 0xd56   : > { %5194 = vadd.xlane.f32.xlu2 %v5193_v3 }
 0xd57   : > { %4926 = vmatmul.f32.gmra.mxu1 %v4800_v2 }
 0xd59   : > { %v12461_v55 = vpop.f32.mrf.mxu1 }
 0xd5c   : > { %v5484_v38 = vpop.f32.mrf.mxu3 }
 0xd5d   : > { %5714 = vmatpush.msra.mxu1 %v5484_v38 }
 0xd5f   : > { %5715 = vmatpush.msra.mxu1 %v5481_v23 }
 0xd60   : > { %4929 = vmatmul.f32.gmra.mxu1 %v4801_v31 }
 0xd61   : > { %5716 = vmatpush.msra.mxu1 %v5478_v47  ;;  %v12464_v25 = vpop.f32.mrf.mxu1 }
 0xd63   : > { %5717 = vmatpush.msra.mxu1 %v5475_v20 }
 0xd65   : > { %5718 = vmatpush.msra.mxu1 %v5472_v51 }
 0xd67   : > { %5719 = vmatpush.msra.mxu1 %v12401_v26 }
 0xd69   : > { %5720 = vmatpush.msra.mxu1 %v12388_v29 }
 0xd6b   : > { %5721 = vmatpush.msra.mxu1 %v12372_v21 }
 0xd7c   : > { %v12466_v30 = vpop.f32.mrf.mxu1 }
 0xd84   : > { %v12468_v61 = vpop.f32.mrf.mxu1 }
 0xd8c   : > { %v12470_v40 = vpop.f32.mrf.mxu1 }
 0xd8d   : > { %v5168_v18 = vpop.xlane.xlu2 %5167 }
 0xd8e   : > { %8469 = vrcp.f32 %v5168_v18 }
 0xd94   : > { %v8470_v20 = vpop.eup %8469  ;;  %v12472_v51 = vpop.f32.mrf.mxu1 }
 0xd95   : > { %v5294_v26 = vmul.f32 %v8470_v20, %v12356_v59  ;;  %v5171_v29 = vpop.xlane.xlu2 %5170 }
 0xd96   : > { %8471 = vrcp.f32 %v5171_v29 }
 0xd97   : > { %7784 = vmatmul.msk.f32.vlgmr.msrb.gmra.mxu1 %vm1955_vm2, %v5294_v26 }
 0xd98   : > { %v5174_v47 = vpop.xlane.xlu1 %5173 }
 0xd99   : > { %8473 = vrcp.f32 %v5174_v47 }
 0xd9c   : > { %v8472_v21 = vpop.eup %8471  ;;  %v12476_v58 = vpop.f32.mrf.mxu1 }
 0xd9d   : > { %v5006_v46 = vpop.xlane.xlu2 %5005  ;;  %v5295_v16 = vmul.f32 %v8472_v21, %v12364_v1 }
 0xd9e   : > { %v5080_v27 = vsub.f32 %v12150_v57, %v5006_v46 }
 0xd9f   : > { %7785 = vmatmul.msk.f32.gmra.mxu1 %vm1955_vm2, %v5295_v16  ;;  %v8474_v2 = vpop.eup %8473 }
 0xda0   : > { %v5009_v23 = vpop.xlane.xlu1 %5008  ;;  %v5177_v3 = vpop.xlane.xlu0 %5176  ;;  %v5122_v9 = vmul.f32 1.442695, %v5080_v27  ;;  %v5296_v1 = vmul.f32 %v8474_v2, %v12370_v56 }
 0xda1   : > { %v5081_v59 = vsub.f32 %v12157_v6, %v5009_v23 }
 0xda2   : > { %8475 = vpow2.f32 %v5122_v9 }
 0xda3   : > { %v5124_v38 = vmul.f32 1.442695, %v5081_v59  ;;  %8477 = vrcp.f32 %v5177_v3 }
 0xda4   : > { %v12482_v10 = vpop.f32.mrf.mxu1 }
 0xda5   : > { %8479 = vpow2.f32 %v5124_v38  ;;  %v5022_v31 = vsel %vm1955_vm2, %v12482_v10, -inf }
 0xda6   : > { %5023 = vmax.xlane.f32.xlu1 %v5022_v31 }
 0xda7   : > { %7786 = vmatmul.msk.f32.gmra.mxu1 %vm1955_vm2, %v5296_v1 }
 0xda8   : > { %v5012_v57 = vpop.xlane.xlu0 %5011  ;;  %v5180_v18 = vpop.xlane.xlu2 %5179 }
 0xda9   : > { %v12488_v20 = vpop.eup %8475  ;;  %v5082_v6 = vsub.f32 %v12163_v39, %v5012_v57  ;;  %8481 = vrcp.f32 %v5180_v18 }
 0xdaa   : > { %v8478_v26 = vpop.eup %8477  ;;  %v5196_v29 = vsel %vm1955_vm2, %v12488_v20, 0.0 }
 0xdab   : > { %v12493_v47 = vpop.eup %8479  ;;  %v5126_v21 = vmul.f32 1.442695, %v5082_v6  ;;  %5197 = vadd.xlane.f32.xlu0 %v5196_v29  ;;  %v5297_v16 = vmul.f32 %v8478_v26, %v12385_v36 }
 0xdac   : > { %v5199_v56 = vsel %vm1955_vm2, %v12493_v47, 0.0  ;;  %v12497_v46 = vpop.f32.mrf.mxu1 }
 0xdad   : > { %8483 = vpow2.f32 %v5126_v21  ;;  %5200 = vadd.xlane.f32.xlu2 %v5199_v56  ;;  %v5025_v9 = vsel %vm1955_vm2, %v12497_v46, -inf }
 0xdaf   : > { %7787 = vmatmul.msk.f32.gmra.mxu1 %vm1955_vm2, %v5297_v16  ;;  %v8482_v3 = vpop.eup %8481 }
 0xdb0   : > { %v5183_v27 = vpop.xlane.xlu1 %5182  ;;  %v5015_v39 = vpop.xlane.xlu2 %5014 }
 0xdb1   : > { %v5083_v23 = vsub.f32 %v12169_v60, %v5015_v39  ;;  %8485 = vrcp.f32 %v5183_v27  ;;  %v5298_v60 = vmul.f32 %v8482_v3, %v12399_v33 }
 0xdb3   : > { %v12504_v59 = vpop.eup %8483  ;;  %v5128_v2 = vmul.f32 1.442695, %v5083_v23  ;;  %5026 = vmax.xlane.f32.xlu0 %v5025_v9 }
 0xdb4   : > { %v5202_v38 = vsel %vm1955_vm2, %v12504_v59, 0.0  ;;  %v12508_v36 = vpop.f32.mrf.mxu1 }
 0xdb5   : > { %8487 = vpow2.f32 %v5128_v2  ;;  %5203 = vadd.xlane.f32.xlu1 %v5202_v38  ;;  %v5028_v31 = vsel %vm1955_vm2, %v12508_v36, -inf }
 0xdb6   : > { %5029 = vmax.xlane.f32.xlu2 %v5028_v31 }
 0xdb7   : > { %7788 = vmatmul.msk.f32.gmra.mxu1 %vm1955_vm2, %v5298_v60  ;;  %v8486_v6 = vpop.eup %8485 }
 0xdb8   : > { %v5018_v1 = vpop.xlane.xlu1 %5017  ;;  %v5186_v57 = vpop.xlane.xlu0 %5185  ;;  %v5299_v16 = vmul.f32 %v8486_v6, %v12412_v63 }
 0xdb9   : > { %v5084_v18 = vsub.f32 %v12177_v5, %v5018_v1  ;;  %8489 = vrcp.f32 %v5186_v57 }
 0xdbb   : > { %v12515_v26 = vpop.eup %8487  ;;  %v5130_v29 = vmul.f32 1.442695, %v5084_v18 }
 0xdbc   : > { %v5205_v21 = vsel %vm1955_vm2, %v12515_v26, 0.0  ;;  %v12519_v56 = vpop.f32.mrf.mxu1 }
 0xdbd   : > { %8491 = vpow2.f32 %v5130_v29  ;;  %5206 = vadd.xlane.f32.xlu0 %v5205_v21  ;;  %v5031_v33 = vsel %vm1955_vm2, %v12519_v56, -inf }
 0xdbe   : > { %5032 = vmax.xlane.f32.xlu1 %v5031_v33 }
 0xdbf   : > { %7789 = vmatmul.msk.f32.gmra.mxu1 %vm1955_vm2, %v5299_v16  ;;  %v8490_v3 = vpop.eup %8489 }
 0xdc0   : > { %v5021_v27 = vpop.xlane.xlu1 %5020  ;;  %v5192_v5 = vpop.xlane.xlu0 %5191  ;;  %v5300_v60 = vmul.f32 %v8490_v3, %v12422_v41 }
 0xdc1   : > { %v5085_v39 = vsub.f32 %v12185_v13, %v5021_v27  ;;  %8493 = vrcp.f32 %v5192_v5  ;;  %v5189_v23 = vpop.xlane.xlu2 %5188 }
 0xdc2   : > { %8495 = vrcp.f32 %v5189_v23 }
 0xdc3   : > { %v12526_v9 = vpop.eup %8491  ;;  %v5132_v2 = vmul.f32 1.442695, %v5085_v39 }
 0xdc4   : > { %v5208_v38 = vsel %vm1955_vm2, %v12526_v9, 0.0  ;;  %v12530_v31 = vpop.f32.mrf.mxu1 }
 0xdc5   : > { %8497 = vpow2.f32 %v5132_v2  ;;  %5209 = vadd.xlane.f32.xlu2 %v5208_v38  ;;  %v5034_v63 = vsel %vm1955_vm2, %v12530_v31, -inf  ;;  %v12559_v2 = vpop.f32.mrf.mxu2 }
 0xdc6   : > { %5035 = vmax.xlane.f32.xlu0 %v5034_v63 }
 0xdc7   : > { %v8494_v13 = vpop.eup %8493  ;;  %7790 = vmatmul.msk.f32.gmra.mxu1 %vm1955_vm2, %v5300_v60 }
 0xdc8   : > { %v5302_v1 = vmul.f32 %v8494_v13, %v12433_v42  ;;  %v8496_v18 = vpop.eup %8495 }
 0xdc9   : > { %v5195_v57 = vpop.xlane.xlu2 %5194  ;;  %v5301_v42 = vmul.f32 %v8496_v18, %v12435_v8 }
 0xdca   : > { %8499 = vrcp.f32 %v5195_v57  ;;  %7792 = vmatmul.msk.f32.vlgmr.msra.gmra.mxu2 %vm1955_vm2, %v5302_v1 }
 0xdcb   : > { %v12538_v6 = vpop.eup %8497 }
 0xdcc   : > { %v5211_v29 = vsel %vm1955_vm2, %v12538_v6, 0.0  ;;  %v12542_v21 = vpop.f32.mrf.mxu1 }
 0xdcd   : > { %5212 = vadd.xlane.f32.xlu1 %v5211_v29  ;;  %v5037_v41 = vsel %vm1955_vm2, %v12542_v21, -inf  ;;  %v12565_v18 = vpop.f32.mrf.mxu2 }
 0xdce   : > { %5038 = vmax.xlane.f32.xlu2 %v5037_v41 }
 0xdcf   : > { %7791 = vmatmul.msk.f32.gmra.mxu1 %vm1955_vm2, %v5301_v42 }
 0xdd0   : > { %v8500_v33 = vpop.eup %8499 }
 0xdd1   : > { %v5303_v16 = vmul.f32 %v8500_v33, %v12447_v11 }
 0xdd3   : > { %7793 = vmatmul.msk.f32.gmra.mxu2 %vm1955_vm2, %v5303_v16 }
 0xdd4   : > { %v12550_v27 = vpop.f32.mrf.mxu1 }
 0xdd5   : > { %v5040_v5 = vsel %vm1955_vm2, %v12550_v27, -inf }
 0xdd6   : > { %5041 = vmax.xlane.f32.xlu0 %v5040_v5 }
 0xddd   : > { %v12554_v39 = vpop.f32.mrf.mxu1 }
 0xdde   : > { %v5043_v23 = vsel %vm1955_vm2, %v12554_v39, -inf }
 0xddf   : > { %5044 = vmax.xlane.f32.xlu2 %v5043_v23 }
 0xe19   : > { %v5024_v8 = vpop.xlane.xlu1 %5023 }
 0xe1a   : > { %v5086_v3 = vsub.f32 %v12482_v10, %v5024_v8  ;;  %v5046_v8 = vsel %vm1955_vm2, %v12559_v2, -inf }
 0xe1c   : > { %v5134_v11 = vmul.f32 1.442695, %v5086_v3 }
 0xe1e   : > { %v5198_v38 = vpop.xlane.xlu0 %5197  ;;  %8501 = vpow2.f32 %v5134_v11 }
 0xe1f   : > { %8503 = vrcp.f32 %v5198_v38 }
 0xe20   : > { %v5201_v63 = vpop.xlane.xlu2 %5200 }
 0xe21   : > { %8505 = vrcp.f32 %v5201_v63 }
 0xe24   : > { %v12561_v60 = vpop.eup %8501 }
 0xe25   : > { %v8504_v13 = vpop.eup %8503  ;;  %v5214_v57 = vsel %vm1955_vm2, %v12561_v60, 0.0 }
 0xe26   : > { %v5027_v1 = vpop.xlane.xlu0 %5026  ;;  %5215 = vadd.xlane.f32.xlu1 %v5214_v57  ;;  %v5304_v10 = vmul.f32 %v8504_v13, %v12488_v20  ;;  %v12576_v20 = vpop.f32.mrf.mxu2 }
 0xe27   : > { %v5087_v29 = vsub.f32 %v12497_v46, %v5027_v1  ;;  %v8506_v5 = vpop.eup %8505 }
 0xe28   : > { %7794 = vmatmul.msk.f32.gmra.mxu2 %vm1955_vm2, %v5304_v10  ;;  %v5204_v42 = vpop.xlane.xlu1 %5203  ;;  %v5305_v46 = vmul.f32 %v8506_v5, %v12493_v47 }
 0xe29   : > { %v5136_v41 = vmul.f32 1.442695, %v5087_v29  ;;  %v5030_v33 = vpop.xlane.xlu2 %5029 }
 0xe2a   : > { %v5088_v16 = vsub.f32 %v12508_v36, %v5030_v33 }
 0xe2b   : > { %8507 = vpow2.f32 %v5136_v41 }
 0xe2c   : > { %v5138_v23 = vmul.f32 1.442695, %v5088_v16  ;;  %8509 = vrcp.f32 %v5204_v42 }
 0xe2e   : > { %8511 = vpow2.f32 %v5138_v23  ;;  %5047 = vmax.xlane.f32.xlu1 %v5046_v8  ;;  %v12590_v42 = vpop.f32.mrf.mxu2  ;;  %v5052_v8 = vsel %vm1955_vm2, %v12576_v20, -inf }
 0xe30   : > { %7795 = vmatmul.msk.f32.gmra.mxu2 %vm1955_vm2, %v5305_v46  ;;  %v5207_v11 = vpop.xlane.xlu0 %5206 }
 0xe31   : > { %v12574_v3 = vpop.eup %8507  ;;  %v5033_v38 = vpop.xlane.xlu1 %5032  ;;  %8513 = vrcp.f32 %v5207_v11 }
 0xe32   : > { %v5217_v36 = vsel %vm1955_vm2, %v12574_v3, 0.0  ;;  %v5089_v63 = vsub.f32 %v12519_v56, %v5033_v38  ;;  %v8510_v13 = vpop.eup %8509  ;;  %v5049_v56 = vsel %vm1955_vm2, %v12565_v18, -inf }
 0xe33   : > { %5218 = vadd.xlane.f32.xlu0 %v5217_v36  ;;  %v5306_v29 = vmul.f32 %v8510_v13, %v12504_v59 }
 0xe34   : > { %v12582_v1 = vpop.eup %8511  ;;  %v5140_v57 = vmul.f32 1.442695, %v5089_v63 }
 0xe35   : > { %v5220_v47 = vsel %vm1955_vm2, %v12582_v1, 0.0 }
 0xe36   : > { %8515 = vpow2.f32 %v5140_v57  ;;  %5221 = vadd.xlane.f32.xlu2 %v5220_v47  ;;  %v12604_v13 = vpop.f32.mrf.mxu2  ;;  %v5055_v47 = vsel %vm1955_vm2, %v12590_v42, -inf }
 0xe37   : > { %v8514_v16 = vpop.eup %8513 }
 0xe38   : > { %7796 = vmatmul.msk.f32.gmra.mxu2 %vm1955_vm2, %v5306_v29  ;;  %v5210_v10 = vpop.xlane.xlu2 %5209  ;;  %v5307_v46 = vmul.f32 %v8514_v16, %v12515_v26 }
 0xe39   : > { %v5036_v41 = vpop.xlane.xlu0 %5035  ;;  %8517 = vrcp.f32 %v5210_v10 }
 0xe3a   : > { %v5090_v33 = vsub.f32 %v12530_v31, %v5036_v41 }
 0xe3b   : > { %5050 = vmax.xlane.f32.xlu0 %v5049_v56  ;;  %v8779_v56 = vld [vmem:[%s9284_s1] sm:$0xff] }
 0xe3c   : > { %v12593_v5 = vpop.eup %8515  ;;  %v5142_v23 = vmul.f32 1.442695, %v5090_v33  ;;  %v12617_v33 = vld [vmem:[%s13892_s5] ss:$0 sm:$0xff] }
 0xe3d   : > { %v5223_v59 = vsel %vm1955_vm2, %v12593_v5, 0.0  ;;  %v1722_v16 = vadd.f32 %v12617_v33, %v8779_v56 }
 0xe3e   : > { %8519 = vpow2.f32 %v5142_v23  ;;  %5224 = vadd.xlane.f32.xlu1 %v5223_v59  ;;  %5053 = vmax.xlane.f32.xlu2 %v5052_v8  ;;  %v5528_v59 = vpop.f32.mrf.mxu1 }
 0xe3f   : > { %v8518_v36 = vpop.eup %8517 }
 0xe40   : > { %7797 = vmatmul.msk.f32.gmra.mxu2 %vm1955_vm2, %v5307_v46  ;;  %v5213_v11 = vpop.xlane.xlu1 %5212  ;;  %v5308_v29 = vmul.f32 %v8518_v36, %v12526_v9  ;;  %v5058_v9 = vsel %vm1955_vm2, %v12604_v13, -inf  ;;  %v12626_v46 = vpop.f32.mrf.mxu2  ;;  %v14519_v36 = vld [vmem:[#allocation117_spill] sm:$0xff] }
 0xe41   : > { %v5039_v31 = vpop.xlane.xlu2 %5038  ;;  %8521 = vrcp.f32 %v5213_v11  ;;  %v14518_v11 = vld [vmem:[#allocation87_spill] sm:$0xff] }
 0xe42   : > { %v5091_v38 = vsub.f32 %v12542_v21, %v5039_v31 }
 0xe44   : > { %v12602_v63 = vpop.eup %8519  ;;  %v5144_v57 = vmul.f32 1.442695, %v5091_v38  ;;  %v2729_v38 = vadd.f32 %v14518_v11, %v1722_v16  ;;  %v8782_v11 = vld [vmem:[%s9284_s1 + $0x10] sm:$0xff] }
 0xe45   : > { %v5226_v26 = vsel %vm1955_vm2, %v12602_v63, 0.0 }
 0xe46   : > { %8523 = vpow2.f32 %v5144_v57  ;;  %5056 = vmax.xlane.f32.xlu1 %v5055_v47  ;;  %5227 = vadd.xlane.f32.xlu0 %v5226_v26  ;;  %v3735_v57 = vadd.f32 %v14519_v36, %v2729_v38  ;;  %v5531_v16 = vpop.f32.mrf.mxu1  ;;  %v1724_v38 = vadd.f32 %v8782_v11, %v12617_v33  ;;  %v14524_v11 = vld [vmem:[#allocation67_spill] sm:$0xff] }
 0xe47   : > { %v8522_v41 = vpop.eup %8521 }
 0xe48   : > { %7798 = vmatmul.msk.f32.gmra.mxu2 %vm1955_vm2, %v5308_v29  ;;  %v5309_v31 = vmul.f32 %v8522_v41, %v12538_v6  ;;  %v8781_v29 = vld [vmem:[%s9284_s1 + $0x8] sm:$0xff]  ;;  %v5061_v6 = vsel %vm1955_vm2, %v12626_v46, -inf }
 0xe49   : > { %v5042_v21 = vpop.xlane.xlu0 %5041 }
 0xe4a   : > { %v5092_v10 = vsub.f32 %v12550_v27, %v5042_v21  ;;  %v1723_v21 = vadd.f32 %v8781_v29, %v12617_v33 }
 0xe4c   : > { %v12620_v23 = vpop.eup %8523  ;;  %v5146_v8 = vmul.f32 1.442695, %v5092_v10  ;;  %v4741_v10 = vadd.f32 %v12352_v4, %v3735_v57  ;;  %v12646_v4 = vpop.f32.mrf.mxu2 }
 0xe4d   : > { %v5229_v27 = vsel %vm1955_vm2, %v12620_v23, 0.0 }
 0xe4e   : > { %8525 = vpow2.f32 %v5146_v8  ;;  %5059 = vmax.xlane.f32.xlu0 %v5058_v9  ;;  %5230 = vadd.xlane.f32.xlu2 %v5229_v27  ;;  %v12638_v9 = vadd.f32 %v5528_v59, %v4741_v10 }
 0xe50   : > { %7799 = vmatmul.msk.f32.gmra.mxu2 %vm1955_vm2, %v5309_v31  ;;  %v14521_v31 = vld [vmem:[#allocation116_spill] sm:$0xff] }
 0xe52   : > { %v5045_v47 = vpop.xlane.xlu2 %5044 }
 0xe53   : > { %v5093_v26 = vsub.f32 %v12554_v39, %v5045_v47  ;;  %v14520_v39 = vld [vmem:[#allocation59_spill] sm:$0xff] }
 0xe54   : > { %v12636_v56 = vpop.eup %8525  ;;  %v2730_v27 = vadd.f32 %v14520_v39, %v1723_v21  ;;  %v14522_v21 = vld [vmem:[#allocation63_spill] sm:$0xff]  ;;  %v8783_v39 = vld [vmem:[%s9284_s1 + $0x18] sm:$0xff] }
 0xe55   : > { %v5148_v8 = vmul.f32 1.442695, %v5093_v26  ;;  %v5232_v41 = vsel %vm1955_vm2, %v12636_v56, 0.0  ;;  %v5064_v26 = vsel %vm1955_vm2, %v12646_v4, -inf  ;;  %v2731_v10 = vadd.f32 %v14522_v21, %v1724_v38 }
 0xe56   : > { %5062 = vmax.xlane.f32.xlu0 %v5061_v6  ;;  %5233 = vadd.xlane.f32.xlu1 %v5232_v41  ;;  %v3736_v59 = vadd.f32 %v14521_v31, %v2730_v27  ;;  %v14523_v6 = vld [vmem:[#allocation120_spill] sm:$0xff] }
 0xe57   : > { %8527 = vpow2.f32 %v5148_v8  ;;  %5781 = vadd.xlane.f32.xlu2 %v12638_v9  ;;  %v5534_v8 = vpop.f32.mrf.mxu1  ;;  %v3737_v41 = vadd.f32 %v14523_v6, %v2731_v10 }
 0xe58   : > { %v4742_v36 = vadd.f32 %v12361_v44, %v3736_v59  ;;  %v12663_v44 = vpop.f32.mrf.mxu2 }
 0xe59   : > { %v4743_v27 = vadd.f32 %v12378_v7, %v3737_v41  ;;  %v5067_v59 = vsel %vm1955_vm2, %v12663_v44, -inf }
 0xe5a   : > { %v12654_v47 = vadd.f32 %v5531_v16, %v4742_v36  ;;  %v1725_v16 = vadd.f32 %v8783_v39, %v12617_v33  ;;  %v14525_v36 = vld [vmem:[#allocation119_spill] sm:$0xff] }
 0xe5b   : > { %v12668_v31 = vadd.f32 %v5534_v8, %v4743_v27 }
 0xe5c   : > { %v2732_v38 = vadd.f32 %v14524_v11, %v1725_v16 }
 0xe5d   : > { %v12652_v57 = vpop.eup %8527 }
 0xe5e   : > { %v5235_v29 = vsel %vm1955_vm2, %v12652_v57, 0.0  ;;  %5065 = vmax.xlane.f32.xlu0 %v5064_v26  ;;  %v3738_v26 = vadd.f32 %v14525_v36, %v2732_v38 }
 0xe5f   : > { %5236 = vadd.xlane.f32.xlu1 %v5235_v29  ;;  %5783 = vadd.xlane.f32.xlu2 %v12654_v47  ;;  %v5537_v29 = vpop.f32.mrf.mxu1 }
 0xe60   : > { %v4744_v21 = vadd.f32 %v12396_v15, %v3738_v26 }
 0xe62   : > { %v12676_v10 = vadd.f32 %v5537_v29, %v4744_v21 }
 0xe66   : > { %5068 = vmax.xlane.f32.xlu0 %v5067_v59 }
 0xe67   : > { %5785 = vadd.xlane.f32.xlu2 %v12668_v31 }
 0xe6f   : > { %5787 = vadd.xlane.f32.xlu2 %v12676_v10 }
 0xe99   : > { %v5216_v7 = vpop.xlane.xlu1 %5215 }
 0xe9a   : > { %8529 = vrcp.f32 %v5216_v7  ;;  %v5540_v7 = vpop.f32.mrf.mxu1 }
 0xea0   : > { %v8530_v8 = vpop.eup %8529 }
 0xea1   : > { %v5310_v6 = vmul.f32 %v8530_v8, %v12561_v60  ;;  %v5048_v41 = vpop.xlane.xlu1 %5047 }
 0xea2   : > { %v5094_v39 = vsub.f32 %v12559_v2, %v5048_v41 }
 0xea3   : > { %7800 = vmatmul.msk.f32.vlgmr.msrb.gmra.mxu0 %vm1955_vm2, %v5310_v6 }
 0xea4   : > { %v5150_v16 = vmul.f32 1.442695, %v5094_v39  ;;  %v8784_v39 = vld [vmem:[%s9284_s1 + $0x20] sm:$0xff] }
 0xea6   : > { %v5219_v27 = vpop.xlane.xlu0 %5218  ;;  %8531 = vpow2.f32 %v5150_v16  ;;  %v1726_v16 = vadd.f32 %v8784_v39, %v12617_v33  ;;  %v14528_v39 = vld [vmem:[#allocation76_spill] sm:$0xff] }
 0xea7   : > { %8533 = vrcp.f32 %v5219_v27 }
 0xea9   : > { %v5222_v59 = vpop.xlane.xlu2 %5221 }
 0xeaa   : > { %8535 = vrcp.f32 %v5222_v59 }
 0xeac   : > { %v12682_v15 = vpop.eup %8531 }
 0xead   : > { %v8534_v11 = vpop.eup %8533  ;;  %v5238_v36 = vsel %vm1955_vm2, %v12682_v15, 0.0 }
 0xeae   : > { %v5051_v38 = vpop.xlane.xlu0 %5050  ;;  %5239 = vadd.xlane.f32.xlu1 %v5238_v36  ;;  %v5311_v2 = vmul.f32 %v8534_v11, %v12574_v3  ;;  %v8785_v36 = vld [vmem:[%s9284_s1 + $0x28] sm:$0xff] }
 0xeaf   : > { %v5095_v60 = vsub.f32 %v12565_v18, %v5051_v38  ;;  %v14526_v38 = vld [vmem:[#allocation71_spill] sm:$0xff] }
 0xeb0   : > { %7801 = vmatmul.msk.f32.gmra.mxu0 %vm1955_vm2, %v5311_v2  ;;  %v8536_v6 = vpop.eup %8535 }
 0xeb1   : > { %v5152_v26 = vmul.f32 1.442695, %v5095_v60  ;;  %v5225_v29 = vpop.xlane.xlu1 %5224  ;;  %v5054_v21 = vpop.xlane.xlu2 %5053  ;;  %v5312_v18 = vmul.f32 %v8536_v6, %v12582_v1  ;;  %v1727_v60 = vadd.f32 %v8785_v36, %v12617_v33  ;;  %v14527_v1 = vld [vmem:[#allocation79_spill] sm:$0xff] }
 0xeb2   : > { %v5096_v8 = vsub.f32 %v12576_v20, %v5054_v21  ;;  %v2733_v20 = vadd.f32 %v14526_v38, %v1726_v16 }
 0xeb3   : > { %8537 = vpow2.f32 %v5152_v26  ;;  %v2734_v16 = vadd.f32 %v14528_v39, %v1727_v60 }
 0xeb4   : > { %v5154_v41 = vmul.f32 1.442695, %v5096_v8  ;;  %8539 = vrcp.f32 %v5225_v29  ;;  %v3739_v21 = vadd.f32 %v14527_v1, %v2733_v20  ;;  %v5543_v8 = vpop.f32.mrf.mxu1 }
 0xeb6   : > { %8541 = vpow2.f32 %v5154_v41 }
 0xeb8   : > { %7802 = vmatmul.msk.f32.gmra.mxu0 %vm1955_vm2, %v5312_v18  ;;  %v4745_v18 = vadd.f32 %v12409_v53, %v3739_v21 }
 0xeb9   : > { %v12693_v3 = vpop.eup %8537  ;;  %v5057_v27 = vpop.xlane.xlu1 %5056 }
 0xeba   : > { %v5228_v59 = vpop.xlane.xlu0 %5227  ;;  %v5241_v11 = vsel %vm1955_vm2, %v12693_v3, 0.0  ;;  %v5097_v2 = vsub.f32 %v12590_v42, %v5057_v27  ;;  %v8540_v26 = vpop.eup %8539  ;;  %v14529_v27 = vld [vmem:[#allocation83_spill] sm:$0xff]  ;;  %v12711_v38 = vadd.f32 %v5540_v7, %v4745_v18 }
 0xebb   : > { %5242 = vadd.xlane.f32.xlu1 %v5241_v11  ;;  %8543 = vrcp.f32 %v5228_v59  ;;  %v5313_v42 = vmul.f32 %v8540_v26, %v12593_v5  ;;  %v3740_v11 = vadd.f32 %v14529_v27, %v2734_v16  ;;  %v8786_v59 = vld [vmem:[%s9284_s1 + $0x30] sm:$0xff] }
 0xebc   : > { %v12702_v29 = vpop.eup %8541  ;;  %v5156_v6 = vmul.f32 1.442695, %v5097_v2  ;;  %v1728_v2 = vadd.f32 %v8786_v59, %v12617_v33  ;;  %v5546_v39 = vpop.f32.mrf.mxu1 }
 0xebd   : > { %v5244_v41 = vsel %vm1955_vm2, %v12702_v29, 0.0  ;;  %v4746_v1 = vadd.f32 %v12424_v32, %v3740_v11 }
 0xebe   : > { %8545 = vpow2.f32 %v5156_v6  ;;  %5245 = vadd.xlane.f32.xlu0 %v5244_v41  ;;  %v14531_v6 = vld [vmem:[#allocation121_spill] sm:$0xff] }
 0xebf   : > { %v12721_v26 = vadd.f32 %v5543_v8, %v4746_v1  ;;  %v2735_v41 = vadd.f32 %v14531_v6, %v1728_v2 }
 0xec0   : > { %7803 = vmatmul.msk.f32.gmra.mxu0 %vm1955_vm2, %v5313_v42  ;;  %v8787_v42 = vld [vmem:[%s9284_s1 + $0x38] sm:$0xff] }
 0xec1   : > { %v5231_v36 = vpop.xlane.xlu2 %5230  ;;  %v8544_v53 = vpop.eup %8543  ;;  %14530 = vst [vmem:[#allocation30_spill] sm:$0xff] %v12721_v26  ;;  %v1729_v27 = vadd.f32 %v8787_v42, %v12617_v33  ;;  %v8788_v42 = vld [vmem:[%s9284_s1 + $0x40] sm:$0xff] }
 0xec2   : > { %v5060_v20 = vpop.xlane.xlu0 %5059  ;;  %8547 = vrcp.f32 %v5231_v36  ;;  %v5314_v32 = vmul.f32 %v8544_v53, %v12602_v63 }
 0xec3   : > { %v5098_v60 = vsub.f32 %v12604_v13, %v5060_v20  ;;  %5789 = vadd.xlane.f32.xlu1 %v12711_v38  ;;  %v14532_v13 = vld [vmem:[#allocation97_spill] sm:$0xff] }
 0xec4   : > { %v12719_v5 = vpop.eup %8545  ;;  %v3741_v16 = vadd.f32 %v14532_v13, %v2735_v41  ;;  %v14534_v41 = vld [vmem:[#allocation141_spill] sm:$0xff]  ;;  %v5593_v13 = vpop.f32.mrf.mxu2 }
 0xec5   : > { %v5158_v7 = vmul.f32 1.442695, %v5098_v60  ;;  %v5247_v21 = vsel %vm1955_vm2, %v12719_v5, 0.0 }
 0xec6   : > { %5791 = vadd.xlane.f32.xlu0 %v12721_v26  ;;  %5248 = vadd.xlane.f32.xlu2 %v5247_v21  ;;  %v4747_v11 = vadd.f32 %v12441_v50, %v3741_v16  ;;  %v14533_v21 = vld [vmem:[#allocation122_spill] sm:$0xff] }
 0xec7   : > { %8549 = vpow2.f32 %v5158_v7  ;;  %v2736_v50 = vadd.f32 %v14533_v21, %v1729_v27  ;;  %v1730_v27 = vadd.f32 %v8788_v42, %v12617_v33  ;;  %v8789_v42 = vld [vmem:[%s9284_s1 + $0x48] sm:$0xff] }
 0xec8   : > { %7804 = vmatmul.msk.f32.gmra.mxu0 %vm1955_vm2, %v5314_v32  ;;  %v8548_v59 = vpop.eup %8547  ;;  %v12736_v60 = vadd.f32 %v5546_v39, %v4747_v11  ;;  %v5549_v32 = vpop.f32.mrf.mxu1 }
 0xec9   : > { %v5234_v8 = vpop.xlane.xlu1 %5233  ;;  %v3742_v39 = vadd.f32 %v14534_v41, %v2736_v50 }
 0xeca   : > { %v5063_v18 = vpop.xlane.xlu0 %5062  ;;  %v5782_v36 = vpop.xlane.xlu2 %5781  ;;  %8551 = vrcp.f32 %v5234_v8  ;;  %v14535_v8 = vld [vmem:[#allocation20_spill] sm:$0xff] }
 0xecb   : > { %v5099_v20 = vsub.f32 %v12626_v46, %v5063_v18  ;;  %v5845_v2 = vmul.f32 0.015625, %v5782_v36  ;;  %v5315_v46 = vmul.f32 %v8548_v59, %v12620_v23  ;;  %v4748_v11 = vadd.f32 %v12453_v62, %v3742_v39  ;;  %v14537_v39 = vld [vmem:[#allocation88_spill] sm:$0xff] }
 0xecd   : > { %v12734_v1 = vpop.eup %8549  ;;  %v5160_v63 = vmul.f32 1.442695, %v5099_v20  ;;  %v12739_v53 = vsub.f32 %v12638_v9, %v5845_v2 }
 0xece   : > { %v5250_v7 = vsel %vm1955_vm2, %v12734_v1, 0.0  ;;  %5793 = vadd.xlane.f32.xlu2 %v12736_v60 }
 0xecf   : > { %8553 = vpow2.f32 %v5160_v63  ;;  %5251 = vadd.xlane.f32.xlu1 %v5250_v7  ;;  %v5909_v6 = vmul.f32 %v12739_v53, %v12739_v53  ;;  %v12757_v7 = vadd.f32 %v5549_v32, %v4748_v11  ;;  %v1731_v11 = vadd.f32 %v8789_v42, %v12617_v33 }
 0xed0   : > { %7805 = vmatmul.msk.f32.gmra.mxu0 %vm1955_vm2, %v5315_v46  ;;  %v8552_v59 = vpop.eup %8551  ;;  %v14536_v46 = vld [vmem:[#allocation46_spill] sm:$0xff] }
 0xed1   : > { %v5941_v18 = vmul.f32 %v14535_v8, %v5909_v6  ;;  %v5316_v6 = vmul.f32 %v8552_v59, %v12636_v56 }
 0xed2   : > { %v5066_v16 = vpop.xlane.xlu0 %5065  ;;  %v5237_v23 = vpop.xlane.xlu1 %5236 }
 0xed3   : > { %v5100_v20 = vsub.f32 %v12646_v4, %v5066_v16  ;;  %v5784_v36 = vpop.xlane.xlu2 %5783  ;;  %5973 = vadd.xlane.f32.xlu0 %v5941_v18  ;;  %8555 = vrcp.f32 %v5237_v23  ;;  %v2737_v4 = vadd.f32 %v14536_v46, %v1730_v27 }
 0xed4   : > { %v5846_v2 = vmul.f32 0.015625, %v5784_v36 }
 0xed5   : > { %v12755_v63 = vpop.eup %8553  ;;  %v5162_v21 = vmul.f32 1.442695, %v5100_v20  ;;  %v3743_v32 = vadd.f32 %v14537_v39, %v2737_v4 }
 0xed6   : > { %v12760_v50 = vsub.f32 %v12654_v47, %v5846_v2  ;;  %v5253_v62 = vsel %vm1955_vm2, %v12755_v63, 0.0  ;;  %5795 = vadd.xlane.f32.xlu2 %v12757_v7 }
 0xed7   : > { %8557 = vpow2.f32 %v5162_v21  ;;  %5254 = vadd.xlane.f32.xlu1 %v5253_v62  ;;  %v4749_v27 = vadd.f32 %v12171_v54, %v3743_v32  ;;  %v5596_v21 = vpop.f32.mrf.mxu2  ;;  %v14538_v54 = vld [vmem:[#allocation36_spill] sm:$0xff] }
 0xed8   : > { %v5910_v41 = vmul.f32 %v12760_v50, %v12760_v50  ;;  %7806 = vmatmul.msk.f32.gmra.mxu0 %vm1955_vm2, %v5316_v6  ;;  %v2738_v6 = vadd.f32 %v14538_v54, %v1731_v11 }
 0xed9   : > { %v8556_v36 = vpop.eup %8555  ;;  %v12778_v2 = vadd.f32 %v5593_v13, %v4749_v27 }
 0xeda   : > { %v5069_v16 = vpop.xlane.xlu0 %5068  ;;  %v5942_v18 = vmul.f32 %v14535_v8, %v5910_v41  ;;  %v14539_v41 = vld [vmem:[#allocation41_spill] sm:$0xff] }
 0xedb   : > { %v5101_v20 = vsub.f32 %v12663_v44, %v5069_v16  ;;  %v5786_v23 = vpop.xlane.xlu2 %5785  ;;  %v5317_v44 = vmul.f32 %v8556_v36, %v12652_v57  ;;  %v3744_v39 = vadd.f32 %v14539_v41, %v2738_v6  ;;  %v8790_v16 = vld [vmem:[%s9284_s1 + $0x50] sm:$0xff] }
 0xedc   : > { %v5847_v56 = vmul.f32 0.015625, %v5786_v23  ;;  %5975 = vadd.xlane.f32.xlu0 %v5942_v18  ;;  %v1732_v18 = vadd.f32 %v8790_v16, %v12617_v33 }
 0xedd   : > { %v12776_v59 = vpop.eup %8557  ;;  %v5164_v62 = vmul.f32 1.442695, %v5101_v20  ;;  %v4750_v42 = vadd.f32 %v12181_v24, %v3744_v39  ;;  %v8791_v24 = vld [vmem:[%s9284_s1 + $0x58] sm:$0xff]  ;;  %v14543_v39 = vld [vmem:[#allocation39_spill] sm:$0xff] }
 0xede   : > { %v12781_v46 = vsub.f32 %v12668_v31, %v5847_v56  ;;  %v5256_v4 = vsel %vm1955_vm2, %v12776_v59, 0.0  ;;  %5797 = vadd.xlane.f32.xlu2 %v12778_v2  ;;  %v1733_v54 = vadd.f32 %v8791_v24, %v12617_v33 }
 0xedf   : > { %8559 = vpow2.f32 %v5164_v62  ;;  %5257 = vadd.xlane.f32.xlu1 %v5256_v4  ;;  %v12798_v57 = vadd.f32 %v5596_v21, %v4750_v42  ;;  %v5599_v23 = vpop.f32.mrf.mxu2  ;;  %v14541_v62 = vld [vmem:[#allocation37_spill] sm:$0xff]  ;;  %v14542_v21 = vld [vmem:[#allocation43_spill] sm:$0xff] }
 0xee0   : > { %v5911_v13 = vmul.f32 %v12781_v46, %v12781_v46  ;;  %7807 = vmatmul.msk.f32.gmra.mxu0 %vm1955_vm2, %v5317_v44  ;;  %v2739_v4 = vadd.f32 %v14541_v62, %v1732_v18  ;;  %v14544_v18 = vld [vmem:[#allocation45_spill] sm:$0xff] }
 0xee1   : > { %14540 = vst [vmem:[#allocation101_spill] sm:$0xff] %v12798_v57 }
 0xee2   : > { %v5943_v32 = vmul.f32 %v14535_v8, %v5911_v13  ;;  %v3745_v44 = vadd.f32 %v14542_v21, %v2739_v4  ;;  %v6538_v4 = vld [vmem:[#allocation10 + $0x78] sm:$0xff] }
 0xee3   : > { %v5788_v11 = vpop.xlane.xlu2 %5787  ;;  %6543 = vmatpush.msrb.mxu2 %v6538_v4 }
 0xee4   : > { %v5848_v27 = vmul.f32 0.015625, %v5788_v11  ;;  %5977 = vadd.xlane.f32.xlu0 %v5943_v32  ;;  %v4751_v41 = vadd.f32 %v12191_v43, %v3745_v44  ;;  %v2740_v32 = vadd.f32 %v14543_v39, %v1733_v54  ;;  %v6537_v43 = vld [vmem:[#allocation10 + $0x70] sm:$0xff] }
 0xee5   : > { %v12796_v20 = vpop.eup %8559  ;;  %6544 = vmatpush.msrb.mxu2 %v6537_v43  ;;  %v8792_v43 = vld [vmem:[%s9284_s1 + $0x60] sm:$0xff] }
 0xee6   : > { %v12801_v36 = vsub.f32 %v12676_v10, %v5848_v27  ;;  %v5259_v56 = vsel %vm1955_vm2, %v12796_v20, 0.0  ;;  %5799 = vadd.xlane.f32.xlu2 %v12798_v57  ;;  %v12815_v16 = vadd.f32 %v5599_v23, %v4751_v41  ;;  %v3746_v42 = vadd.f32 %v14544_v18, %v2740_v32  ;;  %v6533_v18 = vld [vmem:[#allocation10 + $0x50] sm:$0xff] }
 0xee7   : > { %5260 = vadd.xlane.f32.xlu1 %v5259_v56  ;;  %v5602_v11 = vpop.f32.mrf.mxu2 }
 0xee8   : > { %v5912_v6 = vmul.f32 %v12801_v36, %v12801_v36  ;;  %v4752_v27 = vadd.f32 %v12199_v45, %v3746_v42  ;;  %v6535_v45 = vld [vmem:[#allocation10 + $0x60] sm:$0xff] }
 0xeea   : > { %v5944_v13 = vmul.f32 %v14535_v8, %v5912_v6  ;;  %v12820_v56 = vadd.f32 %v5602_v11, %v4752_v27  ;;  %v6536_v6 = vld [vmem:[#allocation10 + $0x68] sm:$0xff] }
 0xeeb   : > { %6545 = vmatpush.msrb.mxu2 %v6536_v6  ;;  %v6532_v11 = vld [vmem:[#allocation10 + $0x48] sm:$0xff] }
 0xeec   : > { %5979 = vadd.xlane.f32.xlu0 %v5944_v13  ;;  %v6534_v13 = vld [vmem:[#allocation10 + $0x58] sm:$0xff] }
 0xeed   : > { %6546 = vmatpush.msrb.mxu2 %v6535_v45  ;;  %v6530_v45 = vld [vmem:[#allocation10 + $0x38] sm:$0xff] }
 0xeef   : > { %5801 = vadd.xlane.f32.xlu1 %v12815_v16  ;;  %6547 = vmatpush.msrb.mxu2 %v6534_v13  ;;  %v5605_v32 = vpop.f32.mrf.mxu2  ;;  %v14545_v13 = vld [vmem:[#allocation129_spill] sm:$0xff] }
 0xef1   : > { %6548 = vmatpush.msrb.mxu2 %v6533_v18 }
 0xef3   : > { %6549 = vmatpush.msrb.mxu2 %v6532_v11  ;;  %v6529_v11 = vld [vmem:[#allocation10 + $0x30] sm:$0xff] }
 0xef4   : > { %5803 = vadd.xlane.f32.xlu0 %v12820_v56 }
 0xf21   : > { %v5240_v62 = vpop.xlane.xlu1 %5239 }
 0xf22   : > { %8561 = vrcp.f32 %v5240_v62 }
 0xf28   : > { %v8562_v24 = vpop.eup %8561 }
 0xf29   : > { %v5318_v23 = vmul.f32 %v8562_v24, %v12682_v15  ;;  %v1734_v24 = vadd.f32 %v8792_v43, %v12617_v33  ;;  %v5608_v43 = vpop.f32.mrf.mxu2 }
 0xf2b   : > { %7808 = vmatmul.msk.f32.vlgmr.msra.gmra.mxu1 %vm1955_vm2, %v5318_v23 }
 0xf2e   : > { %v5243_v54 = vpop.xlane.xlu1 %5242 }
 0xf2f   : > { %8563 = vrcp.f32 %v5243_v54  ;;  %v6531_v54 = vld [vmem:[#allocation10 + $0x40] sm:$0xff] }
 0xf30   : > { %6550 = vmatpush.msrb.mxu2 %v6531_v54  ;;  %v14547_v54 = vld [vmem:[#allocation130_spill] sm:$0xff] }
 0xf31   : > { %v5246_v21 = vpop.xlane.xlu0 %5245 }
 0xf32   : > { %8565 = vrcp.f32 %v5246_v21  ;;  %6551 = vmatpush.msrb.mxu2 %v6530_v45 }
 0xf34   : > { %6552 = vmatpush.msrb.mxu2 %v6529_v11 }
 0xf35   : > { %v8564_v44 = vpop.eup %8563 }
 0xf36   : > { %v5790_v41 = vpop.xlane.xlu1 %5789  ;;  %v5319_v39 = vmul.f32 %v8564_v44, %v12693_v3 }
 0xf37   : > { %v5849_v15 = vmul.f32 0.015625, %v5790_v41  ;;  %v2741_v41 = vadd.f32 %v14545_v13, %v1734_v24 }
 0xf38   : > { %7809 = vmatmul.msk.f32.gmra.mxu1 %vm1955_vm2, %v5319_v39  ;;  %v8566_v4 = vpop.eup %8565  ;;  %v8793_v39 = vld [vmem:[%s9284_s1 + $0x68] sm:$0xff] }
 0xf39   : > { %v12828_v42 = vsub.f32 %v12711_v38, %v5849_v15  ;;  %v5792_v27 = vpop.xlane.xlu0 %5791  ;;  %v5249_v62 = vpop.xlane.xlu2 %5248  ;;  %v5320_v44 = vmul.f32 %v8566_v4, %v12702_v29  ;;  %v1735_v15 = vadd.f32 %v8793_v39, %v12617_v33  ;;  %v6528_v29 = vld [vmem:[#allocation10 + $0x28] sm:$0xff]  ;;  %v6527_v39 = vld [vmem:[#allocation10 + $0x20] sm:$0xff] }
 0xf3a   : > { %v5850_v23 = vmul.f32 0.015625, %v5792_v27  ;;  %8567 = vrcp.f32 %v5249_v62  ;;  %v14546_v27 = vld [vmem:[#allocation47_spill] sm:$0xff]  ;;  %6553 = vmatpush.msrb.mxu2 %v6528_v29 }
 0xf3b   : > { %v5913_v3 = vmul.f32 %v12828_v42, %v12828_v42  ;;  %v3747_v62 = vadd.f32 %v14546_v27, %v2741_v41  ;;  %v2742_v45 = vadd.f32 %v14547_v54, %v1735_v15  ;;  %v6526_v27 = vld [vmem:[#allocation10 + $0x18] sm:$0xff] }
 0xf3c   : > { %v12835_v6 = vsub.f32 %v12721_v26, %v5850_v23  ;;  %6554 = vmatpush.msrb.mxu2 %v6527_v39  ;;  %v8794_v26 = vld [vmem:[%s9284_s1 + $0x70] sm:$0xff] }
 0xf3d   : > { %v5945_v21 = vmul.f32 %v14535_v8, %v5913_v3  ;;  %v4753_v13 = vadd.f32 %v12207_v49, %v3747_v62  ;;  %v1736_v15 = vadd.f32 %v8794_v26, %v12617_v33 }
 0xf3e   : > { %v5914_v18 = vmul.f32 %v12835_v6, %v12835_v6  ;;  %6555 = vmatpush.msrb.mxu2 %v6526_v27 }
 0xf3f   : > { %5981 = vadd.xlane.f32.xlu2 %v5945_v21  ;;  %v12850_v41 = vadd.f32 %v5605_v32, %v4753_v13  ;;  %v6525_v32 = vld [vmem:[#allocation10 + $0x10] sm:$0xff]  ;;  %v14551_v13 = vld [vmem:[#allocation131_spill] sm:$0xff] }
 0xf40   : > { %7810 = vmatmul.msk.f32.gmra.mxu1 %vm1955_vm2, %v5320_v44  ;;  %v5946_v3 = vmul.f32 %v14535_v8, %v5914_v18  ;;  %v8568_v24 = vpop.eup %8567  ;;  %v14548_v44 = vld [vmem:[#allocation49_spill] sm:$0xff]  ;;  %6556 = vmatpush.msrb.mxu2 %v6525_v32 }
 0xf41   : > { %v5794_v23 = vpop.xlane.xlu2 %5793  ;;  %v3748_v11 = vadd.f32 %v14548_v44, %v2742_v45  ;;  %14549 = vst [vmem:[#allocation29_spill] sm:$0xff] %v12850_v41  ;;  %v5321_v29 = vmul.f32 %v8568_v24, %v12719_v5  ;;  %v6524_v24 = vld [vmem:[#allocation10 + $0x8] sm:$0xff]  ;;  %v6523_v44 = vld [vmem:[#allocation10] sm:$0xff] }
 0xf42   : > { %v5252_v4 = vpop.xlane.xlu1 %5251  ;;  %v5851_v21 = vmul.f32 0.015625, %v5794_v23  ;;  %5983 = vadd.xlane.f32.xlu1 %v5946_v3  ;;  %6557 = vmatpush.msrb.mxu2 %v6524_v24 }
 0xf43   : > { %8569 = vrcp.f32 %v5252_v4  ;;  %v4754_v49 = vadd.f32 %v12218_v19, %v3748_v11  ;;  %v5611_v11 = vpop.f32.mrf.mxu2 }
 0xf44   : > { %v12853_v18 = vsub.f32 %v12736_v60, %v5851_v21  ;;  %v2743_v21 = vadd.f32 %v14551_v13, %v1736_v15  ;;  %6558 = vmatpush.msrb.mxu2 %v6523_v44 }
 0xf45   : > { %v12863_v23 = vadd.f32 %v5608_v43, %v4754_v49  ;;  %v14552_v43 = vld [vmem:[#allocation100_spill] sm:$0xff] }
 0xf46   : > { %v5915_v62 = vmul.f32 %v12853_v18, %v12853_v18  ;;  %v5974_v3 = vpop.xlane.xlu0 %5973  ;;  %v3749_v27 = vadd.f32 %v14552_v43, %v2743_v21 }
 0xf47   : > { %5805 = vadd.xlane.f32.xlu2 %v12850_v41  ;;  %v6037_v4 = vmul.f32 0.015625, %v5974_v3  ;;  %14550 = vst [vmem:[#allocation28_spill] sm:$0xff] %v12863_v23 }
 0xf48   : > { %7811 = vmatmul.msk.f32.gmra.mxu1 %vm1955_vm2, %v5321_v29  ;;  %v5947_v5 = vmul.f32 %v14535_v8, %v5915_v62  ;;  %v8795_v62 = vld [vmem:[%s9284_s1 + $0x78] sm:$0xff]  ;;  %v4755_v3 = vadd.f32 %v12233_v37, %v3749_v27 }
 0xf49   : > { %v12866_v54 = vadd.f32 1e-05, %v6037_v4  ;;  %v5796_v19 = vpop.xlane.xlu2 %5795  ;;  %v8570_v45 = vpop.eup %8569  ;;  %v1737_v15 = vadd.f32 %v8795_v62, %v12617_v33  ;;  %v14553_v33 = vld [vmem:[#allocation132_spill] sm:$0xff] }
 0xf4a   : > { %v5255_v26 = vpop.xlane.xlu1 %5254  ;;  %v5852_v39 = vmul.f32 0.015625, %v5796_v19  ;;  %5807 = vadd.xlane.f32.xlu1 %v12863_v23  ;;  %5985 = vadd.xlane.f32.xlu0 %v5947_v5  ;;  %v5322_v49 = vmul.f32 %v8570_v45, %v12734_v1  ;;  %v12882_v24 = vadd.f32 %v5611_v11, %v4755_v3  ;;  %v14554_v11 = vld [vmem:[#allocation32_spill] sm:$0xff] }
 0xf4b   : > { %8571 = vrsqrt.f32 %v12866_v54  ;;  %v5614_v62 = vpop.f32.mrf.mxu2  ;;  %vm6107_vm13 = vweird.f32 %v12866_v54 }
 0xf4c   : > { %8573 = vrcp.f32 %v5255_v26  ;;  %v12873_v29 = vsub.f32 %v12757_v7, %v5852_v39  ;;  %v2744_v39 = vadd.f32 %v14553_v33, %v1737_v15 }
 0xf4e   : > { %v5916_v32 = vmul.f32 %v12873_v29, %v12873_v29  ;;  %v3750_v43 = vadd.f32 %v14554_v11, %v2744_v39 }
 0xf4f   : > { %v5976_v4 = vpop.xlane.xlu0 %5975 }
 0xf50   : > { %v6038_v5 = vmul.f32 0.015625, %v5976_v4  ;;  %7812 = vmatmul.msk.f32.gmra.mxu1 %vm1955_vm2, %v5322_v49  ;;  %v5948_v26 = vmul.f32 %v14535_v8, %v5916_v32  ;;  %v4756_v15 = vadd.f32 %v12249_v34, %v3750_v43  ;;  %v5658_v32 = vpop.f32.mrf.mxu0 }
 0xf51   : > { %v8572_v19 = vpop.eup %8571  ;;  %v5798_v45 = vpop.xlane.xlu2 %5797 }
 0xf52   : > { %v12885_v13 = vadd.f32 1e-05, %v6038_v5  ;;  %v5258_v1 = vpop.xlane.xlu1 %5257  ;;  %v8574_v21 = vpop.eup %8573  ;;  %v6102_v37 = vmul.f32 %v8572_v19, %v12866_v54  ;;  %v5853_v44 = vmul.f32 0.015625, %v5798_v45  ;;  %5809 = vadd.xlane.f32.xlu0 %v12882_v24  ;;  %5987 = vadd.xlane.f32.xlu2 %v5948_v26  ;;  %v12900_v33 = vadd.f32 %v5614_v62, %v4756_v15 }
 0xf53   : > { %v5323_v3 = vmul.f32 %v8574_v21, %v12755_v63  ;;  %vm6108_vm12 = vweird.f32 %v8572_v19 }
 0xf54   : > { %8575 = vrsqrt.f32 %v12885_v13  ;;  %v6103_v27 = vmul.f32 %v8572_v19, %v6102_v37  ;;  %v12893_v49 = vsub.f32 %v12778_v2, %v5853_v44  ;;  %14555 = vst [vmem:[#allocation102_spill] sm:$0xff] %v12900_v33  ;;  %vm6109_vm14 = vmor %vm6107_vm13, %vm6108_vm12  ;;  %vm6117_vm0 = vweird.f32 %v12885_v13 }
 0xf55   : > { %8577 = vrcp.f32 %v5258_v1 }
 0xf56   : > { %v6104_v4 = vmul.f32 0.5, %v6103_v27  ;;  %v5917_v5 = vmul.f32 %v12893_v49, %v12893_v49  ;;  %v12911_v27 = vld [vmem:[%s13893_s6] ss:$0 sm:$0xff] }
 0xf57   : > { %v5978_v26 = vpop.xlane.xlu0 %5977 }
 0xf58   : > { %v6039_v45 = vmul.f32 0.015625, %v5978_v26  ;;  %7813 = vmatmul.msk.f32.gmra.mxu1 %vm1955_vm2, %v5323_v3  ;;  %v6105_v1 = vsub.f32 1.5, %v6104_v4  ;;  %v5949_v39 = vmul.f32 %v14535_v8, %v5917_v5  ;;  %v12922_v26 = vld [vmem:[%s13894_s7] ss:$0 sm:$0xff] }
 0xf59   : > { %v5800_v34 = vpop.xlane.xlu2 %5799 }
 0xf5a   : > { %v8576_v37 = vpop.eup %8575  ;;  %v12903_v44 = vadd.f32 1e-05, %v6039_v45  ;;  %v5261_v63 = vpop.xlane.xlu1 %5260  ;;  %v6106_v11 = vmul.f32 %v8572_v19, %v6105_v1  ;;  %5811 = vadd.xlane.f32.xlu2 %v12900_v33  ;;  %5989 = vadd.xlane.f32.xlu1 %v5949_v39  ;;  %v5854_v62 = vmul.f32 0.015625, %v5800_v34 }
 0xf5b   : > { %v8578_v21 = vpop.eup %8577  ;;  %v6112_v43 = vmul.f32 %v8576_v37, %v12885_v13  ;;  %v5661_v45 = vpop.f32.mrf.mxu0  ;;  %vm6118_vm15 = vweird.f32 %v8576_v37 }
 0xf5c   : > { %8579 = vrsqrt.f32 %v12903_v44  ;;  %v6110_v3 = vsel %vm6109_vm14, %v8572_v19, %v6106_v11  ;;  %v12916_v54 = vsub.f32 %v12798_v57, %v5854_v62  ;;  %v5324_v5 = vmul.f32 %v8578_v21, %v12776_v59  ;;  %vm6119_vm1 = vmor %vm6117_vm0, %vm6118_vm15 }
 0xf5d   : > { %v6113_v15 = vmul.f32 %v8576_v37, %v6112_v43  ;;  %8581 = vrcp.f32 %v5261_v63  ;;  %v6421_v4 = vmul.f32 %v6110_v3, %v12739_v53  ;;  %v12929_v53 = vadd.f32 %v5658_v32, %v11993_v48 }
 0xf5e   : > { %v5918_v19 = vmul.f32 %v12916_v54, %v12916_v54  ;;  %vm6127_vm4 = vweird.f32 %v12903_v44 }
 0xf5f   : > { %v6114_v1 = vmul.f32 0.5, %v6113_v15  ;;  %v5980_v39 = vpop.xlane.xlu0 %5979  ;;  %v6456_v34 = vmul.f32 %v12911_v27, %v6421_v4  ;;  %14556 = vst [vmem:[#allocation27_spill] sm:$0xff] %v12929_v53 }
 0xf60   : > { %v6040_v63 = vmul.f32 0.015625, %v5980_v39  ;;  %7814 = vmatmul.msk.f32.gmra.mxu1 %vm1955_vm2, %v5324_v5  ;;  %v5950_v3 = vmul.f32 %v14535_v8, %v5918_v19 }
 0xf61   : > { %v6115_v59 = vsub.f32 1.5, %v6114_v1  ;;  %v6491_v62 = vadd.f32 %v12922_v26, %v6456_v34 }
 0xf62   : > { %v8580_v21 = vpop.eup %8579  ;;  %v6072_v11 = vadd.f32 1e-05, %v6040_v63  ;;  %v5802_v43 = vpop.xlane.xlu1 %5801  ;;  %5813 = vadd.xlane.f32.xlu1 %v12929_v53  ;;  %5991 = vadd.xlane.f32.xlu0 %v5950_v3 }
 0xf63   : > { %v8582_v15 = vpop.eup %8581  ;;  %v6116_v4 = vmul.f32 %v8576_v37, %v6115_v59  ;;  %v6122_v39 = vmul.f32 %v8580_v21, %v12903_v44  ;;  %v5855_v57 = vmul.f32 0.015625, %v5802_v43  ;;  %6559 = vmatmul.f32.vlgmr.msrb.gmra.mxu2 %v6491_v62  ;;  %v5664_v62 = vpop.f32.mrf.mxu0  ;;  %vm6128_vm3 = vweird.f32 %v8580_v21 }
 0xf64   : > { %8583 = vrsqrt.f32 %v6072_v11  ;;  %v5325_v1 = vmul.f32 %v8582_v15, %v12796_v20  ;;  %v12947_v20 = vadd.f32 %v5661_v45, %v12001_v12  ;;  %v12961_v44 = vadd.f32 %v5664_v62, %v12014_v0 }
 0xf65   : > { %v6120_v48 = vsel %vm6119_vm1, %v8576_v37, %v6116_v4  ;;  %v6123_v32 = vmul.f32 %v8580_v21, %v6122_v39  ;;  %v12937_v5 = vsub.f32 %v12815_v16, %v5855_v57  ;;  %vm6137_vm6 = vweird.f32 %v6072_v11 }
 0xf66   : > { %v6422_v34 = vmul.f32 %v6120_v48, %v12760_v50  ;;  %14557 = vst [vmem:[#allocation26_spill] sm:$0xff] %v12947_v20 }
 0xf67   : > { %v6124_v19 = vmul.f32 0.5, %v6123_v32  ;;  %v5919_v13 = vmul.f32 %v12937_v5, %v12937_v5  ;;  %v5804_v63 = vpop.xlane.xlu0 %5803  ;;  %14558 = vst [vmem:[#allocation103_spill] sm:$0xff] %v12961_v44 }
 0xf68   : > { %v5856_v59 = vmul.f32 0.015625, %v5804_v63  ;;  %7815 = vmatmul.msk.f32.gmra.mxu1 %vm1955_vm2, %v5325_v1  ;;  %v6457_v43 = vmul.f32 %v12911_v27, %v6422_v34  ;;  %vm6129_vm2 = vmor %vm6127_vm4, %vm6128_vm3 }
 0xf69   : > { %v6125_v37 = vsub.f32 1.5, %v6124_v19  ;;  %v5951_v57 = vmul.f32 %v14535_v8, %v5919_v13 }
 0xf6a   : > { %v8584_v3 = vpop.eup %8583  ;;  %v12950_v50 = vsub.f32 %v12820_v56, %v5856_v59  ;;  %v6492_v15 = vadd.f32 %v12922_v26, %v6457_v43  ;;  %5815 = vadd.xlane.f32.xlu0 %v12947_v20 }
 0xf6b   : > { %v6126_v4 = vmul.f32 %v8580_v21, %v6125_v37  ;;  %v6132_v39 = vmul.f32 %v8584_v3, %v6072_v11  ;;  %5993 = vadd.xlane.f32.xlu2 %v5951_v57  ;;  %vm6138_vm5 = vweird.f32 %v8584_v3  ;;  %v5667_v59 = vpop.f32.mrf.mxu0 }
 0xf6c   : > { %v5920_v48 = vmul.f32 %v12950_v50, %v12950_v50  ;;  %6562 = vmatmul.f32.gmra.mxu2 %v6492_v15  ;;  %vm6139_vm7 = vmor %vm6137_vm6, %vm6138_vm5 }
 0xf6d   : > { %v6130_v32 = vsel %vm6129_vm2, %v8580_v21, %v6126_v4  ;;  %v6133_v12 = vmul.f32 %v8584_v3, %v6132_v39 }
 0xf6e   : > { %v5952_v45 = vmul.f32 %v14535_v8, %v5920_v48  ;;  %v6423_v1 = vmul.f32 %v6130_v32, %v12781_v46  ;;  %v12966_v46 = vadd.f32 %v5667_v59, %v12031_v28 }
 0xf6f   : > { %v6134_v34 = vmul.f32 0.5, %v6133_v12 }
 0xf70   : > { %5995 = vadd.xlane.f32.xlu1 %v5952_v45  ;;  %v6458_v19 = vmul.f32 %v12911_v27, %v6423_v1 }
 0xf71   : > { %v6135_v13 = vsub.f32 1.5, %v6134_v34 }
 0xf72   : > { %v6493_v63 = vadd.f32 %v12922_v26, %v6458_v19 }
 0xf73   : > { %v6136_v43 = vmul.f32 %v8584_v3, %v6135_v13  ;;  %5817 = vadd.xlane.f32.xlu2 %v12961_v44  ;;  %v5670_v32 = vpop.f32.mrf.mxu0 }
 0xf74   : > { %6565 = vmatmul.f32.gmra.mxu2 %v6493_v63 }
 0xf75   : > { %v6140_v21 = vsel %vm6139_vm7, %v8584_v3, %v6136_v43 }
 0xf76   : > { %v6424_v37 = vmul.f32 %v6140_v21, %v12801_v36 }
 0xf78   : > { %5819 = vadd.xlane.f32.xlu1 %v12966_v46  ;;  %v6459_v0 = vmul.f32 %v12911_v27, %v6424_v37 }
 0xf7a   : > { %v6494_v62 = vadd.f32 %v12922_v26, %v6459_v0 }
 0xf7c   : > { %6568 = vmatmul.f32.gmra.mxu2 %v6494_v62 }
 0xfb2   : > { %v5982_v57 = vpop.xlane.xlu2 %5981 }
 0xfb3   : > { %v6041_v15 = vmul.f32 0.015625, %v5982_v57 }
 0xfb5   : > { %v6073_v11 = vadd.f32 1e-05, %v6041_v15  ;;  %v5984_v4 = vpop.xlane.xlu1 %5983 }
 0xfb6   : > { %v6042_v39 = vmul.f32 0.015625, %v5984_v4 }
 0xfb7   : > { %8585 = vrsqrt.f32 %v6073_v11  ;;  %vm6147_vm9 = vweird.f32 %v6073_v11 }
 0xfb8   : > { %v6074_v48 = vadd.f32 1e-05, %v6042_v39 }
 0xfba   : > { %v5806_v3 = vpop.xlane.xlu2 %5805  ;;  %8587 = vrsqrt.f32 %v6074_v48  ;;  %vm6157_vm12 = vweird.f32 %v6074_v48 }
 0xfbb   : > { %v5857_v28 = vmul.f32 0.015625, %v5806_v3  ;;  %v5673_v3 = vpop.f32.mrf.mxu0 }
 0xfbd   : > { %v8586_v12 = vpop.eup %8585  ;;  %v12973_v36 = vsub.f32 %v12850_v41, %v5857_v28  ;;  %v5808_v1 = vpop.xlane.xlu1 %5807 }
 0xfbe   : > { %v6142_v45 = vmul.f32 %v8586_v12, %v6073_v11  ;;  %v5986_v34 = vpop.xlane.xlu0 %5985  ;;  %v5858_v13 = vmul.f32 0.015625, %v5808_v1  ;;  %vm6148_vm8 = vweird.f32 %v8586_v12 }
 0xfbf   : > { %v5921_v19 = vmul.f32 %v12973_v36, %v12973_v36  ;;  %v6043_v63 = vmul.f32 0.015625, %v5986_v34  ;;  %vm6149_vm10 = vmor %vm6147_vm9, %vm6148_vm8 }
 0xfc0   : > { %v6143_v59 = vmul.f32 %v8586_v12, %v6142_v45  ;;  %v8588_v43 = vpop.eup %8587  ;;  %v12978_v21 = vsub.f32 %v12863_v23, %v5858_v13 }
 0xfc1   : > { %v12980_v37 = vadd.f32 1e-05, %v6043_v63  ;;  %v5953_v0 = vmul.f32 %v14535_v8, %v5921_v19  ;;  %v6152_v57 = vmul.f32 %v8588_v43, %v6074_v48  ;;  %vm6158_vm11 = vweird.f32 %v8588_v43 }
 0xfc2   : > { %v6144_v62 = vmul.f32 0.5, %v6143_v59  ;;  %v5922_v15 = vmul.f32 %v12978_v21, %v12978_v21  ;;  %vm6159_vm13 = vmor %vm6157_vm12, %vm6158_vm11 }
 0xfc3   : > { %8589 = vrsqrt.f32 %v12980_v37  ;;  %5997 = vadd.xlane.f32.xlu0 %v5953_v0  ;;  %v6153_v39 = vmul.f32 %v8588_v43, %v6152_v57  ;;  %v12988_v0 = vadd.f32 %v5670_v32, %v12051_v14  ;;  %vm6167_vm15 = vweird.f32 %v12980_v37 }
 0xfc4   : > { %v6145_v4 = vsub.f32 1.5, %v6144_v62  ;;  %v5954_v28 = vmul.f32 %v14535_v8, %v5922_v15 }
 0xfc5   : > { %v6154_v1 = vmul.f32 0.5, %v6153_v39  ;;  %v5988_v13 = vpop.xlane.xlu2 %5987 }
 0xfc6   : > { %v6146_v45 = vmul.f32 %v8586_v12, %v6145_v4  ;;  %v5810_v34 = vpop.xlane.xlu0 %5809  ;;  %v6044_v63 = vmul.f32 0.015625, %v5988_v13  ;;  %5999 = vadd.xlane.f32.xlu2 %v5954_v28  ;;  %v13003_v28 = vadd.f32 %v5673_v3, %v12072_v22 }
 0xfc7   : > { %v5859_v19 = vmul.f32 0.015625, %v5810_v34  ;;  %v6155_v23 = vsub.f32 1.5, %v6154_v1 }
 0xfc8   : > { %v6150_v59 = vsel %vm6149_vm10, %v8586_v12, %v6146_v45  ;;  %v12993_v57 = vadd.f32 1e-05, %v6044_v63  ;;  %14559 = vst [vmem:[#allocation25_spill] sm:$0xff] %v13003_v28  ;;  %v5676_v63 = vpop.f32.mrf.mxu0 }
 0xfc9   : > { %v8590_v41 = vpop.eup %8589  ;;  %v12991_v62 = vsub.f32 %v12882_v24, %v5859_v19  ;;  %v6425_v11 = vmul.f32 %v6150_v59, %v12828_v42  ;;  %v6156_v15 = vmul.f32 %v8588_v43, %v6155_v23 }
 0xfca   : > { %v6162_v4 = vmul.f32 %v8590_v41, %v12980_v37  ;;  %8591 = vrsqrt.f32 %v12993_v57  ;;  %vm6168_vm14 = vweird.f32 %v8590_v41  ;;  %vm6177_vm3 = vweird.f32 %v12993_v57 }
 0xfcb   : > { %v5923_v12 = vmul.f32 %v12991_v62, %v12991_v62  ;;  %5821 = vadd.xlane.f32.xlu0 %v12988_v0  ;;  %v6460_v14 = vmul.f32 %v12911_v27, %v6425_v11  ;;  %v6160_v32 = vsel %vm6159_vm13, %v8588_v43, %v6156_v15  ;;  %v7311_v11 = vld [vmem:[#allocation11 + $0x78] sm:$0xff]  ;;  %vm6169_vm0 = vmor %vm6167_vm15, %vm6168_vm14 }
 0xfcc   : > { %v6163_v39 = vmul.f32 %v8590_v41, %v6162_v4  ;;  %v6426_v34 = vmul.f32 %v6160_v32, %v12835_v6  ;;  %7312 = vmatpush.msra.mxu0 %v7311_v11 }
 0xfcd   : > { %v5955_v42 = vmul.f32 %v14535_v8, %v5923_v12  ;;  %v6495_v23 = vadd.f32 %v12922_v26, %v6460_v14  ;;  %v5990_v45 = vpop.xlane.xlu1 %5989  ;;  %v5812_v1 = vpop.xlane.xlu2 %5811  ;;  %v7310_v14 = vld [vmem:[#allocation11 + $0x70] sm:$0xff] }
 0xfce   : > { %v6164_v48 = vmul.f32 0.5, %v6163_v39  ;;  %v6045_v13 = vmul.f32 0.015625, %v5990_v45  ;;  %v5860_v19 = vmul.f32 0.015625, %v5812_v1  ;;  %5823 = vadd.xlane.f32.xlu2 %v13003_v28  ;;  %v6461_v4 = vmul.f32 %v12911_v27, %v6426_v34  ;;  %7313 = vmatpush.msra.mxu0 %v7310_v14 }
 0xfcf   : > { %6001 = vadd.xlane.f32.xlu1 %v5955_v42  ;;  %6571 = vmatmul.f32.gmra.mxu2 %v6495_v23  ;;  %v13021_v42 = vadd.f32 %v5676_v63, %v12092_v52  ;;  %v7309_v23 = vld [vmem:[#allocation11 + $0x68] sm:$0xff] }
 0xfd0   : > { %v6165_v43 = vsub.f32 1.5, %v6164_v48  ;;  %v8592_v22 = vpop.eup %8591  ;;  %v13009_v3 = vadd.f32 1e-05, %v6045_v13  ;;  %v13012_v59 = vsub.f32 %v12900_v33, %v5860_v19  ;;  %v6496_v1 = vadd.f32 %v12922_v26, %v6461_v4  ;;  %7314 = vmatpush.msra.mxu0 %v7309_v23 }
 0xfd1   : > { %v6172_v6 = vmul.f32 %v8592_v22, %v12993_v57  ;;  %vm6178_vm1 = vweird.f32 %v8592_v22 }
 0xfd2   : > { %v6166_v15 = vmul.f32 %v8590_v41, %v6165_v43  ;;  %8593 = vrsqrt.f32 %v13009_v3  ;;  %v5924_v12 = vmul.f32 %v13012_v59, %v13012_v59  ;;  %vm6179_vm4 = vmor %vm6177_vm3, %vm6178_vm1  ;;  %vm6187_vm5 = vweird.f32 %v13009_v3 }
 0xfd3   : > { %v6173_v39 = vmul.f32 %v8592_v22, %v6172_v6 }
 0xfd4   : > { %v6170_v32 = vsel %vm6169_vm0, %v8590_v41, %v6166_v15  ;;  %v5956_v37 = vmul.f32 %v14535_v8, %v5924_v12  ;;  %v7308_v41 = vld [vmem:[#allocation11 + $0x60] sm:$0xff]  ;;  %v5679_v15 = vpop.f32.mrf.mxu0 }
 0xfd5   : > { %v6174_v48 = vmul.f32 0.5, %v6173_v39  ;;  %v5814_v45 = vpop.xlane.xlu1 %5813  ;;  %v6427_v34 = vmul.f32 %v6170_v32, %v12853_v18  ;;  %v5992_v19 = vpop.xlane.xlu0 %5991  ;;  %7315 = vmatpush.msra.mxu0 %v7308_v41  ;;  %v7307_v18 = vld [vmem:[#allocation11 + $0x58] sm:$0xff] }
 0xfd6   : > { %v5861_v13 = vmul.f32 0.015625, %v5814_v45  ;;  %6003 = vadd.xlane.f32.xlu0 %v5956_v37  ;;  %v6046_v52 = vmul.f32 0.015625, %v5992_v19  ;;  %v8796_v32 = vld [vmem:[%s9284_s1 + $0xc0] sm:$0xff]  ;;  %v5723_v37 = vpop.f32.mrf.mxu1  ;;  %v7305_v19 = vld [vmem:[#allocation11 + $0x48] sm:$0xff] }
 0xfd7   : > { %5825 = vadd.xlane.f32.xlu1 %v13021_v42  ;;  %v6175_v43 = vsub.f32 1.5, %v6174_v48  ;;  %6574 = vmatmul.f32.gmra.mxu2 %v6496_v1  ;;  %v6462_v14 = vmul.f32 %v12911_v27, %v6427_v34  ;;  %v13042_v39 = vld [vmem:[%s13892_s5] ss:$0 sm:$0xff]  ;;  %v7306_v48 = vld [vmem:[#allocation11 + $0x50] sm:$0xff]  ;;  %v13051_v34 = vadd.f32 %v5679_v15, %v12108_v35  ;;  %v7304_v35 = vld [vmem:[#allocation11 + $0x40] sm:$0xff] }
 0xfd8   : > { %v13027_v63 = vpop.eup %8593  ;;  %v13031_v11 = vsub.f32 %v12929_v53, %v5861_v13  ;;  %v13035_v12 = vadd.f32 1e-05, %v6046_v52  ;;  %7316 = vmatpush.msra.mxu0 %v7307_v18  ;;  %v1746_v57 = vadd.f32 %v13042_v39, %v8796_v32  ;;  %v14561_v32 = vld [vmem:[#allocation123_spill] sm:$0xff] }
 0xfd9   : > { %v6176_v6 = vmul.f32 %v8592_v22, %v6175_v43  ;;  %v6182_v4 = vmul.f32 %v13027_v63, %v13009_v3  ;;  %14560 = vst [vmem:[#allocation24_spill] sm:$0xff] %v13051_v34  ;;  %v6497_v52 = vadd.f32 %v12922_v26, %v6462_v14  ;;  %vm6188_vm2 = vweird.f32 %v13027_v63 }
 0xfda   : > { %v5925_v23 = vmul.f32 %v13031_v11, %v13031_v11  ;;  %8595 = vrsqrt.f32 %v13035_v12  ;;  %7317 = vmatpush.msra.mxu0 %v7306_v48  ;;  %v14562_v48 = vld [vmem:[#allocation142_spill] sm:$0xff]  ;;  %vm13075_vm6 = vmor %vm6187_vm5, %vm6188_vm2  ;;  %vm6197_vm8 = vweird.f32 %v13035_v12 }
 0xfdb   : > { %v6180_v45 = vsel %vm6179_vm4, %v8592_v22, %v6176_v6  ;;  %v6183_v1 = vmul.f32 %v13027_v63, %v6182_v4  ;;  %v2753_v22 = vadd.f32 %v14561_v32, %v1746_v57 }
 0xfdc   : > { %v5957_v13 = vmul.f32 %v14535_v8, %v5925_v23  ;;  %v6428_v18 = vmul.f32 %v6180_v45, %v12873_v29  ;;  %7318 = vmatpush.msra.mxu0 %v7305_v19  ;;  %v7303_v29 = vld [vmem:[#allocation11 + $0x38] sm:$0xff] }
 0xfdd   : > { %v6184_v41 = vmul.f32 0.5, %v6183_v1  ;;  %v5816_v6 = vpop.xlane.xlu0 %5815  ;;  %v3759_v14 = vadd.f32 %v14562_v48, %v2753_v22 }
 0xfde   : > { %v5994_v43 = vpop.xlane.xlu2 %5993  ;;  %6005 = vadd.xlane.f32.xlu2 %v5957_v13  ;;  %5827 = vadd.xlane.f32.xlu0 %v13051_v34  ;;  %v5862_v23 = vmul.f32 0.015625, %v5816_v6  ;;  %v6463_v19 = vmul.f32 %v12911_v27, %v6428_v18  ;;  %v5726_v32 = vpop.f32.mrf.mxu1  ;;  %v7302_v18 = vld [vmem:[#allocation11 + $0x30] sm:$0xff] }
 0xfdf   : > { %v6047_v4 = vmul.f32 0.015625, %v5994_v43  ;;  %v6185_v15 = vsub.f32 1.5, %v6184_v41  ;;  %6577 = vmatmul.f32.gmra.mxu2 %v6497_v52  ;;  %7319 = vmatpush.msra.mxu0 %v7304_v35  ;;  %v8798_v41 = vld [vmem:[%s9284_s1 + $0xc8] sm:$0xff]  ;;  %v4765_v52 = vadd.f32 %v12457_v17, %v3759_v14 }
 0xfe0   : > { %v13062_v45 = vpop.eup %8595  ;;  %v13067_v13 = vsub.f32 %v12947_v20, %v5862_v23  ;;  %v1747_v43 = vadd.f32 %v8798_v41, %v13042_v39  ;;  %v7301_v14 = vld [vmem:[#allocation11 + $0x28] sm:$0xff] }
 0xfe1   : > { %v13060_v1 = vadd.f32 1e-05, %v6047_v4  ;;  %v6186_v57 = vmul.f32 %v13027_v63, %v6185_v15  ;;  %7320 = vmatpush.msra.mxu0 %v7303_v29  ;;  %v6192_v3 = vmul.f32 %v13062_v45, %v13035_v12  ;;  %v13090_v15 = vld [vmem:[%s13896_s9] ss:$0 sm:$0xff]  ;;  %v13092_v23 = vadd.f32 %v5723_v37, %v4765_v52  ;;  %v7300_v52 = vld [vmem:[#allocation11 + $0x20] sm:$0xff] }
 0xfe2   : > { %v5926_v17 = vmul.f32 %v13067_v13, %v13067_v13  ;;  %vm6198_vm7 = vweird.f32 %v13062_v45 }
 0xfe3   : > { %8597 = vrsqrt.f32 %v13060_v1  ;;  %v5996_v6 = vpop.xlane.xlu1 %5995  ;;  %v6190_v4 = vsel %vm13075_vm6, %v13027_v63, %v6186_v57  ;;  %7321 = vmatpush.msra.mxu0 %v7302_v18  ;;  %14565 = vst [vmem:[#allocation104_spill] sm:$0xff] %v13092_v23  ;;  %v6193_v48 = vmul.f32 %v13062_v45, %v6192_v3  ;;  %v6498_v57 = vadd.f32 %v12922_v26, %v6463_v19  ;;  %vm6199_vm9 = vmor %vm6197_vm8, %vm6198_vm7 }
 0xfe4   : > { %v6048_v35 = vmul.f32 0.015625, %v5996_v6  ;;  %v5958_v63 = vmul.f32 %v14535_v8, %v5926_v17  ;;  %v6429_v22 = vmul.f32 %v6190_v4, %v12893_v49  ;;  %v14566_v6 = vld [vmem:[#allocation124_spill] sm:$0xff]  ;;  %v14567_v49 = vld [vmem:[#allocation143_spill] sm:$0xff]  ;;  %vm6207_vm11 = vweird.f32 %v13060_v1 }
 0xfe5   : > { %7322 = vmatpush.msra.mxu0 %v7301_v14  ;;  %v2754_v20 = vadd.f32 %v14566_v6, %v1747_v43  ;;  %v6194_v53 = vmul.f32 0.5, %v6193_v48  ;;  %v8799_v48 = vld [vmem:[%s9284_s1 + $0xd0] sm:$0xff] }
 0xfe6   : > { %v13095_v29 = vadd.f32 1e-05, %v6048_v35  ;;  %v5818_v41 = vpop.xlane.xlu2 %5817  ;;  %v6560_v18 = vpop.f32.mrf.mxu2  ;;  %5829 = vadd.xlane.f32.xlu2 %v13092_v23  ;;  %6007 = vadd.xlane.f32.xlu1 %v5958_v63  ;;  %v7299_v35 = vld [vmem:[#allocation11 + $0x18] sm:$0xff]  ;;  %v1748_v14 = vadd.f32 %v8799_v48, %v13042_v39 }
 0xfe7   : > { %v5863_v37 = vmul.f32 0.015625, %v5818_v41  ;;  %v13104_v3 = vadd.f32 %v13090_v15, %v6560_v18  ;;  %6580 = vmatmul.f32.gmra.mxu2 %v6498_v57  ;;  %v3760_v4 = vadd.f32 %v14567_v49, %v2754_v20  ;;  %v6195_v17 = vsub.f32 1.5, %v6194_v53  ;;  %7323 = vmatpush.msra.mxu0 %v7300_v52 }
 0xfe8   : > { %8599 = vrsqrt.f32 %v13095_v29  ;;  %v6464_v57 = vmul.f32 %v12911_v27, %v6429_v22  ;;  %vm6217_vm14 = vweird.f32 %v13095_v29 }
 0xfe9   : > { %v13106_v19 = vpop.eup %8597  ;;  %v13111_v43 = vsub.f32 %v12961_v44, %v5863_v37  ;;  %v7816_v63 = vmul.f32 -1.442695, %v13104_v3  ;;  %v4766_v20 = vadd.f32 %v12461_v55, %v3760_v4  ;;  %v6196_v53 = vmul.f32 %v13062_v45, %v6195_v17  ;;  %7324 = vmatpush.msra.mxu0 %v7299_v35  ;;  %v7298_v37 = vld [vmem:[#allocation11 + $0x10] sm:$0xff]  ;;  %v5729_v55 = vpop.f32.mrf.mxu1  ;;  %v7297_v17 = vld [vmem:[#allocation11 + $0x8] sm:$0xff] }
 0xfea   : > { %v6202_v41 = vmul.f32 %v13106_v19, %v13060_v1  ;;  %v6499_v33 = vadd.f32 %v12922_v26, %v6464_v57  ;;  %vm6208_vm10 = vweird.f32 %v13106_v19  ;;  %v14571_v1 = vld [vmem:[#allocation126_spill] sm:$0xff] }
 0xfeb   : > { %v5927_v6 = vmul.f32 %v13111_v43, %v13111_v43  ;;  %v5820_v18 = vpop.xlane.xlu1 %5819  ;;  %8601 = vpow2.f32 %v7816_v63  ;;  %v13127_v49 = vadd.f32 %v5726_v32, %v4766_v20  ;;  %v6200_v4 = vsel %vm6199_vm9, %v13062_v45, %v6196_v53  ;;  %7325 = vmatpush.msra.mxu0 %v7298_v37  ;;  %v14569_v63 = vld [vmem:[#allocation125_spill] sm:$0xff]  ;;  %vm6209_vm12 = vmor %vm6207_vm11, %vm6208_vm10 }
 0xfec   : > { %v6203_v52 = vmul.f32 %v13106_v19, %v6202_v41  ;;  %v5864_v22 = vmul.f32 0.015625, %v5820_v18  ;;  %v6430_v41 = vmul.f32 %v6200_v4, %v12916_v54  ;;  %v2755_v32 = vadd.f32 %v14569_v63, %v1748_v14  ;;  %v8800_v20 = vld [vmem:[%s9284_s1 + $0xd8] sm:$0xff]  ;;  %v14570_v14 = vld [vmem:[#allocation144_spill] sm:$0xff] }
 0xfed   : > { %14568 = vst [vmem:[#allocation21_spill] sm:$0xff] %v13127_v49  ;;  %v5959_v12 = vmul.f32 %v14535_v8, %v5927_v6  ;;  %v1749_v18 = vadd.f32 %v8800_v20, %v13042_v39  ;;  %7326 = vmatpush.msra.mxu0 %v7297_v17  ;;  %v7296_v6 = vld [vmem:[#allocation11] sm:$0xff] }
 0xfee   : > { %v13131_v48 = vpop.eup %8599  ;;  %v6204_v35 = vmul.f32 0.5, %v6203_v52  ;;  %v13134_v44 = vsub.f32 %v12966_v46, %v5864_v22  ;;  %5831 = vadd.xlane.f32.xlu1 %v13127_v49  ;;  %v3761_v52 = vadd.f32 %v14570_v14, %v2755_v32  ;;  %v6465_v63 = vmul.f32 %v12911_v27, %v6430_v41 }
 0xfef   : > { %v6212_v45 = vmul.f32 %v13131_v48, %v13095_v29  ;;  %v6563_v53 = vpop.f32.mrf.mxu2  ;;  %6009 = vadd.xlane.f32.xlu0 %v5959_v12  ;;  %6583 = vmatmul.f32.gmra.mxu2 %v6499_v33  ;;  %vm6218_vm13 = vweird.f32 %v13131_v48 }
 0xff0   : > { %v6205_v37 = vsub.f32 1.5, %v6204_v35  ;;  %v5928_v57 = vmul.f32 %v13134_v44, %v13134_v44  ;;  %v13147_v54 = vadd.f32 %v13090_v15, %v6563_v53  ;;  %7327 = vmatpush.msra.mxu0 %v7296_v6  ;;  %v4767_v20 = vadd.f32 %v12464_v25, %v3761_v52  ;;  %vm6219_vm15 = vmor %vm6217_vm14, %vm6218_vm13 }
 0xff1   : > { %v6213_v22 = vmul.f32 %v13131_v48, %v6212_v45  ;;  %v8602_v4 = vpop.eup %8601  ;;  %v2756_v53 = vadd.f32 %v14571_v1, %v1749_v18  ;;  %v6500_v41 = vadd.f32 %v12922_v26, %v6465_v63  ;;  %v5732_v52 = vpop.f32.mrf.mxu1 }
 0xff2   : > { %v6206_v12 = vmul.f32 %v13106_v19, %v6205_v37  ;;  %v7817_v17 = vmul.f32 -1.442695, %v13147_v54  ;;  %v5960_v35 = vmul.f32 %v14535_v8, %v5928_v57  ;;  %v6752_v32 = vadd.f32 1.0, %v8602_v4  ;;  %v14573_v57 = vld [vmem:[#allocation145_spill] sm:$0xff] }
 0xff3   : > { %v6214_v33 = vmul.f32 0.5, %v6213_v22  ;;  %v13162_v6 = vadd.f32 %v5729_v55, %v4767_v20  ;;  %v3762_v14 = vadd.f32 %v14573_v57, %v2756_v53 }
 0xff4   : > { %v6210_v45 = vsel %vm6209_vm12, %v13106_v19, %v6206_v12  ;;  %8603 = vpow2.f32 %v7817_v17  ;;  %6011 = vadd.xlane.f32.xlu2 %v5960_v35  ;;  %v6795_v53 = vand.u32 2147483648, %v6752_v32  ;;  %v6793_v57 = vand.u32 2147483647, %v6752_v32 }
 0xff5   : > { %14572 = vst [vmem:[#allocation113_spill] sm:$0xff] %v13162_v6  ;;  %v6215_v37 = vsub.f32 1.5, %v6214_v33  ;;  %8605 = vrcp.f32 %v6752_v32  ;;  %v6431_v25 = vmul.f32 %v6210_v45, %v12937_v5  ;;  %v4768_v19 = vadd.f32 %v12466_v30, %v3762_v14 }
 0xff6   : > { %vm6789_vm1 = vweird.f32 %v6752_v32  ;;  %vm6794_vm4 = vcmp.eq.f32.partialorder %v6793_v57, 8.507059e+37 }
 0xff7   : > { %v6216_v22 = vmul.f32 %v13131_v48, %v6215_v37  ;;  %v6566_v18 = vpop.f32.mrf.mxu2  ;;  %5833 = vadd.xlane.f32.xlu0 %v13162_v6  ;;  %6586 = vmatmul.f32.gmra.mxu2 %v6500_v41  ;;  %v13175_v12 = vadd.f32 %v5732_v52, %v4768_v19  ;;  %v6466_v17 = vmul.f32 %v12911_v27, %v6431_v25 }
 0xff8   : > { %v13172_v55 = vadd.f32 %v13090_v15, %v6566_v18  ;;  %v6796_v18 = vor.u32 1.1754944e-38, %v6795_v53 }
 0xff9   : > { %14574 = vst [vmem:[#allocation22_spill] sm:$0xff] %v13175_v12  ;;  %v6220_v63 = vsel %vm6219_vm15, %v13131_v48, %v6216_v22  ;;  %v6501_v29 = vadd.f32 %v12922_v26, %v6466_v17 }
 0xffa   : > { %v8604_v4 = vpop.eup %8603  ;;  %v7818_v5 = vmul.f32 -1.442695, %v13172_v55  ;;  %v6432_v1 = vmul.f32 %v6220_v63, %v12950_v50 }
 0xffb   : > { %v8606_v35 = vpop.eup %8605  ;;  %v6753_v20 = vadd.f32 1.0, %v8604_v4 }
 0xffc   : > { %v6785_v33 = vmul.f32 %v8606_v35, %v6752_v32  ;;  %8607 = vpow2.f32 %v7818_v5  ;;  %5835 = vadd.xlane.f32.xlu2 %v13175_v12  ;;  %vm6790_vm0 = vweird.f32 %v8606_v35  ;;  %v6467_v52 = vmul.f32 %v12911_v27, %v6432_v1 }
 0xffd   : > { %8609 = vrcp.f32 %v6753_v20  ;;  %vm6791_vm3 = vmor %vm6789_vm1, %vm6790_vm0  ;;  %v6810_v32 = vand.u32 2147483648, %v6753_v20  ;;  %vm6804_vm5 = vweird.f32 %v6753_v20 }
 0xffe   : > { %v6786_v30 = vsub.f32 1.0, %v6785_v33  ;;  %v6502_v33 = vadd.f32 %v12922_v26, %v6467_v52 }
 0xfff   : > { %v6569_v45 = vpop.f32.mrf.mxu2  ;;  %6589 = vmatmul.f32.gmra.mxu2 %v6501_v29  ;;  %v6808_v29 = vand.u32 2147483647, %v6753_v20 }
0x1000   : > { %v6787_v37 = vmul.f32 %v8606_v35, %v6786_v30  ;;  %v13184_v14 = vadd.f32 %v13090_v15, %v6569_v45  ;;  %v6811_v45 = vor.u32 1.1754944e-38, %v6810_v32 }
0x1001   : > { %vm6809_vm7 = vcmp.eq.f32.partialorder %v6808_v29, 8.507059e+37 }
0x1002   : > { %v8608_v48 = vpop.eup %8607  ;;  %v6788_v41 = vadd.f32 %v8606_v35, %v6787_v37  ;;  %v7819_v25 = vmul.f32 -1.442695, %v13184_v14 }
0x1003   : > { %v8610_v22 = vpop.eup %8609  ;;  %v6754_v50 = vadd.f32 1.0, %v8608_v48 }
0x1004   : > { %v6792_v19 = vsel %vm6791_vm3, %v8606_v35, %v6788_v41  ;;  %v6800_v4 = vmul.f32 %v8610_v22, %v6753_v20  ;;  %8611 = vpow2.f32 %v7819_v25  ;;  %vm6805_vm2 = vweird.f32 %v8610_v22 }
0x1005   : > { %v6797_v5 = vsel %vm6794_vm4, %v6796_v18, %v6792_v19  ;;  %8613 = vrcp.f32 %v6754_v50  ;;  %vm6806_vm6 = vmor %vm6804_vm5, %vm6805_vm2  ;;  %v6825_v52 = vand.u32 2147483648, %v6754_v50  ;;  %v6823_v19 = vand.u32 2147483647, %v6754_v50 }
0x1006   : > { %v7264_v17 = vmul.f32 %v6797_v5, %v13104_v3  ;;  %v6801_v63 = vsub.f32 1.0, %v6800_v4  ;;  %vm6819_vm9 = vweird.f32 %v6754_v50 }
0x1007   : > { %6592 = vmatmul.f32.gmra.mxu2 %v6502_v33  ;;  %v6826_v5 = vor.u32 1.1754944e-38, %v6825_v52  ;;  %vm6824_vm11 = vcmp.eq.f32.partialorder %v6823_v19, 8.507059e+37 }
0x1008   : > { %v6802_v30 = vmul.f32 %v8610_v22, %v6801_v63  ;;  %7328 = vmatmul.f32.vlgmr.msra.gmra.mxu0 %v7264_v17 }
0x100a   : > { %v8612_v1 = vpop.eup %8611  ;;  %v6803_v53 = vadd.f32 %v8610_v22, %v6802_v30 }
0x100b   : > { %v8614_v35 = vpop.eup %8613  ;;  %v6755_v37 = vadd.f32 1.0, %v8612_v1 }
0x100c   : > { %v6807_v57 = vsel %vm6806_vm6, %v8610_v22, %v6803_v53  ;;  %v6815_v48 = vmul.f32 %v8614_v35, %v6754_v50  ;;  %vm6820_vm8 = vweird.f32 %v8614_v35 }
0x100d   : > { %v6812_v3 = vsel %vm6809_vm7, %v6811_v45, %v6807_v57  ;;  %8615 = vrcp.f32 %v6755_v37  ;;  %vm6821_vm10 = vmor %vm6819_vm9, %vm6820_vm8  ;;  %v6840_v30 = vand.u32 2147483648, %v6755_v37  ;;  %v6838_v29 = vand.u32 2147483647, %v6755_v37 }
0x100e   : > { %v7265_v41 = vmul.f32 %v6812_v3, %v13147_v54  ;;  %v6816_v25 = vsub.f32 1.0, %v6815_v48  ;;  %vm6834_vm13 = vweird.f32 %v6755_v37 }
0x100f   : > { %v6841_v53 = vor.u32 1.1754944e-38, %v6840_v30  ;;  %vm6839_vm15 = vcmp.eq.f32.partialorder %v6838_v29, 8.507059e+37 }
0x1010   : > { %v6817_v18 = vmul.f32 %v8614_v35, %v6816_v25  ;;  %7331 = vmatmul.f32.gmra.mxu0 %v7265_v41 }
0x1012   : > { %v6818_v4 = vadd.f32 %v8614_v35, %v6817_v18  ;;  %v5735_v18 = vpop.f32.mrf.mxu1 }
0x1013   : > { %v8616_v20 = vpop.eup %8615 }
0x1014   : > { %v6822_v17 = vsel %vm6821_vm10, %v8614_v35, %v6818_v4  ;;  %v6830_v22 = vmul.f32 %v8616_v20, %v6755_v37  ;;  %vm6835_vm12 = vweird.f32 %v8616_v20 }
0x1015   : > { %v6827_v63 = vsel %vm6824_vm11, %v6826_v5, %v6822_v17  ;;  %vm6836_vm14 = vmor %vm6834_vm13, %vm6835_vm12  ;;  %v8801_v17 = vld [vmem:[%s9284_s1 + $0xe0] sm:$0xff] }
0x1016   : > { %v7266_v33 = vmul.f32 %v6827_v63, %v13172_v55  ;;  %v6831_v32 = vsub.f32 1.0, %v6830_v22  ;;  %v1750_v22 = vadd.f32 %v8801_v17, %v13042_v39 }
0x1018   : > { %v6832_v54 = vmul.f32 %v8616_v20, %v6831_v32  ;;  %7334 = vmatmul.f32.gmra.mxu0 %v7266_v33 }
0x101a   : > { %v6833_v1 = vadd.f32 %v8616_v20, %v6832_v54 }
0x101c   : > { %v6837_v50 = vsel %vm6836_vm14, %v8616_v20, %v6833_v1 }
0x101d   : > { %v6842_v45 = vsel %vm6839_vm15, %v6841_v53, %v6837_v50 }
0x101e   : > { %v7267_v35 = vmul.f32 %v6842_v45, %v13184_v14 }
0x1020   : > { %7337 = vmatmul.f32.gmra.mxu0 %v7267_v35  ;;  %v14575_v35 = vld [vmem:[#allocation127_spill] sm:$0xff] }
0x1036   : > { %v5998_v57 = vpop.xlane.xlu0 %5997 }
0x1037   : > { %v6049_v48 = vmul.f32 0.015625, %v5998_v57  ;;  %v2757_v57 = vadd.f32 %v14575_v35, %v1750_v22 }
0x1039   : > { %v6081_v55 = vadd.f32 1e-05, %v6049_v48  ;;  %v6000_v3 = vpop.xlane.xlu2 %5999 }
0x103a   : > { %v6050_v41 = vmul.f32 0.015625, %v6000_v3  ;;  %v8802_v3 = vld [vmem:[%s9284_s1 + $0xe8] sm:$0xff] }
0x103b   : > { %8617 = vrsqrt.f32 %v6081_v55  ;;  %vm6227_vm1 = vweird.f32 %v6081_v55 }
0x103c   : > { %v6082_v25 = vadd.f32 1e-05, %v6050_v41  ;;  %v1751_v41 = vadd.f32 %v8802_v3, %v13042_v39 }
0x103e   : > { %v5822_v52 = vpop.xlane.xlu0 %5821  ;;  %8619 = vrsqrt.f32 %v6082_v25  ;;  %vm6237_vm2 = vweird.f32 %v6082_v25 }
0x103f   : > { %v5865_v37 = vmul.f32 0.015625, %v5822_v52 }
0x1041   : > { %v8618_v19 = vpop.eup %8617  ;;  %v13194_v4 = vsub.f32 %v12988_v0, %v5865_v37  ;;  %v5824_v14 = vpop.xlane.xlu2 %5823 }
0x1042   : > { %v6222_v20 = vmul.f32 %v8618_v19, %v6081_v55  ;;  %v6002_v5 = vpop.xlane.xlu1 %6001  ;;  %v5866_v32 = vmul.f32 0.015625, %v5824_v14  ;;  %vm6228_vm0 = vweird.f32 %v8618_v19  ;;  %v5738_v14 = vpop.f32.mrf.mxu1 }
0x1043   : > { %v5929_v63 = vmul.f32 %v13194_v4, %v13194_v4  ;;  %v6051_v33 = vmul.f32 0.015625, %v6002_v5  ;;  %vm6229_vm3 = vmor %vm6227_vm1, %vm6228_vm0 }
0x1044   : > { %v6223_v30 = vmul.f32 %v8618_v19, %v6222_v20  ;;  %v8620_v54 = vpop.eup %8619  ;;  %v13203_v1 = vsub.f32 %v13003_v28, %v5866_v32  ;;  %v14576_v20 = vld [vmem:[#allocation146_spill] sm:$0xff] }
0x1045   : > { %v13200_v29 = vadd.f32 1e-05, %v6051_v33  ;;  %v5961_v53 = vmul.f32 %v14535_v8, %v5929_v63  ;;  %v6232_v45 = vmul.f32 %v8620_v54, %v6082_v25  ;;  %v3763_v5 = vadd.f32 %v14576_v20, %v2757_v57 }
0x1046   : > { %v6224_v50 = vmul.f32 0.5, %v6223_v30  ;;  %v5930_v48 = vmul.f32 %v13203_v1, %v13203_v1  ;;  %vm6238_vm4 = vweird.f32 %v8620_v54 }
0x1047   : > { %8621 = vrsqrt.f32 %v13200_v29  ;;  %6013 = vadd.xlane.f32.xlu1 %v5961_v53  ;;  %v6233_v37 = vmul.f32 %v8620_v54, %v6232_v45  ;;  %v4769_v30 = vadd.f32 %v12468_v61, %v3763_v5  ;;  %vm6239_vm5 = vmor %vm6237_vm2, %vm6238_vm4  ;;  %vm6247_vm7 = vweird.f32 %v13200_v29 }
0x1048   : > { %v6225_v52 = vsub.f32 1.5, %v6224_v50  ;;  %v5962_v17 = vmul.f32 %v14535_v8, %v5930_v48  ;;  %v14577_v50 = vld [vmem:[#allocation128_spill] sm:$0xff] }
0x1049   : > { %v6234_v22 = vmul.f32 0.5, %v6233_v37  ;;  %v6004_v32 = vpop.xlane.xlu0 %6003  ;;  %v2758_v3 = vadd.f32 %v14577_v50, %v1751_v41  ;;  %v13216_v20 = vadd.f32 %v5735_v18, %v4769_v30  ;;  %v8803_v41 = vld [vmem:[%s9284_s1 + $0xf0] sm:$0xff] }
0x104a   : > { %v6226_v63 = vmul.f32 %v8618_v19, %v6225_v52  ;;  %v5826_v33 = vpop.xlane.xlu1 %5825  ;;  %v6052_v35 = vmul.f32 0.015625, %v6004_v32  ;;  %6015 = vadd.xlane.f32.xlu0 %v5962_v17  ;;  %v14578_v52 = vld [vmem:[#allocation147_spill] sm:$0xff] }
0x104b   : > { %v5867_v53 = vmul.f32 0.015625, %v5826_v33  ;;  %v6235_v28 = vsub.f32 1.5, %v6234_v22  ;;  %v3764_v37 = vadd.f32 %v14578_v52, %v2758_v3  ;;  %v14579_v3 = vld [vmem:[#allocation52_spill] sm:$0xff] }
0x104c   : > { %v6230_v45 = vsel %vm6229_vm3, %v8618_v19, %v6226_v63  ;;  %v13221_v48 = vadd.f32 1e-05, %v6052_v35  ;;  %v1752_v19 = vadd.f32 %v8803_v41, %v13042_v39 }
0x104d   : > { %v8622_v57 = vpop.eup %8621  ;;  %v13219_v55 = vsub.f32 %v13021_v42, %v5867_v53  ;;  %v6433_v61 = vmul.f32 %v6230_v45, %v12973_v36  ;;  %v6236_v5 = vmul.f32 %v8620_v54, %v6235_v28  ;;  %v4770_v36 = vadd.f32 %v12470_v40, %v3764_v37  ;;  %v5741_v40 = vpop.f32.mrf.mxu1 }
0x104e   : > { %v6242_v17 = vmul.f32 %v8622_v57, %v13200_v29  ;;  %8623 = vrsqrt.f32 %v13221_v48  ;;  %v2759_v45 = vadd.f32 %v14579_v3, %v1752_v19  ;;  %vm6248_vm6 = vweird.f32 %v8622_v57 }
0x104f   : > { %v5931_v18 = vmul.f32 %v13219_v55, %v13219_v55  ;;  %5837 = vadd.xlane.f32.xlu1 %v13216_v20  ;;  %v6468_v63 = vmul.f32 %v12911_v27, %v6433_v61  ;;  %v6240_v22 = vsel %vm6239_vm5, %v8620_v54, %v6236_v5  ;;  %v13236_v32 = vadd.f32 %v5738_v14, %v4770_v36  ;;  %v14580_v61 = vld [vmem:[#allocation148_spill] sm:$0xff]  ;;  %vm6249_vm8 = vmor %vm6247_vm7, %vm6248_vm6 }
0x1050   : > { %v6243_v28 = vmul.f32 %v8622_v57, %v6242_v17  ;;  %v6434_v50 = vmul.f32 %v6240_v22, %v12978_v21  ;;  %v3765_v21 = vadd.f32 %v14580_v61, %v2759_v45  ;;  %v8805_v22 = vld [vmem:[%s9284_s1 + $0xf8] sm:$0xff]  ;;  %vm6257_vm10 = vweird.f32 %v13221_v48 }
0x1051   : > { %v5963_v25 = vmul.f32 %v14535_v8, %v5931_v18  ;;  %v6503_v33 = vadd.f32 %v12922_v26, %v6468_v63  ;;  %v5828_v53 = vpop.xlane.xlu0 %5827  ;;  %v6006_v35 = vpop.xlane.xlu2 %6005  ;;  %v13259_v63 = vld [vmem:[%s13893_s6] ss:$0 sm:$0xff]  ;;  %v1753_v29 = vadd.f32 %v8805_v22, %v13042_v39 }
0x1052   : > { %v6244_v30 = vmul.f32 0.5, %v6243_v28  ;;  %v6572_v52 = vpop.f32.mrf.mxu2  ;;  %v5868_v41 = vmul.f32 0.015625, %v5828_v53  ;;  %v6053_v27 = vmul.f32 0.015625, %v6006_v35  ;;  %5839 = vadd.xlane.f32.xlu0 %v13236_v32  ;;  %v6469_v36 = vmul.f32 %v13259_v63, %v6434_v50 }
0x1053   : > { %6017 = vadd.xlane.f32.xlu2 %v5963_v25  ;;  %6595 = vmatmul.f32.gmra.mxu2 %v6503_v33  ;;  %v13241_v26 = vadd.f32 %v13090_v15, %v6572_v52  ;;  %v4771_v28 = vadd.f32 %v12472_v51, %v3765_v21  ;;  %v13277_v51 = vld [vmem:[%s13894_s7] ss:$0 sm:$0xff] }
0x1054   : > { %v6245_v54 = vsub.f32 1.5, %v6244_v30  ;;  %v13244_v14 = vpop.eup %8623  ;;  %v13249_v37 = vsub.f32 %v13051_v34, %v5868_v41  ;;  %v13251_v5 = vadd.f32 1e-05, %v6053_v27  ;;  %v6504_v45 = vadd.f32 %v13277_v51, %v6469_v36  ;;  %v14581_v52 = vld [vmem:[#allocation50_spill] sm:$0xff] }
0x1055   : > { %v6252_v19 = vmul.f32 %v13244_v14, %v13221_v48  ;;  %v7820_v18 = vmul.f32 -1.442695, %v13241_v26  ;;  %v13270_v53 = vadd.f32 %v5741_v40, %v4771_v28  ;;  %vm6258_vm9 = vweird.f32 %v13244_v14 }
0x1056   : > { %v6246_v17 = vmul.f32 %v8622_v57, %v6245_v54  ;;  %v5932_v25 = vmul.f32 %v13249_v37, %v13249_v37  ;;  %8625 = vrsqrt.f32 %v13251_v5  ;;  %vm6259_vm11 = vmor %vm6257_vm10, %vm6258_vm9  ;;  %vm6267_vm13 = vweird.f32 %v13251_v5 }
0x1057   : > { %v6253_v30 = vmul.f32 %v13244_v14, %v6252_v19  ;;  %8627 = vpow2.f32 %v7820_v18 }
0x1058   : > { %v6250_v33 = vsel %vm6249_vm8, %v8622_v57, %v6246_v17  ;;  %v5964_v35 = vmul.f32 %v14535_v8, %v5932_v25  ;;  %v2760_v57 = vadd.f32 %v14581_v52, %v1753_v29  ;;  %v14582_v17 = vld [vmem:[#allocation149_spill] sm:$0xff]  ;;  %v5744_v29 = vpop.f32.mrf.mxu1 }
0x1059   : > { %v6435_v50 = vmul.f32 %v6250_v33, %v12991_v62  ;;  %v6254_v39 = vmul.f32 0.5, %v6253_v30  ;;  %v5830_v3 = vpop.xlane.xlu2 %5829  ;;  %v6008_v41 = vpop.xlane.xlu1 %6007 }
0x105a   : > { %v6575_v27 = vpop.f32.mrf.mxu2  ;;  %v5869_v54 = vmul.f32 0.015625, %v5830_v3  ;;  %6019 = vadd.xlane.f32.xlu1 %v5964_v35  ;;  %v6054_v62 = vmul.f32 0.015625, %v6008_v41  ;;  %v3766_v19 = vadd.f32 %v14582_v17, %v2760_v57 }
0x105b   : > { %5841 = vadd.xlane.f32.xlu2 %v13270_v53  ;;  %v6255_v40 = vsub.f32 1.5, %v6254_v39  ;;  %v13284_v61 = vadd.f32 %v13090_v15, %v6575_v27  ;;  %6598 = vmatmul.f32.gmra.mxu2 %v6504_v45  ;;  %v6470_v36 = vmul.f32 %v13259_v63, %v6435_v50 }
0x105c   : > { %v13286_v21 = vpop.eup %8625  ;;  %v13290_v18 = vsub.f32 %v13092_v23, %v5869_v54  ;;  %v13297_v33 = vadd.f32 1e-05, %v6054_v62  ;;  %v4772_v30 = vadd.f32 %v12476_v58, %v3766_v19 }
0x105d   : > { %v8628_v22 = vpop.eup %8627  ;;  %v6256_v28 = vmul.f32 %v13244_v14, %v6255_v40  ;;  %v6262_v25 = vmul.f32 %v13286_v21, %v13251_v5  ;;  %v7821_v50 = vmul.f32 -1.442695, %v13284_v61  ;;  %v6505_v58 = vadd.f32 %v13277_v51, %v6470_v36 }
0x105e   : > { %v13302_v35 = vadd.f32 1.0, %v8628_v22  ;;  %v5933_v39 = vmul.f32 %v13290_v18, %v13290_v18  ;;  %8629 = vrsqrt.f32 %v13297_v33  ;;  %v13310_v45 = vadd.f32 %v5744_v29, %v4772_v30 }
0x105f   : > { %v6260_v3 = vsel %vm6259_vm11, %v13244_v14, %v6256_v28  ;;  %v6263_v48 = vmul.f32 %v13286_v21, %v6262_v25  ;;  %vm6268_vm12 = vweird.f32 %v13286_v21  ;;  %vm6277_vm15 = vweird.f32 %v13297_v33 }
0x1060   : > { %8631 = vrcp.f32 %v13302_v35  ;;  %v5965_v41 = vmul.f32 %v14535_v8, %v5933_v39  ;;  %v6436_v27 = vmul.f32 %v6260_v3, %v13012_v59  ;;  %vm13342_vm14 = vmor %vm6267_vm13, %vm6268_vm12  ;;  %vm6849_vm1 = vweird.f32 %v13302_v35 }
0x1061   : > { %v6264_v52 = vmul.f32 0.5, %v6263_v48  ;;  %8633 = vpow2.f32 %v7821_v50  ;;  %v5832_v54 = vpop.xlane.xlu1 %5831 }
0x1062   : > { %v6010_v57 = vpop.xlane.xlu0 %6009  ;;  %v6578_v40 = vpop.f32.mrf.mxu2  ;;  %5843 = vadd.xlane.f32.xlu1 %v13310_v45  ;;  %v5870_v17 = vmul.f32 0.015625, %v5832_v54  ;;  %6021 = vadd.xlane.f32.xlu0 %v5965_v41  ;;  %v6471_v25 = vmul.f32 %v13259_v63, %v6436_v27 }
0x1063   : > { %v6055_v14 = vmul.f32 0.015625, %v6010_v57  ;;  %v6265_v62 = vsub.f32 1.5, %v6264_v52  ;;  %v13318_v19 = vadd.f32 %v13090_v15, %v6578_v40  ;;  %6601 = vmatmul.f32.gmra.mxu2 %v6505_v58  ;;  %v6853_v58 = vand.u32 2147483647, %v13302_v35 }
0x1064   : > { %v13323_v22 = vpop.eup %8629  ;;  %v13327_v29 = vsub.f32 %v13127_v49, %v5870_v17  ;;  %v6855_v52 = vand.u32 2147483648, %v13302_v35  ;;  %v6506_v49 = vadd.f32 %v13277_v51, %v6471_v25 }
0x1065   : > { %v13321_v36 = vadd.f32 1e-05, %v6055_v14  ;;  %v6266_v59 = vmul.f32 %v13286_v21, %v6265_v62  ;;  %v7822_v28 = vmul.f32 -1.442695, %v13318_v19  ;;  %v6272_v50 = vmul.f32 %v13323_v22, %v13297_v33 }
0x1066   : > { %v8632_v30 = vpop.eup %8631  ;;  %v5934_v57 = vmul.f32 %v13327_v29, %v13327_v29  ;;  %vm6854_vm3 = vcmp.eq.f32.partialorder %v6853_v58, 8.507059e+37  ;;  %v6856_v5 = vor.u32 1.1754944e-38, %v6855_v52  ;;  %vm6278_vm2 = vweird.f32 %v13323_v22 }
0x1067   : > { %8635 = vrsqrt.f32 %v13321_v36  ;;  %v6012_v39 = vpop.xlane.xlu2 %6011  ;;  %v8634_v3 = vpop.eup %8633  ;;  %v6845_v48 = vmul.f32 %v8632_v30, %v13302_v35  ;;  %v6273_v41 = vmul.f32 %v13323_v22, %v6272_v50  ;;  %v6270_v14 = vsel %vm13342_vm14, %v13286_v21, %v6266_v59  ;;  %vm13382_vm5 = vmor %vm6277_vm15, %vm6278_vm2 }
0x1068   : > { %v13347_v27 = vadd.f32 1.0, %v8634_v3  ;;  %8637 = vpow2.f32 %v7822_v28  ;;  %v6056_v54 = vmul.f32 0.015625, %v6012_v39  ;;  %v5966_v17 = vmul.f32 %v14535_v8, %v5934_v57 }
0x1069   : > { %v6846_v40 = vsub.f32 1.0, %v6845_v48  ;;  %v6274_v23 = vmul.f32 0.5, %v6273_v41  ;;  %vm6850_vm0 = vweird.f32 %v8632_v30  ;;  %v6437_v48 = vmul.f32 %v6270_v14, %v13031_v11 }
0x106a   : > { %v5834_v62 = vpop.xlane.xlu0 %5833  ;;  %8639 = vrcp.f32 %v13347_v27  ;;  %v6581_v50 = vpop.f32.mrf.mxu2  ;;  %v13356_v28 = vadd.f32 1e-05, %v6056_v54  ;;  %6023 = vadd.xlane.f32.xlu2 %v5966_v17  ;;  %vm6851_vm4 = vmor %vm6849_vm1, %vm6850_vm0  ;;  %vm6864_vm6 = vweird.f32 %v13347_v27  ;;  %vm6287_vm10 = vweird.f32 %v13321_v36 }
0x106b   : > { %v6847_v3 = vmul.f32 %v8632_v30, %v6846_v40  ;;  %v13359_v39 = vadd.f32 %v13090_v15, %v6581_v50  ;;  %6604 = vmatmul.f32.gmra.mxu2 %v6506_v49  ;;  %v6275_v59 = vsub.f32 1.5, %v6274_v23  ;;  %v5871_v25 = vmul.f32 0.015625, %v5834_v62 }
0x106c   : > { %8641 = vrsqrt.f32 %v13356_v28  ;;  %v6472_v50 = vmul.f32 %v13259_v63, %v6437_v48  ;;  %v6868_v48 = vand.u32 2147483647, %v13347_v27 }
0x106d   : > { %v13361_v21 = vpop.eup %8635  ;;  %v6848_v57 = vadd.f32 %v8632_v30, %v6847_v3  ;;  %v6276_v40 = vmul.f32 %v13323_v22, %v6275_v59  ;;  %v7823_v23 = vmul.f32 -1.442695, %v13359_v39  ;;  %v13376_v52 = vsub.f32 %v13162_v6, %v5871_v25 }
0x106e   : > { %v6282_v41 = vmul.f32 %v13361_v21, %v13321_v36  ;;  %v8638_v54 = vpop.eup %8637  ;;  %vm6288_vm7 = vweird.f32 %v13361_v21  ;;  %vm6869_vm11 = vcmp.eq.f32.partialorder %v6868_v48, 8.507059e+37 }
0x106f   : > { %v5836_v49 = vpop.xlane.xlu2 %5835  ;;  %v6852_v35 = vsel %vm6851_vm4, %v8632_v30, %v6848_v57  ;;  %v13372_v11 = vadd.f32 1.0, %v8638_v54  ;;  %8643 = vpow2.f32 %v7823_v23  ;;  %v6280_v25 = vsel %vm13382_vm5, %v13323_v22, %v6276_v40  ;;  %vm13424_vm12 = vmor %vm6287_vm10, %vm6288_vm7 }
0x1070   : > { %v6283_v58 = vmul.f32 %v13361_v21, %v6282_v41  ;;  %v8640_v14 = vpop.eup %8639  ;;  %v6857_v62 = vsel %vm6854_vm3, %v6856_v5, %v6852_v35  ;;  %v5872_v17 = vmul.f32 0.015625, %v5836_v49  ;;  %v5935_v33 = vmul.f32 %v13376_v52, %v13376_v52 }
0x1071   : > { %v7268_v3 = vmul.f32 %v6857_v62, %v13241_v26  ;;  %v6860_v30 = vmul.f32 %v8640_v14, %v13347_v27  ;;  %8645 = vrcp.f32 %v13372_v11  ;;  %v6870_v22 = vand.u32 2147483648, %v13347_v27 }
0x1072   : > { %v6284_v57 = vmul.f32 0.5, %v6283_v58  ;;  %v6584_v26 = vpop.f32.mrf.mxu2  ;;  %v13396_v41 = vsub.f32 %v13175_v12, %v5872_v17  ;;  %v13401_v23 = vpop.eup %8641  ;;  %v6507_v49 = vadd.f32 %v13277_v51, %v6472_v50  ;;  %vm6865_vm8 = vweird.f32 %v8640_v14 }
0x1073   : > { %v6861_v5 = vsub.f32 1.0, %v6860_v30  ;;  %v13399_v54 = vadd.f32 %v13090_v15, %v6584_v26  ;;  %7340 = vmatmul.f32.gmra.mxu0 %v7268_v3  ;;  %v6292_v58 = vmul.f32 %v13401_v23, %v13356_v28  ;;  %v5967_v30 = vmul.f32 %v14535_v8, %v5935_v33  ;;  %vm6866_vm9 = vmor %vm6864_vm6, %vm6865_vm8 }
0x1074   : > { %v6285_v40 = vsub.f32 1.5, %v6284_v57  ;;  %v5936_v62 = vmul.f32 %v13396_v41, %v13396_v41  ;;  %6607 = vmatmul.f32.gmra.mxu2 %v6507_v49  ;;  %v6438_v57 = vmul.f32 %v6280_v25, %v13067_v13  ;;  %v6871_v34 = vor.u32 1.1754944e-38, %v6870_v22 }
0x1075   : > { %v6862_v35 = vmul.f32 %v8640_v14, %v6861_v5  ;;  %v8644_v17 = vpop.eup %8643  ;;  %v7824_v59 = vmul.f32 -1.442695, %v13399_v54  ;;  %v6293_v5 = vmul.f32 %v13401_v23, %v6292_v58  ;;  %6025 = vadd.xlane.f32.xlu0 %v5967_v30  ;;  %v6885_v49 = vand.u32 2147483648, %v13372_v11 }
0x1076   : > { %v6286_v3 = vmul.f32 %v13361_v21, %v6285_v40  ;;  %v13415_v12 = vadd.f32 1.0, %v8644_v17  ;;  %v5968_v6 = vmul.f32 %v14535_v8, %v5936_v62  ;;  %v6473_v62 = vmul.f32 %v13259_v63, %v6438_v57 }
0x1077   : > { %v8646_v26 = vpop.eup %8645  ;;  %v6863_v50 = vadd.f32 %v8640_v14, %v6862_v35  ;;  %8647 = vpow2.f32 %v7824_v59  ;;  %v6294_v25 = vmul.f32 0.5, %v6293_v5  ;;  %vm6879_vm14 = vweird.f32 %v13372_v11 }
0x1078   : > { %v6875_v40 = vmul.f32 %v8646_v26, %v13372_v11  ;;  %8649 = vrcp.f32 %v13415_v12  ;;  %6027 = vadd.xlane.f32.xlu1 %v5968_v6  ;;  %v6290_v36 = vsel %vm13424_vm12, %v13361_v21, %v6286_v3  ;;  %vm6880_vm13 = vweird.f32 %v8646_v26 }
0x1079   : > { %v6867_v33 = vsel %vm6866_vm9, %v8640_v14, %v6863_v50  ;;  %v6295_v35 = vsub.f32 1.5, %v6294_v25  ;;  %v6508_v59 = vadd.f32 %v13277_v51, %v6473_v62  ;;  %v6439_v21 = vmul.f32 %v6290_v36, %v13111_v43  ;;  %vm6881_vm0 = vmor %vm6879_vm14, %vm6880_vm13  ;;  %v13466_v36 = vld [vmem:[%s13898_s11] ss:$0 sm:$0xff] }
0x107a   : > { %v6872_v27 = vsel %vm6869_vm11, %v6871_v34, %v6867_v33  ;;  %v6876_v22 = vsub.f32 1.0, %v6875_v40  ;;  %v6587_v14 = vpop.f32.mrf.mxu2  ;;  %v6883_v34 = vand.u32 2147483647, %v13372_v11  ;;  %vm6298_vm15 = vweird.f32 %v13401_v23 }
0x107b   : > { %v7269_v48 = vmul.f32 %v6872_v27, %v13284_v61  ;;  %v13435_v58 = vadd.f32 %v13090_v15, %v6587_v14  ;;  %v6296_v61 = vmul.f32 %v13401_v23, %v6295_v35  ;;  %v6886_v50 = vor.u32 1.1754944e-38, %v6885_v49 }
0x107c   : > { %v6877_v17 = vmul.f32 %v8646_v26, %v6876_v22  ;;  %6610 = vmatmul.f32.gmra.mxu2 %v6508_v59  ;;  %vm6884_vm1 = vcmp.eq.f32.partialorder %v6883_v34, 8.507059e+37  ;;  %vm6297_vm3 = vweird.f32 %v13356_v28  ;;  %v6474_v13 = vmul.f32 %v13259_v63, %v6439_v21 }
0x107d   : > { %v7825_v6 = vmul.f32 -1.442695, %v13435_v58  ;;  %7343 = vmatmul.f32.gmra.mxu0 %v7269_v48  ;;  %v8648_v3 = vpop.eup %8647  ;;  %vm13449_vm4 = vmor %vm6297_vm3, %vm6298_vm15  ;;  %v6900_v28 = vand.u32 2147483648, %v13415_v12  ;;  %vm6894_vm5 = vweird.f32 %v13415_v12 }
0x107e   : > { %v6878_v30 = vadd.f32 %v8646_v26, %v6877_v17  ;;  %v8650_v57 = vpop.eup %8649  ;;  %v13445_v5 = vadd.f32 1.0, %v8648_v3  ;;  %v6509_v62 = vadd.f32 %v13277_v51, %v6474_v13 }
0x107f   : > { %8651 = vpow2.f32 %v7825_v6  ;;  %v6890_v43 = vmul.f32 %v8650_v57, %v13415_v12  ;;  %vm6895_vm2 = vweird.f32 %v8650_v57  ;;  %v6901_v21 = vor.u32 1.1754944e-38, %v6900_v28 }
0x1080   : > { %v6882_v40 = vsel %vm6881_vm0, %v8646_v26, %v6878_v30  ;;  %8653 = vrcp.f32 %v13445_v5  ;;  %v6300_v26 = vsel %vm13449_vm4, %v13401_v23, %v6296_v61  ;;  %vm6896_vm6 = vmor %vm6894_vm5, %vm6895_vm2  ;;  %v6913_v13 = vand.u32 2147483647, %v13445_v5 }
0x1081   : > { %v6887_v33 = vsel %vm6884_vm1, %v6886_v50, %v6882_v40  ;;  %v6891_v27 = vsub.f32 1.0, %v6890_v43  ;;  %v6915_v43 = vand.u32 2147483648, %v13445_v5  ;;  %vm6909_vm9 = vweird.f32 %v13445_v5 }
0x1082   : > { %v7270_v25 = vmul.f32 %v6887_v33, %v13318_v19  ;;  %v6590_v22 = vpop.f32.mrf.mxu2  ;;  %v6898_v19 = vand.u32 2147483647, %v13415_v12  ;;  %vm6914_vm11 = vcmp.eq.f32.partialorder %v6913_v13, 8.507059e+37 }
0x1083   : > { %v13461_v49 = vadd.f32 %v13090_v15, %v6590_v22  ;;  %v6892_v14 = vmul.f32 %v8650_v57, %v6891_v27  ;;  %v6440_v15 = vmul.f32 %v6300_v26, %v13134_v44 }
0x1084   : > { %6613 = vmatmul.f32.gmra.mxu2 %v6509_v62  ;;  %vm6899_vm7 = vcmp.eq.f32.partialorder %v6898_v19, 8.507059e+37 }
0x1085   : > { %v7329_v48 = vpop.f32.mrf.mxu0  ;;  %v8652_v35 = vpop.eup %8651  ;;  %v7826_v23 = vmul.f32 -1.442695, %v13461_v49  ;;  %7346 = vmatmul.f32.gmra.mxu0 %v7270_v25  ;;  %v6893_v34 = vadd.f32 %v8650_v57, %v6892_v14  ;;  %v6475_v44 = vmul.f32 %v13259_v63, %v6440_v15 }
0x1086   : > { %v7425_v17 = vadd.f32 %v7329_v48, %v12638_v9  ;;  %v13474_v6 = vadd.f32 1.0, %v8652_v35  ;;  %v8654_v59 = vpop.eup %8653  ;;  %v6916_v48 = vor.u32 1.1754944e-38, %v6915_v43 }
0x1087   : > { %8655 = vpow2.f32 %v7826_v23  ;;  %v6897_v30 = vsel %vm6896_vm6, %v8650_v57, %v6893_v34  ;;  %v6905_v61 = vmul.f32 %v8654_v59, %v13445_v5  ;;  %v13490_v57 = vld [vmem:[%s13896_s9] ss:$0 sm:$0xff]  ;;  %vm6910_vm8 = vweird.f32 %v8654_v59 }
0x1088   : > { %v7461_v3 = vadd.f32 %v13466_v36, %v7425_v17  ;;  %8657 = vrcp.f32 %v13474_v6  ;;  %v6902_v9 = vsel %vm6899_vm7, %v6901_v21, %v6897_v30  ;;  %v6510_v27 = vadd.f32 %v13277_v51, %v6475_v44  ;;  %vm6911_vm10 = vmor %vm6909_vm9, %vm6910_vm8 }
0x1089   : > { %v7271_v12 = vmul.f32 %v6902_v9, %v13359_v39  ;;  %v6906_v50 = vsub.f32 1.0, %v6905_v61  ;;  %v6930_v34 = vand.u32 2147483648, %v13474_v6  ;;  %v6928_v21 = vand.u32 2147483647, %v13474_v6 }
0x108a   : > { %7493 = vst [vmem:[%s13481_s19] sm:$0xff] %v7461_v3  ;;  %v6593_v40 = vpop.f32.mrf.mxu2  ;;  %vm6924_vm13 = vweird.f32 %v13474_v6 }
0x108b   : > { %v13493_v33 = vadd.f32 %v13490_v57, %v6593_v40  ;;  %v6907_v11 = vmul.f32 %v8654_v59, %v6906_v50  ;;  %v6931_v44 = vor.u32 1.1754944e-38, %v6930_v34  ;;  %vm6929_vm15 = vcmp.eq.f32.partialorder %v6928_v21, 8.507059e+37 }
0x108c   : > { %6616 = vmatmul.f32.gmra.mxu2 %v6510_v27 }
0x108d   : > { %v7332_v25 = vpop.f32.mrf.mxu0  ;;  %v8656_v26 = vpop.eup %8655  ;;  %v7827_v39 = vmul.f32 -1.442695, %v13493_v33  ;;  %7349 = vmatmul.f32.gmra.mxu0 %v7271_v12  ;;  %v6908_v14 = vadd.f32 %v8654_v59, %v6907_v11 }
0x108e   : > { %v7426_v22 = vadd.f32 %v7332_v25, %v12654_v47  ;;  %v8658_v28 = vpop.eup %8657  ;;  %v6762_v19 = vadd.f32 1.0, %v8656_v26 }
0x108f   : > { %v6920_v35 = vmul.f32 %v8658_v28, %v13474_v6  ;;  %8659 = vpow2.f32 %v7827_v39  ;;  %v6912_v62 = vsel %vm6911_vm10, %v8654_v59, %v6908_v14  ;;  %vm6925_vm12 = vweird.f32 %v8658_v28 }
0x1090   : > { %v7462_v23 = vadd.f32 %v13466_v36, %v7426_v22  ;;  %8661 = vrcp.f32 %v6762_v19  ;;  %v6917_v17 = vsel %vm6914_vm11, %v6916_v48, %v6912_v62  ;;  %vm6926_vm14 = vmor %vm6924_vm13, %vm6925_vm12  ;;  %v6945_v25 = vand.u32 2147483648, %v6762_v19 }
0x1091   : > { %v6921_v15 = vsub.f32 1.0, %v6920_v35  ;;  %v7272_v47 = vmul.f32 %v6917_v17, %v13399_v54  ;;  %v6943_v26 = vand.u32 2147483647, %v6762_v19  ;;  %vm6939_vm1 = vweird.f32 %v6762_v19 }
0x1092   : > { %7494 = vst [vmem:[%s13481_s19 + $0x8] sm:$0xff] %v7462_v23 }
0x1093   : > { %v6922_v5 = vmul.f32 %v8658_v28, %v6921_v15  ;;  %vm6944_vm4 = vcmp.eq.f32.partialorder %v6943_v26, 8.507059e+37 }
0x1095   : > { %v7335_v3 = vpop.f32.mrf.mxu0  ;;  %v8660_v30 = vpop.eup %8659  ;;  %v6923_v61 = vadd.f32 %v8658_v28, %v6922_v5  ;;  %7352 = vmatmul.f32.gmra.mxu0 %v7272_v47 }
0x1096   : > { %v7427_v59 = vadd.f32 %v7335_v3, %v12668_v31  ;;  %v8662_v9 = vpop.eup %8661  ;;  %v6763_v12 = vadd.f32 1.0, %v8660_v30 }
0x1097   : > { %v6927_v54 = vsel %vm6926_vm14, %v8658_v28, %v6923_v61  ;;  %v6935_v50 = vmul.f32 %v8662_v9, %v6762_v19  ;;  %vm6940_vm0 = vweird.f32 %v8662_v9  ;;  %v6946_v28 = vor.u32 1.1754944e-38, %v6945_v25 }
0x1098   : > { %v7463_v40 = vadd.f32 %v13466_v36, %v7427_v59  ;;  %v6932_v43 = vsel %vm6929_vm15, %v6931_v44, %v6927_v54  ;;  %8663 = vrcp.f32 %v6763_v12  ;;  %vm6941_vm3 = vmor %vm6939_vm1, %vm6940_vm0  ;;  %v6960_v17 = vand.u32 2147483648, %v6763_v12 }
0x1099   : > { %v7273_v11 = vmul.f32 %v6932_v43, %v13435_v58  ;;  %v6936_v13 = vsub.f32 1.0, %v6935_v50  ;;  %v6958_v19 = vand.u32 2147483647, %v6763_v12  ;;  %vm6954_vm5 = vweird.f32 %v6763_v12 }
0x109a   : > { %7495 = vst [vmem:[%s13481_s19 + $0x10] sm:$0xff] %v7463_v40 }
0x109b   : > { %v6937_v6 = vmul.f32 %v8662_v9, %v6936_v13  ;;  %vm6959_vm7 = vcmp.eq.f32.partialorder %v6958_v19, 8.507059e+37 }
0x109d   : > { %v7338_v31 = vpop.f32.mrf.mxu0  ;;  %v6938_v39 = vadd.f32 %v8662_v9, %v6937_v6  ;;  %7355 = vmatmul.f32.gmra.mxu0 %v7273_v11 }
0x109e   : > { %v7428_v27 = vadd.f32 %v7338_v31, %v12676_v10  ;;  %v8664_v22 = vpop.eup %8663  ;;  %v6961_v10 = vor.u32 1.1754944e-38, %v6960_v17 }
0x109f   : > { %v6942_v14 = vsel %vm6941_vm3, %v8662_v9, %v6938_v39  ;;  %v6950_v48 = vmul.f32 %v8664_v22, %v6763_v12  ;;  %vm6955_vm2 = vweird.f32 %v8664_v22 }
0x10a0   : > { %v7464_v58 = vadd.f32 %v13466_v36, %v7428_v27  ;;  %v6947_v35 = vsel %vm6944_vm4, %v6946_v28, %v6942_v14  ;;  %vm6956_vm6 = vmor %vm6954_vm5, %vm6955_vm2 }
0x10a1   : > { %v7274_v23 = vmul.f32 %v6947_v35, %v13461_v49  ;;  %v6951_v62 = vsub.f32 1.0, %v6950_v48 }
0x10a2   : > { %7496 = vst [vmem:[%s13481_s19 + $0x18] sm:$0xff] %v7464_v58 }
0x10a3   : > { %v6952_v15 = vmul.f32 %v8664_v22, %v6951_v62 }
0x10a5   : > { %v6953_v47 = vadd.f32 %v8664_v22, %v6952_v15  ;;  %7358 = vmatmul.f32.gmra.mxu0 %v7274_v23 }
0x10a7   : > { %v6957_v34 = vsel %vm6956_vm6, %v8664_v22, %v6953_v47 }
0x10a8   : > { %v6962_v5 = vsel %vm6959_vm7, %v6961_v10, %v6957_v34 }
0x10a9   : > { %v7275_v21 = vmul.f32 %v6962_v5, %v13493_v33 }
0x10ad   : > { %7361 = vmatmul.f32.gmra.mxu0 %v7275_v21 }
0x10ba   : > { %v6014_v3 = vpop.xlane.xlu1 %6013 }
0x10bb   : > { %v6057_v30 = vmul.f32 0.015625, %v6014_v3 }
0x10bd   : > { %v6089_v49 = vadd.f32 1e-05, %v6057_v30  ;;  %v6016_v61 = vpop.xlane.xlu0 %6015 }
0x10be   : > { %v6058_v59 = vmul.f32 0.015625, %v6016_v61 }
0x10bf   : > { %8665 = vrsqrt.f32 %v6089_v49  ;;  %vm6307_vm9 = vweird.f32 %v6089_v49 }
0x10c0   : > { %v6090_v9 = vadd.f32 1e-05, %v6058_v59 }
0x10c2   : > { %v5838_v44 = vpop.xlane.xlu1 %5837  ;;  %8667 = vrsqrt.f32 %v6090_v9  ;;  %vm6317_vm12 = vweird.f32 %v6090_v9 }
0x10c3   : > { %v5873_v54 = vmul.f32 0.015625, %v5838_v44 }
0x10c5   : > { %v8666_v12 = vpop.eup %8665  ;;  %v13517_v50 = vsub.f32 %v13216_v20, %v5873_v54  ;;  %v5840_v11 = vpop.xlane.xlu0 %5839 }
0x10c6   : > { %v6302_v40 = vmul.f32 %v8666_v12, %v6089_v49  ;;  %v6018_v43 = vpop.xlane.xlu2 %6017  ;;  %v5874_v6 = vmul.f32 0.015625, %v5840_v11  ;;  %vm6308_vm8 = vweird.f32 %v8666_v12 }
0x10c7   : > { %v5937_v33 = vmul.f32 %v13517_v50, %v13517_v50  ;;  %v6059_v13 = vmul.f32 0.015625, %v6018_v43  ;;  %vm6309_vm10 = vmor %vm6307_vm9, %vm6308_vm8 }
0x10c8   : > { %v6303_v25 = vmul.f32 %v8666_v12, %v6302_v40  ;;  %v8668_v26 = vpop.eup %8667  ;;  %v13523_v28 = vsub.f32 %v13236_v32, %v5874_v6 }
0x10c9   : > { %v6091_v31 = vadd.f32 1e-05, %v6059_v13  ;;  %v5969_v39 = vmul.f32 %v14535_v8, %v5937_v33  ;;  %v6312_v22 = vmul.f32 %v8668_v26, %v6090_v9  ;;  %vm6318_vm11 = vweird.f32 %v8668_v26 }
0x10ca   : > { %v6304_v27 = vmul.f32 0.5, %v6303_v25  ;;  %v5938_v58 = vmul.f32 %v13523_v28, %v13523_v28  ;;  %vm6319_vm13 = vmor %vm6317_vm12, %vm6318_vm11 }
0x10cb   : > { %8669 = vrsqrt.f32 %v6091_v31  ;;  %6029 = vadd.xlane.f32.xlu2 %v5969_v39  ;;  %v6313_v48 = vmul.f32 %v8668_v26, %v6312_v22  ;;  %vm6327_vm15 = vweird.f32 %v6091_v31 }
0x10cc   : > { %v6305_v14 = vsub.f32 1.5, %v6304_v27  ;;  %v5970_v15 = vmul.f32 %v14535_v8, %v5938_v58 }
0x10cd   : > { %v6314_v23 = vmul.f32 0.5, %v6313_v48  ;;  %v6020_v62 = vpop.xlane.xlu1 %6019 }
0x10ce   : > { %v6306_v35 = vmul.f32 %v8666_v12, %v6305_v14  ;;  %v5842_v17 = vpop.xlane.xlu2 %5841  ;;  %v6060_v19 = vmul.f32 0.015625, %v6020_v62  ;;  %6031 = vadd.xlane.f32.xlu0 %v5970_v15 }
0x10cf   : > { %v5875_v47 = vmul.f32 0.015625, %v5842_v17  ;;  %v6315_v34 = vsub.f32 1.5, %v6314_v23 }
0x10d0   : > { %v6310_v10 = vsel %vm6309_vm10, %v8666_v12, %v6306_v35  ;;  %v6092_v21 = vadd.f32 1e-05, %v6060_v19 }
0x10d1   : > { %v8670_v5 = vpop.eup %8669  ;;  %v13529_v3 = vsub.f32 %v13270_v53, %v5875_v47  ;;  %v6441_v30 = vmul.f32 %v6310_v10, %v13194_v4  ;;  %v6316_v49 = vmul.f32 %v8668_v26, %v6315_v34 }
0x10d2   : > { %v6322_v61 = vmul.f32 %v8670_v5, %v6091_v31  ;;  %8671 = vrsqrt.f32 %v6092_v21  ;;  %vm6328_vm14 = vweird.f32 %v8670_v5  ;;  %vm6337_vm3 = vweird.f32 %v6092_v21 }
0x10d3   : > { %v5939_v59 = vmul.f32 %v13529_v3, %v13529_v3  ;;  %v6476_v44 = vmul.f32 %v13259_v63, %v6441_v30  ;;  %v6320_v54 = vsel %vm6319_vm13, %v8668_v26, %v6316_v49  ;;  %vm6329_vm0 = vmor %vm6327_vm15, %vm6328_vm14 }
0x10d4   : > { %v6323_v12 = vmul.f32 %v8670_v5, %v6322_v61  ;;  %v6442_v33 = vmul.f32 %v6320_v54, %v13203_v1 }
0x10d5   : > { %v6511_v40 = vadd.f32 %v13277_v51, %v6476_v44  ;;  %v5971_v43 = vmul.f32 %v14535_v8, %v5939_v59  ;;  %v5844_v4 = vpop.xlane.xlu1 %5843  ;;  %v6022_v6 = vpop.xlane.xlu0 %6021 }
0x10d6   : > { %v6324_v11 = vmul.f32 0.5, %v6323_v12  ;;  %v6596_v13 = vpop.f32.mrf.mxu2  ;;  %v5876_v9 = vmul.f32 0.015625, %v5844_v4  ;;  %v6061_v26 = vmul.f32 0.015625, %v6022_v6  ;;  %v6477_v1 = vmul.f32 %v13259_v63, %v6442_v33 }
0x10d7   : > { %v13539_v25 = vadd.f32 %v13490_v57, %v6596_v13  ;;  %6619 = vmatmul.f32.gmra.mxu2 %v6511_v40  ;;  %6033 = vadd.xlane.f32.xlu1 %v5971_v43 }
0x10d8   : > { %v6325_v39 = vsub.f32 1.5, %v6324_v11  ;;  %v8672_v27 = vpop.eup %8671  ;;  %v13542_v22 = vsub.f32 %v13310_v45, %v5876_v9  ;;  %v6093_v35 = vadd.f32 1e-05, %v6061_v26  ;;  %v6512_v19 = vadd.f32 %v13277_v51, %v6477_v1 }
0x10d9   : > { %v7828_v14 = vmul.f32 -1.442695, %v13539_v25  ;;  %v6332_v58 = vmul.f32 %v8672_v27, %v6092_v21  ;;  %vm6338_vm1 = vweird.f32 %v8672_v27 }
0x10da   : > { %v6326_v48 = vmul.f32 %v8670_v5, %v6325_v39  ;;  %v5940_v23 = vmul.f32 %v13542_v22, %v13542_v22  ;;  %vm6339_vm4 = vmor %vm6337_vm3, %vm6338_vm1  ;;  %vm6347_vm5 = vweird.f32 %v6093_v35 }
0x10db   : > { %8673 = vpow2.f32 %v7828_v14  ;;  %v6333_v17 = vmul.f32 %v8672_v27, %v6332_v58 }
0x10dc   : > { %v6330_v62 = vsel %vm6329_vm0, %v8670_v5, %v6326_v48  ;;  %8675 = vrsqrt.f32 %v6093_v35  ;;  %v5972_v15 = vmul.f32 %v14535_v8, %v5940_v23 }
0x10dd   : > { %v6443_v47 = vmul.f32 %v6330_v62, %v13219_v55  ;;  %v6334_v10 = vmul.f32 0.5, %v6333_v17  ;;  %v6024_v30 = vpop.xlane.xlu2 %6023 }
0x10de   : > { %v6599_v34 = vpop.f32.mrf.mxu2  ;;  %6035 = vadd.xlane.f32.xlu2 %v5972_v15  ;;  %v6062_v61 = vmul.f32 0.015625, %v6024_v30 }
0x10df   : > { %6622 = vmatmul.f32.gmra.mxu2 %v6512_v19  ;;  %v6335_v31 = vsub.f32 1.5, %v6334_v10  ;;  %v13552_v49 = vadd.f32 %v13490_v57, %v6599_v34  ;;  %v6478_v59 = vmul.f32 %v13259_v63, %v6443_v47 }
0x10e0   : > { %v13556_v12 = vadd.f32 1e-05, %v6062_v61 }
0x10e1   : > { %v8674_v5 = vpop.eup %8673  ;;  %v6336_v44 = vmul.f32 %v8672_v27, %v6335_v31  ;;  %v7829_v55 = vmul.f32 -1.442695, %v13552_v49  ;;  %v6513_v11 = vadd.f32 %v13277_v51, %v6478_v59 }
0x10e2   : > { %v8676_v8 = vpop.eup %8675  ;;  %v6764_v54 = vadd.f32 1.0, %v8674_v5  ;;  %vm6357_vm12 = vweird.f32 %v13556_v12 }
0x10e3   : > { %v6342_v40 = vmul.f32 %v8676_v8, %v6093_v35  ;;  %v6340_v43 = vsel %vm6339_vm4, %v8672_v27, %v6336_v44  ;;  %vm6348_vm2 = vweird.f32 %v8676_v8 }
0x10e4   : > { %8677 = vrcp.f32 %v6764_v54  ;;  %v6444_v21 = vmul.f32 %v6340_v43, %v13249_v37  ;;  %v6973_v23 = vand.u32 2147483647, %v6764_v54  ;;  %vm13566_vm6 = vmor %vm6347_vm5, %vm6348_vm2  ;;  %v6975_v35 = vand.u32 2147483648, %v6764_v54 }
0x10e5   : > { %v6343_v33 = vmul.f32 %v8676_v8, %v6342_v40  ;;  %8679 = vpow2.f32 %v7829_v55  ;;  %vm6969_vm8 = vweird.f32 %v6764_v54 }
0x10e6   : > { %8681 = vrsqrt.f32 %v13556_v12  ;;  %v6602_v13 = vpop.f32.mrf.mxu2  ;;  %v6479_v39 = vmul.f32 %v13259_v63, %v6444_v21  ;;  %vm13577_vm9 = vcmp.eq.f32.partialorder %v6973_v23, 8.507059e+37 }
0x10e7   : > { %v6344_v4 = vmul.f32 0.5, %v6343_v33  ;;  %6625 = vmatmul.f32.gmra.mxu2 %v6513_v11  ;;  %v13562_v9 = vadd.f32 %v13490_v57, %v6602_v13 }
0x10e8   : > { %v6026_v17 = vpop.xlane.xlu0 %6025  ;;  %v6514_v34 = vadd.f32 %v13277_v51, %v6479_v39 }
0x10e9   : > { %v6345_v6 = vsub.f32 1.5, %v6344_v4  ;;  %v7830_v27 = vmul.f32 -1.442695, %v13562_v9  ;;  %v6063_v61 = vmul.f32 0.015625, %v6026_v17 }
0x10ea   : > { %v8678_v26 = vpop.eup %8677 }
0x10eb   : > { %v8680_v14 = vpop.eup %8679  ;;  %v6965_v1 = vmul.f32 %v8678_v26, %v6764_v54  ;;  %v6346_v48 = vmul.f32 %v8676_v8, %v6345_v6  ;;  %8683 = vpow2.f32 %v7830_v27  ;;  %v6028_v10 = vpop.xlane.xlu1 %6027  ;;  %vm6970_vm7 = vweird.f32 %v8678_v26 }
0x10ec   : > { %v8682_v58 = vpop.eup %8681  ;;  %v13570_v62 = vadd.f32 1.0, %v8680_v14  ;;  %v6064_v5 = vmul.f32 0.015625, %v6028_v10  ;;  %v13585_v33 = vadd.f32 1e-05, %v6063_v61  ;;  %vm6971_vm10 = vmor %vm6969_vm8, %vm6970_vm7  ;;  %v6976_v54 = vor.u32 1.1754944e-38, %v6975_v35 }
0x10ed   : > { %v6966_v15 = vsub.f32 1.0, %v6965_v1  ;;  %v6350_v19 = vsel %vm13566_vm6, %v8676_v8, %v6346_v48  ;;  %v6352_v47 = vmul.f32 %v8682_v58, %v13556_v12  ;;  %vm6358_vm11 = vweird.f32 %v8682_v58 }
0x10ee   : > { %8685 = vrcp.f32 %v13570_v62  ;;  %v6605_v59 = vpop.f32.mrf.mxu2  ;;  %v6445_v55 = vmul.f32 %v6350_v19, %v13290_v18  ;;  %v13587_v11 = vadd.f32 1e-05, %v6064_v5  ;;  %vm6359_vm13 = vmor %vm6357_vm12, %vm6358_vm11  ;;  %vm6984_vm15 = vweird.f32 %v13570_v62 }
0x10ef   : > { %v6967_v30 = vmul.f32 %v8678_v26, %v6966_v15  ;;  %v6353_v31 = vmul.f32 %v8682_v58, %v6352_v47  ;;  %6628 = vmatmul.f32.gmra.mxu2 %v6514_v34  ;;  %v13582_v8 = vadd.f32 %v13490_v57, %v6605_v59  ;;  %8687 = vrsqrt.f32 %v13585_v33 }
0x10f0   : > { %v7341_v21 = vpop.f32.mrf.mxu0  ;;  %8689 = vrsqrt.f32 %v13587_v11  ;;  %v6480_v48 = vmul.f32 %v13259_v63, %v6445_v55  ;;  %v14597_v55 = vld [vmem:[#allocation30_spill] sm:$0xff]  ;;  %vm6367_vm2 = vweird.f32 %v13585_v33  ;;  %vm6377_vm8 = vweird.f32 %v13587_v11 }
0x10f1   : > { %v6968_v40 = vadd.f32 %v8678_v26, %v6967_v30  ;;  %v6354_v43 = vmul.f32 0.5, %v6353_v31  ;;  %v8684_v4 = vpop.eup %8683  ;;  %v7831_v13 = vmul.f32 -1.442695, %v13582_v8  ;;  %v7429_v6 = vadd.f32 %v7341_v21, %v12711_v38 }
0x10f2   : > { %v13592_v14 = vadd.f32 1.0, %v8684_v4  ;;  %v6988_v38 = vand.u32 2147483647, %v13570_v62 }
0x10f3   : > { %v6972_v39 = vsel %vm6971_vm10, %v8678_v26, %v6968_v40  ;;  %v6355_v27 = vsub.f32 1.5, %v6354_v43  ;;  %v6990_v26 = vand.u32 2147483648, %v13570_v62  ;;  %v7465_v63 = vadd.f32 %v13466_v36, %v7429_v6  ;;  %v13632_v43 = vld [vmem:[%s13893_s6] ss:$0 sm:$0xff] }
0x10f4   : > { %v8686_v18 = vpop.eup %8685  ;;  %v6977_v1 = vsel %vm13577_vm9, %v6976_v54, %v6972_v39  ;;  %8691 = vrcp.f32 %v13592_v14  ;;  %vm13615_vm0 = vcmp.eq.f32.partialorder %v6988_v38, 8.507059e+37  ;;  %v7005_v6 = vand.u32 2147483648, %v13592_v14 }
0x10f5   : > { %v7276_v23 = vmul.f32 %v6977_v1, %v13539_v25  ;;  %v6980_v37 = vmul.f32 %v8686_v18, %v13570_v62  ;;  %v6356_v17 = vmul.f32 %v8682_v58, %v6355_v27  ;;  %8693 = vpow2.f32 %v7831_v13  ;;  %v13609_v10 = vpop.eup %8687  ;;  %7497 = vst [vmem:[%s13481_s19 + $0x20] sm:$0xff] %v7465_v63 }
0x10f6   : > { %v6515_v25 = vadd.f32 %v13277_v51, %v6480_v48  ;;  %vm6985_vm14 = vweird.f32 %v8686_v18  ;;  %v13612_v34 = vpop.eup %8689  ;;  %v7003_v62 = vand.u32 2147483647, %v13592_v14  ;;  %vm6368_vm3 = vweird.f32 %v13609_v10 }
0x10f7   : > { %v6981_v15 = vsub.f32 1.0, %v6980_v37  ;;  %v6360_v19 = vsel %vm6359_vm13, %v8682_v58, %v6356_v17  ;;  %7364 = vmatmul.f32.gmra.mxu0 %v7276_v23  ;;  %v6362_v58 = vmul.f32 %v13609_v10, %v13585_v33  ;;  %v6608_v30 = vpop.f32.mrf.mxu2  ;;  %v6372_v31 = vmul.f32 %v13612_v34, %v13587_v11  ;;  %vm6986_vm1 = vmor %vm6984_vm15, %vm6985_vm14 }
0x10f8   : > { %v6446_v47 = vmul.f32 %v6360_v19, %v13327_v29  ;;  %6631 = vmatmul.f32.gmra.mxu2 %v6515_v25  ;;  %v6991_v29 = vor.u32 1.1754944e-38, %v6990_v26  ;;  %v13624_v61 = vadd.f32 %v13490_v57, %v6608_v30  ;;  %vm6378_vm5 = vweird.f32 %v13612_v34  ;;  %vm6369_vm7 = vmor %vm6367_vm2, %vm6368_vm3 }
0x10f9   : > { %v6982_v12 = vmul.f32 %v8686_v18, %v6981_v15  ;;  %v6363_v44 = vmul.f32 %v13609_v10, %v6362_v58  ;;  %v6373_v39 = vmul.f32 %v13612_v34, %v6372_v31  ;;  %v13650_v15 = vld [vmem:[%s13894_s7] ss:$0 sm:$0xff]  ;;  %vm6999_vm6 = vweird.f32 %v13592_v14  ;;  %vm13670_vm11 = vmor %vm6377_vm8, %vm6378_vm5 }
0x10fa   : > { %v7344_v5 = vpop.f32.mrf.mxu0  ;;  %v8692_v59 = vpop.eup %8691  ;;  %v6481_v21 = vmul.f32 %v13632_v43, %v6446_v47  ;;  %v7832_v23 = vmul.f32 -1.442695, %v13624_v61  ;;  %v7006_v30 = vor.u32 1.1754944e-38, %v7005_v6  ;;  %vm7004_vm10 = vcmp.eq.f32.partialorder %v7003_v62, 8.507059e+37 }
0x10fb   : > { %v6983_v51 = vadd.f32 %v8686_v18, %v6982_v12  ;;  %v7430_v40 = vadd.f32 %v7344_v5, %v14597_v55  ;;  %v8694_v4 = vpop.eup %8693  ;;  %v6995_v13 = vmul.f32 %v8692_v59, %v13592_v14  ;;  %v6364_v1 = vmul.f32 0.5, %v6363_v44 }
0x10fc   : > { %v13640_v48 = vadd.f32 1.0, %v8694_v4  ;;  %v6374_v38 = vmul.f32 0.5, %v6373_v39  ;;  %v6516_v19 = vadd.f32 %v13650_v15, %v6481_v21  ;;  %vm7000_vm4 = vweird.f32 %v8692_v59 }
0x10fd   : > { %v6987_v54 = vsel %vm6986_vm1, %v8686_v18, %v6983_v51  ;;  %v6996_v17 = vsub.f32 1.0, %v6995_v13  ;;  %v7466_v18 = vadd.f32 %v13466_v36, %v7430_v40  ;;  %v6365_v26 = vsub.f32 1.5, %v6364_v1  ;;  %vm7001_vm9 = vmor %vm6999_vm6, %vm7000_vm4 }
0x10fe   : > { %v6992_v27 = vsel %vm13615_vm0, %v6991_v29, %v6987_v54  ;;  %8695 = vrcp.f32 %v13640_v48  ;;  %v6375_v25 = vsub.f32 1.5, %v6374_v38  ;;  %v7020_v13 = vand.u32 2147483648, %v13640_v48 }
0x10ff   : > { %v7277_v37 = vmul.f32 %v6992_v27, %v13552_v49  ;;  %v6997_v63 = vmul.f32 %v8692_v59, %v6996_v17  ;;  %8697 = vpow2.f32 %v7832_v23  ;;  %7498 = vst [vmem:[%s13481_s19 + $0x28] sm:$0xff] %v7466_v18  ;;  %v6366_v49 = vmul.f32 %v13609_v10, %v6365_v26  ;;  %v6611_v35 = vpop.f32.mrf.mxu2 }
0x1100   : > { %6634 = vmatmul.f32.gmra.mxu2 %v6516_v19  ;;  %v6376_v12 = vmul.f32 %v13612_v34, %v6375_v25  ;;  %v13665_v51 = vadd.f32 %v13490_v57, %v6611_v35  ;;  %vm7014_vm13 = vweird.f32 %v13640_v48  ;;  %v7021_v38 = vor.u32 1.1754944e-38, %v7020_v13 }
0x1101   : > { %7367 = vmatmul.f32.gmra.mxu0 %v7277_v37  ;;  %v6998_v47 = vadd.f32 %v8692_v59, %v6997_v63  ;;  %v6370_v33 = vsel %vm6369_vm7, %v13609_v10, %v6366_v49 }
0x1102   : > { %v7347_v58 = vpop.f32.mrf.mxu0  ;;  %v6447_v11 = vmul.f32 %v6370_v33, %v13376_v52  ;;  %v6380_v10 = vsel %vm13670_vm11, %v13612_v34, %v6376_v12  ;;  %v7833_v55 = vmul.f32 -1.442695, %v13665_v51 }
0x1103   : > { %v7431_v29 = vadd.f32 %v7347_v58, %v12736_v60  ;;  %v7002_v14 = vsel %vm7001_vm9, %v8692_v59, %v6998_v47  ;;  %v6448_v34 = vmul.f32 %v6380_v10, %v13396_v41 }
0x1104   : > { %v8696_v5 = vpop.eup %8695  ;;  %v7007_v44 = vsel %vm7004_vm10, %v7006_v30, %v7002_v14  ;;  %v6482_v21 = vmul.f32 %v13632_v43, %v6447_v11  ;;  %8699 = vpow2.f32 %v7833_v55 }
0x1105   : > { %v7467_v60 = vadd.f32 %v13466_v36, %v7431_v29  ;;  %v8698_v59 = vpop.eup %8697  ;;  %v7278_v62 = vmul.f32 %v7007_v44, %v13562_v9  ;;  %v7010_v40 = vmul.f32 %v8696_v5, %v13640_v48  ;;  %vm7015_vm12 = vweird.f32 %v8696_v5 }
0x1106   : > { %v6768_v4 = vadd.f32 1.0, %v8698_v59  ;;  %v6517_v54 = vadd.f32 %v13650_v15, %v6482_v21  ;;  %v7018_v9 = vand.u32 2147483647, %v13640_v48  ;;  %v6483_v41 = vmul.f32 %v13632_v43, %v6448_v34  ;;  %vm7016_vm14 = vmor %vm7014_vm13, %vm7015_vm12 }
0x1107   : > { %7499 = vst [vmem:[%s13481_s19 + $0x30] sm:$0xff] %v7467_v60  ;;  %v7011_v52 = vsub.f32 1.0, %v7010_v40  ;;  %v6614_v39 = vpop.f32.mrf.mxu2 }
0x1108   : > { %8701 = vrcp.f32 %v6768_v4  ;;  %6637 = vmatmul.f32.gmra.mxu2 %v6517_v54  ;;  %v13689_v1 = vadd.f32 %v13490_v57, %v6614_v39  ;;  %vm7019_vm15 = vcmp.eq.f32.partialorder %v7018_v9, 8.507059e+37  ;;  %v6518_v48 = vadd.f32 %v13650_v15, %v6483_v41 }
0x1109   : > { %7370 = vmatmul.f32.gmra.mxu0 %v7278_v62  ;;  %v7012_v6 = vmul.f32 %v8696_v5, %v7011_v52  ;;  %v7035_v30 = vand.u32 2147483648, %v6768_v4  ;;  %v7033_v31 = vand.u32 2147483647, %v6768_v4  ;;  %vm7029_vm1 = vweird.f32 %v6768_v4 }
0x110a   : > { %v7350_v27 = vpop.f32.mrf.mxu0  ;;  %v8700_v17 = vpop.eup %8699  ;;  %v7834_v18 = vmul.f32 -1.442695, %v13689_v1 }
0x110b   : > { %v7432_v23 = vadd.f32 %v7350_v27, %v12757_v7  ;;  %v7013_v37 = vadd.f32 %v8696_v5, %v7012_v6  ;;  %v6769_v63 = vadd.f32 1.0, %v8700_v17  ;;  %v7036_v60 = vor.u32 1.1754944e-38, %v7035_v30 }
0x110c   : > { %8703 = vpow2.f32 %v7834_v18  ;;  %vm7034_vm4 = vcmp.eq.f32.partialorder %v7033_v31, 8.507059e+37 }
0x110d   : > { %v7468_v26 = vadd.f32 %v13466_v36, %v7432_v23  ;;  %v7017_v19 = vsel %vm7016_vm14, %v8696_v5, %v7013_v37  ;;  %8705 = vrcp.f32 %v6769_v63  ;;  %v7050_v21 = vand.u32 2147483648, %v6769_v63 }
0x110e   : > { %v8702_v25 = vpop.eup %8701  ;;  %v7022_v49 = vsel %vm7019_vm15, %v7021_v38, %v7017_v19  ;;  %v7048_v34 = vand.u32 2147483647, %v6769_v63  ;;  %vm7044_vm5 = vweird.f32 %v6769_v63 }
0x110f   : > { %7500 = vst [vmem:[%s13481_s19 + $0x38] sm:$0xff] %v7468_v26  ;;  %v7279_v7 = vmul.f32 %v7022_v49, %v13582_v8  ;;  %v7025_v47 = vmul.f32 %v8702_v25, %v6768_v4  ;;  %v6617_v35 = vpop.f32.mrf.mxu2  ;;  %vm7030_vm0 = vweird.f32 %v8702_v25  ;;  %v14600_v4 = vld [vmem:[#allocation101_spill] sm:$0xff]  ;;  %v7051_v23 = vor.u32 1.1754944e-38, %v7050_v21 }
0x1110   : > { %6640 = vmatmul.f32.gmra.mxu2 %v6518_v48  ;;  %v13700_v33 = vadd.f32 %v13490_v57, %v6617_v35  ;;  %vm7031_vm3 = vmor %vm7029_vm1, %vm7030_vm0  ;;  %vm7049_vm7 = vcmp.eq.f32.partialorder %v7048_v34, 8.507059e+37 }
0x1111   : > { %v7026_v12 = vsub.f32 1.0, %v7025_v47  ;;  %7373 = vmatmul.f32.gmra.mxu0 %v7279_v7 }
0x1112   : > { %v7353_v58 = vpop.f32.mrf.mxu0  ;;  %v8704_v8 = vpop.eup %8703  ;;  %v7835_v11 = vmul.f32 -1.442695, %v13700_v33 }
0x1113   : > { %v7433_v29 = vadd.f32 %v7353_v58, %v12778_v2  ;;  %v7027_v14 = vmul.f32 %v8702_v25, %v7026_v12  ;;  %v8706_v44 = vpop.eup %8705  ;;  %v6770_v55 = vadd.f32 1.0, %v8704_v8 }
0x1114   : > { %v7040_v59 = vmul.f32 %v8706_v44, %v6769_v63  ;;  %8707 = vpow2.f32 %v7835_v11  ;;  %vm7045_vm2 = vweird.f32 %v8706_v44 }
0x1115   : > { %v7469_v5 = vadd.f32 %v13466_v36, %v7433_v29  ;;  %v7028_v10 = vadd.f32 %v8702_v25, %v7027_v14  ;;  %8709 = vrcp.f32 %v6770_v55  ;;  %vm7046_vm6 = vmor %vm7044_vm5, %vm7045_vm2  ;;  %v7065_v26 = vand.u32 2147483648, %v6770_v55 }
0x1116   : > { %v7041_v62 = vsub.f32 1.0, %v7040_v59  ;;  %v7063_v63 = vand.u32 2147483647, %v6770_v55  ;;  %vm7059_vm9 = vweird.f32 %v6770_v55 }
0x1117   : > { %7501 = vst [vmem:[%s13481_s19 + $0x40] sm:$0xff] %v7469_v5  ;;  %v7032_v57 = vsel %vm7031_vm3, %v8702_v25, %v7028_v10  ;;  %v7066_v12 = vor.u32 1.1754944e-38, %v7065_v26 }
0x1118   : > { %v7037_v2 = vsel %vm7034_vm4, %v7036_v60, %v7032_v57  ;;  %v7042_v54 = vmul.f32 %v8706_v44, %v7041_v62  ;;  %vm7064_vm11 = vcmp.eq.f32.partialorder %v7063_v63, 8.507059e+37 }
0x1119   : > { %v7280_v40 = vmul.f32 %v7037_v2, %v13624_v61 }
0x111a   : > { %v7356_v52 = vpop.f32.mrf.mxu0  ;;  %v8708_v6 = vpop.eup %8707  ;;  %v7043_v9 = vadd.f32 %v8706_v44, %v7042_v54 }
0x111b   : > { %v7434_v13 = vadd.f32 %v7356_v52, %v14600_v4  ;;  %7376 = vmatmul.f32.gmra.mxu0 %v7280_v40  ;;  %v8710_v27 = vpop.eup %8709  ;;  %v6771_v37 = vadd.f32 1.0, %v8708_v6 }
0x111c   : > { %v7047_v41 = vsel %vm7046_vm6, %v8706_v44, %v7043_v9  ;;  %v7055_v61 = vmul.f32 %v8710_v27, %v6770_v55  ;;  %vm7060_vm8 = vweird.f32 %v8710_v27 }
0x111d   : > { %v7470_v39 = vadd.f32 %v13466_v36, %v7434_v13  ;;  %v7052_v17 = vsel %vm7049_vm7, %v7051_v23, %v7047_v41  ;;  %8711 = vrcp.f32 %v6771_v37  ;;  %vm7061_vm10 = vmor %vm7059_vm9, %vm7060_vm8  ;;  %v7080_v14 = vand.u32 2147483648, %v6771_v37 }
0x111e   : > { %v7281_v38 = vmul.f32 %v7052_v17, %v13665_v51  ;;  %v7056_v18 = vsub.f32 1.0, %v7055_v61  ;;  %v7078_v8 = vand.u32 2147483647, %v6771_v37  ;;  %vm7074_vm13 = vweird.f32 %v6771_v37 }
0x111f   : > { %7502 = vst [vmem:[%s13481_s19 + $0x48] sm:$0xff] %v7470_v39  ;;  %v7081_v10 = vor.u32 1.1754944e-38, %v7080_v14 }
0x1120   : > { %v7057_v25 = vmul.f32 %v8710_v27, %v7056_v18  ;;  %vm7079_vm15 = vcmp.eq.f32.partialorder %v7078_v8, 8.507059e+37 }
0x1122   : > { %v7359_v19 = vpop.f32.mrf.mxu0  ;;  %v7058_v7 = vadd.f32 %v8710_v27, %v7057_v25 }
0x1123   : > { %v7435_v49 = vadd.f32 %v7359_v19, %v12815_v16  ;;  %7379 = vmatmul.f32.gmra.mxu0 %v7281_v38  ;;  %v8712_v48 = vpop.eup %8711 }
0x1124   : > { %v7062_v35 = vsel %vm7061_vm10, %v8710_v27, %v7058_v7  ;;  %v7070_v51 = vmul.f32 %v8712_v48, %v6771_v37  ;;  %vm7075_vm12 = vweird.f32 %v8712_v48 }
0x1125   : > { %v7471_v47 = vadd.f32 %v13466_v36, %v7435_v49  ;;  %v7067_v58 = vsel %vm7064_vm11, %v7066_v12, %v7062_v35  ;;  %vm7076_vm14 = vmor %vm7074_vm13, %vm7075_vm12 }
0x1126   : > { %v7282_v30 = vmul.f32 %v7067_v58, %v13689_v1  ;;  %v7071_v29 = vsub.f32 1.0, %v7070_v51  ;;  %v13726_v51 = vld [vmem:[%s13896_s9] ss:$0 sm:$0xff] }
0x1127   : > { %7503 = vst [vmem:[%s13481_s19 + $0x50] sm:$0xff] %v7471_v47 }
0x1128   : > { %v7072_v16 = vmul.f32 %v8712_v48, %v7071_v29 }
0x112a   : > { %v7362_v31 = vpop.f32.mrf.mxu0  ;;  %v7073_v5 = vadd.f32 %v8712_v48, %v7072_v16 }
0x112b   : > { %v7436_v11 = vadd.f32 %v7362_v31, %v12820_v56  ;;  %7382 = vmatmul.f32.gmra.mxu0 %v7282_v30 }
0x112c   : > { %v7077_v55 = vsel %vm7076_vm14, %v8712_v48, %v7073_v5 }
0x112d   : > { %v7472_v44 = vadd.f32 %v13466_v36, %v7436_v11  ;;  %v7082_v1 = vsel %vm7079_vm15, %v7081_v10, %v7077_v55 }
0x112e   : > { %v7283_v60 = vmul.f32 %v7082_v1, %v13700_v33 }
0x112f   : > { %7504 = vst [vmem:[%s13481_s19 + $0x58] sm:$0xff] %v7472_v44 }
0x1133   : > { %7385 = vmatmul.f32.gmra.mxu0 %v7283_v60 }
0x113e   : > { %v6030_v59 = vpop.xlane.xlu2 %6029 }
0x113f   : > { %v6065_v57 = vmul.f32 0.015625, %v6030_v59 }
0x1141   : > { %v6097_v2 = vadd.f32 1e-05, %v6065_v57  ;;  %v6032_v62 = vpop.xlane.xlu0 %6031 }
0x1142   : > { %v6066_v56 = vmul.f32 0.015625, %v6032_v62 }
0x1143   : > { %8713 = vrsqrt.f32 %v6097_v2  ;;  %vm6387_vm1 = vweird.f32 %v6097_v2 }
0x1144   : > { %v6098_v40 = vadd.f32 1e-05, %v6066_v56 }
0x1146   : > { %8715 = vrsqrt.f32 %v6098_v40  ;;  %vm6397_vm2 = vweird.f32 %v6098_v40 }
0x1149   : > { %v8714_v21 = vpop.eup %8713 }
0x114a   : > { %v6382_v52 = vmul.f32 %v8714_v21, %v6097_v2  ;;  %v6034_v36 = vpop.xlane.xlu1 %6033  ;;  %vm6388_vm0 = vweird.f32 %v8714_v21 }
0x114b   : > { %v6067_v54 = vmul.f32 0.015625, %v6034_v36  ;;  %vm6389_vm3 = vmor %vm6387_vm1, %vm6388_vm0 }
0x114c   : > { %v6383_v34 = vmul.f32 %v8714_v21, %v6382_v52  ;;  %v8716_v13 = vpop.eup %8715 }
0x114d   : > { %v6099_v4 = vadd.f32 1e-05, %v6067_v54  ;;  %v6392_v9 = vmul.f32 %v8716_v13, %v6098_v40  ;;  %vm6398_vm4 = vweird.f32 %v8716_v13 }
0x114e   : > { %v6384_v6 = vmul.f32 0.5, %v6383_v34  ;;  %vm6399_vm5 = vmor %vm6397_vm2, %vm6398_vm4 }
0x114f   : > { %8717 = vrsqrt.f32 %v6099_v4  ;;  %v6393_v39 = vmul.f32 %v8716_v13, %v6392_v9  ;;  %vm6407_vm7 = vweird.f32 %v6099_v4 }
0x1150   : > { %v6385_v33 = vsub.f32 1.5, %v6384_v6 }
0x1151   : > { %v6036_v23 = vpop.xlane.xlu2 %6035  ;;  %v6394_v37 = vmul.f32 0.5, %v6393_v39 }
0x1152   : > { %v6386_v27 = vmul.f32 %v8714_v21, %v6385_v33  ;;  %v6068_v41 = vmul.f32 0.015625, %v6036_v23 }
0x1153   : > { %v6395_v38 = vsub.f32 1.5, %v6394_v37 }
0x1154   : > { %v6390_v61 = vsel %vm6389_vm3, %v8714_v21, %v6386_v27  ;;  %v6100_v18 = vadd.f32 1e-05, %v6068_v41 }
0x1155   : > { %v8718_v17 = vpop.eup %8717  ;;  %v6449_v26 = vmul.f32 %v6390_v61, %v13517_v50  ;;  %v6396_v25 = vmul.f32 %v8716_v13, %v6395_v38  ;;  %v14601_v38 = vld [vmem:[#allocation29_spill] sm:$0xff] }
0x1156   : > { %v6402_v19 = vmul.f32 %v8718_v17, %v6099_v4  ;;  %8719 = vrsqrt.f32 %v6100_v18  ;;  %vm6408_vm6 = vweird.f32 %v8718_v17  ;;  %vm6417_vm10 = vweird.f32 %v6100_v18 }
0x1157   : > { %v6484_v63 = vmul.f32 %v13632_v43, %v6449_v26  ;;  %v6400_v7 = vsel %vm6399_vm5, %v8716_v13, %v6396_v25  ;;  %vm6409_vm8 = vmor %vm6407_vm7, %vm6408_vm6 }
0x1158   : > { %v6403_v49 = vmul.f32 %v8718_v17, %v6402_v19  ;;  %v6450_v35 = vmul.f32 %v6400_v7, %v13523_v28 }
0x1159   : > { %v6519_v47 = vadd.f32 %v13650_v15, %v6484_v63 }
0x115a   : > { %v6404_v48 = vmul.f32 0.5, %v6403_v49  ;;  %v6620_v12 = vpop.f32.mrf.mxu2  ;;  %v6485_v14 = vmul.f32 %v13632_v43, %v6450_v35 }
0x115b   : > { %v13729_v50 = vadd.f32 %v13726_v51, %v6620_v12  ;;  %6643 = vmatmul.f32.gmra.mxu2 %v6519_v47 }
0x115c   : > { %v6405_v58 = vsub.f32 1.5, %v6404_v48  ;;  %v8720_v30 = vpop.eup %8719  ;;  %v6520_v11 = vadd.f32 %v13650_v15, %v6485_v14  ;;  %v13757_v48 = vld [vmem:[%s13898_s11] ss:$0 sm:$0xff] }
0x115d   : > { %v7836_v29 = vmul.f32 -1.442695, %v13729_v50  ;;  %v6412_v16 = vmul.f32 %v8720_v30, %v6100_v18  ;;  %vm6418_vm9 = vweird.f32 %v8720_v30 }
0x115e   : > { %v6406_v31 = vmul.f32 %v8718_v17, %v6405_v58  ;;  %vm6419_vm11 = vmor %vm6417_vm10, %vm6418_vm9 }
0x115f   : > { %8721 = vpow2.f32 %v7836_v29  ;;  %v6413_v8 = vmul.f32 %v8720_v30, %v6412_v16 }
0x1160   : > { %v6410_v28 = vsel %vm6409_vm8, %v8718_v17, %v6406_v31 }
0x1161   : > { %v6451_v5 = vmul.f32 %v6410_v28, %v13529_v3  ;;  %v6414_v44 = vmul.f32 0.5, %v6413_v8 }
0x1162   : > { %v6623_v10 = vpop.f32.mrf.mxu2 }
0x1163   : > { %v13736_v55 = vadd.f32 %v13726_v51, %v6623_v10  ;;  %6646 = vmatmul.f32.gmra.mxu2 %v6520_v11  ;;  %v6415_v1 = vsub.f32 1.5, %v6414_v44  ;;  %v6486_v57 = vmul.f32 %v13632_v43, %v6451_v5  ;;  %v14602_v10 = vld [vmem:[#allocation28_spill] sm:$0xff] }
0x1165   : > { %v8722_v60 = vpop.eup %8721  ;;  %v7837_v59 = vmul.f32 -1.442695, %v13736_v55  ;;  %v6416_v2 = vmul.f32 %v8720_v30, %v6415_v1  ;;  %v6521_v3 = vadd.f32 %v13650_v15, %v6486_v57 }
0x1166   : > { %v6772_v62 = vadd.f32 1.0, %v8722_v60 }
0x1167   : > { %8723 = vpow2.f32 %v7837_v59  ;;  %v6420_v56 = vsel %vm6419_vm11, %v8720_v30, %v6416_v2 }
0x1168   : > { %8725 = vrcp.f32 %v6772_v62  ;;  %v6452_v40 = vmul.f32 %v6420_v56, %v13542_v22  ;;  %v7095_v39 = vand.u32 2147483648, %v6772_v62  ;;  %v7093_v23 = vand.u32 2147483647, %v6772_v62 }
0x1169   : > { %vm7089_vm13 = vweird.f32 %v6772_v62 }
0x116a   : > { %v6626_v21 = vpop.f32.mrf.mxu2  ;;  %v6487_v34 = vmul.f32 %v13632_v43, %v6452_v40  ;;  %vm7094_vm15 = vcmp.eq.f32.partialorder %v7093_v23, 8.507059e+37 }
0x116b   : > { %v13743_v52 = vadd.f32 %v13726_v51, %v6626_v21  ;;  %6649 = vmatmul.f32.gmra.mxu2 %v6521_v3 }
0x116c   : > { %v6522_v33 = vadd.f32 %v13650_v15, %v6487_v34  ;;  %v7096_v15 = vor.u32 1.1754944e-38, %v7095_v39 }
0x116d   : > { %v8724_v36 = vpop.eup %8723  ;;  %v7838_v54 = vmul.f32 -1.442695, %v13743_v52 }
0x116e   : > { %v8726_v4 = vpop.eup %8725  ;;  %v6773_v13 = vadd.f32 1.0, %v8724_v36 }
0x116f   : > { %v7085_v6 = vmul.f32 %v8726_v4, %v6772_v62  ;;  %8727 = vpow2.f32 %v7838_v54  ;;  %vm7090_vm12 = vweird.f32 %v8726_v4 }
0x1170   : > { %8729 = vrcp.f32 %v6773_v13  ;;  %vm7091_vm14 = vmor %vm7089_vm13, %vm7090_vm12  ;;  %v7110_v35 = vand.u32 2147483648, %v6773_v13  ;;  %v7108_v30 = vand.u32 2147483647, %v6773_v13  ;;  %vm7104_vm1 = vweird.f32 %v6773_v13 }
0x1171   : > { %v7086_v9 = vsub.f32 1.0, %v7085_v6 }
0x1172   : > { %v6629_v22 = vpop.f32.mrf.mxu2  ;;  %vm7109_vm4 = vcmp.eq.f32.partialorder %v7108_v30, 8.507059e+37 }
0x1173   : > { %v7087_v27 = vmul.f32 %v8726_v4, %v7086_v9  ;;  %v13749_v37 = vadd.f32 %v13726_v51, %v6629_v22  ;;  %6652 = vmatmul.f32.gmra.mxu2 %v6522_v33 }
0x1174   : > { %v7365_v41 = vpop.f32.mrf.mxu0 }
0x1175   : > { %v8728_v61 = vpop.eup %8727  ;;  %v7088_v43 = vadd.f32 %v8726_v4, %v7087_v27  ;;  %v7839_v17 = vmul.f32 -1.442695, %v13749_v37  ;;  %v7437_v18 = vadd.f32 %v7365_v41, %v14601_v38 }
0x1176   : > { %v8730_v26 = vpop.eup %8729  ;;  %v6774_v19 = vadd.f32 1.0, %v8728_v61 }
0x1177   : > { %v7092_v25 = vsel %vm7091_vm14, %v8726_v4, %v7088_v43  ;;  %v7100_v63 = vmul.f32 %v8730_v26, %v6773_v13  ;;  %8731 = vpow2.f32 %v7839_v17  ;;  %v7473_v12 = vadd.f32 %v13757_v48, %v7437_v18 }
0x1178   : > { %v7097_v49 = vsel %vm7094_vm15, %v7096_v15, %v7092_v25  ;;  %8733 = vrcp.f32 %v6774_v19  ;;  %vm7105_vm0 = vweird.f32 %v8730_v26  ;;  %v7125_v62 = vand.u32 2147483648, %v6774_v19 }
0x1179   : > { %v7284_v7 = vmul.f32 %v7097_v49, %v13729_v50  ;;  %v7101_v47 = vsub.f32 1.0, %v7100_v63  ;;  %7505 = vst [vmem:[%s13481_s19 + $0x60] sm:$0xff] %v7473_v12  ;;  %vm7106_vm3 = vmor %vm7104_vm1, %vm7105_vm0  ;;  %v7111_v50 = vor.u32 1.1754944e-38, %v7110_v35  ;;  %v7123_v40 = vand.u32 2147483647, %v6774_v19  ;;  %v14603_v12 = vld [vmem:[#allocation102_spill] sm:$0xff] }
0x117a   : > { %vm7119_vm5 = vweird.f32 %v6774_v19  ;;  %v7126_v34 = vor.u32 1.1754944e-38, %v7125_v62  ;;  %v14604_v62 = vld [vmem:[#allocation27_spill] sm:$0xff] }
0x117b   : > { %v7102_v58 = vmul.f32 %v8730_v26, %v7101_v47  ;;  %7388 = vmatmul.f32.gmra.mxu0 %v7284_v7  ;;  %v6632_v31 = vpop.f32.mrf.mxu2  ;;  %vm7124_vm7 = vcmp.eq.f32.partialorder %v7123_v40, 8.507059e+37 }
0x117c   : > { %v13762_v8 = vadd.f32 %v13726_v51, %v6632_v31 }
0x117d   : > { %v8732_v29 = vpop.eup %8731  ;;  %v7103_v14 = vadd.f32 %v8730_v26, %v7102_v58 }
0x117e   : > { %v8734_v16 = vpop.eup %8733  ;;  %v6775_v28 = vadd.f32 1.0, %v8732_v29  ;;  %v7368_v11 = vpop.f32.mrf.mxu0  ;;  %v7840_v2 = vmul.f32 -1.442695, %v13762_v8 }
0x117f   : > { %v7107_v5 = vsel %vm7106_vm3, %v8730_v26, %v7103_v14  ;;  %v7115_v44 = vmul.f32 %v8734_v16, %v6774_v19  ;;  %v7438_v1 = vadd.f32 %v7368_v11, %v14602_v10  ;;  %vm7120_vm2 = vweird.f32 %v8734_v16 }
0x1180   : > { %v7112_v60 = vsel %vm7109_vm4, %v7111_v50, %v7107_v5  ;;  %8735 = vrcp.f32 %v6775_v28  ;;  %vm7121_vm6 = vmor %vm7119_vm5, %vm7120_vm2  ;;  %v7140_v61 = vand.u32 2147483648, %v6775_v28  ;;  %v7138_v38 = vand.u32 2147483647, %v6775_v28 }
0x1181   : > { %v7285_v59 = vmul.f32 %v7112_v60, %v13736_v55  ;;  %v7116_v57 = vsub.f32 1.0, %v7115_v44  ;;  %v7474_v56 = vadd.f32 %v13757_v48, %v7438_v1  ;;  %8737 = vpow2.f32 %v7840_v2 }
0x1182   : > { %vm7134_vm9 = vweird.f32 %v6775_v28  ;;  %vm7139_vm11 = vcmp.eq.f32.partialorder %v7138_v38, 8.507059e+37 }
0x1183   : > { %v7117_v3 = vmul.f32 %v8734_v16, %v7116_v57  ;;  %7391 = vmatmul.f32.gmra.mxu0 %v7285_v59  ;;  %7506 = vst [vmem:[%s13481_s19 + $0x68] sm:$0xff] %v7474_v56  ;;  %v6635_v36 = vpop.f32.mrf.mxu2 }
0x1184   : > { %v13770_v55 = vadd.f32 %v13726_v51, %v6635_v36 }
0x1185   : > { %v7118_v21 = vadd.f32 %v8734_v16, %v7117_v3 }
0x1186   : > { %v8736_v54 = vpop.eup %8735  ;;  %v7371_v4 = vpop.f32.mrf.mxu0  ;;  %v7841_v39 = vmul.f32 -1.442695, %v13770_v55 }
0x1187   : > { %v7122_v13 = vsel %vm7121_vm6, %v8734_v16, %v7118_v21  ;;  %v7130_v6 = vmul.f32 %v8736_v54, %v6775_v28  ;;  %v7439_v9 = vadd.f32 %v7371_v4, %v12882_v24  ;;  %v8738_v22 = vpop.eup %8737  ;;  %vm7135_vm8 = vweird.f32 %v8736_v54 }
0x1188   : > { %v7127_v33 = vsel %vm7124_vm7, %v7126_v34, %v7122_v13  ;;  %v6776_v43 = vadd.f32 1.0, %v8738_v22  ;;  %8739 = vpow2.f32 %v7841_v39  ;;  %vm7136_vm10 = vmor %vm7134_vm9, %vm7135_vm8  ;;  %v7141_v24 = vor.u32 1.1754944e-38, %v7140_v61 }
0x1189   : > { %v7286_v27 = vmul.f32 %v7127_v33, %v13743_v52  ;;  %v7131_v23 = vsub.f32 1.0, %v7130_v6  ;;  %v7475_v41 = vadd.f32 %v13757_v48, %v7439_v9 }
0x118a   : > { %8741 = vrcp.f32 %v6776_v43  ;;  %v7153_v31 = vand.u32 2147483647, %v6776_v43  ;;  %v7155_v16 = vand.u32 2147483648, %v6776_v43  ;;  %vm7149_vm13 = vweird.f32 %v6776_v43 }
0x118b   : > { %v7132_v17 = vmul.f32 %v8736_v54, %v7131_v23  ;;  %7507 = vst [vmem:[%s13481_s19 + $0x70] sm:$0xff] %v7475_v41  ;;  %7394 = vmatmul.f32.gmra.mxu0 %v7286_v27  ;;  %v6638_v26 = vpop.f32.mrf.mxu2  ;;  %v14605_v23 = vld [vmem:[#allocation26_spill] sm:$0xff] }
0x118c   : > { %v13778_v52 = vadd.f32 %v13726_v51, %v6638_v26  ;;  %vm7154_vm15 = vcmp.eq.f32.partialorder %v7153_v31, 8.507059e+37  ;;  %v7156_v1 = vor.u32 1.1754944e-38, %v7155_v16 }
0x118d   : > { %v7133_v18 = vadd.f32 %v8736_v54, %v7132_v17 }
0x118e   : > { %v8740_v19 = vpop.eup %8739  ;;  %v7374_v63 = vpop.f32.mrf.mxu0  ;;  %v7842_v47 = vmul.f32 -1.442695, %v13778_v52 }
0x118f   : > { %v7137_v15 = vsel %vm7136_vm10, %v8736_v54, %v7133_v18  ;;  %v6777_v7 = vadd.f32 1.0, %v8740_v19  ;;  %v7440_v35 = vadd.f32 %v7374_v63, %v14603_v12 }
0x1190   : > { %v7142_v25 = vsel %vm7139_vm11, %v7141_v24, %v7137_v15  ;;  %v8742_v58 = vpop.eup %8741 }
0x1191   : > { %v7287_v49 = vmul.f32 %v7142_v25, %v13749_v37  ;;  %v7145_v30 = vmul.f32 %v8742_v58, %v6776_v43  ;;  %8743 = vrcp.f32 %v6777_v7  ;;  %v7476_v29 = vadd.f32 %v13757_v48, %v7440_v35 }
0x1192   : > { %8745 = vpow2.f32 %v7842_v47  ;;  %vm7150_vm12 = vweird.f32 %v8742_v58  ;;  %v7170_v36 = vand.u32 2147483648, %v6777_v7  ;;  %v7168_v34 = vand.u32 2147483647, %v6777_v7 }
0x1193   : > { %7397 = vmatmul.f32.gmra.mxu0 %v7287_v49  ;;  %v7146_v14 = vsub.f32 1.0, %v7145_v30  ;;  %7508 = vst [vmem:[%s13481_s19 + $0x78] sm:$0xff] %v7476_v29  ;;  %v6641_v50 = vpop.f32.mrf.mxu2  ;;  %vm7151_vm14 = vmor %vm7149_vm13, %vm7150_vm12  ;;  %vm7164_vm1 = vweird.f32 %v6777_v7 }
0x1194   : > { %v13786_v37 = vadd.f32 %v13726_v51, %v6641_v50  ;;  %v7171_v9 = vor.u32 1.1754944e-38, %v7170_v36  ;;  %vm7169_vm4 = vcmp.eq.f32.partialorder %v7168_v34, 8.507059e+37 }
0x1195   : > { %v7147_v28 = vmul.f32 %v8742_v58, %v7146_v14 }
0x1196   : > { %v7843_v44 = vmul.f32 -1.442695, %v13786_v37 }
0x1197   : > { %v8744_v11 = vpop.eup %8743  ;;  %v7148_v5 = vadd.f32 %v8742_v58, %v7147_v28 }
0x1198   : > { %v8746_v10 = vpop.eup %8745  ;;  %v7160_v60 = vmul.f32 %v8744_v11, %v6777_v7  ;;  %v7377_v59 = vpop.f32.mrf.mxu0  ;;  %8747 = vpow2.f32 %v7843_v44  ;;  %vm7165_vm0 = vweird.f32 %v8744_v11 }
0x1199   : > { %v7152_v57 = vsel %vm7151_vm14, %v8742_v58, %v7148_v5  ;;  %v6778_v2 = vadd.f32 1.0, %v8746_v10  ;;  %v7441_v56 = vadd.f32 %v7377_v59, %v14604_v62  ;;  %vm7166_vm3 = vmor %vm7164_vm1, %vm7165_vm0 }
0x119a   : > { %v7157_v3 = vsel %vm7154_vm15, %v7156_v1, %v7152_v57  ;;  %v7161_v40 = vsub.f32 1.0, %v7160_v60 }
0x119b   : > { %v7288_v21 = vmul.f32 %v7157_v3, %v13762_v8  ;;  %8749 = vrcp.f32 %v6778_v2  ;;  %v7477_v4 = vadd.f32 %v13757_v48, %v7441_v56  ;;  %v7185_v18 = vand.u32 2147483648, %v6778_v2 }
0x119c   : > { %v7162_v54 = vmul.f32 %v8744_v11, %v7161_v40  ;;  %v7183_v26 = vand.u32 2147483647, %v6778_v2  ;;  %vm7179_vm5 = vweird.f32 %v6778_v2 }
0x119d   : > { %7400 = vmatmul.f32.gmra.mxu0 %v7288_v21  ;;  %7509 = vst [vmem:[%s13481_s19 + $0x80] sm:$0xff] %v7477_v4  ;;  %v7186_v63 = vor.u32 1.1754944e-38, %v7185_v18 }
0x119e   : > { %v7163_v13 = vadd.f32 %v8744_v11, %v7162_v54  ;;  %v8748_v6 = vpop.eup %8747  ;;  %vm7184_vm7 = vcmp.eq.f32.partialorder %v7183_v26, 8.507059e+37 }
0x119f   : > { %v6779_v39 = vadd.f32 1.0, %v8748_v6 }
0x11a0   : > { %v7167_v33 = vsel %vm7166_vm3, %v8744_v11, %v7163_v13  ;;  %v7380_v22 = vpop.f32.mrf.mxu0 }
0x11a1   : > { %v8750_v8 = vpop.eup %8749  ;;  %v7172_v27 = vsel %vm7169_vm4, %v7171_v9, %v7167_v33  ;;  %v7442_v41 = vadd.f32 %v7380_v22, %v14605_v23  ;;  %8751 = vrcp.f32 %v6779_v39  ;;  %v7200_v29 = vand.u32 2147483648, %v6779_v39 }
0x11a2   : > { %v7289_v61 = vmul.f32 %v7172_v27, %v13770_v55  ;;  %v7175_v43 = vmul.f32 %v8750_v8, %v6778_v2  ;;  %vm7180_vm2 = vweird.f32 %v8750_v8  ;;  %v14606_v55 = vld [vmem:[#allocation103_spill] sm:$0xff]  ;;  %v7198_v31 = vand.u32 2147483647, %v6779_v39 }
0x11a3   : > { %v7478_v17 = vadd.f32 %v13757_v48, %v7442_v41  ;;  %vm7181_vm6 = vmor %vm7179_vm5, %vm7180_vm2  ;;  %vm7194_vm9 = vweird.f32 %v6779_v39  ;;  %v7201_v50 = vor.u32 1.1754944e-38, %v7200_v29 }
0x11a4   : > { %v7176_v38 = vsub.f32 1.0, %v7175_v43  ;;  %vm7199_vm11 = vcmp.eq.f32.partialorder %v7198_v31, 8.507059e+37 }
0x11a5   : > { %7510 = vst [vmem:[%s13481_s19 + $0x88] sm:$0xff] %v7478_v17  ;;  %7403 = vmatmul.f32.gmra.mxu0 %v7289_v61 }
0x11a6   : > { %v7177_v24 = vmul.f32 %v8750_v8, %v7176_v38 }
0x11a7   : > { %v8752_v15 = vpop.eup %8751 }
0x11a8   : > { %v7178_v19 = vadd.f32 %v8750_v8, %v7177_v24  ;;  %v7383_v25 = vpop.f32.mrf.mxu0  ;;  %v7190_v49 = vmul.f32 %v8752_v15, %v6779_v39  ;;  %vm7195_vm8 = vweird.f32 %v8752_v15 }
0x11a9   : > { %v7443_v7 = vadd.f32 %v7383_v25, %v14606_v55  ;;  %vm7196_vm10 = vmor %vm7194_vm9, %vm7195_vm8 }
0x11aa   : > { %v7182_v47 = vsel %vm7181_vm6, %v8750_v8, %v7178_v19  ;;  %v7191_v35 = vsub.f32 1.0, %v7190_v49 }
0x11ab   : > { %v7187_v12 = vsel %vm7184_vm7, %v7186_v63, %v7182_v47  ;;  %v7479_v58 = vadd.f32 %v13757_v48, %v7443_v7  ;;  %v14607_v7 = vld [vmem:[#allocation25_spill] sm:$0xff] }
0x11ac   : > { %v7290_v30 = vmul.f32 %v7187_v12, %v13778_v52  ;;  %v7192_v14 = vmul.f32 %v8752_v15, %v7191_v35 }
0x11ad   : > { %7511 = vst [vmem:[%s13481_s19 + $0x90] sm:$0xff] %v7479_v58 }
0x11ae   : > { %7406 = vmatmul.f32.gmra.mxu0 %v7290_v30  ;;  %v7193_v16 = vadd.f32 %v8752_v15, %v7192_v14 }
0x11b0   : > { %v7386_v28 = vpop.f32.mrf.mxu0  ;;  %v7197_v11 = vsel %vm7196_vm10, %v8752_v15, %v7193_v16 }
0x11b1   : > { %v7444_v5 = vadd.f32 %v7386_v28, %v12966_v46  ;;  %v7202_v44 = vsel %vm7199_vm11, %v7201_v50, %v7197_v11 }
0x11b2   : > { %v7291_v10 = vmul.f32 %v7202_v44, %v13786_v37 }
0x11b3   : > { %v7480_v52 = vadd.f32 %v13757_v48, %v7444_v5 }
0x11b5   : > { %7512 = vst [vmem:[%s13481_s19 + $0x98] sm:$0xff] %v7480_v52 }
0x11b6   : > { %7409 = vmatmul.f32.gmra.mxu0 %v7291_v10 }
0x11de   : > { %v6644_v1 = vpop.f32.mrf.mxu2 }
0x11df   : > { %v6645_v60 = vadd.f32 %v13726_v51, %v6644_v1 }
0x11e1   : > { %v7844_v59 = vmul.f32 -1.442695, %v6645_v60 }
0x11e3   : > { %8753 = vpow2.f32 %v7844_v59 }
0x11e6   : > { %v6647_v57 = vpop.f32.mrf.mxu2 }
0x11e7   : > { %v6648_v2 = vadd.f32 %v13726_v51, %v6647_v57 }
0x11e9   : > { %v8754_v62 = vpop.eup %8753  ;;  %v7845_v56 = vmul.f32 -1.442695, %v6648_v2 }
0x11ea   : > { %v6780_v3 = vadd.f32 1.0, %v8754_v62 }
0x11eb   : > { %8755 = vpow2.f32 %v7845_v56 }
0x11ec   : > { %8757 = vrcp.f32 %v6780_v3  ;;  %v7215_v13 = vand.u32 2147483648, %v6780_v3  ;;  %v7213_v33 = vand.u32 2147483647, %v6780_v3  ;;  %vm7209_vm13 = vweird.f32 %v6780_v3 }
0x11ee   : > { %v6650_v46 = vpop.f32.mrf.mxu2  ;;  %v7216_v43 = vor.u32 1.1754944e-38, %v7215_v13  ;;  %vm7214_vm15 = vcmp.eq.f32.partialorder %v7213_v33, 8.507059e+37 }
0x11ef   : > { %v13808_v37 = vadd.f32 %v13726_v51, %v6650_v46 }
0x11f1   : > { %v8756_v40 = vpop.eup %8755  ;;  %v7846_v21 = vmul.f32 -1.442695, %v13808_v37 }
0x11f2   : > { %v8758_v36 = vpop.eup %8757  ;;  %v6781_v54 = vadd.f32 1.0, %v8756_v40 }
0x11f3   : > { %v7205_v34 = vmul.f32 %v8758_v36, %v6780_v3  ;;  %8759 = vpow2.f32 %v7846_v21  ;;  %vm7210_vm12 = vweird.f32 %v8758_v36 }
0x11f4   : > { %8761 = vrcp.f32 %v6781_v54  ;;  %vm7211_vm14 = vmor %vm7209_vm13, %vm7210_vm12  ;;  %v7230_v19 = vand.u32 2147483648, %v6781_v54  ;;  %v7228_v63 = vand.u32 2147483647, %v6781_v54  ;;  %vm7224_vm1 = vweird.f32 %v6781_v54 }
0x11f5   : > { %v7206_v4 = vsub.f32 1.0, %v7205_v34 }
0x11f6   : > { %v6653_v6 = vpop.f32.mrf.mxu2  ;;  %v7231_v35 = vor.u32 1.1754944e-38, %v7230_v19  ;;  %vm7229_vm4 = vcmp.eq.f32.partialorder %v7228_v63, 8.507059e+37 }
0x11f7   : > { %v7207_v9 = vmul.f32 %v8758_v36, %v7206_v4  ;;  %v13812_v39 = vadd.f32 %v13726_v51, %v6653_v6 }
0x11f8   : > { %v7389_v22 = vpop.f32.mrf.mxu0 }
0x11f9   : > { %v8760_v8 = vpop.eup %8759  ;;  %v7208_v27 = vadd.f32 %v8758_v36, %v7207_v9  ;;  %v7847_v23 = vmul.f32 -1.442695, %v13812_v39  ;;  %v7445_v41 = vadd.f32 %v7389_v22, %v12988_v0  ;;  %v14609_v22 = vld [vmem:[#allocation104_spill] sm:$0xff] }
0x11fa   : > { %v8762_v61 = vpop.eup %8761  ;;  %v6782_v17 = vadd.f32 1.0, %v8760_v8 }
0x11fb   : > { %v7212_v38 = vsel %vm7211_vm14, %v8758_v36, %v7208_v27  ;;  %v7220_v18 = vmul.f32 %v8762_v61, %v6781_v54  ;;  %8763 = vpow2.f32 %v7847_v23  ;;  %v7481_v15 = vadd.f32 %v13757_v48, %v7445_v41  ;;  %v14608_v54 = vld [vmem:[#allocation24_spill] sm:$0xff]  ;;  %v14610_v41 = vld [vmem:[#allocation21_spill] sm:$0xff] }
0x11fc   : > { %v7217_v24 = vsel %vm7214_vm15, %v7216_v43, %v7212_v38  ;;  %8765 = vrcp.f32 %v6782_v17  ;;  %vm7225_vm0 = vweird.f32 %v8762_v61  ;;  %v7245_v28 = vand.u32 2147483648, %v6782_v17  ;;  %v14611_v38 = vld [vmem:[#allocation113_spill] sm:$0xff] }
0x11fd   : > { %v7292_v51 = vmul.f32 %v7217_v24, %v6645_v60  ;;  %v7221_v26 = vsub.f32 1.0, %v7220_v18  ;;  %7513 = vst [vmem:[%s13481_s19 + $0xa0] sm:$0xff] %v7481_v15  ;;  %vm7226_vm3 = vmor %vm7224_vm1, %vm7225_vm0  ;;  %v7243_v5 = vand.u32 2147483647, %v6782_v17  ;;  %vm7239_vm5 = vweird.f32 %v6782_v17 }
0x11fe   : > { %v7246_v60 = vor.u32 1.1754944e-38, %v7245_v28 }
0x11ff   : > { %v7222_v25 = vmul.f32 %v8762_v61, %v7221_v26  ;;  %7412 = vmatmul.f32.gmra.mxu0 %v7292_v51  ;;  %vm7244_vm7 = vcmp.eq.f32.partialorder %v7243_v5, 8.507059e+37  ;;  %v14612_v51 = vld [vmem:[#allocation22_spill] sm:$0xff] }
0x1200   : > { %v7392_v0 = vpop.f32.mrf.mxu0 }
0x1201   : > { %v8764_v49 = vpop.eup %8763  ;;  %v7223_v55 = vadd.f32 %v8762_v61, %v7222_v25  ;;  %v7446_v47 = vadd.f32 %v7392_v0, %v14607_v7 }
0x1202   : > { %v8766_v12 = vpop.eup %8765  ;;  %v6783_v58 = vadd.f32 1.0, %v8764_v49 }
0x1203   : > { %v7227_v30 = vsel %vm7226_vm3, %v8762_v61, %v7223_v55  ;;  %v7235_v29 = vmul.f32 %v8766_v12, %v6782_v17  ;;  %v7482_v14 = vadd.f32 %v13757_v48, %v7446_v47  ;;  %vm7240_vm2 = vweird.f32 %v8766_v12 }
0x1204   : > { %v7232_v31 = vsel %vm7229_vm4, %v7231_v35, %v7227_v30  ;;  %8767 = vrcp.f32 %v6783_v58  ;;  %vm7241_vm6 = vmor %vm7239_vm5, %vm7240_vm2  ;;  %v7260_v46 = vand.u32 2147483648, %v6783_v58  ;;  %v7258_v21 = vand.u32 2147483647, %v6783_v58 }
0x1205   : > { %v7293_v16 = vmul.f32 %v7232_v31, %v6648_v2  ;;  %v7236_v50 = vsub.f32 1.0, %v7235_v29  ;;  %7514 = vst [vmem:[%s13481_s19 + $0xa8] sm:$0xff] %v7482_v14  ;;  %vm7254_vm9 = vweird.f32 %v6783_v58 }
0x1206   : > { %v7261_v4 = vor.u32 1.1754944e-38, %v7260_v46  ;;  %vm7259_vm11 = vcmp.eq.f32.partialorder %v7258_v21, 8.507059e+37 }
0x1207   : > { %v7237_v11 = vmul.f32 %v8766_v12, %v7236_v50  ;;  %7415 = vmatmul.f32.gmra.mxu0 %v7293_v16 }
0x1208   : > { %v7395_v44 = vpop.f32.mrf.mxu0 }
0x1209   : > { %v7238_v10 = vadd.f32 %v8766_v12, %v7237_v11  ;;  %v7447_v52 = vadd.f32 %v7395_v44, %v13021_v42 }
0x120a   : > { %v8768_v1 = vpop.eup %8767 }
0x120b   : > { %v7242_v59 = vsel %vm7241_vm6, %v8766_v12, %v7238_v10  ;;  %v7250_v57 = vmul.f32 %v8768_v1, %v6783_v58  ;;  %v7483_v2 = vadd.f32 %v13757_v48, %v7447_v52  ;;  %vm7255_vm8 = vweird.f32 %v8768_v1 }
0x120c   : > { %v7247_v62 = vsel %vm7244_vm7, %v7246_v60, %v7242_v59  ;;  %vm7256_vm10 = vmor %vm7254_vm9, %vm7255_vm8 }
0x120d   : > { %v7294_v56 = vmul.f32 %v7247_v62, %v13808_v37  ;;  %v7251_v3 = vsub.f32 1.0, %v7250_v57  ;;  %7515 = vst [vmem:[%s13481_s19 + $0xb0] sm:$0xff] %v7483_v2 }
0x120f   : > { %v7252_v40 = vmul.f32 %v8768_v1, %v7251_v3  ;;  %7418 = vmatmul.f32.gmra.mxu0 %v7294_v56 }
0x1210   : > { %v7398_v42 = vpop.f32.mrf.mxu0 }
0x1211   : > { %v7253_v36 = vadd.f32 %v8768_v1, %v7252_v40  ;;  %v7448_v34 = vadd.f32 %v7398_v42, %v14608_v54 }
0x1213   : > { %v7257_v13 = vsel %vm7256_vm10, %v8768_v1, %v7253_v36  ;;  %v7484_v37 = vadd.f32 %v13757_v48, %v7448_v34 }
0x1214   : > { %v7262_v6 = vsel %vm7259_vm11, %v7261_v4, %v7257_v13 }
0x1215   : > { %v7295_v9 = vmul.f32 %v7262_v6, %v13812_v39  ;;  %7516 = vst [vmem:[%s13481_s19 + $0xb8] sm:$0xff] %v7484_v37 }
0x1217   : > { %7421 = vmatmul.f32.gmra.mxu0 %v7295_v9 }
0x121a   : > { %v7401_v33 = vpop.f32.mrf.mxu0 }
0x121b   : > { %v7449_v8 = vadd.f32 %v7401_v33, %v14609_v22 }
0x121d   : > { %v7485_v27 = vadd.f32 %v13757_v48, %v7449_v8 }
0x121f   : > { %7517 = vst [vmem:[%s13481_s19 + $0xc0] sm:$0xff] %v7485_v27 }
0x1222   : > { %v7404_v23 = vpop.f32.mrf.mxu0 }
0x1223   : > { %v7450_v61 = vadd.f32 %v7404_v23, %v14610_v41 }
0x1225   : > { %v7486_v43 = vadd.f32 %v13757_v48, %v7450_v61 }
0x1227   : > { %7518 = vst [vmem:[%s13481_s19 + $0xc8] sm:$0xff] %v7486_v43 }
0x122b   : > { %v7407_v17 = vpop.f32.mrf.mxu0 }
0x122c   : > { %v7451_v39 = vadd.f32 %v7407_v17, %v14611_v38 }
0x122e   : > { %v7487_v18 = vadd.f32 %v13757_v48, %v7451_v39 }
0x1230   : > { %7519 = vst [vmem:[%s13481_s19 + $0xd0] sm:$0xff] %v7487_v18 }
0x1233   : > { %v7410_v24 = vpop.f32.mrf.mxu0 }
0x1234   : > { %v7452_v26 = vadd.f32 %v7410_v24, %v14612_v51 }
0x1236   : > { %v7488_v15 = vadd.f32 %v13757_v48, %v7452_v26 }
0x1238   : > { %7520 = vst [vmem:[%s13481_s19 + $0xd8] sm:$0xff] %v7488_v15 }
0x127c   : > { %v7413_v19 = vpop.f32.mrf.mxu0 }
0x127d   : > { %v7453_v25 = vadd.f32 %v7413_v19, %v13216_v20 }
0x127f   : > { %v7489_v63 = vadd.f32 %v13757_v48, %v7453_v25 }
0x1281   : > { %7521 = vst [vmem:[%s13481_s19 + $0xe0] sm:$0xff] %v7489_v63 }
0x1284   : > { %v7416_v0 = vpop.f32.mrf.mxu0 }
0x1285   : > { %v7454_v49 = vadd.f32 %v7416_v0, %v13236_v32 }
0x1287   : > { %v7490_v55 = vadd.f32 %v13757_v48, %v7454_v49 }
0x1289   : > { %7522 = vst [vmem:[%s13481_s19 + $0xe8] sm:$0xff] %v7490_v55 }
0x128c   : > { %v7419_v7 = vpop.f32.mrf.mxu0 }
0x128d   : > { %v7455_v47 = vadd.f32 %v7419_v7, %v13270_v53 }
0x128f   : > { %v7491_v12 = vadd.f32 %v13757_v48, %v7455_v47 }
0x1291   : > { %7523 = vst [vmem:[%s13481_s19 + $0xf0] sm:$0xff] %v7491_v12 }
0x1294   : > { %v7422_v20 = vpop.f32.mrf.mxu0 }
0x1295   : > { %v7456_v32 = vadd.f32 %v7422_v20, %v13310_v45 }
0x1297   : > { %v7492_v35 = vadd.f32 %v13757_v48, %v7456_v32 }
0x1299   : > { %7524 = vst [vmem:[%s13481_s19 + $0xf8] sm:$0xff] %v7492_v35 }
0x129a   : > { %9019 = shalt.err (!%p9016_p9)
}
0x129b   : > { %s9082_s4 = smov 128   ;;  %s9083_s19 = smov 8  }
0x129c   : > { %7912 = dma.vmem_to_hbm [thread:$0]  (%p9244_p13), %s7540_s8, 4096, %s7542_s3, %s7526_s29, %s9082_s4, %s9082_s4, %s9083_s19  }
0x129d PF: > { %s7556_s30 = sand.u32 1, %s9058_s21   ;;  %p14614_p10 = scmp.ge.s32.totalorder %s9070_s24, 2 }
0x129e   : > { %s7557_s12 = scalar_lea.sflag [#allocation4], %s7556_s30 }
0x129f   : > { %p7935_p11 = pnand %p14614_p10, %p9249_p5 }
0x12a1   : > { %p7936_p0 = pneg %p7935_p11 }
0x12a3   : > { %9053 = dma.done.wait (%p7936_p0), %s7557_s12, 4096  }
0x12a4   : > { %9055 = vsyncadd (%p7936_p0), %s7557_s12, 4294963200  ;;  %p28_p2 = scmp.ge.s32.totalorder %s9224_s15, 4   ;;  %s14615_s21 = smov %s9062_s22 }
0x12a5   : > { %s14616_s22 = smov %s9066_s23  ;;  %s14617_s23 = smov %s9236_s27 }
0x12a6   : > { %s14618_s24 = smov %s9224_s15  ;;  %30 = sbr.rel (!%p28_p2) target bundleno = 15 (0xf), region = 133 }
0x12ab   :  { %7563 = vsyncpa [#allocation3], 1 }
0x12ac   :  { %7565 = vsyncpa [#allocation3 + $0x1], 1 }
0x12ad   :  { %7566 = vsyncpa [#allocation6], 1 }
0x12ae   :  { %7567 = vsyncpa [#allocation9], 1 }
0x12af   :  { %7568 = vsyncpa [#allocation12], 1 }
0x12b0   :  { %7569 = vsyncpa [#allocation4], 1 }
0x12b1   :  { %7571 = vsyncpa [#allocation4 + $0x1], 1 }

</bundles_post_ra>
